<compile_context>
chip_gen: v7x
topology: tpu7x:2x2x1
jax: 0.10.0
libtpu: 0.0.40
codegen_flags: <defaults>
</compile_context>

<pallas_src>
import functools

import jax
import jax.numpy as jnp
import numpy as np
from jax import lax
from jax.experimental import pallas as pl
from jax.experimental.pallas import tpu as pltpu

_EPS = 1e-5


# --------------------- fused BN+ReLU+pad+conv+stats kernel ------------------

def _make_fused_conv_kernel(H, W, Cin, Cout, TH, n_tiles):
    """One row-tile of a SAME 3x3 conv whose input is relu(x*s+t) zero-padded.

    x_ref : (1, H, W, Cin)    raw (pre-BN) input of this layer
    s_ref : (1, 1, Cin)       BN scale for the input (1.0 if already activated)
    t_ref : (1, 1, Cin)       BN shift for the input (0.0 if already activated)
    w_ref : (3, 3*Cin, Cout)  weights with the 3 kw taps folded into K
    y_ref : (1, TH, W, Cout)  raw conv output for this row tile
    st_ref: (1, 2, Cout)      [sum; sum-of-squares] over this batch element
    """
    TM = TH * W

    def kernel(x_ref, s_ref, t_ref, w_ref, y_ref, st_ref):
        t = pl.program_id(1)
        h0 = t * TH
        s = s_ref[...]                                   # (1, 1, Cin)
        b = t_ref[...]

        def act(rows):                                   # raw -> BN + ReLU
            return jnp.maximum(rows * s + b, 0.0)

        # Activated rows needed by this tile: [h0-1, h0+TH], zeros outside.
        mid = act(x_ref[0, pl.ds(h0, TH), :, :])         # (TH, W, Cin)
        if n_tiles == 1:
            top = jnp.zeros((1, W, Cin), jnp.float32)
            bot = jnp.zeros((1, W, Cin), jnp.float32)
        else:
            top_i = jnp.maximum(h0 - 1, 0)
            bot_i = jnp.minimum(h0 + TH, H - 1)
            top = act(x_ref[0, pl.ds(top_i, 1), :, :])
            bot = act(x_ref[0, pl.ds(bot_i, 1), :, :])
            top = jnp.where(t == 0, jnp.zeros_like(top), top)
            bot = jnp.where(t == n_tiles - 1, jnp.zeros_like(bot), bot)
        rows = jnp.concatenate([top, mid, bot], axis=0)  # (TH+2, W, Cin)
        zc = jnp.zeros((TH + 2, 1, Cin), jnp.float32)
        slab = jnp.concatenate([zc, rows, zc], axis=1)   # (TH+2, W+2, Cin)

        # 3 matmuls with K = 3*Cin (kw taps folded into the contraction dim).
        acc = jnp.zeros((TM, Cout), jnp.float32)
        for kh in range(3):
            lhs = jnp.concatenate(
                [slab[kh:kh + TH, kw:kw + W, :].reshape(TM, Cin)
                 for kw in range(3)], axis=-1)           # (TM, 3*Cin)
            acc = acc + jnp.dot(lhs, w_ref[kh],
                                preferred_element_type=jnp.float32)

        y_ref[...] = acc.reshape(1, TH, W, Cout)

        @pl.when(t == 0)
        def _():
            st_ref[...] = jnp.zeros_like(st_ref)

        ssum = jnp.sum(acc, axis=0, keepdims=True)       # (1, Cout)
        ssq = jnp.sum(acc * acc, axis=0, keepdims=True)
        st_ref[...] = st_ref[...] + jnp.concatenate(
            [ssum, ssq], axis=0).reshape(1, 2, Cout)

    return kernel


def _fused_conv_bn_act(x, scale, shift, w):
    """y = conv3x3_same(relu(x*scale+shift), w); also returns per-N stats of y.

    x: (N, H, W, Cin) raw input.  scale/shift: (Cin,).  w: (3, 3, Cin, Cout).
    Returns (y, stats) with y: (N, H, W, Cout), stats: (N, 2, Cout).
    """
    N, H, W, Cin = x.shape
    Cout = w.shape[-1]
    tm_target = 256 if 3 * Cin <= 128 else 128           # keep acc/lhs in vregs
    TH = max(1, min(H, tm_target // W))
    while H % TH:
        TH -= 1
    n_tiles = H // TH

    kernel = _make_fused_conv_kernel(H, W, Cin, Cout, TH, n_tiles)
    w3 = w.reshape(3, 3 * Cin, Cout).astype(jnp.float32)
    s3 = scale.reshape(1, 1, Cin).astype(jnp.float32)
    t3 = shift.reshape(1, 1, Cin).astype(jnp.float32)

    y, st = pl.pallas_call(
        kernel,
        out_shape=(jax.ShapeDtypeStruct((N, H, W, Cout), jnp.float32),
                   jax.ShapeDtypeStruct((N, 2, Cout), jnp.float32)),
        grid_spec=pltpu.PrefetchScalarGridSpec(
            num_scalar_prefetch=0,
            grid=(N, n_tiles),
            in_specs=[
                pl.BlockSpec((1, H, W, Cin), lambda n, t: (n, 0, 0, 0)),
                pl.BlockSpec((1, 1, Cin), lambda n, t: (0, 0, 0)),
                pl.BlockSpec((1, 1, Cin), lambda n, t: (0, 0, 0)),
                pl.BlockSpec((3, 3 * Cin, Cout), lambda n, t: (0, 0, 0)),
            ],
            out_specs=[
                pl.BlockSpec((1, TH, W, Cout), lambda n, t: (n, t, 0, 0)),
                pl.BlockSpec((1, 2, Cout), lambda n, t: (n, 0, 0)),
            ],
        ),
        compiler_params=pltpu.CompilerParams(
            dimension_semantics=("parallel", "arbitrary")),
    )(x, s3, t3, w3)
    return y, st


# ------------------------------ BN helpers ----------------------------------

def _bn_scale_shift_from_stats(stats, gamma, beta, count):
    """Per-channel BN scale/shift from fused kernel stats (biased batch var)."""
    tot = jnp.sum(stats, axis=0)                         # (2, C)
    mean = tot[0] / count
    var = jnp.maximum(tot[1] / count - mean * mean, 0.0)
    scale = gamma * lax.rsqrt(var + _EPS)
    shift = beta - mean * scale
    return scale, shift


def _bn_scale_shift_direct(y, gamma, beta):
    mean = jnp.mean(y, axis=(0, 1, 2))
    var = jnp.var(y, axis=(0, 1, 2))                     # biased (train mode)
    scale = gamma * lax.rsqrt(var + _EPS)
    shift = beta - mean * scale
    return scale, shift


def _relu_pool_xla(y, scale, shift):
    """BN-apply + ReLU + MaxPool2d(2) (tiny, XLA-fused)."""
    a = jnp.maximum(y * scale + shift, 0.0)
    N, H, W, C = a.shape
    return jnp.max(a.reshape(N, H // 2, 2, W // 2, 2, C), axis=(2, 4))


# ------------------------- XLA path (tiny tensors) ---------------------------

def _conv3x3_xla(x, w, b=None):
    y = lax.conv_general_dilated(
        x, w, window_strides=(1, 1), padding="SAME",
        dimension_numbers=("NHWC", "HWIO", "NHWC"))
    if b is not None:
        y = y + b
    return y


def _bn_relu_xla(y, gamma, beta):
    scale, shift = _bn_scale_shift_direct(y, gamma, beta)
    return jnp.maximum(y * scale + shift, 0.0)


def _maxpool2_xla(x):
    N, H, W, C = x.shape
    return jnp.max(x.reshape(N, H // 2, 2, W // 2, 2, C), axis=(2, 4))


def _dsb_xla(x, p):
    x = _bn_relu_xla(_conv3x3_xla(x, p["conv1"]["w"]),
                     p["bn1"]["gamma"], p["bn1"]["beta"])
    x = _bn_relu_xla(_conv3x3_xla(x, p["conv2"]["w"]),
                     p["bn2"]["gamma"], p["bn2"]["beta"])
    return _maxpool2_xla(x)


# --------------------------- Pallas-path base net ----------------------------

def _base_net_pallas(x, blocks):
    """blk_0 (base_net): 3 down-sample blocks.  x: (N, H, W, 3) NHWC image."""
    N = x.shape[0]

    # --- down-sample block 1 ---
    p = blocks[0]
    # Stem conv has Cin=3 (lane-sparse): run it through XLA, start Pallas at 16ch.
    c = _conv3x3_xla(x, p["conv1"]["w"])
    s, t = _bn_scale_shift_direct(c, p["bn1"]["gamma"], p["bn1"]["beta"])
    c, st = _fused_conv_bn_act(c, s, t, p["conv2"]["w"])
    s, t = _bn_scale_shift_from_stats(
        st, p["bn2"]["gamma"], p["bn2"]["beta"],
        float(N * c.shape[1] * c.shape[2]))
    act_in = _relu_pool_xla(c, s, t)

    # --- down-sample blocks 2 and 3 ---
    for p in blocks[1:]:
        Cin = act_in.shape[-1]
        one = jnp.ones((Cin,), jnp.float32)
        zero = jnp.zeros((Cin,), jnp.float32)
        c, st = _fused_conv_bn_act(act_in, one, zero, p["conv1"]["w"])
        s, t = _bn_scale_shift_from_stats(
            st, p["bn1"]["gamma"], p["bn1"]["beta"],
            float(N * c.shape[1] * c.shape[2]))
        c, st = _fused_conv_bn_act(c, s, t, p["conv2"]["w"])
        s, t = _bn_scale_shift_from_stats(
            st, p["bn2"]["gamma"], p["bn2"]["beta"],
            float(N * c.shape[1] * c.shape[2]))
        act_in = _relu_pool_xla(c, s, t)
    return act_in


# ------------------------------ anchor boxes --------------------------------
# `create_anchor_boxes` is not defined in the given source; implemented with
# d2l.ai `multibox_prior` semantics (shape-only constant, plain numpy).
def multibox_prior(feat_h, feat_w, sizes, ratios):
    sizes = np.asarray(sizes, np.float32)
    ratios = np.asarray(ratios, np.float32)
    bpp = len(sizes) + len(ratios) - 1
    steps_h = 1.0 / feat_h
    steps_w = 1.0 / feat_w
    center_h = (np.arange(feat_h, dtype=np.float32) + 0.5) * steps_h
    center_w = (np.arange(feat_w, dtype=np.float32) + 0.5) * steps_w
    shift_y, shift_x = np.meshgrid(center_h, center_w, indexing="ij")
    shift_y, shift_x = shift_y.reshape(-1), shift_x.reshape(-1)
    w = np.concatenate((sizes * np.sqrt(ratios[0]),
                        sizes[0] * np.sqrt(ratios[1:]))) * feat_h / feat_w
    h = np.concatenate((sizes / np.sqrt(ratios[0]),
                        sizes[0] / np.sqrt(ratios[1:])))
    anchor_manip = np.tile(np.stack((-w, -h, w, h)).T, (feat_h * feat_w, 1)) / 2.0
    out_grid = np.repeat(np.stack([shift_x, shift_y, shift_x, shift_y], axis=1),
                         bpp, axis=0)
    return jnp.asarray((out_grid + anchor_manip)[None], dtype=jnp.float32)


# ------------------------------- parameters ---------------------------------

def _conv_params(key, cin, cout, bias):
    kw, kb = jax.random.split(key)
    p = {"w": jax.random.normal(kw, (3, 3, cin, cout), jnp.float32) * 0.05}
    if bias:
        p["b"] = jax.random.normal(kb, (cout,), jnp.float32) * 0.01
    return p


def _dsb_params(key, cin, cout):
    k1, k2 = jax.random.split(key)
    # Conv bias omitted on purpose: it is exactly cancelled by the following
    # BatchNorm's mean subtraction (identical forward, less work).
    return {"conv1": _conv_params(k1, cin, cout, bias=False),
            "bn1": {"gamma": jnp.ones((cout,), jnp.float32),
                    "beta": jnp.zeros((cout,), jnp.float32)},
            "conv2": _conv_params(k2, cout, cout, bias=False),
            "bn2": {"gamma": jnp.ones((cout,), jnp.float32),
                    "beta": jnp.zeros((cout,), jnp.float32)}}


def init_tiny_ssd_params(key, num_classes):
    num_anchors = 4  # len(sizes[0]) + len(ratios[0]) - 1
    idx_to_in = [64, 128, 128, 128, 128]
    keys = iter(jax.random.split(key, 32))
    params = {"blk": [], "cls": [], "bbox": []}
    base_filters = [3, 16, 32, 64]
    params["blk"].append([_dsb_params(next(keys), base_filters[j], base_filters[j + 1])
                          for j in range(3)])                    # blk_0 = base_net
    params["blk"].append(_dsb_params(next(keys), 64, 128))       # blk_1
    params["blk"].append(_dsb_params(next(keys), 128, 128))      # blk_2
    params["blk"].append(_dsb_params(next(keys), 128, 128))      # blk_3
    params["blk"].append(None)                                   # blk_4 = AdaptiveMaxPool2d
    for i in range(5):
        params["cls"].append(_conv_params(next(keys), idx_to_in[i],
                                          num_anchors * (num_classes + 1), bias=True))
        params["bbox"].append(_conv_params(next(keys), idx_to_in[i],
                                           num_anchors * 4, bias=True))
    return params


# -------------------------------- TinySSD ------------------------------------

SIZES = [[0.2, 0.272], [0.37, 0.447], [0.54, 0.619], [0.71, 0.79], [0.88, 0.961]]
RATIOS = [[1.0, 2.0, 0.5]] * 5


def tiny_ssd_forward(params, x_nchw, num_classes):
    x = jnp.transpose(x_nchw, (0, 2, 3, 1)).astype(jnp.float32)  # NCHW -> NHWC
    N = x.shape[0]

    # blk_0 (base_net) on the Pallas path.
    feat = _base_net_pallas(x, params["blk"][0])                 # (N, 8, 8, 64)

    # Late blocks have tiny spatial extents: XLA beats a Pallas launch there.
    feats = [feat]
    for i in (1, 2, 3):
        feat = _dsb_xla(feat, params["blk"][i])
        feats.append(feat)
    feats.append(jnp.max(feat, axis=(1, 2), keepdims=True))  # blk_4 = AdaptiveMaxPool2d((1,1))

    n_cls_ch = 4 * (num_classes + 1)
    anchors, cls_preds, bbox_preds = [], [], []
    for i, f in enumerate(feats):
        H, W = f.shape[1], f.shape[2]
        anchors.append(multibox_prior(H, W, SIZES[i], RATIOS[i]))
        # cls and bbox heads merged into one conv (shared input read / launch).
        w = jnp.concatenate([params["cls"][i]["w"], params["bbox"][i]["w"]], axis=-1)
        b = jnp.concatenate([params["cls"][i]["b"], params["bbox"][i]["b"]], axis=0)
        y = _conv3x3_xla(f, w, b)
        # flatten_pred: NCHW -> NHWC -> flatten.  We are already NHWC.
        cls_preds.append(y[..., :n_cls_ch].reshape(N, -1))
        bbox_preds.append(y[..., n_cls_ch:].reshape(N, -1))

    anchors = jnp.concatenate(anchors, axis=1)
    cls_preds = jnp.concatenate(cls_preds, axis=1).reshape(N, -1, num_classes + 1)
    bbox_preds = jnp.concatenate(bbox_preds, axis=1)
    return anchors, cls_preds, bbox_preds


# ---------------------------------- main --------------------------------------

if __name__ == "__main__":
    key = jax.random.PRNGKey(0)
    k_params, k_x = jax.random.split(key)
    num_classes = 1
    params = init_tiny_ssd_params(k_params, num_classes)

    # NCHW input (PyTorch convention): base_net requires 3 input channels and
    # 64 is the smallest spatial size that survives all pooling stages.
    x = jax.random.normal(k_x, (2, 3, 64, 64), jnp.float32)

    fwd = jax.jit(functools.partial(tiny_ssd_forward, num_classes=num_classes))
    anchors, cls_preds, bbox_preds = fwd(params, x)
    jax.block_until_ready((anchors, cls_preds, bbox_preds))

    # Expected totals: 8*8*4 + 4*4*4 + 2*2*4 + 4 + 4 = 344 anchors.
    assert anchors.shape == (1, 344, 4), anchors.shape
    assert cls_preds.shape == (2, 344, num_classes + 1), cls_preds.shape
    assert bbox_preds.shape == (2, 344 * 4), bbox_preds.shape
    assert bool(jnp.all(jnp.isfinite(cls_preds))) and bool(jnp.all(jnp.isfinite(bbox_preds)))
    print("KERNEL_OK")
</pallas_src>

<mosaic_0001>
module attributes {stable_mosaic.version = 11 : i64} {
  func.func @kernel(%arg0: i32, %arg1: i32, %arg2: memref<1x64x64x16xf32, #tpu.memory_space<vmem>>, %arg3: memref<1x1x16xf32, #tpu.memory_space<vmem>>, %arg4: memref<1x1x16xf32, #tpu.memory_space<vmem>>, %arg5: memref<3x48x16xf32, #tpu.memory_space<vmem>>, %arg6: memref<1x4x64x16xf32, #tpu.memory_space<vmem>>, %arg7: memref<1x2x16xf32, #tpu.memory_space<vmem>>) attributes {dimension_semantics = [#tpu.dimension_semantics<parallel>, #tpu.dimension_semantics<arbitrary>], iteration_bounds = array<i64: 2, 16>, scalar_prefetch = 0 : i64, scratch_operands = 0 : i64, tpu.core_type = #tpu.core_type<tc>, window_params = [{transform_indices = @transform_0, window_bounds = array<i64: 1, 64, 64, 16>}, {pipeline_mode = #tpu.pipeline_mode<synchronous>, transform_indices = @transform_1, window_bounds = array<i64: 1, 1, 16>}, {pipeline_mode = #tpu.pipeline_mode<synchronous>, transform_indices = @transform_2, window_bounds = array<i64: 1, 1, 16>}, {pipeline_mode = #tpu.pipeline_mode<synchronous>, transform_indices = @transform_3, window_bounds = array<i64: 3, 48, 16>}, {transform_indices = @transform_4, window_bounds = array<i64: 1, 4, 64, 16>}, {transform_indices = @transform_5, window_bounds = array<i64: 1, 2, 16>}]} {
    %c4_i32 = arith.constant 4 : i32
    %0 = arith.muli %arg1, %c4_i32 : i32
    %c0 = arith.constant 0 : index
    %c0_0 = arith.constant 0 : index
    %c0_1 = arith.constant 0 : index
    %1 = vector.load %arg3[%c0, %c0_0, %c0_1] : memref<1x1x16xf32, #tpu.memory_space<vmem>>, vector<1x1x16xf32>
    %c0_2 = arith.constant 0 : index
    %c0_3 = arith.constant 0 : index
    %c0_4 = arith.constant 0 : index
    %2 = vector.load %arg4[%c0_2, %c0_3, %c0_4] : memref<1x1x16xf32, #tpu.memory_space<vmem>>, vector<1x1x16xf32>
    %c0_5 = arith.constant 0 : index
    %3 = arith.index_cast %0 : i32 to index
    %c0_6 = arith.constant 0 : index
    %c0_7 = arith.constant 0 : index
    %4 = vector.load %arg2[%c0_5, %3, %c0_6, %c0_7] : memref<1x64x64x16xf32, #tpu.memory_space<vmem>>, vector<1x4x64x16xf32>
    %5 = vector.shape_cast %4 : vector<1x4x64x16xf32> to vector<4x64x16xf32>
    %6 = vector.broadcast %1 : vector<1x1x16xf32> to vector<4x64x16xf32>
    %7 = arith.mulf %5, %6 : vector<4x64x16xf32>
    %8 = vector.broadcast %2 : vector<1x1x16xf32> to vector<4x64x16xf32>
    %9 = arith.addf %7, %8 : vector<4x64x16xf32>
    %cst = arith.constant 0.000000e+00 : f32
    %10 = vector.broadcast %cst : f32 to vector<4x64x16xf32>
    %11 = arith.maximumf %9, %10 : vector<4x64x16xf32>
    %c1_i32 = arith.constant 1 : i32
    %12 = arith.subi %0, %c1_i32 : i32
    %c0_i32 = arith.constant 0 : i32
    %13 = arith.maxsi %12, %c0_i32 : i32
    %c4_i32_8 = arith.constant 4 : i32
    %14 = arith.addi %0, %c4_i32_8 : i32
    %c63_i32 = arith.constant 63 : i32
    %15 = arith.minsi %14, %c63_i32 : i32
    %c0_9 = arith.constant 0 : index
    %16 = arith.index_cast %13 : i32 to index
    %c0_10 = arith.constant 0 : index
    %c0_11 = arith.constant 0 : index
    %17 = vector.load %arg2[%c0_9, %16, %c0_10, %c0_11] : memref<1x64x64x16xf32, #tpu.memory_space<vmem>>, vector<1x1x64x16xf32>
    %18 = vector.shape_cast %17 : vector<1x1x64x16xf32> to vector<1x64x16xf32>
    %19 = vector.broadcast %1 : vector<1x1x16xf32> to vector<1x64x16xf32>
    %20 = arith.mulf %18, %19 : vector<1x64x16xf32>
    %21 = vector.broadcast %2 : vector<1x1x16xf32> to vector<1x64x16xf32>
    %22 = arith.addf %20, %21 : vector<1x64x16xf32>
    %cst_12 = arith.constant 0.000000e+00 : f32
    %23 = vector.broadcast %cst_12 : f32 to vector<1x64x16xf32>
    %24 = arith.maximumf %22, %23 : vector<1x64x16xf32>
    %c0_13 = arith.constant 0 : index
    %25 = arith.index_cast %15 : i32 to index
    %c0_14 = arith.constant 0 : index
    %c0_15 = arith.constant 0 : index
    %26 = vector.load %arg2[%c0_13, %25, %c0_14, %c0_15] : memref<1x64x64x16xf32, #tpu.memory_space<vmem>>, vector<1x1x64x16xf32>
    %27 = vector.shape_cast %26 : vector<1x1x64x16xf32> to vector<1x64x16xf32>
    %28 = vector.broadcast %1 : vector<1x1x16xf32> to vector<1x64x16xf32>
    %29 = arith.mulf %27, %28 : vector<1x64x16xf32>
    %30 = vector.broadcast %2 : vector<1x1x16xf32> to vector<1x64x16xf32>
    %31 = arith.addf %29, %30 : vector<1x64x16xf32>
    %cst_16 = arith.constant 0.000000e+00 : f32
    %32 = vector.broadcast %cst_16 : f32 to vector<1x64x16xf32>
    %33 = arith.maximumf %31, %32 : vector<1x64x16xf32>
    %c0_i32_17 = arith.constant 0 : i32
    %34 = arith.cmpi eq, %arg1, %c0_i32_17 : i32
    %cst_18 = arith.constant 0.000000e+00 : f32
    %35 = vector.broadcast %cst_18 : f32 to vector<1x64x16xf32>
    %36 = arith.select %34, %35, %24 : vector<1x64x16xf32>
    %c15_i32 = arith.constant 15 : i32
    %37 = arith.cmpi eq, %arg1, %c15_i32 : i32
    %cst_19 = arith.constant 0.000000e+00 : f32
    %38 = vector.broadcast %cst_19 : f32 to vector<1x64x16xf32>
    %39 = arith.select %37, %38, %33 : vector<1x64x16xf32>
    %40 = tpu.concatenate %36, %11, %39 in 0 : vector<1x64x16xf32>, vector<4x64x16xf32>, vector<1x64x16xf32> -> vector<6x64x16xf32>
    %cst_20 = arith.constant 0.000000e+00 : f32
    %41 = vector.broadcast %cst_20 : f32 to vector<6x1x16xf32>
    %42 = tpu.concatenate %41, %40, %41 in 1 : vector<6x1x16xf32>, vector<6x64x16xf32>, vector<6x1x16xf32> -> vector<6x66x16xf32>
    %cst_21 = arith.constant 0.000000e+00 : f32
    %43 = vector.broadcast %cst_21 : f32 to vector<256x16xf32>
    %44 = vector.extract_strided_slice %42 {offsets = [0, 0, 0], sizes = [4, 64, 16], strides = [1, 1, 1]} : vector<6x66x16xf32> to vector<4x64x16xf32>
    %45 = vector.shape_cast %44 : vector<4x64x16xf32> to vector<256x16xf32>
    %46 = vector.extract_strided_slice %42 {offsets = [0, 1, 0], sizes = [4, 64, 16], strides = [1, 1, 1]} : vector<6x66x16xf32> to vector<4x64x16xf32>
    %47 = vector.shape_cast %46 : vector<4x64x16xf32> to vector<256x16xf32>
    %48 = vector.extract_strided_slice %42 {offsets = [0, 2, 0], sizes = [4, 64, 16], strides = [1, 1, 1]} : vector<6x66x16xf32> to vector<4x64x16xf32>
    %49 = vector.shape_cast %48 : vector<4x64x16xf32> to vector<256x16xf32>
    %50 = tpu.concatenate %45, %47, %49 in 1 : vector<256x16xf32>, vector<256x16xf32>, vector<256x16xf32> -> vector<256x48xf32>
    %c0_22 = arith.constant 0 : index
    %c0_23 = arith.constant 0 : index
    %c0_24 = arith.constant 0 : index
    %51 = vector.load %arg5[%c0_22, %c0_23, %c0_24] : memref<3x48x16xf32, #tpu.memory_space<vmem>>, vector<1x48x16xf32>
    %52 = vector.shape_cast %51 : vector<1x48x16xf32> to vector<48x16xf32>
    %cst_25 = arith.constant dense<0.000000e+00> : vector<256x16xf32>
    %53 = tpu.matmul %50, %52, %cst_25 {dimension_numbers = #tpu.dot_dimension_numbers<[1], [0], [0], [1], [0, 0, 1, 1], [], []>} : vector<256x48xf32>, vector<48x16xf32>, vector<256x16xf32> -> vector<256x16xf32>
    %54 = arith.addf %43, %53 : vector<256x16xf32>
    %55 = vector.extract_strided_slice %42 {offsets = [1, 0, 0], sizes = [4, 64, 16], strides = [1, 1, 1]} : vector<6x66x16xf32> to vector<4x64x16xf32>
    %56 = vector.shape_cast %55 : vector<4x64x16xf32> to vector<256x16xf32>
    %57 = vector.extract_strided_slice %42 {offsets = [1, 1, 0], sizes = [4, 64, 16], strides = [1, 1, 1]} : vector<6x66x16xf32> to vector<4x64x16xf32>
    %58 = vector.shape_cast %57 : vector<4x64x16xf32> to vector<256x16xf32>
    %59 = vector.extract_strided_slice %42 {offsets = [1, 2, 0], sizes = [4, 64, 16], strides = [1, 1, 1]} : vector<6x66x16xf32> to vector<4x64x16xf32>
    %60 = vector.shape_cast %59 : vector<4x64x16xf32> to vector<256x16xf32>
    %61 = tpu.concatenate %56, %58, %60 in 1 : vector<256x16xf32>, vector<256x16xf32>, vector<256x16xf32> -> vector<256x48xf32>
    %c1 = arith.constant 1 : index
    %c0_26 = arith.constant 0 : index
    %c0_27 = arith.constant 0 : index
    %62 = vector.load %arg5[%c1, %c0_26, %c0_27] : memref<3x48x16xf32, #tpu.memory_space<vmem>>, vector<1x48x16xf32>
    %63 = vector.shape_cast %62 : vector<1x48x16xf32> to vector<48x16xf32>
    %cst_28 = arith.constant dense<0.000000e+00> : vector<256x16xf32>
    %64 = tpu.matmul %61, %63, %cst_28 {dimension_numbers = #tpu.dot_dimension_numbers<[1], [0], [0], [1], [0, 0, 1, 1], [], []>} : vector<256x48xf32>, vector<48x16xf32>, vector<256x16xf32> -> vector<256x16xf32>
    %65 = arith.addf %54, %64 : vector<256x16xf32>
    %66 = vector.extract_strided_slice %42 {offsets = [2, 0, 0], sizes = [4, 64, 16], strides = [1, 1, 1]} : vector<6x66x16xf32> to vector<4x64x16xf32>
    %67 = vector.shape_cast %66 : vector<4x64x16xf32> to vector<256x16xf32>
    %68 = vector.extract_strided_slice %42 {offsets = [2, 1, 0], sizes = [4, 64, 16], strides = [1, 1, 1]} : vector<6x66x16xf32> to vector<4x64x16xf32>
    %69 = vector.shape_cast %68 : vector<4x64x16xf32> to vector<256x16xf32>
    %70 = vector.extract_strided_slice %42 {offsets = [2, 2, 0], sizes = [4, 64, 16], strides = [1, 1, 1]} : vector<6x66x16xf32> to vector<4x64x16xf32>
    %71 = vector.shape_cast %70 : vector<4x64x16xf32> to vector<256x16xf32>
    %72 = tpu.concatenate %67, %69, %71 in 1 : vector<256x16xf32>, vector<256x16xf32>, vector<256x16xf32> -> vector<256x48xf32>
    %c2 = arith.constant 2 : index
    %c0_29 = arith.constant 0 : index
    %c0_30 = arith.constant 0 : index
    %73 = vector.load %arg5[%c2, %c0_29, %c0_30] : memref<3x48x16xf32, #tpu.memory_space<vmem>>, vector<1x48x16xf32>
    %74 = vector.shape_cast %73 : vector<1x48x16xf32> to vector<48x16xf32>
    %cst_31 = arith.constant dense<0.000000e+00> : vector<256x16xf32>
    %75 = tpu.matmul %72, %74, %cst_31 {dimension_numbers = #tpu.dot_dimension_numbers<[1], [0], [0], [1], [0, 0, 1, 1], [], []>} : vector<256x48xf32>, vector<48x16xf32>, vector<256x16xf32> -> vector<256x16xf32>
    %76 = arith.addf %65, %75 : vector<256x16xf32>
    %77 = vector.shape_cast %76 : vector<256x16xf32> to vector<1x4x64x16xf32>
    %c0_32 = arith.constant 0 : index
    %c0_33 = arith.constant 0 : index
    %c0_34 = arith.constant 0 : index
    %c0_35 = arith.constant 0 : index
    %78 = vector.load %arg6[%c0_32, %c0_33, %c0_34, %c0_35] : memref<1x4x64x16xf32, #tpu.memory_space<vmem>>, vector<1x4x64x16xf32>
    tpu.vector_store %arg6[%c0_32, %c0_33, %c0_34, %c0_35], %77 {strides = array<i32>} : memref<1x4x64x16xf32, #tpu.memory_space<vmem>>, vector<1x4x64x16xf32>,
    %c0_i32_36 = arith.constant 0 : i32
    %79 = arith.cmpi eq, %arg1, %c0_i32_36 : i32
    %80 = arith.extui %79 : i1 to i32
    %c0_i32_37 = arith.constant 0 : i32
    %81 = arith.cmpi ne, %80, %c0_i32_37 : i32
    scf.if %81 {
      %cst_46 = arith.constant 0.000000e+00 : f32
      %92 = vector.broadcast %cst_46 : f32 to vector<1x2x16xf32>
      %c0_47 = arith.constant 0 : index
      %c0_48 = arith.constant 0 : index
      %c0_49 = arith.constant 0 : index
      %93 = vector.load %arg7[%c0_47, %c0_48, %c0_49] : memref<1x2x16xf32, #tpu.memory_space<vmem>>, vector<1x2x16xf32>
      tpu.vector_store %arg7[%c0_47, %c0_48, %c0_49], %92 {strides = array<i32>} : memref<1x2x16xf32, #tpu.memory_space<vmem>>, vector<1x2x16xf32>,
    } else {
    }
    %cst_38 = arith.constant dense<0.000000e+00> : vector<16xf32>
    %82 = vector.multi_reduction <add>, %76, %cst_38 [0] : vector<256x16xf32> to vector<16xf32>
    %83 = vector.shape_cast %82 : vector<16xf32> to vector<1x16xf32>
    %84 = arith.mulf %76, %76 : vector<256x16xf32>
    %cst_39 = arith.constant dense<0.000000e+00> : vector<16xf32>
    %85 = vector.multi_reduction <add>, %84, %cst_39 [0] : vector<256x16xf32> to vector<16xf32>
    %86 = vector.shape_cast %85 : vector<16xf32> to vector<1x16xf32>
    %c0_40 = arith.constant 0 : index
    %c0_41 = arith.constant 0 : index
    %c0_42 = arith.constant 0 : index
    %87 = vector.load %arg7[%c0_40, %c0_41, %c0_42] : memref<1x2x16xf32, #tpu.memory_space<vmem>>, vector<1x2x16xf32>
    %88 = tpu.concatenate %83, %86 in 0 : vector<1x16xf32>, vector<1x16xf32> -> vector<2x16xf32>
    %89 = vector.shape_cast %88 : vector<2x16xf32> to vector<1x2x16xf32>
    %90 = arith.addf %87, %89 : vector<1x2x16xf32>
    %c0_43 = arith.constant 0 : index
    %c0_44 = arith.constant 0 : index
    %c0_45 = arith.constant 0 : index
    %91 = vector.load %arg7[%c0_43, %c0_44, %c0_45] : memref<1x2x16xf32, #tpu.memory_space<vmem>>, vector<1x2x16xf32>
    tpu.vector_store %arg7[%c0_43, %c0_44, %c0_45], %90 {strides = array<i32>} : memref<1x2x16xf32, #tpu.memory_space<vmem>>, vector<1x2x16xf32>,
    return
  }
  func.func @transform_0(%arg0: i32, %arg1: i32) -> (i32, i32, i32, i32) {
    %c0_i32 = arith.constant 0 : i32
    %c0_i32_0 = arith.constant 0 : i32
    %c0_i32_1 = arith.constant 0 : i32
    %c0_i32_2 = arith.constant 0 : i32
    return %arg0, %c0_i32, %c0_i32_0, %c0_i32_1 : i32, i32, i32, i32
  }
  func.func @transform_1(%arg0: i32, %arg1: i32) -> (i32, i32, i32) {
    %c0_i32 = arith.constant 0 : i32
    %c0_i32_0 = arith.constant 0 : i32
    %c0_i32_1 = arith.constant 0 : i32
    %c0_i32_2 = arith.constant 0 : i32
    return %c0_i32, %c0_i32_0, %c0_i32_1 : i32, i32, i32
  }
  func.func @transform_2(%arg0: i32, %arg1: i32) -> (i32, i32, i32) {
    %c0_i32 = arith.constant 0 : i32
    %c0_i32_0 = arith.constant 0 : i32
    %c0_i32_1 = arith.constant 0 : i32
    %c0_i32_2 = arith.constant 0 : i32
    return %c0_i32, %c0_i32_0, %c0_i32_1 : i32, i32, i32
  }
  func.func @transform_3(%arg0: i32, %arg1: i32) -> (i32, i32, i32) {
    %c0_i32 = arith.constant 0 : i32
    %c0_i32_0 = arith.constant 0 : i32
    %c0_i32_1 = arith.constant 0 : i32
    %c0_i32_2 = arith.constant 0 : i32
    return %c0_i32, %c0_i32_0, %c0_i32_1 : i32, i32, i32
  }
  func.func @transform_4(%arg0: i32, %arg1: i32) -> (i32, i32, i32, i32) {
    %c0_i32 = arith.constant 0 : i32
    %c0_i32_0 = arith.constant 0 : i32
    %c0_i32_1 = arith.constant 0 : i32
    return %arg0, %arg1, %c0_i32, %c0_i32_0 : i32, i32, i32, i32
  }
  func.func @transform_5(%arg0: i32, %arg1: i32) -> (i32, i32, i32) {
    %c0_i32 = arith.constant 0 : i32
    %c0_i32_0 = arith.constant 0 : i32
    %c0_i32_1 = arith.constant 0 : i32
    return %arg0, %c0_i32, %c0_i32_0 : i32, i32, i32
  }
}

module attributes {stable_mosaic.version = 11 : i64} {
  func.func @kernel(%arg0: i32, %arg1: i32, %arg2: memref<1x32x32x16xf32, #tpu.memory_space<vmem>>, %arg3: memref<1x1x16xf32, #tpu.memory_space<vmem>>, %arg4: memref<1x1x16xf32, #tpu.memory_space<vmem>>, %arg5: memref<3x48x32xf32, #tpu.memory_space<vmem>>, %arg6: memref<1x8x32x32xf32, #tpu.memory_space<vmem>>, %arg7: memref<1x2x32xf32, #tpu.memory_space<vmem>>) attributes {dimension_semantics = [#tpu.dimension_semantics<parallel>, #tpu.dimension_semantics<arbitrary>], iteration_bounds = array<i64: 2, 4>, scalar_prefetch = 0 : i64, scratch_operands = 0 : i64, tpu.core_type = #tpu.core_type<tc>, window_params = [{transform_indices = @transform_0, window_bounds = array<i64: 1, 32, 32, 16>}, {pipeline_mode = #tpu.pipeline_mode<synchronous>, transform_indices = @transform_1, window_bounds = array<i64: 1, 1, 16>}, {pipeline_mode = #tpu.pipeline_mode<synchronous>, transform_indices = @transform_2, window_bounds = array<i64: 1, 1, 16>}, {pipeline_mode = #tpu.pipeline_mode<synchronous>, transform_indices = @transform_3, window_bounds = array<i64: 3, 48, 32>}, {transform_indices = @transform_4, window_bounds = array<i64: 1, 8, 32, 32>}, {transform_indices = @transform_5, window_bounds = array<i64: 1, 2, 32>}]} {
    %c8_i32 = arith.constant 8 : i32
    %0 = arith.muli %arg1, %c8_i32 : i32
    %c0 = arith.constant 0 : index
    %c0_0 = arith.constant 0 : index
    %c0_1 = arith.constant 0 : index
    %1 = vector.load %arg3[%c0, %c0_0, %c0_1] : memref<1x1x16xf32, #tpu.memory_space<vmem>>, vector<1x1x16xf32>
    %c0_2 = arith.constant 0 : index
    %c0_3 = arith.constant 0 : index
    %c0_4 = arith.constant 0 : index
    %2 = vector.load %arg4[%c0_2, %c0_3, %c0_4] : memref<1x1x16xf32, #tpu.memory_space<vmem>>, vector<1x1x16xf32>
    %c0_5 = arith.constant 0 : index
    %3 = arith.index_cast %0 : i32 to index
    %c0_6 = arith.constant 0 : index
    %c0_7 = arith.constant 0 : index
    %4 = vector.load %arg2[%c0_5, %3, %c0_6, %c0_7] : memref<1x32x32x16xf32, #tpu.memory_space<vmem>>, vector<1x8x32x16xf32>
    %5 = vector.shape_cast %4 : vector<1x8x32x16xf32> to vector<8x32x16xf32>
    %6 = vector.broadcast %1 : vector<1x1x16xf32> to vector<8x32x16xf32>
    %7 = arith.mulf %5, %6 : vector<8x32x16xf32>
    %8 = vector.broadcast %2 : vector<1x1x16xf32> to vector<8x32x16xf32>
    %9 = arith.addf %7, %8 : vector<8x32x16xf32>
    %cst = arith.constant 0.000000e+00 : f32
    %10 = vector.broadcast %cst : f32 to vector<8x32x16xf32>
    %11 = arith.maximumf %9, %10 : vector<8x32x16xf32>
    %c1_i32 = arith.constant 1 : i32
    %12 = arith.subi %0, %c1_i32 : i32
    %c0_i32 = arith.constant 0 : i32
    %13 = arith.maxsi %12, %c0_i32 : i32
    %c8_i32_8 = arith.constant 8 : i32
    %14 = arith.addi %0, %c8_i32_8 : i32
    %c31_i32 = arith.constant 31 : i32
    %15 = arith.minsi %14, %c31_i32 : i32
    %c0_9 = arith.constant 0 : index
    %16 = arith.index_cast %13 : i32 to index
    %c0_10 = arith.constant 0 : index
    %c0_11 = arith.constant 0 : index
    %17 = vector.load %arg2[%c0_9, %16, %c0_10, %c0_11] : memref<1x32x32x16xf32, #tpu.memory_space<vmem>>, vector<1x1x32x16xf32>
    %18 = vector.shape_cast %17 : vector<1x1x32x16xf32> to vector<1x32x16xf32>
    %19 = vector.broadcast %1 : vector<1x1x16xf32> to vector<1x32x16xf32>
    %20 = arith.mulf %18, %19 : vector<1x32x16xf32>
    %21 = vector.broadcast %2 : vector<1x1x16xf32> to vector<1x32x16xf32>
    %22 = arith.addf %20, %21 : vector<1x32x16xf32>
    %cst_12 = arith.constant 0.000000e+00 : f32
    %23 = vector.broadcast %cst_12 : f32 to vector<1x32x16xf32>
    %24 = arith.maximumf %22, %23 : vector<1x32x16xf32>
    %c0_13 = arith.constant 0 : index
    %25 = arith.index_cast %15 : i32 to index
    %c0_14 = arith.constant 0 : index
    %c0_15 = arith.constant 0 : index
    %26 = vector.load %arg2[%c0_13, %25, %c0_14, %c0_15] : memref<1x32x32x16xf32, #tpu.memory_space<vmem>>, vector<1x1x32x16xf32>
    %27 = vector.shape_cast %26 : vector<1x1x32x16xf32> to vector<1x32x16xf32>
    %28 = vector.broadcast %1 : vector<1x1x16xf32> to vector<1x32x16xf32>
    %29 = arith.mulf %27, %28 : vector<1x32x16xf32>
    %30 = vector.broadcast %2 : vector<1x1x16xf32> to vector<1x32x16xf32>
    %31 = arith.addf %29, %30 : vector<1x32x16xf32>
    %cst_16 = arith.constant 0.000000e+00 : f32
    %32 = vector.broadcast %cst_16 : f32 to vector<1x32x16xf32>
    %33 = arith.maximumf %31, %32 : vector<1x32x16xf32>
    %c0_i32_17 = arith.constant 0 : i32
    %34 = arith.cmpi eq, %arg1, %c0_i32_17 : i32
    %cst_18 = arith.constant 0.000000e+00 : f32
    %35 = vector.broadcast %cst_18 : f32 to vector<1x32x16xf32>
    %36 = arith.select %34, %35, %24 : vector<1x32x16xf32>
    %c3_i32 = arith.constant 3 : i32
    %37 = arith.cmpi eq, %arg1, %c3_i32 : i32
    %cst_19 = arith.constant 0.000000e+00 : f32
    %38 = vector.broadcast %cst_19 : f32 to vector<1x32x16xf32>
    %39 = arith.select %37, %38, %33 : vector<1x32x16xf32>
    %40 = tpu.concatenate %36, %11, %39 in 0 : vector<1x32x16xf32>, vector<8x32x16xf32>, vector<1x32x16xf32> -> vector<10x32x16xf32>
    %cst_20 = arith.constant 0.000000e+00 : f32
    %41 = vector.broadcast %cst_20 : f32 to vector<10x1x16xf32>
    %42 = tpu.concatenate %41, %40, %41 in 1 : vector<10x1x16xf32>, vector<10x32x16xf32>, vector<10x1x16xf32> -> vector<10x34x16xf32>
    %cst_21 = arith.constant 0.000000e+00 : f32
    %43 = vector.broadcast %cst_21 : f32 to vector<256x32xf32>
    %44 = vector.extract_strided_slice %42 {offsets = [0, 0, 0], sizes = [8, 32, 16], strides = [1, 1, 1]} : vector<10x34x16xf32> to vector<8x32x16xf32>
    %45 = vector.shape_cast %44 : vector<8x32x16xf32> to vector<256x16xf32>
    %46 = vector.extract_strided_slice %42 {offsets = [0, 1, 0], sizes = [8, 32, 16], strides = [1, 1, 1]} : vector<10x34x16xf32> to vector<8x32x16xf32>
    %47 = vector.shape_cast %46 : vector<8x32x16xf32> to vector<256x16xf32>
    %48 = vector.extract_strided_slice %42 {offsets = [0, 2, 0], sizes = [8, 32, 16], strides = [1, 1, 1]} : vector<10x34x16xf32> to vector<8x32x16xf32>
    %49 = vector.shape_cast %48 : vector<8x32x16xf32> to vector<256x16xf32>
    %50 = tpu.concatenate %45, %47, %49 in 1 : vector<256x16xf32>, vector<256x16xf32>, vector<256x16xf32> -> vector<256x48xf32>
    %c0_22 = arith.constant 0 : index
    %c0_23 = arith.constant 0 : index
    %c0_24 = arith.constant 0 : index
    %51 = vector.load %arg5[%c0_22, %c0_23, %c0_24] : memref<3x48x32xf32, #tpu.memory_space<vmem>>, vector<1x48x32xf32>
    %52 = vector.shape_cast %51 : vector<1x48x32xf32> to vector<48x32xf32>
    %cst_25 = arith.constant dense<0.000000e+00> : vector<256x32xf32>
    %53 = tpu.matmul %50, %52, %cst_25 {dimension_numbers = #tpu.dot_dimension_numbers<[1], [0], [0], [1], [0, 0, 1, 1], [], []>} : vector<256x48xf32>, vector<48x32xf32>, vector<256x32xf32> -> vector<256x32xf32>
    %54 = arith.addf %43, %53 : vector<256x32xf32>
    %55 = vector.extract_strided_slice %42 {offsets = [1, 0, 0], sizes = [8, 32, 16], strides = [1, 1, 1]} : vector<10x34x16xf32> to vector<8x32x16xf32>
    %56 = vector.shape_cast %55 : vector<8x32x16xf32> to vector<256x16xf32>
    %57 = vector.extract_strided_slice %42 {offsets = [1, 1, 0], sizes = [8, 32, 16], strides = [1, 1, 1]} : vector<10x34x16xf32> to vector<8x32x16xf32>
    %58 = vector.shape_cast %57 : vector<8x32x16xf32> to vector<256x16xf32>
    %59 = vector.extract_strided_slice %42 {offsets = [1, 2, 0], sizes = [8, 32, 16], strides = [1, 1, 1]} : vector<10x34x16xf32> to vector<8x32x16xf32>
    %60 = vector.shape_cast %59 : vector<8x32x16xf32> to vector<256x16xf32>
    %61 = tpu.concatenate %56, %58, %60 in 1 : vector<256x16xf32>, vector<256x16xf32>, vector<256x16xf32> -> vector<256x48xf32>
    %c1 = arith.constant 1 : index
    %c0_26 = arith.constant 0 : index
    %c0_27 = arith.constant 0 : index
    %62 = vector.load %arg5[%c1, %c0_26, %c0_27] : memref<3x48x32xf32, #tpu.memory_space<vmem>>, vector<1x48x32xf32>
    %63 = vector.shape_cast %62 : vector<1x48x32xf32> to vector<48x32xf32>
    %cst_28 = arith.constant dense<0.000000e+00> : vector<256x32xf32>
    %64 = tpu.matmul %61, %63, %cst_28 {dimension_numbers = #tpu.dot_dimension_numbers<[1], [0], [0], [1], [0, 0, 1, 1], [], []>} : vector<256x48xf32>, vector<48x32xf32>, vector<256x32xf32> -> vector<256x32xf32>
    %65 = arith.addf %54, %64 : vector<256x32xf32>
    %66 = vector.extract_strided_slice %42 {offsets = [2, 0, 0], sizes = [8, 32, 16], strides = [1, 1, 1]} : vector<10x34x16xf32> to vector<8x32x16xf32>
    %67 = vector.shape_cast %66 : vector<8x32x16xf32> to vector<256x16xf32>
    %68 = vector.extract_strided_slice %42 {offsets = [2, 1, 0], sizes = [8, 32, 16], strides = [1, 1, 1]} : vector<10x34x16xf32> to vector<8x32x16xf32>
    %69 = vector.shape_cast %68 : vector<8x32x16xf32> to vector<256x16xf32>
    %70 = vector.extract_strided_slice %42 {offsets = [2, 2, 0], sizes = [8, 32, 16], strides = [1, 1, 1]} : vector<10x34x16xf32> to vector<8x32x16xf32>
    %71 = vector.shape_cast %70 : vector<8x32x16xf32> to vector<256x16xf32>
    %72 = tpu.concatenate %67, %69, %71 in 1 : vector<256x16xf32>, vector<256x16xf32>, vector<256x16xf32> -> vector<256x48xf32>
    %c2 = arith.constant 2 : index
    %c0_29 = arith.constant 0 : index
    %c0_30 = arith.constant 0 : index
    %73 = vector.load %arg5[%c2, %c0_29, %c0_30] : memref<3x48x32xf32, #tpu.memory_space<vmem>>, vector<1x48x32xf32>
    %74 = vector.shape_cast %73 : vector<1x48x32xf32> to vector<48x32xf32>
    %cst_31 = arith.constant dense<0.000000e+00> : vector<256x32xf32>
    %75 = tpu.matmul %72, %74, %cst_31 {dimension_numbers = #tpu.dot_dimension_numbers<[1], [0], [0], [1], [0, 0, 1, 1], [], []>} : vector<256x48xf32>, vector<48x32xf32>, vector<256x32xf32> -> vector<256x32xf32>
    %76 = arith.addf %65, %75 : vector<256x32xf32>
    %77 = vector.shape_cast %76 : vector<256x32xf32> to vector<1x8x32x32xf32>
    %c0_32 = arith.constant 0 : index
    %c0_33 = arith.constant 0 : index
    %c0_34 = arith.constant 0 : index
    %c0_35 = arith.constant 0 : index
    %78 = vector.load %arg6[%c0_32, %c0_33, %c0_34, %c0_35] : memref<1x8x32x32xf32, #tpu.memory_space<vmem>>, vector<1x8x32x32xf32>
    tpu.vector_store %arg6[%c0_32, %c0_33, %c0_34, %c0_35], %77 {strides = array<i32>} : memref<1x8x32x32xf32, #tpu.memory_space<vmem>>, vector<1x8x32x32xf32>,
    %c0_i32_36 = arith.constant 0 : i32
    %79 = arith.cmpi eq, %arg1, %c0_i32_36 : i32
    %80 = arith.extui %79 : i1 to i32
    %c0_i32_37 = arith.constant 0 : i32
    %81 = arith.cmpi ne, %80, %c0_i32_37 : i32
    scf.if %81 {
      %cst_46 = arith.constant 0.000000e+00 : f32
      %92 = vector.broadcast %cst_46 : f32 to vector<1x2x32xf32>
      %c0_47 = arith.constant 0 : index
      %c0_48 = arith.constant 0 : index
      %c0_49 = arith.constant 0 : index
      %93 = vector.load %arg7[%c0_47, %c0_48, %c0_49] : memref<1x2x32xf32, #tpu.memory_space<vmem>>, vector<1x2x32xf32>
      tpu.vector_store %arg7[%c0_47, %c0_48, %c0_49], %92 {strides = array<i32>} : memref<1x2x32xf32, #tpu.memory_space<vmem>>, vector<1x2x32xf32>,
    } else {
    }
    %cst_38 = arith.constant dense<0.000000e+00> : vector<32xf32>
    %82 = vector.multi_reduction <add>, %76, %cst_38 [0] : vector<256x32xf32> to vector<32xf32>
    %83 = vector.shape_cast %82 : vector<32xf32> to vector<1x32xf32>
    %84 = arith.mulf %76, %76 : vector<256x32xf32>
    %cst_39 = arith.constant dense<0.000000e+00> : vector<32xf32>
    %85 = vector.multi_reduction <add>, %84, %cst_39 [0] : vector<256x32xf32> to vector<32xf32>
    %86 = vector.shape_cast %85 : vector<32xf32> to vector<1x32xf32>
    %c0_40 = arith.constant 0 : index
    %c0_41 = arith.constant 0 : index
    %c0_42 = arith.constant 0 : index
    %87 = vector.load %arg7[%c0_40, %c0_41, %c0_42] : memref<1x2x32xf32, #tpu.memory_space<vmem>>, vector<1x2x32xf32>
    %88 = tpu.concatenate %83, %86 in 0 : vector<1x32xf32>, vector<1x32xf32> -> vector<2x32xf32>
    %89 = vector.shape_cast %88 : vector<2x32xf32> to vector<1x2x32xf32>
    %90 = arith.addf %87, %89 : vector<1x2x32xf32>
    %c0_43 = arith.constant 0 : index
    %c0_44 = arith.constant 0 : index
    %c0_45 = arith.constant 0 : index
    %91 = vector.load %arg7[%c0_43, %c0_44, %c0_45] : memref<1x2x32xf32, #tpu.memory_space<vmem>>, vector<1x2x32xf32>
    tpu.vector_store %arg7[%c0_43, %c0_44, %c0_45], %90 {strides = array<i32>} : memref<1x2x32xf32, #tpu.memory_space<vmem>>, vector<1x2x32xf32>,
    return
  }
  func.func @transform_0(%arg0: i32, %arg1: i32) -> (i32, i32, i32, i32) {
    %c0_i32 = arith.constant 0 : i32
    %c0_i32_0 = arith.constant 0 : i32
    %c0_i32_1 = arith.constant 0 : i32
    %c0_i32_2 = arith.constant 0 : i32
    return %arg0, %c0_i32, %c0_i32_0, %c0_i32_1 : i32, i32, i32, i32
  }
  func.func @transform_1(%arg0: i32, %arg1: i32) -> (i32, i32, i32) {
    %c0_i32 = arith.constant 0 : i32
    %c0_i32_0 = arith.constant 0 : i32
    %c0_i32_1 = arith.constant 0 : i32
    %c0_i32_2 = arith.constant 0 : i32
    return %c0_i32, %c0_i32_0, %c0_i32_1 : i32, i32, i32
  }
  func.func @transform_2(%arg0: i32, %arg1: i32) -> (i32, i32, i32) {
    %c0_i32 = arith.constant 0 : i32
    %c0_i32_0 = arith.constant 0 : i32
    %c0_i32_1 = arith.constant 0 : i32
    %c0_i32_2 = arith.constant 0 : i32
    return %c0_i32, %c0_i32_0, %c0_i32_1 : i32, i32, i32
  }
  func.func @transform_3(%arg0: i32, %arg1: i32) -> (i32, i32, i32) {
    %c0_i32 = arith.constant 0 : i32
    %c0_i32_0 = arith.constant 0 : i32
    %c0_i32_1 = arith.constant 0 : i32
    %c0_i32_2 = arith.constant 0 : i32
    return %c0_i32, %c0_i32_0, %c0_i32_1 : i32, i32, i32
  }
  func.func @transform_4(%arg0: i32, %arg1: i32) -> (i32, i32, i32, i32) {
    %c0_i32 = arith.constant 0 : i32
    %c0_i32_0 = arith.constant 0 : i32
    %c0_i32_1 = arith.constant 0 : i32
    return %arg0, %arg1, %c0_i32, %c0_i32_0 : i32, i32, i32, i32
  }
  func.func @transform_5(%arg0: i32, %arg1: i32) -> (i32, i32, i32) {
    %c0_i32 = arith.constant 0 : i32
    %c0_i32_0 = arith.constant 0 : i32
    %c0_i32_1 = arith.constant 0 : i32
    return %arg0, %c0_i32, %c0_i32_0 : i32, i32, i32
  }
}

module attributes {stable_mosaic.version = 11 : i64} {
  func.func @kernel(%arg0: i32, %arg1: i32, %arg2: memref<1x32x32x32xf32, #tpu.memory_space<vmem>>, %arg3: memref<1x1x32xf32, #tpu.memory_space<vmem>>, %arg4: memref<1x1x32xf32, #tpu.memory_space<vmem>>, %arg5: memref<3x96x32xf32, #tpu.memory_space<vmem>>, %arg6: memref<1x8x32x32xf32, #tpu.memory_space<vmem>>, %arg7: memref<1x2x32xf32, #tpu.memory_space<vmem>>) attributes {dimension_semantics = [#tpu.dimension_semantics<parallel>, #tpu.dimension_semantics<arbitrary>], iteration_bounds = array<i64: 2, 4>, scalar_prefetch = 0 : i64, scratch_operands = 0 : i64, tpu.core_type = #tpu.core_type<tc>, window_params = [{transform_indices = @transform_0, window_bounds = array<i64: 1, 32, 32, 32>}, {pipeline_mode = #tpu.pipeline_mode<synchronous>, transform_indices = @transform_1, window_bounds = array<i64: 1, 1, 32>}, {pipeline_mode = #tpu.pipeline_mode<synchronous>, transform_indices = @transform_2, window_bounds = array<i64: 1, 1, 32>}, {pipeline_mode = #tpu.pipeline_mode<synchronous>, transform_indices = @transform_3, window_bounds = array<i64: 3, 96, 32>}, {transform_indices = @transform_4, window_bounds = array<i64: 1, 8, 32, 32>}, {transform_indices = @transform_5, window_bounds = array<i64: 1, 2, 32>}]} {
    %c8_i32 = arith.constant 8 : i32
    %0 = arith.muli %arg1, %c8_i32 : i32
    %c0 = arith.constant 0 : index
    %c0_0 = arith.constant 0 : index
    %c0_1 = arith.constant 0 : index
    %1 = vector.load %arg3[%c0, %c0_0, %c0_1] : memref<1x1x32xf32, #tpu.memory_space<vmem>>, vector<1x1x32xf32>
    %c0_2 = arith.constant 0 : index
    %c0_3 = arith.constant 0 : index
    %c0_4 = arith.constant 0 : index
    %2 = vector.load %arg4[%c0_2, %c0_3, %c0_4] : memref<1x1x32xf32, #tpu.memory_space<vmem>>, vector<1x1x32xf32>
    %c0_5 = arith.constant 0 : index
    %3 = arith.index_cast %0 : i32 to index
    %c0_6 = arith.constant 0 : index
    %c0_7 = arith.constant 0 : index
    %4 = vector.load %arg2[%c0_5, %3, %c0_6, %c0_7] : memref<1x32x32x32xf32, #tpu.memory_space<vmem>>, vector<1x8x32x32xf32>
    %5 = vector.shape_cast %4 : vector<1x8x32x32xf32> to vector<8x32x32xf32>
    %6 = vector.broadcast %1 : vector<1x1x32xf32> to vector<8x32x32xf32>
    %7 = arith.mulf %5, %6 : vector<8x32x32xf32>
    %8 = vector.broadcast %2 : vector<1x1x32xf32> to vector<8x32x32xf32>
    %9 = arith.addf %7, %8 : vector<8x32x32xf32>
    %cst = arith.constant 0.000000e+00 : f32
    %10 = vector.broadcast %cst : f32 to vector<8x32x32xf32>
    %11 = arith.maximumf %9, %10 : vector<8x32x32xf32>
    %c1_i32 = arith.constant 1 : i32
    %12 = arith.subi %0, %c1_i32 : i32
    %c0_i32 = arith.constant 0 : i32
    %13 = arith.maxsi %12, %c0_i32 : i32
    %c8_i32_8 = arith.constant 8 : i32
    %14 = arith.addi %0, %c8_i32_8 : i32
    %c31_i32 = arith.constant 31 : i32
    %15 = arith.minsi %14, %c31_i32 : i32
    %c0_9 = arith.constant 0 : index
    %16 = arith.index_cast %13 : i32 to index
    %c0_10 = arith.constant 0 : index
    %c0_11 = arith.constant 0 : index
    %17 = vector.load %arg2[%c0_9, %16, %c0_10, %c0_11] : memref<1x32x32x32xf32, #tpu.memory_space<vmem>>, vector<1x1x32x32xf32>
    %18 = vector.shape_cast %17 : vector<1x1x32x32xf32> to vector<1x32x32xf32>
    %19 = vector.broadcast %1 : vector<1x1x32xf32> to vector<1x32x32xf32>
    %20 = arith.mulf %18, %19 : vector<1x32x32xf32>
    %21 = vector.broadcast %2 : vector<1x1x32xf32> to vector<1x32x32xf32>
    %22 = arith.addf %20, %21 : vector<1x32x32xf32>
    %cst_12 = arith.constant 0.000000e+00 : f32
    %23 = vector.broadcast %cst_12 : f32 to vector<1x32x32xf32>
    %24 = arith.maximumf %22, %23 : vector<1x32x32xf32>
    %c0_13 = arith.constant 0 : index
    %25 = arith.index_cast %15 : i32 to index
    %c0_14 = arith.constant 0 : index
    %c0_15 = arith.constant 0 : index
    %26 = vector.load %arg2[%c0_13, %25, %c0_14, %c0_15] : memref<1x32x32x32xf32, #tpu.memory_space<vmem>>, vector<1x1x32x32xf32>
    %27 = vector.shape_cast %26 : vector<1x1x32x32xf32> to vector<1x32x32xf32>
    %28 = vector.broadcast %1 : vector<1x1x32xf32> to vector<1x32x32xf32>
    %29 = arith.mulf %27, %28 : vector<1x32x32xf32>
    %30 = vector.broadcast %2 : vector<1x1x32xf32> to vector<1x32x32xf32>
    %31 = arith.addf %29, %30 : vector<1x32x32xf32>
    %cst_16 = arith.constant 0.000000e+00 : f32
    %32 = vector.broadcast %cst_16 : f32 to vector<1x32x32xf32>
    %33 = arith.maximumf %31, %32 : vector<1x32x32xf32>
    %c0_i32_17 = arith.constant 0 : i32
    %34 = arith.cmpi eq, %arg1, %c0_i32_17 : i32
    %cst_18 = arith.constant 0.000000e+00 : f32
    %35 = vector.broadcast %cst_18 : f32 to vector<1x32x32xf32>
    %36 = arith.select %34, %35, %24 : vector<1x32x32xf32>
    %c3_i32 = arith.constant 3 : i32
    %37 = arith.cmpi eq, %arg1, %c3_i32 : i32
    %cst_19 = arith.constant 0.000000e+00 : f32
    %38 = vector.broadcast %cst_19 : f32 to vector<1x32x32xf32>
    %39 = arith.select %37, %38, %33 : vector<1x32x32xf32>
    %40 = tpu.concatenate %36, %11, %39 in 0 : vector<1x32x32xf32>, vector<8x32x32xf32>, vector<1x32x32xf32> -> vector<10x32x32xf32>
    %cst_20 = arith.constant 0.000000e+00 : f32
    %41 = vector.broadcast %cst_20 : f32 to vector<10x1x32xf32>
    %42 = tpu.concatenate %41, %40, %41 in 1 : vector<10x1x32xf32>, vector<10x32x32xf32>, vector<10x1x32xf32> -> vector<10x34x32xf32>
    %cst_21 = arith.constant 0.000000e+00 : f32
    %43 = vector.broadcast %cst_21 : f32 to vector<256x32xf32>
    %44 = vector.extract_strided_slice %42 {offsets = [0, 0, 0], sizes = [8, 32, 32], strides = [1, 1, 1]} : vector<10x34x32xf32> to vector<8x32x32xf32>
    %45 = vector.shape_cast %44 : vector<8x32x32xf32> to vector<256x32xf32>
    %46 = vector.extract_strided_slice %42 {offsets = [0, 1, 0], sizes = [8, 32, 32], strides = [1, 1, 1]} : vector<10x34x32xf32> to vector<8x32x32xf32>
    %47 = vector.shape_cast %46 : vector<8x32x32xf32> to vector<256x32xf32>
    %48 = vector.extract_strided_slice %42 {offsets = [0, 2, 0], sizes = [8, 32, 32], strides = [1, 1, 1]} : vector<10x34x32xf32> to vector<8x32x32xf32>
    %49 = vector.shape_cast %48 : vector<8x32x32xf32> to vector<256x32xf32>
    %50 = tpu.concatenate %45, %47, %49 in 1 : vector<256x32xf32>, vector<256x32xf32>, vector<256x32xf32> -> vector<256x96xf32>
    %c0_22 = arith.constant 0 : index
    %c0_23 = arith.constant 0 : index
    %c0_24 = arith.constant 0 : index
    %51 = vector.load %arg5[%c0_22, %c0_23, %c0_24] : memref<3x96x32xf32, #tpu.memory_space<vmem>>, vector<1x96x32xf32>
    %52 = vector.shape_cast %51 : vector<1x96x32xf32> to vector<96x32xf32>
    %cst_25 = arith.constant dense<0.000000e+00> : vector<256x32xf32>
    %53 = tpu.matmul %50, %52, %cst_25 {dimension_numbers = #tpu.dot_dimension_numbers<[1], [0], [0], [1], [0, 0, 1, 1], [], []>} : vector<256x96xf32>, vector<96x32xf32>, vector<256x32xf32> -> vector<256x32xf32>
    %54 = arith.addf %43, %53 : vector<256x32xf32>
    %55 = vector.extract_strided_slice %42 {offsets = [1, 0, 0], sizes = [8, 32, 32], strides = [1, 1, 1]} : vector<10x34x32xf32> to vector<8x32x32xf32>
    %56 = vector.shape_cast %55 : vector<8x32x32xf32> to vector<256x32xf32>
    %57 = vector.extract_strided_slice %42 {offsets = [1, 1, 0], sizes = [8, 32, 32], strides = [1, 1, 1]} : vector<10x34x32xf32> to vector<8x32x32xf32>
    %58 = vector.shape_cast %57 : vector<8x32x32xf32> to vector<256x32xf32>
    %59 = vector.extract_strided_slice %42 {offsets = [1, 2, 0], sizes = [8, 32, 32], strides = [1, 1, 1]} : vector<10x34x32xf32> to vector<8x32x32xf32>
    %60 = vector.shape_cast %59 : vector<8x32x32xf32> to vector<256x32xf32>
    %61 = tpu.concatenate %56, %58, %60 in 1 : vector<256x32xf32>, vector<256x32xf32>, vector<256x32xf32> -> vector<256x96xf32>
    %c1 = arith.constant 1 : index
    %c0_26 = arith.constant 0 : index
    %c0_27 = arith.constant 0 : index
    %62 = vector.load %arg5[%c1, %c0_26, %c0_27] : memref<3x96x32xf32, #tpu.memory_space<vmem>>, vector<1x96x32xf32>
    %63 = vector.shape_cast %62 : vector<1x96x32xf32> to vector<96x32xf32>
    %cst_28 = arith.constant dense<0.000000e+00> : vector<256x32xf32>
    %64 = tpu.matmul %61, %63, %cst_28 {dimension_numbers = #tpu.dot_dimension_numbers<[1], [0], [0], [1], [0, 0, 1, 1], [], []>} : vector<256x96xf32>, vector<96x32xf32>, vector<256x32xf32> -> vector<256x32xf32>
    %65 = arith.addf %54, %64 : vector<256x32xf32>
    %66 = vector.extract_strided_slice %42 {offsets = [2, 0, 0], sizes = [8, 32, 32], strides = [1, 1, 1]} : vector<10x34x32xf32> to vector<8x32x32xf32>
    %67 = vector.shape_cast %66 : vector<8x32x32xf32> to vector<256x32xf32>
    %68 = vector.extract_strided_slice %42 {offsets = [2, 1, 0], sizes = [8, 32, 32], strides = [1, 1, 1]} : vector<10x34x32xf32> to vector<8x32x32xf32>
    %69 = vector.shape_cast %68 : vector<8x32x32xf32> to vector<256x32xf32>
    %70 = vector.extract_strided_slice %42 {offsets = [2, 2, 0], sizes = [8, 32, 32], strides = [1, 1, 1]} : vector<10x34x32xf32> to vector<8x32x32xf32>
    %71 = vector.shape_cast %70 : vector<8x32x32xf32> to vector<256x32xf32>
    %72 = tpu.concatenate %67, %69, %71 in 1 : vector<256x32xf32>, vector<256x32xf32>, vector<256x32xf32> -> vector<256x96xf32>
    %c2 = arith.constant 2 : index
    %c0_29 = arith.constant 0 : index
    %c0_30 = arith.constant 0 : index
    %73 = vector.load %arg5[%c2, %c0_29, %c0_30] : memref<3x96x32xf32, #tpu.memory_space<vmem>>, vector<1x96x32xf32>
    %74 = vector.shape_cast %73 : vector<1x96x32xf32> to vector<96x32xf32>
    %cst_31 = arith.constant dense<0.000000e+00> : vector<256x32xf32>
    %75 = tpu.matmul %72, %74, %cst_31 {dimension_numbers = #tpu.dot_dimension_numbers<[1], [0], [0], [1], [0, 0, 1, 1], [], []>} : vector<256x96xf32>, vector<96x32xf32>, vector<256x32xf32> -> vector<256x32xf32>
    %76 = arith.addf %65, %75 : vector<256x32xf32>
    %77 = vector.shape_cast %76 : vector<256x32xf32> to vector<1x8x32x32xf32>
    %c0_32 = arith.constant 0 : index
    %c0_33 = arith.constant 0 : index
    %c0_34 = arith.constant 0 : index
    %c0_35 = arith.constant 0 : index
    %78 = vector.load %arg6[%c0_32, %c0_33, %c0_34, %c0_35] : memref<1x8x32x32xf32, #tpu.memory_space<vmem>>, vector<1x8x32x32xf32>
    tpu.vector_store %arg6[%c0_32, %c0_33, %c0_34, %c0_35], %77 {strides = array<i32>} : memref<1x8x32x32xf32, #tpu.memory_space<vmem>>, vector<1x8x32x32xf32>,
    %c0_i32_36 = arith.constant 0 : i32
    %79 = arith.cmpi eq, %arg1, %c0_i32_36 : i32
    %80 = arith.extui %79 : i1 to i32
    %c0_i32_37 = arith.constant 0 : i32
    %81 = arith.cmpi ne, %80, %c0_i32_37 : i32
    scf.if %81 {
      %cst_46 = arith.constant 0.000000e+00 : f32
      %92 = vector.broadcast %cst_46 : f32 to vector<1x2x32xf32>
      %c0_47 = arith.constant 0 : index
      %c0_48 = arith.constant 0 : index
      %c0_49 = arith.constant 0 : index
      %93 = vector.load %arg7[%c0_47, %c0_48, %c0_49] : memref<1x2x32xf32, #tpu.memory_space<vmem>>, vector<1x2x32xf32>
      tpu.vector_store %arg7[%c0_47, %c0_48, %c0_49], %92 {strides = array<i32>} : memref<1x2x32xf32, #tpu.memory_space<vmem>>, vector<1x2x32xf32>,
    } else {
    }
    %cst_38 = arith.constant dense<0.000000e+00> : vector<32xf32>
    %82 = vector.multi_reduction <add>, %76, %cst_38 [0] : vector<256x32xf32> to vector<32xf32>
    %83 = vector.shape_cast %82 : vector<32xf32> to vector<1x32xf32>
    %84 = arith.mulf %76, %76 : vector<256x32xf32>
    %cst_39 = arith.constant dense<0.000000e+00> : vector<32xf32>
    %85 = vector.multi_reduction <add>, %84, %cst_39 [0] : vector<256x32xf32> to vector<32xf32>
    %86 = vector.shape_cast %85 : vector<32xf32> to vector<1x32xf32>
    %c0_40 = arith.constant 0 : index
    %c0_41 = arith.constant 0 : index
    %c0_42 = arith.constant 0 : index
    %87 = vector.load %arg7[%c0_40, %c0_41, %c0_42] : memref<1x2x32xf32, #tpu.memory_space<vmem>>, vector<1x2x32xf32>
    %88 = tpu.concatenate %83, %86 in 0 : vector<1x32xf32>, vector<1x32xf32> -> vector<2x32xf32>
    %89 = vector.shape_cast %88 : vector<2x32xf32> to vector<1x2x32xf32>
    %90 = arith.addf %87, %89 : vector<1x2x32xf32>
    %c0_43 = arith.constant 0 : index
    %c0_44 = arith.constant 0 : index
    %c0_45 = arith.constant 0 : index
    %91 = vector.load %arg7[%c0_43, %c0_44, %c0_45] : memref<1x2x32xf32, #tpu.memory_space<vmem>>, vector<1x2x32xf32>
    tpu.vector_store %arg7[%c0_43, %c0_44, %c0_45], %90 {strides = array<i32>} : memref<1x2x32xf32, #tpu.memory_space<vmem>>, vector<1x2x32xf32>,
    return
  }
  func.func @transform_0(%arg0: i32, %arg1: i32) -> (i32, i32, i32, i32) {
    %c0_i32 = arith.constant 0 : i32
    %c0_i32_0 = arith.constant 0 : i32
    %c0_i32_1 = arith.constant 0 : i32
    %c0_i32_2 = arith.constant 0 : i32
    return %arg0, %c0_i32, %c0_i32_0, %c0_i32_1 : i32, i32, i32, i32
  }
  func.func @transform_1(%arg0: i32, %arg1: i32) -> (i32, i32, i32) {
    %c0_i32 = arith.constant 0 : i32
    %c0_i32_0 = arith.constant 0 : i32
    %c0_i32_1 = arith.constant 0 : i32
    %c0_i32_2 = arith.constant 0 : i32
    return %c0_i32, %c0_i32_0, %c0_i32_1 : i32, i32, i32
  }
  func.func @transform_2(%arg0: i32, %arg1: i32) -> (i32, i32, i32) {
    %c0_i32 = arith.constant 0 : i32
    %c0_i32_0 = arith.constant 0 : i32
    %c0_i32_1 = arith.constant 0 : i32
    %c0_i32_2 = arith.constant 0 : i32
    return %c0_i32, %c0_i32_0, %c0_i32_1 : i32, i32, i32
  }
  func.func @transform_3(%arg0: i32, %arg1: i32) -> (i32, i32, i32) {
    %c0_i32 = arith.constant 0 : i32
    %c0_i32_0 = arith.constant 0 : i32
    %c0_i32_1 = arith.constant 0 : i32
    %c0_i32_2 = arith.constant 0 : i32
    return %c0_i32, %c0_i32_0, %c0_i32_1 : i32, i32, i32
  }
  func.func @transform_4(%arg0: i32, %arg1: i32) -> (i32, i32, i32, i32) {
    %c0_i32 = arith.constant 0 : i32
    %c0_i32_0 = arith.constant 0 : i32
    %c0_i32_1 = arith.constant 0 : i32
    return %arg0, %arg1, %c0_i32, %c0_i32_0 : i32, i32, i32, i32
  }
  func.func @transform_5(%arg0: i32, %arg1: i32) -> (i32, i32, i32) {
    %c0_i32 = arith.constant 0 : i32
    %c0_i32_0 = arith.constant 0 : i32
    %c0_i32_1 = arith.constant 0 : i32
    return %arg0, %c0_i32, %c0_i32_0 : i32, i32, i32
  }
}

module attributes {stable_mosaic.version = 11 : i64} {
  func.func @kernel(%arg0: i32, %arg1: i32, %arg2: memref<1x16x16x32xf32, #tpu.memory_space<vmem>>, %arg3: memref<1x1x32xf32, #tpu.memory_space<vmem>>, %arg4: memref<1x1x32xf32, #tpu.memory_space<vmem>>, %arg5: memref<3x96x64xf32, #tpu.memory_space<vmem>>, %arg6: memref<1x16x16x64xf32, #tpu.memory_space<vmem>>, %arg7: memref<1x2x64xf32, #tpu.memory_space<vmem>>) attributes {dimension_semantics = [#tpu.dimension_semantics<parallel>, #tpu.dimension_semantics<arbitrary>], iteration_bounds = array<i64: 2, 1>, scalar_prefetch = 0 : i64, scratch_operands = 0 : i64, tpu.core_type = #tpu.core_type<tc>, window_params = [{transform_indices = @transform_0, window_bounds = array<i64: 1, 16, 16, 32>}, {pipeline_mode = #tpu.pipeline_mode<synchronous>, transform_indices = @transform_1, window_bounds = array<i64: 1, 1, 32>}, {pipeline_mode = #tpu.pipeline_mode<synchronous>, transform_indices = @transform_2, window_bounds = array<i64: 1, 1, 32>}, {pipeline_mode = #tpu.pipeline_mode<synchronous>, transform_indices = @transform_3, window_bounds = array<i64: 3, 96, 64>}, {transform_indices = @transform_4, window_bounds = array<i64: 1, 16, 16, 64>}, {transform_indices = @transform_5, window_bounds = array<i64: 1, 2, 64>}]} {
    %c16_i32 = arith.constant 16 : i32
    %0 = arith.muli %arg1, %c16_i32 : i32
    %c0 = arith.constant 0 : index
    %c0_0 = arith.constant 0 : index
    %c0_1 = arith.constant 0 : index
    %1 = vector.load %arg3[%c0, %c0_0, %c0_1] : memref<1x1x32xf32, #tpu.memory_space<vmem>>, vector<1x1x32xf32>
    %c0_2 = arith.constant 0 : index
    %c0_3 = arith.constant 0 : index
    %c0_4 = arith.constant 0 : index
    %2 = vector.load %arg4[%c0_2, %c0_3, %c0_4] : memref<1x1x32xf32, #tpu.memory_space<vmem>>, vector<1x1x32xf32>
    %c0_5 = arith.constant 0 : index
    %3 = arith.index_cast %0 : i32 to index
    %c0_6 = arith.constant 0 : index
    %c0_7 = arith.constant 0 : index
    %4 = vector.load %arg2[%c0_5, %3, %c0_6, %c0_7] : memref<1x16x16x32xf32, #tpu.memory_space<vmem>>, vector<1x16x16x32xf32>
    %5 = vector.shape_cast %4 : vector<1x16x16x32xf32> to vector<16x16x32xf32>
    %6 = vector.broadcast %1 : vector<1x1x32xf32> to vector<16x16x32xf32>
    %7 = arith.mulf %5, %6 : vector<16x16x32xf32>
    %8 = vector.broadcast %2 : vector<1x1x32xf32> to vector<16x16x32xf32>
    %9 = arith.addf %7, %8 : vector<16x16x32xf32>
    %cst = arith.constant 0.000000e+00 : f32
    %10 = vector.broadcast %cst : f32 to vector<16x16x32xf32>
    %11 = arith.maximumf %9, %10 : vector<16x16x32xf32>
    %cst_8 = arith.constant 0.000000e+00 : f32
    %12 = vector.broadcast %cst_8 : f32 to vector<1x16x32xf32>
    %cst_9 = arith.constant 0.000000e+00 : f32
    %13 = vector.broadcast %cst_9 : f32 to vector<1x16x32xf32>
    %14 = tpu.concatenate %12, %11, %13 in 0 : vector<1x16x32xf32>, vector<16x16x32xf32>, vector<1x16x32xf32> -> vector<18x16x32xf32>
    %cst_10 = arith.constant 0.000000e+00 : f32
    %15 = vector.broadcast %cst_10 : f32 to vector<18x1x32xf32>
    %16 = tpu.concatenate %15, %14, %15 in 1 : vector<18x1x32xf32>, vector<18x16x32xf32>, vector<18x1x32xf32> -> vector<18x18x32xf32>
    %cst_11 = arith.constant 0.000000e+00 : f32
    %17 = vector.broadcast %cst_11 : f32 to vector<256x64xf32>
    %18 = vector.extract_strided_slice %16 {offsets = [0, 0, 0], sizes = [16, 16, 32], strides = [1, 1, 1]} : vector<18x18x32xf32> to vector<16x16x32xf32>
    %19 = vector.shape_cast %18 : vector<16x16x32xf32> to vector<256x32xf32>
    %20 = vector.extract_strided_slice %16 {offsets = [0, 1, 0], sizes = [16, 16, 32], strides = [1, 1, 1]} : vector<18x18x32xf32> to vector<16x16x32xf32>
    %21 = vector.shape_cast %20 : vector<16x16x32xf32> to vector<256x32xf32>
    %22 = vector.extract_strided_slice %16 {offsets = [0, 2, 0], sizes = [16, 16, 32], strides = [1, 1, 1]} : vector<18x18x32xf32> to vector<16x16x32xf32>
    %23 = vector.shape_cast %22 : vector<16x16x32xf32> to vector<256x32xf32>
    %24 = tpu.concatenate %19, %21, %23 in 1 : vector<256x32xf32>, vector<256x32xf32>, vector<256x32xf32> -> vector<256x96xf32>
    %c0_12 = arith.constant 0 : index
    %c0_13 = arith.constant 0 : index
    %c0_14 = arith.constant 0 : index
    %25 = vector.load %arg5[%c0_12, %c0_13, %c0_14] : memref<3x96x64xf32, #tpu.memory_space<vmem>>, vector<1x96x64xf32>
    %26 = vector.shape_cast %25 : vector<1x96x64xf32> to vector<96x64xf32>
    %cst_15 = arith.constant dense<0.000000e+00> : vector<256x64xf32>
    %27 = tpu.matmul %24, %26, %cst_15 {dimension_numbers = #tpu.dot_dimension_numbers<[1], [0], [0], [1], [0, 0, 1, 1], [], []>} : vector<256x96xf32>, vector<96x64xf32>, vector<256x64xf32> -> vector<256x64xf32>
    %28 = arith.addf %17, %27 : vector<256x64xf32>
    %29 = vector.extract_strided_slice %16 {offsets = [1, 0, 0], sizes = [16, 16, 32], strides = [1, 1, 1]} : vector<18x18x32xf32> to vector<16x16x32xf32>
    %30 = vector.shape_cast %29 : vector<16x16x32xf32> to vector<256x32xf32>
    %31 = vector.extract_strided_slice %16 {offsets = [1, 1, 0], sizes = [16, 16, 32], strides = [1, 1, 1]} : vector<18x18x32xf32> to vector<16x16x32xf32>
    %32 = vector.shape_cast %31 : vector<16x16x32xf32> to vector<256x32xf32>
    %33 = vector.extract_strided_slice %16 {offsets = [1, 2, 0], sizes = [16, 16, 32], strides = [1, 1, 1]} : vector<18x18x32xf32> to vector<16x16x32xf32>
    %34 = vector.shape_cast %33 : vector<16x16x32xf32> to vector<256x32xf32>
    %35 = tpu.concatenate %30, %32, %34 in 1 : vector<256x32xf32>, vector<256x32xf32>, vector<256x32xf32> -> vector<256x96xf32>
    %c1 = arith.constant 1 : index
    %c0_16 = arith.constant 0 : index
    %c0_17 = arith.constant 0 : index
    %36 = vector.load %arg5[%c1, %c0_16, %c0_17] : memref<3x96x64xf32, #tpu.memory_space<vmem>>, vector<1x96x64xf32>
    %37 = vector.shape_cast %36 : vector<1x96x64xf32> to vector<96x64xf32>
    %cst_18 = arith.constant dense<0.000000e+00> : vector<256x64xf32>
    %38 = tpu.matmul %35, %37, %cst_18 {dimension_numbers = #tpu.dot_dimension_numbers<[1], [0], [0], [1], [0, 0, 1, 1], [], []>} : vector<256x96xf32>, vector<96x64xf32>, vector<256x64xf32> -> vector<256x64xf32>
    %39 = arith.addf %28, %38 : vector<256x64xf32>
    %40 = vector.extract_strided_slice %16 {offsets = [2, 0, 0], sizes = [16, 16, 32], strides = [1, 1, 1]} : vector<18x18x32xf32> to vector<16x16x32xf32>
    %41 = vector.shape_cast %40 : vector<16x16x32xf32> to vector<256x32xf32>
    %42 = vector.extract_strided_slice %16 {offsets = [2, 1, 0], sizes = [16, 16, 32], strides = [1, 1, 1]} : vector<18x18x32xf32> to vector<16x16x32xf32>
    %43 = vector.shape_cast %42 : vector<16x16x32xf32> to vector<256x32xf32>
    %44 = vector.extract_strided_slice %16 {offsets = [2, 2, 0], sizes = [16, 16, 32], strides = [1, 1, 1]} : vector<18x18x32xf32> to vector<16x16x32xf32>
    %45 = vector.shape_cast %44 : vector<16x16x32xf32> to vector<256x32xf32>
    %46 = tpu.concatenate %41, %43, %45 in 1 : vector<256x32xf32>, vector<256x32xf32>, vector<256x32xf32> -> vector<256x96xf32>
    %c2 = arith.constant 2 : index
    %c0_19 = arith.constant 0 : index
    %c0_20 = arith.constant 0 : index
    %47 = vector.load %arg5[%c2, %c0_19, %c0_20] : memref<3x96x64xf32, #tpu.memory_space<vmem>>, vector<1x96x64xf32>
    %48 = vector.shape_cast %47 : vector<1x96x64xf32> to vector<96x64xf32>
    %cst_21 = arith.constant dense<0.000000e+00> : vector<256x64xf32>
    %49 = tpu.matmul %46, %48, %cst_21 {dimension_numbers = #tpu.dot_dimension_numbers<[1], [0], [0], [1], [0, 0, 1, 1], [], []>} : vector<256x96xf32>, vector<96x64xf32>, vector<256x64xf32> -> vector<256x64xf32>
    %50 = arith.addf %39, %49 : vector<256x64xf32>
    %51 = vector.shape_cast %50 : vector<256x64xf32> to vector<1x16x16x64xf32>
    %c0_22 = arith.constant 0 : index
    %c0_23 = arith.constant 0 : index
    %c0_24 = arith.constant 0 : index
    %c0_25 = arith.constant 0 : index
    %52 = vector.load %arg6[%c0_22, %c0_23, %c0_24, %c0_25] : memref<1x16x16x64xf32, #tpu.memory_space<vmem>>, vector<1x16x16x64xf32>
    tpu.vector_store %arg6[%c0_22, %c0_23, %c0_24, %c0_25], %51 {strides = array<i32>} : memref<1x16x16x64xf32, #tpu.memory_space<vmem>>, vector<1x16x16x64xf32>,
    %c0_i32 = arith.constant 0 : i32
    %53 = arith.cmpi eq, %arg1, %c0_i32 : i32
    %54 = arith.extui %53 : i1 to i32
    %c0_i32_26 = arith.constant 0 : i32
    %55 = arith.cmpi ne, %54, %c0_i32_26 : i32
    scf.if %55 {
      %cst_35 = arith.constant 0.000000e+00 : f32
      %66 = vector.broadcast %cst_35 : f32 to vector<1x2x64xf32>
      %c0_36 = arith.constant 0 : index
      %c0_37 = arith.constant 0 : index
      %c0_38 = arith.constant 0 : index
      %67 = vector.load %arg7[%c0_36, %c0_37, %c0_38] : memref<1x2x64xf32, #tpu.memory_space<vmem>>, vector<1x2x64xf32>
      tpu.vector_store %arg7[%c0_36, %c0_37, %c0_38], %66 {strides = array<i32>} : memref<1x2x64xf32, #tpu.memory_space<vmem>>, vector<1x2x64xf32>,
    } else {
    }
    %cst_27 = arith.constant dense<0.000000e+00> : vector<64xf32>
    %56 = vector.multi_reduction <add>, %50, %cst_27 [0] : vector<256x64xf32> to vector<64xf32>
    %57 = vector.shape_cast %56 : vector<64xf32> to vector<1x64xf32>
    %58 = arith.mulf %50, %50 : vector<256x64xf32>
    %cst_28 = arith.constant dense<0.000000e+00> : vector<64xf32>
    %59 = vector.multi_reduction <add>, %58, %cst_28 [0] : vector<256x64xf32> to vector<64xf32>
    %60 = vector.shape_cast %59 : vector<64xf32> to vector<1x64xf32>
    %c0_29 = arith.constant 0 : index
    %c0_30 = arith.constant 0 : index
    %c0_31 = arith.constant 0 : index
    %61 = vector.load %arg7[%c0_29, %c0_30, %c0_31] : memref<1x2x64xf32, #tpu.memory_space<vmem>>, vector<1x2x64xf32>
    %62 = tpu.concatenate %57, %60 in 0 : vector<1x64xf32>, vector<1x64xf32> -> vector<2x64xf32>
    %63 = vector.shape_cast %62 : vector<2x64xf32> to vector<1x2x64xf32>
    %64 = arith.addf %61, %63 : vector<1x2x64xf32>
    %c0_32 = arith.constant 0 : index
    %c0_33 = arith.constant 0 : index
    %c0_34 = arith.constant 0 : index
    %65 = vector.load %arg7[%c0_32, %c0_33, %c0_34] : memref<1x2x64xf32, #tpu.memory_space<vmem>>, vector<1x2x64xf32>
    tpu.vector_store %arg7[%c0_32, %c0_33, %c0_34], %64 {strides = array<i32>} : memref<1x2x64xf32, #tpu.memory_space<vmem>>, vector<1x2x64xf32>,
    return
  }
  func.func @transform_0(%arg0: i32, %arg1: i32) -> (i32, i32, i32, i32) {
    %c0_i32 = arith.constant 0 : i32
    %c0_i32_0 = arith.constant 0 : i32
    %c0_i32_1 = arith.constant 0 : i32
    %c0_i32_2 = arith.constant 0 : i32
    return %arg0, %c0_i32, %c0_i32_0, %c0_i32_1 : i32, i32, i32, i32
  }
  func.func @transform_1(%arg0: i32, %arg1: i32) -> (i32, i32, i32) {
    %c0_i32 = arith.constant 0 : i32
    %c0_i32_0 = arith.constant 0 : i32
    %c0_i32_1 = arith.constant 0 : i32
    %c0_i32_2 = arith.constant 0 : i32
    return %c0_i32, %c0_i32_0, %c0_i32_1 : i32, i32, i32
  }
  func.func @transform_2(%arg0: i32, %arg1: i32) -> (i32, i32, i32) {
    %c0_i32 = arith.constant 0 : i32
    %c0_i32_0 = arith.constant 0 : i32
    %c0_i32_1 = arith.constant 0 : i32
    %c0_i32_2 = arith.constant 0 : i32
    return %c0_i32, %c0_i32_0, %c0_i32_1 : i32, i32, i32
  }
  func.func @transform_3(%arg0: i32, %arg1: i32) -> (i32, i32, i32) {
    %c0_i32 = arith.constant 0 : i32
    %c0_i32_0 = arith.constant 0 : i32
    %c0_i32_1 = arith.constant 0 : i32
    %c0_i32_2 = arith.constant 0 : i32
    return %c0_i32, %c0_i32_0, %c0_i32_1 : i32, i32, i32
  }
  func.func @transform_4(%arg0: i32, %arg1: i32) -> (i32, i32, i32, i32) {
    %c0_i32 = arith.constant 0 : i32
    %c0_i32_0 = arith.constant 0 : i32
    %c0_i32_1 = arith.constant 0 : i32
    return %arg0, %arg1, %c0_i32, %c0_i32_0 : i32, i32, i32, i32
  }
  func.func @transform_5(%arg0: i32, %arg1: i32) -> (i32, i32, i32) {
    %c0_i32 = arith.constant 0 : i32
    %c0_i32_0 = arith.constant 0 : i32
    %c0_i32_1 = arith.constant 0 : i32
    return %arg0, %c0_i32, %c0_i32_0 : i32, i32, i32
  }
}

module attributes {stable_mosaic.version = 11 : i64} {
  func.func @kernel(%arg0: i32, %arg1: i32, %arg2: memref<1x16x16x64xf32, #tpu.memory_space<vmem>>, %arg3: memref<1x1x64xf32, #tpu.memory_space<vmem>>, %arg4: memref<1x1x64xf32, #tpu.memory_space<vmem>>, %arg5: memref<3x192x64xf32, #tpu.memory_space<vmem>>, %arg6: memref<1x8x16x64xf32, #tpu.memory_space<vmem>>, %arg7: memref<1x2x64xf32, #tpu.memory_space<vmem>>) attributes {dimension_semantics = [#tpu.dimension_semantics<parallel>, #tpu.dimension_semantics<arbitrary>], iteration_bounds = array<i64: 2, 2>, scalar_prefetch = 0 : i64, scratch_operands = 0 : i64, tpu.core_type = #tpu.core_type<tc>, window_params = [{transform_indices = @transform_0, window_bounds = array<i64: 1, 16, 16, 64>}, {pipeline_mode = #tpu.pipeline_mode<synchronous>, transform_indices = @transform_1, window_bounds = array<i64: 1, 1, 64>}, {pipeline_mode = #tpu.pipeline_mode<synchronous>, transform_indices = @transform_2, window_bounds = array<i64: 1, 1, 64>}, {pipeline_mode = #tpu.pipeline_mode<synchronous>, transform_indices = @transform_3, window_bounds = array<i64: 3, 192, 64>}, {transform_indices = @transform_4, window_bounds = array<i64: 1, 8, 16, 64>}, {transform_indices = @transform_5, window_bounds = array<i64: 1, 2, 64>}]} {
    %c8_i32 = arith.constant 8 : i32
    %0 = arith.muli %arg1, %c8_i32 : i32
    %c0 = arith.constant 0 : index
    %c0_0 = arith.constant 0 : index
    %c0_1 = arith.constant 0 : index
    %1 = vector.load %arg3[%c0, %c0_0, %c0_1] : memref<1x1x64xf32, #tpu.memory_space<vmem>>, vector<1x1x64xf32>
    %c0_2 = arith.constant 0 : index
    %c0_3 = arith.constant 0 : index
    %c0_4 = arith.constant 0 : index
    %2 = vector.load %arg4[%c0_2, %c0_3, %c0_4] : memref<1x1x64xf32, #tpu.memory_space<vmem>>, vector<1x1x64xf32>
    %c0_5 = arith.constant 0 : index
    %3 = arith.index_cast %0 : i32 to index
    %c0_6 = arith.constant 0 : index
    %c0_7 = arith.constant 0 : index
    %4 = vector.load %arg2[%c0_5, %3, %c0_6, %c0_7] : memref<1x16x16x64xf32, #tpu.memory_space<vmem>>, vector<1x8x16x64xf32>
    %5 = vector.shape_cast %4 : vector<1x8x16x64xf32> to vector<8x16x64xf32>
    %6 = vector.broadcast %1 : vector<1x1x64xf32> to vector<8x16x64xf32>
    %7 = arith.mulf %5, %6 : vector<8x16x64xf32>
    %8 = vector.broadcast %2 : vector<1x1x64xf32> to vector<8x16x64xf32>
    %9 = arith.addf %7, %8 : vector<8x16x64xf32>
    %cst = arith.constant 0.000000e+00 : f32
    %10 = vector.broadcast %cst : f32 to vector<8x16x64xf32>
    %11 = arith.maximumf %9, %10 : vector<8x16x64xf32>
    %c1_i32 = arith.constant 1 : i32
    %12 = arith.subi %0, %c1_i32 : i32
    %c0_i32 = arith.constant 0 : i32
    %13 = arith.maxsi %12, %c0_i32 : i32
    %c8_i32_8 = arith.constant 8 : i32
    %14 = arith.addi %0, %c8_i32_8 : i32
    %c15_i32 = arith.constant 15 : i32
    %15 = arith.minsi %14, %c15_i32 : i32
    %c0_9 = arith.constant 0 : index
    %16 = arith.index_cast %13 : i32 to index
    %c0_10 = arith.constant 0 : index
    %c0_11 = arith.constant 0 : index
    %17 = vector.load %arg2[%c0_9, %16, %c0_10, %c0_11] : memref<1x16x16x64xf32, #tpu.memory_space<vmem>>, vector<1x1x16x64xf32>
    %18 = vector.shape_cast %17 : vector<1x1x16x64xf32> to vector<1x16x64xf32>
    %19 = vector.broadcast %1 : vector<1x1x64xf32> to vector<1x16x64xf32>
    %20 = arith.mulf %18, %19 : vector<1x16x64xf32>
    %21 = vector.broadcast %2 : vector<1x1x64xf32> to vector<1x16x64xf32>
    %22 = arith.addf %20, %21 : vector<1x16x64xf32>
    %cst_12 = arith.constant 0.000000e+00 : f32
    %23 = vector.broadcast %cst_12 : f32 to vector<1x16x64xf32>
    %24 = arith.maximumf %22, %23 : vector<1x16x64xf32>
    %c0_13 = arith.constant 0 : index
    %25 = arith.index_cast %15 : i32 to index
    %c0_14 = arith.constant 0 : index
    %c0_15 = arith.constant 0 : index
    %26 = vector.load %arg2[%c0_13, %25, %c0_14, %c0_15] : memref<1x16x16x64xf32, #tpu.memory_space<vmem>>, vector<1x1x16x64xf32>
    %27 = vector.shape_cast %26 : vector<1x1x16x64xf32> to vector<1x16x64xf32>
    %28 = vector.broadcast %1 : vector<1x1x64xf32> to vector<1x16x64xf32>
    %29 = arith.mulf %27, %28 : vector<1x16x64xf32>
    %30 = vector.broadcast %2 : vector<1x1x64xf32> to vector<1x16x64xf32>
    %31 = arith.addf %29, %30 : vector<1x16x64xf32>
    %cst_16 = arith.constant 0.000000e+00 : f32
    %32 = vector.broadcast %cst_16 : f32 to vector<1x16x64xf32>
    %33 = arith.maximumf %31, %32 : vector<1x16x64xf32>
    %c0_i32_17 = arith.constant 0 : i32
    %34 = arith.cmpi eq, %arg1, %c0_i32_17 : i32
    %cst_18 = arith.constant 0.000000e+00 : f32
    %35 = vector.broadcast %cst_18 : f32 to vector<1x16x64xf32>
    %36 = arith.select %34, %35, %24 : vector<1x16x64xf32>
    %c1_i32_19 = arith.constant 1 : i32
    %37 = arith.cmpi eq, %arg1, %c1_i32_19 : i32
    %cst_20 = arith.constant 0.000000e+00 : f32
    %38 = vector.broadcast %cst_20 : f32 to vector<1x16x64xf32>
    %39 = arith.select %37, %38, %33 : vector<1x16x64xf32>
    %40 = tpu.concatenate %36, %11, %39 in 0 : vector<1x16x64xf32>, vector<8x16x64xf32>, vector<1x16x64xf32> -> vector<10x16x64xf32>
    %cst_21 = arith.constant 0.000000e+00 : f32
    %41 = vector.broadcast %cst_21 : f32 to vector<10x1x64xf32>
    %42 = tpu.concatenate %41, %40, %41 in 1 : vector<10x1x64xf32>, vector<10x16x64xf32>, vector<10x1x64xf32> -> vector<10x18x64xf32>
    %cst_22 = arith.constant 0.000000e+00 : f32
    %43 = vector.broadcast %cst_22 : f32 to vector<128x64xf32>
    %44 = vector.extract_strided_slice %42 {offsets = [0, 0, 0], sizes = [8, 16, 64], strides = [1, 1, 1]} : vector<10x18x64xf32> to vector<8x16x64xf32>
    %45 = vector.shape_cast %44 : vector<8x16x64xf32> to vector<128x64xf32>
    %46 = vector.extract_strided_slice %42 {offsets = [0, 1, 0], sizes = [8, 16, 64], strides = [1, 1, 1]} : vector<10x18x64xf32> to vector<8x16x64xf32>
    %47 = vector.shape_cast %46 : vector<8x16x64xf32> to vector<128x64xf32>
    %48 = vector.extract_strided_slice %42 {offsets = [0, 2, 0], sizes = [8, 16, 64], strides = [1, 1, 1]} : vector<10x18x64xf32> to vector<8x16x64xf32>
    %49 = vector.shape_cast %48 : vector<8x16x64xf32> to vector<128x64xf32>
    %50 = tpu.concatenate %45, %47, %49 in 1 : vector<128x64xf32>, vector<128x64xf32>, vector<128x64xf32> -> vector<128x192xf32>
    %c0_23 = arith.constant 0 : index
    %c0_24 = arith.constant 0 : index
    %c0_25 = arith.constant 0 : index
    %51 = vector.load %arg5[%c0_23, %c0_24, %c0_25] : memref<3x192x64xf32, #tpu.memory_space<vmem>>, vector<1x192x64xf32>
    %52 = vector.shape_cast %51 : vector<1x192x64xf32> to vector<192x64xf32>
    %cst_26 = arith.constant dense<0.000000e+00> : vector<128x64xf32>
    %53 = tpu.matmul %50, %52, %cst_26 {dimension_numbers = #tpu.dot_dimension_numbers<[1], [0], [0], [1], [0, 0, 1, 1], [], []>} : vector<128x192xf32>, vector<192x64xf32>, vector<128x64xf32> -> vector<128x64xf32>
    %54 = arith.addf %43, %53 : vector<128x64xf32>
    %55 = vector.extract_strided_slice %42 {offsets = [1, 0, 0], sizes = [8, 16, 64], strides = [1, 1, 1]} : vector<10x18x64xf32> to vector<8x16x64xf32>
    %56 = vector.shape_cast %55 : vector<8x16x64xf32> to vector<128x64xf32>
    %57 = vector.extract_strided_slice %42 {offsets = [1, 1, 0], sizes = [8, 16, 64], strides = [1, 1, 1]} : vector<10x18x64xf32> to vector<8x16x64xf32>
    %58 = vector.shape_cast %57 : vector<8x16x64xf32> to vector<128x64xf32>
    %59 = vector.extract_strided_slice %42 {offsets = [1, 2, 0], sizes = [8, 16, 64], strides = [1, 1, 1]} : vector<10x18x64xf32> to vector<8x16x64xf32>
    %60 = vector.shape_cast %59 : vector<8x16x64xf32> to vector<128x64xf32>
    %61 = tpu.concatenate %56, %58, %60 in 1 : vector<128x64xf32>, vector<128x64xf32>, vector<128x64xf32> -> vector<128x192xf32>
    %c1 = arith.constant 1 : index
    %c0_27 = arith.constant 0 : index
    %c0_28 = arith.constant 0 : index
    %62 = vector.load %arg5[%c1, %c0_27, %c0_28] : memref<3x192x64xf32, #tpu.memory_space<vmem>>, vector<1x192x64xf32>
    %63 = vector.shape_cast %62 : vector<1x192x64xf32> to vector<192x64xf32>
    %cst_29 = arith.constant dense<0.000000e+00> : vector<128x64xf32>
    %64 = tpu.matmul %61, %63, %cst_29 {dimension_numbers = #tpu.dot_dimension_numbers<[1], [0], [0], [1], [0, 0, 1, 1], [], []>} : vector<128x192xf32>, vector<192x64xf32>, vector<128x64xf32> -> vector<128x64xf32>
    %65 = arith.addf %54, %64 : vector<128x64xf32>
    %66 = vector.extract_strided_slice %42 {offsets = [2, 0, 0], sizes = [8, 16, 64], strides = [1, 1, 1]} : vector<10x18x64xf32> to vector<8x16x64xf32>
    %67 = vector.shape_cast %66 : vector<8x16x64xf32> to vector<128x64xf32>
    %68 = vector.extract_strided_slice %42 {offsets = [2, 1, 0], sizes = [8, 16, 64], strides = [1, 1, 1]} : vector<10x18x64xf32> to vector<8x16x64xf32>
    %69 = vector.shape_cast %68 : vector<8x16x64xf32> to vector<128x64xf32>
    %70 = vector.extract_strided_slice %42 {offsets = [2, 2, 0], sizes = [8, 16, 64], strides = [1, 1, 1]} : vector<10x18x64xf32> to vector<8x16x64xf32>
    %71 = vector.shape_cast %70 : vector<8x16x64xf32> to vector<128x64xf32>
    %72 = tpu.concatenate %67, %69, %71 in 1 : vector<128x64xf32>, vector<128x64xf32>, vector<128x64xf32> -> vector<128x192xf32>
    %c2 = arith.constant 2 : index
    %c0_30 = arith.constant 0 : index
    %c0_31 = arith.constant 0 : index
    %73 = vector.load %arg5[%c2, %c0_30, %c0_31] : memref<3x192x64xf32, #tpu.memory_space<vmem>>, vector<1x192x64xf32>
    %74 = vector.shape_cast %73 : vector<1x192x64xf32> to vector<192x64xf32>
    %cst_32 = arith.constant dense<0.000000e+00> : vector<128x64xf32>
    %75 = tpu.matmul %72, %74, %cst_32 {dimension_numbers = #tpu.dot_dimension_numbers<[1], [0], [0], [1], [0, 0, 1, 1], [], []>} : vector<128x192xf32>, vector<192x64xf32>, vector<128x64xf32> -> vector<128x64xf32>
    %76 = arith.addf %65, %75 : vector<128x64xf32>
    %77 = vector.shape_cast %76 : vector<128x64xf32> to vector<1x8x16x64xf32>
    %c0_33 = arith.constant 0 : index
    %c0_34 = arith.constant 0 : index
    %c0_35 = arith.constant 0 : index
    %c0_36 = arith.constant 0 : index
    %78 = vector.load %arg6[%c0_33, %c0_34, %c0_35, %c0_36] : memref<1x8x16x64xf32, #tpu.memory_space<vmem>>, vector<1x8x16x64xf32>
    tpu.vector_store %arg6[%c0_33, %c0_34, %c0_35, %c0_36], %77 {strides = array<i32>} : memref<1x8x16x64xf32, #tpu.memory_space<vmem>>, vector<1x8x16x64xf32>,
    %c0_i32_37 = arith.constant 0 : i32
    %79 = arith.cmpi eq, %arg1, %c0_i32_37 : i32
    %80 = arith.extui %79 : i1 to i32
    %c0_i32_38 = arith.constant 0 : i32
    %81 = arith.cmpi ne, %80, %c0_i32_38 : i32
    scf.if %81 {
      %cst_47 = arith.constant 0.000000e+00 : f32
      %92 = vector.broadcast %cst_47 : f32 to vector<1x2x64xf32>
      %c0_48 = arith.constant 0 : index
      %c0_49 = arith.constant 0 : index
      %c0_50 = arith.constant 0 : index
      %93 = vector.load %arg7[%c0_48, %c0_49, %c0_50] : memref<1x2x64xf32, #tpu.memory_space<vmem>>, vector<1x2x64xf32>
      tpu.vector_store %arg7[%c0_48, %c0_49, %c0_50], %92 {strides = array<i32>} : memref<1x2x64xf32, #tpu.memory_space<vmem>>, vector<1x2x64xf32>,
    } else {
    }
    %cst_39 = arith.constant dense<0.000000e+00> : vector<64xf32>
    %82 = vector.multi_reduction <add>, %76, %cst_39 [0] : vector<128x64xf32> to vector<64xf32>
    %83 = vector.shape_cast %82 : vector<64xf32> to vector<1x64xf32>
    %84 = arith.mulf %76, %76 : vector<128x64xf32>
    %cst_40 = arith.constant dense<0.000000e+00> : vector<64xf32>
    %85 = vector.multi_reduction <add>, %84, %cst_40 [0] : vector<128x64xf32> to vector<64xf32>
    %86 = vector.shape_cast %85 : vector<64xf32> to vector<1x64xf32>
    %c0_41 = arith.constant 0 : index
    %c0_42 = arith.constant 0 : index
    %c0_43 = arith.constant 0 : index
    %87 = vector.load %arg7[%c0_41, %c0_42, %c0_43] : memref<1x2x64xf32, #tpu.memory_space<vmem>>, vector<1x2x64xf32>
    %88 = tpu.concatenate %83, %86 in 0 : vector<1x64xf32>, vector<1x64xf32> -> vector<2x64xf32>
    %89 = vector.shape_cast %88 : vector<2x64xf32> to vector<1x2x64xf32>
    %90 = arith.addf %87, %89 : vector<1x2x64xf32>
    %c0_44 = arith.constant 0 : index
    %c0_45 = arith.constant 0 : index
    %c0_46 = arith.constant 0 : index
    %91 = vector.load %arg7[%c0_44, %c0_45, %c0_46] : memref<1x2x64xf32, #tpu.memory_space<vmem>>, vector<1x2x64xf32>
    tpu.vector_store %arg7[%c0_44, %c0_45, %c0_46], %90 {strides = array<i32>} : memref<1x2x64xf32, #tpu.memory_space<vmem>>, vector<1x2x64xf32>,
    return
  }
  func.func @transform_0(%arg0: i32, %arg1: i32) -> (i32, i32, i32, i32) {
    %c0_i32 = arith.constant 0 : i32
    %c0_i32_0 = arith.constant 0 : i32
    %c0_i32_1 = arith.constant 0 : i32
    %c0_i32_2 = arith.constant 0 : i32
    return %arg0, %c0_i32, %c0_i32_0, %c0_i32_1 : i32, i32, i32, i32
  }
  func.func @transform_1(%arg0: i32, %arg1: i32) -> (i32, i32, i32) {
    %c0_i32 = arith.constant 0 : i32
    %c0_i32_0 = arith.constant 0 : i32
    %c0_i32_1 = arith.constant 0 : i32
    %c0_i32_2 = arith.constant 0 : i32
    return %c0_i32, %c0_i32_0, %c0_i32_1 : i32, i32, i32
  }
  func.func @transform_2(%arg0: i32, %arg1: i32) -> (i32, i32, i32) {
    %c0_i32 = arith.constant 0 : i32
    %c0_i32_0 = arith.constant 0 : i32
    %c0_i32_1 = arith.constant 0 : i32
    %c0_i32_2 = arith.constant 0 : i32
    return %c0_i32, %c0_i32_0, %c0_i32_1 : i32, i32, i32
  }
  func.func @transform_3(%arg0: i32, %arg1: i32) -> (i32, i32, i32) {
    %c0_i32 = arith.constant 0 : i32
    %c0_i32_0 = arith.constant 0 : i32
    %c0_i32_1 = arith.constant 0 : i32
    %c0_i32_2 = arith.constant 0 : i32
    return %c0_i32, %c0_i32_0, %c0_i32_1 : i32, i32, i32
  }
  func.func @transform_4(%arg0: i32, %arg1: i32) -> (i32, i32, i32, i32) {
    %c0_i32 = arith.constant 0 : i32
    %c0_i32_0 = arith.constant 0 : i32
    %c0_i32_1 = arith.constant 0 : i32
    return %arg0, %arg1, %c0_i32, %c0_i32_0 : i32, i32, i32, i32
  }
  func.func @transform_5(%arg0: i32, %arg1: i32) -> (i32, i32, i32) {
    %c0_i32 = arith.constant 0 : i32
    %c0_i32_0 = arith.constant 0 : i32
    %c0_i32_1 = arith.constant 0 : i32
    return %arg0, %c0_i32, %c0_i32_0 : i32, i32, i32
  }
}

</mosaic_0001>

<bundles_post_ra>
// kernel: tiny_ssd_forward.5
= control target key start
LH: loop header
LB: loop body
LE: loop exit
PB: predicated region body
PF: predicated region fallthrough
CT: control target
= control target key end

     0   :  { %s3174_s18 = smov 0   ;;  %s3176_s19 = smov 0   ;;  %s4734_s0 = inlined_call_operand.vmem [shape: f32[2,64,64,16], index: 0, kind: input, shape index: {}]   ;;  %s4735_s1 = inlined_call_operand.vmem [shape: f32[1,1,16], index: 1, kind: input, shape index: {}]   ;;  %s4736_s2 = inlined_call_operand.vmem [shape: f32[1,1,16], index: 2, kind: input, shape index: {}]   ;;  %s4737_s3 = inlined_call_operand.vmem [shape: f32[3,48,16], index: 3, kind: input, shape index: {}]   ;;  %s4738_s4 = inlined_call_operand.vmem [shape: f32[2,64,64,16], index: 4, kind: output, shape index: {0}]   ;;  %s4739_s5 = inlined_call_operand.vmem [shape: f32[2,2,16], index: 5, kind: output, shape index: {1}]  }
   0x1   :  { %s3178_s20 = smov 0   ;;  %s3180_s21 = smov 0  }
   0x2   :  { %s3182_s22 = smov 0  }
   0x3 LB: > { %s25_s23 = sadd.s32 1, %s3131_s20  ;;  %s28_s24 = sadd.s32 1, %s3135_s21  ;;  %s3139_s22 = sphi %s3182_s22, %s16_s22   ;;  %s3135_s21 = sphi %s3180_s21, %s4773_s21   ;;  %s3131_s20 = sphi %s3178_s20, %s4772_s20   ;;  %s3127_s19 = sphi %s3176_s19, %s4771_s19   ;;  %s3123_s18 = sphi %s3174_s18, %s4770_s18  }
   0x4   : > { %p26_p0 = scmp.ge.s32.totalorder %s25_s23, 16  ;;  %p2528_p1 = scmp.ge.s32.totalorder %s3139_s22, 1 }
   0x5   : > { %p204_p2 = scmp.lt.s32.totalorder %s3139_s22, 33 }
   0x6   : > { %s4775_s23 = smov (%p26_p0, %s25_s23), 0  ;;  %s4777_s24 = smov (!%p26_p0, %s28_s24), %s3135_s21 }
   0x7   : > { %p205_p3 = pnand %p2528_p1, %p204_p2  ;;  %p30_p4 = scmp.ge.s32.totalorder %s4777_s24, 2 }
   0x9   : > { %s4779_s24 = smov (%p30_p4, %s4777_s24), 0  ;;  %208 = sbr.rel (%p205_p3) target bundleno = 643 (0x283), region = 36 }
  0x10   : > { %p241_p5 = scmp.lt.s32.totalorder %s3127_s19, 1  ;;  %s2655_s25 = sshll.u32 %s3123_s18, 8  ;;  %v3228_v0 = vld [vmem:[%s4735_s1] ss:$0 sm:$0xff]  ;;  %v2543_v1 = vld [vmem:[%s4737_s3 + $0x30] sm:$0xff]  ;;  %v2544_v2 = vld [vmem:[%s4737_s3 + $0x38] sm:$0xff] }
  0x11   : > { %s3210_s26 = sshll.u32 %s3123_s18, 2  ;;  %p480_p6 = scmp.eq.s32.totalorder %s3123_s18, 0  ;;  %v3239_v3 = vld [vmem:[%s4736_s2] ss:$0 sm:$0xff]  ;;  %v2950_v4 = vpack.c.bf16 %v2544_v2, %v2543_v1  ;;  %vm552_vm0 = vcmask 1040384   ;;  %vm717_vm1 = vcmask 1046528  }
  0x12   : > { %s4781_s19 = smov (!%p241_p5, %s3127_s19), 1  ;;  %vm786_vm2 = vcmask 1045504   ;;  %s3141_s7 = smov 16   ;;  %vm1047_vm4 = vcmask 130048   ;;  %vm1080_vm5 = vcmask 261120   ;;  %vm1226_vm6 = vcmask 392192  }
  0x13   : > { %s2654_s27 = sshll.u32 %s4781_s19, 12  ;;  %s2535_s28 = sshll.u32 %s4781_s19, 1  ;;  %2951 = vmatprep.subr.bf16.mxu1 %v2950_v4 }
  0x14   : > { %s3218_s6 = scalar_lea.vmem %s4734_s0, %s2654_s27  ;;  %s3223_s9 = scalar_lea.vmem %s4739_s5, %s2535_s28  ;;  %2953 = vmatpush3.bf16.msra.mxu1 %v2950_v4 }
  0x15   : > { %s3242_s27 = scalar_lea.vmem %s3218_s6, %s2655_s25  ;;  %s2540_s28 = sadd.s32 4294967295, %s3210_s26 }
  0x16   : > { %v266_v5 = vld [vmem:[%s3242_s27] sm:$0xff]  ;;  %v267_v6 = vld [vmem:[%s3242_s27 + $0x8] sm:$0xff]  ;;  %v268_v7 = vld [vmem:[%s3242_s27 + $0x10] sm:$0xff]  ;;  %p407_p7 = scmp.gt.s32.totalorder %s2540_s28, 0  ;;  %s3142_s8 = smov 32  }
  0x17   : > { %v304_v8 = vmul.f32 %v3228_v0, %v266_v5  ;;  %v305_v9 = vmul.f32 %v3228_v0, %v267_v6  ;;  %v306_v10 = vmul.f32 %v3228_v0, %v268_v7  ;;  %s3253_s25 = scalar_select %p480_p6, 1, 0  ;;  %v269_v11 = vld [vmem:[%s3242_s27 + $0x18] sm:$0xff]  ;;  %v270_v12 = vld [vmem:[%s3242_s27 + $0x20] sm:$0xff]  ;;  %v271_v60 = vld [vmem:[%s3242_s27 + $0x28] sm:$0xff] }
  0x18   : > { %s4783_s28 = smov (!%p407_p7, %s2540_s28), 0  ;;  %v307_v13 = vmul.f32 %v3228_v0, %v269_v11  ;;  %v308_v14 = vmul.f32 %v3228_v0, %v270_v12  ;;  %s409_s10 = sadd.s32 4, %s3210_s26 }
  0x19   : > { %v342_v15 = vadd.f32 %v3239_v3, %v304_v8  ;;  %v343_v16 = vadd.f32 %v3239_v3, %v305_v9  ;;  %v344_v17 = vadd.f32 %v3239_v3, %v306_v10  ;;  %s2541_s29 = sshll.u32 %s4783_s28, 6  ;;  %v482_v23 = vstv %s3253_s25  ;;  %p3731_p8 = scmp.lt.s32.totalorder %s409_s10, 63 }
  0x1a   : > { %v345_v18 = vadd.f32 %v3239_v3, %v307_v13  ;;  %v346_v19 = vadd.f32 %v3239_v3, %v308_v14  ;;  %s3265_s30 = scalar_lea.vmem %s3218_s6, %s2541_s29  ;;  %vm3273_vm3 = vcmp.eq.s32.totalorder %v482_v23, 1  ;;  %v309_v9 = vmul.f32 %v3228_v0, %v271_v60  ;;  %v272_v14 = vld [vmem:[%s3242_s27 + $0x30] sm:$0xff]  ;;  %v273_v60 = vld [vmem:[%s3242_s27 + $0x38] sm:$0xff]  ;;  %p492_p9 = scmp.eq.s32.totalorder %s3123_s18, 15 }
  0x1b   : > { %v374_v20 = vmax.f32 %v342_v15, 0.0  ;;  %v375_v21 = vmax.f32 %v343_v16, 0.0  ;;  %v376_v22 = vmax.f32 %v344_v17, 0.0  ;;  %v414_v24 = vld [vmem:[%s3265_s30] sm:$0xff]  ;;  %v415_v25 = vld [vmem:[%s3265_s30 + $0x8] sm:$0xff]  ;;  %v416_v27 = vld [vmem:[%s3265_s30 + $0x10] sm:$0xff] }
  0x1c   : > { %v377_v26 = vmax.f32 %v345_v18, 0.0  ;;  %v422_v31 = vmul.f32 %v3228_v0, %v414_v24  ;;  %v423_v32 = vmul.f32 %v3228_v0, %v415_v25  ;;  %v424_v34 = vmul.f32 %v3228_v0, %v416_v27  ;;  %v417_v51 = vld [vmem:[%s3265_s30 + $0x18] sm:$0xff]  ;;  %v418_v52 = vld [vmem:[%s3265_s30 + $0x20] sm:$0xff]  ;;  %s4785_s10 = smov (!%p3731_p8, %s409_s10), 63  ;;  %p249_p10 = scmp.lt.s32.totalorder %s3210_s26, 63 }
  0x1d   : > { %v568_v28 = vrot.slane %v374_v20, 7  ;;  %v569_v29 = vrot.slane %v375_v21, 7  ;;  %v571_v30 = vrot.slane %v376_v22, 7  ;;  %v378_v35 = vmax.f32 %v346_v19, 0.0  ;;  %v419_v22 = vld [vmem:[%s3265_s30 + $0x28] sm:$0xff]  ;;  %s2542_s12 = sshll.u32 %s4785_s10, 6 }
  0x1e   : > { %v430_v39 = vadd.f32 %v3239_v3, %v422_v31  ;;  %v431_v45 = vadd.f32 %v3239_v3, %v423_v32  ;;  %v573_v47 = vrot.slane %v377_v26, 7  ;;  %v432_v50 = vadd.f32 %v3239_v3, %v424_v34  ;;  %s3790_s13 = scalar_lea.vmem %s3218_s6, %s2542_s12  ;;  %s4787_s26 = smov (!%p249_p10, %s3210_s26), 63 }
  0x1f   : > { %v3279_v36 = vsel %vm552_vm0, %v568_v28, %v569_v29  ;;  %v3282_v37 = vsel %vm552_vm0, %v569_v29, %v571_v30  ;;  %v3285_v38 = vsel %vm552_vm0, 0.0, %v568_v28  ;;  %v3305_v59 = vrot.slane %v378_v35, 7  ;;  %s3825_s14 = scalar_select %p492_p9, 1, 0 }
  0x20   : > { %v736_v40 = vrot.slane %v3279_v36, 1  ;;  %v738_v41 = vrot.slane %v3282_v37, 1  ;;  %v735_v42 = vrot.slane %v3285_v38, 1  ;;  %v804_v43 = vrot.slane %v3285_v38, 2  ;;  %p2651_p11 = scmp.ne.s32.totalorder %s3123_s18, 0 }
  0x21   : > { %v805_v44 = vrot.slane %v3279_v36, 2  ;;  %v438_v46 = vmax.f32 %v430_v39, 0.0  ;;  %v439_v53 = vmax.f32 %v431_v45, 0.0  ;;  %v807_v55 = vrot.slane %v3282_v37, 2 }
  0x22   : > { %v739_v48 = vsel %vm717_vm1, %v736_v40, %v738_v41  ;;  %v737_v49 = vsel %vm717_vm1, %v735_v42, %v736_v40  ;;  %v440_v58 = vmax.f32 %v432_v50, 0.0  ;;  %v3311_v62 = vsel %vm552_vm0, %v571_v30, %v573_v47  ;;  %v420_v30 = vld [vmem:[%s3265_s30 + $0x30] sm:$0xff] }
  0x23   : > { %873 = vrot.lane.b32.xlu1 %v739_v48, %s3141_s7  ;;  %871 = vrot.lane.b32.xlu0 %v737_v49, %s3141_s7  ;;  %v484_v54 = vsel %vm3273_vm3, 0.0, %v438_v46  ;;  %v806_v56 = vsel %vm786_vm2, %v804_v43, %v805_v44  ;;  %v485_v61 = vsel %vm3273_vm3, 0.0, %v439_v53  ;;  %v425_v63 = vmul.f32 %v3228_v0, %v417_v51 }
  0x24   : > { %v553_v57 = vrot.slane %v484_v54, 7  ;;  %v426_v1 = vmul.f32 %v3228_v0, %v418_v52  ;;  %v554_v2 = vrot.slane %v485_v61, 7  ;;  %v486_v5 = vsel %vm3273_vm3, 0.0, %v440_v58 }
  0x25   : > { %v808_v7 = vsel %vm786_vm2, %v805_v44, %v807_v55  ;;  %v556_v8 = vrot.slane %v486_v5, 7  ;;  %v740_v11 = vrot.slane %v3311_v62, 1  ;;  %v433_v12 = vadd.f32 %v3239_v3, %v425_v63 }
  0x26   : > { %v3316_v4 = vsel %vm552_vm0, 0.0, %v553_v57  ;;  %v3327_v10 = vsel %vm552_vm0, %v553_v57, %v554_v2  ;;  %v434_v13 = vadd.f32 %v3239_v3, %v426_v1  ;;  %v3338_v18 = vsel %vm552_vm0, %v573_v47, %v3305_v59  ;;  %v421_v1 = vld [vmem:[%s3265_s30 + $0x38] sm:$0xff] }
  0x27   : > { %967 = vrot.lane.b32.xlu1 %v806_v56, %s3142_s8  ;;  %v718_v6 = vrot.slane %v3316_v4, 1  ;;  %v719_v15 = vrot.slane %v3327_v10, 1  ;;  %v787_v16 = vrot.slane %v3316_v4, 2  ;;  %v788_v17 = vrot.slane %v3327_v10, 2 }
  0x28   : > { %v3341_v19 = vsel %vm552_vm0, %v554_v2, %v556_v8  ;;  %v441_v20 = vmax.f32 %v433_v12, 0.0  ;;  %v442_v21 = vmax.f32 %v434_v13, 0.0  ;;  %v347_v24 = vadd.f32 %v3239_v3, %v309_v9 }
  0x29   : > { %v720_v23 = vsel %vm717_vm1, %v718_v6, %v719_v15  ;;  %v310_v25 = vmul.f32 %v3228_v0, %v272_v14  ;;  %v741_v26 = vsel %vm717_vm1, %v738_v41, %v740_v11  ;;  %v742_v27 = vrot.slane %v3338_v18, 1 }
  0x2a   : > { %855 = vrot.lane.b32.xlu0 %v720_v23, %s3141_s7  ;;  %v487_v28 = vsel %vm3273_vm3, 0.0, %v441_v20  ;;  %v488_v29 = vsel %vm3273_vm3, 0.0, %v442_v21  ;;  %v789_v31 = vsel %vm786_vm2, %v787_v16, %v788_v17  ;;  %v790_v32 = vrot.slane %v3341_v19, 2 }
  0x2b   : > { %969 = vrot.lane.b32.xlu1 %v808_v7, %s3142_s8  ;;  %v558_v34 = vrot.slane %v487_v28, 7  ;;  %v427_v35 = vmul.f32 %v3228_v0, %v419_v22  ;;  %v560_v39 = vrot.slane %v488_v29, 7  ;;  %v428_v42 = vmul.f32 %v3228_v0, %v420_v30 }
  0x2c   : > { %v743_v43 = vsel %vm717_vm1, %v740_v11, %v742_v27  ;;  %v379_v44 = vmax.f32 %v347_v24, 0.0  ;;  %v791_v45 = vsel %vm786_vm2, %v788_v17, %v790_v32  ;;  %v721_v46 = vrot.slane %v3341_v19, 1 }
  0x2d   : > { %v3361_v40 = vsel %vm552_vm0, %v556_v8, %v558_v34  ;;  %v435_v41 = vadd.f32 %v3239_v3, %v427_v35  ;;  %v348_v48 = vadd.f32 %v3239_v3, %v310_v25  ;;  %v3372_v49 = vsel %vm552_vm0, %v558_v34, %v560_v39  ;;  %v274_v34 = vld [vmem:[%s3242_s27 + $0x40] sm:$0xff] }
  0x2e   : > { %951 = vrot.lane.b32.xlu0 %v789_v31, %s3142_s8  ;;  %v723_v47 = vrot.slane %v3361_v40, 1  ;;  %v436_v51 = vadd.f32 %v3239_v3, %v428_v42  ;;  %v722_v52 = vsel %vm717_vm1, %v719_v15, %v721_v46  ;;  %v809_v53 = vrot.slane %v3311_v62, 2  ;;  %v275_v42 = vld [vmem:[%s3242_s27 + $0x48] sm:$0xff] }
  0x2f   : > { %875 = vrot.lane.b32.xlu1 %v741_v26, %s3141_s7  ;;  %v443_v50 = vmax.f32 %v435_v41, 0.0  ;;  %v725_v56 = vrot.slane %v3372_v49, 1  ;;  %v577_v57 = vrot.slane %v379_v44, 7  ;;  %v380_v58 = vmax.f32 %v348_v48, 0.0  ;;  %v276_v44 = vld [vmem:[%s3242_s27 + $0x50] sm:$0xff] }
  0x30   : > { %v724_v54 = vsel %vm717_vm1, %v721_v46, %v723_v47  ;;  %v444_v63 = vmax.f32 %v436_v51, 0.0  ;;  %v810_v2 = vsel %vm786_vm2, %v807_v55, %v809_v53  ;;  %v811_v5 = vrot.slane %v3338_v18, 2 }
  0x31   : > { %v489_v61 = vsel %vm3273_vm3, 0.0, %v443_v50  ;;  %v311_v6 = vmul.f32 %v3228_v0, %v273_v60  ;;  %v726_v7 = vsel %vm717_vm1, %v723_v47, %v725_v56  ;;  %v792_v8 = vrot.slane %v3361_v40, 2 }
  0x32   : > { %953 = vrot.lane.b32.xlu0 %v791_v45, %s3142_s8  ;;  %v3396_v9 = vsel %vm552_vm0, %v3305_v59, %v577_v57  ;;  %v579_v11 = vrot.slane %v380_v58, 7  ;;  %v562_v12 = vrot.slane %v489_v61, 7  ;;  %v429_v13 = vmul.f32 %v3228_v0, %v421_v1 }
  0x33   : > { %877 = vrot.lane.b32.xlu1 %v743_v43, %s3141_s7  ;;  %v490_v55 = vsel %vm3273_vm3, 0.0, %v444_v63  ;;  %v812_v14 = vsel %vm786_vm2, %v809_v53, %v811_v5  ;;  %v744_v15 = vrot.slane %v3396_v9, 1  ;;  %v793_v16 = vsel %vm786_vm2, %v790_v32, %v792_v8 }
  0x34   : > { %v794_v59 = vrot.slane %v3372_v49, 2  ;;  %v3408_v17 = vsel %vm552_vm0, %v577_v57, %v579_v11  ;;  %v349_v20 = vadd.f32 %v3239_v3, %v311_v6  ;;  %v3412_v21 = vsel %vm552_vm0, %v560_v39, %v562_v12  ;;  %v278_v6 = vld [vmem:[%s3242_s27 + $0x60] sm:$0xff] }
  0x35   : > { %v564_v22 = vrot.slane %v490_v55, 7  ;;  %v437_v23 = vadd.f32 %v3239_v3, %v429_v13  ;;  %v745_v24 = vsel %vm717_vm1, %v742_v27, %v744_v15  ;;  %v746_v25 = vrot.slane %v3408_v17, 1 }
  0x36   : > { %859 = vrot.lane.b32.xlu0 %v724_v54, %s3141_s7  ;;  %v795_v26 = vsel %vm786_vm2, %v792_v8, %v794_v59  ;;  %v727_v28 = vrot.slane %v3412_v21, 1  ;;  %v381_v29 = vmax.f32 %v349_v20, 0.0  ;;  %v813_v27 = vrot.slane %v3396_v9, 2 }
  0x37   : > { %857 = vrot.lane.b32.xlu1 %v722_v52, %s3141_s7  ;;  %v3422_v30 = vsel %vm552_vm0, %v562_v12, %v564_v22  ;;  %v445_v31 = vmax.f32 %v437_v23, 0.0  ;;  %v747_v32 = vsel %vm717_vm1, %v744_v15, %v746_v25  ;;  %v312_v45 = vmul.f32 %v3228_v0, %v274_v34 }
  0x38   : > { %v728_v35 = vsel %vm717_vm1, %v725_v56, %v727_v28  ;;  %v729_v39 = vrot.slane %v3422_v30, 1  ;;  %v581_v41 = vrot.slane %v381_v29, 7  ;;  %v814_v46 = vsel %vm786_vm2, %v811_v5, %v813_v27  ;;  %v277_v5 = vld [vmem:[%s3242_s27 + $0x58] sm:$0xff] }
  0x39   : > { %v491_v43 = vsel %vm3273_vm3, 0.0, %v445_v31  ;;  %v796_v47 = vrot.slane %v3412_v21, 2  ;;  %v815_v48 = vrot.slane %v3408_v17, 2  ;;  %v313_v50 = vmul.f32 %v3228_v0, %v275_v42 }
  0x3a   : > { %861 = vrot.lane.b32.xlu0 %v726_v7, %s3141_s7  ;;  %v730_v51 = vsel %vm717_vm1, %v727_v28, %v729_v39  ;;  %v3444_v33 = vsel %vm552_vm0, %v579_v11, %v581_v41  ;;  %v566_v52 = vrot.slane %v491_v43, 7  ;;  %v314_v53 = vmul.f32 %v3228_v0, %v276_v44 }
  0x3b   : > { %971 = vrot.lane.b32.xlu1 %v810_v2, %s3142_s8  ;;  %v798_v54 = vrot.slane %v3422_v30, 2  ;;  %v816_v56 = vsel %vm786_vm2, %v813_v27, %v815_v48  ;;  %v748_v57 = vrot.slane %v3444_v33, 1  ;;  %v704_v58 = vsel %vm552_vm0, %v581_v41, 0.0  ;;  %v280_v27 = vld [vmem:[%s3242_s27 + $0x70] sm:$0xff] }
  0x3c   : > { %v350_v60 = vadd.f32 %v3239_v3, %v312_v45  ;;  %v797_v61 = vsel %vm786_vm2, %v794_v59, %v796_v47  ;;  %v3456_v63 = vsel %vm552_vm0, %v564_v22, %v566_v52  ;;  %v351_v1 = vadd.f32 %v3239_v3, %v313_v50  ;;  %v2545_v50 = vld [vmem:[%s4737_s3 + $0x40] sm:$0xff] }
  0x3d   : > { %v352_v2 = vadd.f32 %v3239_v3, %v314_v53  ;;  %v799_v7 = vsel %vm786_vm2, %v796_v47, %v798_v54  ;;  %v750_v8 = vrot.slane %v704_v58, 1  ;;  %v749_v11 = vsel %vm717_vm1, %v746_v25, %v748_v57 }
  0x3e   : > { %955 = vrot.lane.b32.xlu0 %v793_v16, %s3142_s8  ;;  %v731_v12 = vrot.slane %v3456_v63, 1  ;;  %v703_v13 = vsel %vm552_vm0, %v566_v52, 0.0  ;;  %v382_v55 = vmax.f32 %v350_v60, 0.0  ;;  %v315_v16 = vmul.f32 %v3228_v0, %v277_v5  ;;  %v2548_v52 = vld [vmem:[%s4737_s3 + $0x58] sm:$0xff] }
  0x3f   : > { %973 = vrot.lane.b32.xlu1 %v812_v14, %s3142_s8  ;;  %v383_v14 = vmax.f32 %v351_v1, 0.0  ;;  %v384_v15 = vmax.f32 %v352_v2, 0.0  ;;  %v316_v59 = vmul.f32 %v3228_v0, %v278_v6  ;;  %v817_v20 = vrot.slane %v3444_v33, 2  ;;  %v281_v2 = vld [vmem:[%s3242_s27 + $0x78] sm:$0xff] }
  0x40   : > { %v732_v22 = vsel %vm717_vm1, %v729_v39, %v731_v12  ;;  %v751_v23 = vsel %vm717_vm1, %v748_v57, %v750_v8  ;;  %v583_v25 = vrot.slane %v382_v55, 7  ;;  %v353_v29 = vadd.f32 %v3239_v3, %v315_v16  ;;  %v1114_v55 = vld [vmem:[%s4737_s3 + $0x8] sm:$0xff] }
  0x41   : > { %v586_v28 = vrot.slane %v384_v15, 7  ;;  %v354_v31 = vadd.f32 %v3239_v3, %v316_v59  ;;  %v800_v34 = vrot.slane %v3456_v63, 2  ;;  %v818_v41 = vsel %vm786_vm2, %v815_v48, %v817_v20  ;;  %v2546_v48 = vld [vmem:[%s4737_s3 + $0x48] sm:$0xff] }
  0x42   : > { %957 = vrot.lane.b32.xlu0 %v795_v26, %s3142_s8  ;;  %v584_v26 = vrot.slane %v383_v14, 7  ;;  %v318_v43 = vmul.f32 %v3228_v0, %v280_v27  ;;  %v802_v57 = vrot.slane %v703_v13, 2  ;;  %v2954_v5 = vpack.c.bf16 %v2546_v48, %v2545_v50  ;;  %v283_v50 = vld [vmem:[%s3242_s27 + $0x88] sm:$0xff]  ;;  %v284_v48 = vld [vmem:[%s3242_s27 + $0x90] sm:$0xff] }
  0x43   : > { %879 = vrot.lane.b32.xlu1 %v745_v24, %s3141_s7  ;;  %v733_v24 = vrot.slane %v703_v13, 1  ;;  %v386_v47 = vmax.f32 %v354_v31, 0.0  ;;  %v801_v53 = vsel %vm786_vm2, %v798_v54, %v800_v34  ;;  %v1113_v13 = vld [vmem:[%s4737_s3] sm:$0xff]  ;;  %vm2220_vm8 = vcmask (!%p2651_p11), 123904  }
  0x44   : > { %v3487_v44 = vsel %vm552_vm0, %v583_v25, %v584_v26  ;;  %v3490_v45 = vsel %vm552_vm0, %v584_v26, %v586_v28  ;;  %v356_v54 = vadd.f32 %v3239_v3, %v318_v43  ;;  %2955 = vmatprep.subr.bf16.mxu1 %v2954_v5  ;;  %v1116_v26 = vld [vmem:[%s4737_s3 + $0x18] sm:$0xff]  ;;  %v1117_v31 = vld [vmem:[%s4737_s3 + $0x20] sm:$0xff] }
  0x45   : > { %v734_v39 = vsel %vm717_vm1, %v731_v12, %v733_v24  ;;  %v753_v60 = vrot.slane %v3487_v44, 1  ;;  %v319_v12 = vmul.f32 %v3228_v0, %v281_v2  ;;  %2957 = vmatpush3.bf16.msra.mxu1 %v2954_v5  ;;  %v822_v16 = vrot.slane %v3487_v44, 2 }
  0x46   : > { %863 = vrot.lane.b32.xlu0 %v728_v35, %s3141_s7  ;;  %v819_v35 = vrot.slane %v704_v58, 2  ;;  %v3508_v58 = vsel %vm552_vm0, 0.0, %v583_v25  ;;  %v824_v59 = vrot.slane %v3490_v45, 2  ;;  %v388_v24 = vmax.f32 %v356_v54, 0.0  ;;  %v1115_v25 = vld [vmem:[%s4737_s3 + $0x10] sm:$0xff] }
  0x47   : > { %881 = vrot.lane.b32.xlu1 %v747_v32, %s3141_s7  ;;  %v279_v32 = vld [vmem:[%s3242_s27 + $0x68] sm:$0xff]  ;;  %v752_v15 = vrot.slane %v3508_v58, 1  ;;  %v322_v54 = vmul.f32 %v3228_v0, %v284_v48 }
  0x48   : > { %v317_v42 = vmul.f32 %v3228_v0, %v279_v32  ;;  %v1118_v32 = vld [vmem:[%s4737_s3 + $0x28] sm:$0xff]  ;;  %v825_v27 = vsel %vm786_vm2, %v822_v16, %v824_v59 }
  0x4a   : > { %865 = vrot.lane.b32.xlu0 %v730_v51, %s3141_s7  ;;  %v2547_v51 = vld [vmem:[%s4737_s3 + $0x50] sm:$0xff]  ;;  %v355_v1 = vadd.f32 %v3239_v3, %v317_v42  ;;  %v754_v42 = vsel %vm717_vm1, %v752_v15, %v753_v60  ;;  %v360_v15 = vadd.f32 %v3239_v3, %v322_v54 }
  0x4b   : > { %975 = vrot.lane.b32.xlu1 %v814_v46, %s3142_s8  ;;  %v385_v46 = vmax.f32 %v353_v29, 0.0  ;;  %v2958_v8 = vpack.c.bf16 %v2548_v52, %v2547_v51  ;;  %v3544_v29 = vpack.c.bf16 %v1114_v55, %v1113_v13  ;;  %v3569_v51 = vpack.c.bf16 %v1118_v32, %v1117_v31 }
  0x4d   : > { %v588_v6 = vrot.slane %v385_v46, 7  ;;  %2959 = vmatprep.subr.bf16.mxu1 %v2958_v8  ;;  %2963 = vmatprep.subr.bf16.mxu0 %v3544_v29  ;;  %v594_v46 = vrot.slane %v388_v24, 7 }
  0x4e   : > { %959 = vrot.lane.b32.xlu0 %v797_v61, %s3142_s8  ;;  %v755_v61 = vrot.slane %v3490_v45, 1  ;;  %2961 = vmatpush3.bf16.msra.mxu1 %v2958_v8 }
  0x4f   : > { %977 = vrot.lane.b32.xlu1 %v816_v56, %s3142_s8  ;;  %v820_v56 = vsel %vm786_vm2, %v817_v20, %v819_v35  ;;  %v3533_v20 = vsel %vm552_vm0, %v586_v28, %v588_v6  ;;  %v821_v28 = vrot.slane %v3508_v58, 2  ;;  %2965 = vmatpush3.bf16.msra.mxu0 %v3544_v29 }
  0x50   : > { %v756_v14 = vsel %vm717_vm1, %v753_v60, %v755_v61  ;;  %2986 = vmatprep.subr.bf16.mxu1 %v3544_v29 }
  0x51   : > { %v823_v52 = vsel %vm786_vm2, %v821_v28, %v822_v16  ;;  %v285_v16 = vld [vmem:[%s3242_s27 + $0x98] sm:$0xff] }
  0x52   : > { %961 = vrot.lane.b32.xlu0 %v799_v7, %s3142_s8  ;;  %v590_v7 = vrot.slane %v386_v47, 7  ;;  %v357_v47 = vadd.f32 %v3239_v3, %v319_v12  ;;  %v323_v31 = vmul.f32 %v3228_v0, %v285_v16 }
  0x53   : > { %883 = vrot.lane.b32.xlu1 %v749_v11, %s3141_s7  ;;  %v803_v11 = vsel %vm786_vm2, %v800_v34, %v802_v57  ;;  %v757_v34 = vrot.slane %v3533_v20, 1  ;;  %v826_v57 = vrot.slane %v3533_v20, 2 }
  0x54   : > { %v361_v48 = vadd.f32 %v3239_v3, %v323_v31 }
  0x55   : > { %v758_v13 = vsel %vm717_vm1, %v755_v61, %v757_v34  ;;  %v827_v24 = vsel %vm786_vm2, %v824_v59, %v826_v57 }
  0x56   : > { %867 = vrot.lane.b32.xlu0 %v732_v22, %s3141_s7  ;;  %v3536_v22 = vsel %vm552_vm0, %v588_v6, %v590_v7  ;;  %v389_v6 = vmax.f32 %v357_v47, 0.0 }
  0x57   : > { %885 = vrot.lane.b32.xlu1 %v751_v23, %s3141_s7  ;;  %v387_v23 = vmax.f32 %v355_v1, 0.0  ;;  %v759_v35 = vrot.slane %v3536_v22, 1  ;;  %v828_v60 = vrot.slane %v3536_v22, 2  ;;  %v321_v1 = vmul.f32 %v3228_v0, %v283_v50 }
  0x58   : > { %v596_v55 = vrot.slane %v389_v6, 7 }
  0x59   : > { %v592_v43 = vrot.slane %v387_v23, 7  ;;  %v829_v8 = vsel %vm786_vm2, %v826_v57, %v828_v60  ;;  %v286_v23 = vld [vmem:[%s3242_s27 + $0xa0] sm:$0xff] }
  0x5a   : > { %869 = vrot.lane.b32.xlu0 %v734_v39, %s3141_s7  ;;  %v282_v39 = vld [vmem:[%s3242_s27 + $0x80] sm:$0xff]  ;;  %v324_v32 = vmul.f32 %v3228_v0, %v286_v23  ;;  %v705_v59 = vsel %vm552_vm0, %v596_v55, 0.0 }
  0x5b   : > { %979 = vrot.lane.b32.xlu1 %v818_v41, %s3142_s8  ;;  %v3560_v41 = vpack.c.bf16 %v1116_v26, %v1115_v25  ;;  %v3580_v2 = vsel %vm552_vm0, %v590_v7, %v592_v43  ;;  %v3583_v5 = vsel %vm552_vm0, %v592_v43, %v594_v46  ;;  %v767_v50 = vrot.slane %v705_v59, 1 }
  0x5c   : > { %v761_v7 = vrot.slane %v3580_v2, 1  ;;  %v830_v25 = vrot.slane %v3580_v2, 2  ;;  %v832_v26 = vrot.slane %v3583_v5, 2  ;;  %v362_v57 = vadd.f32 %v3239_v3, %v324_v32 }
  0x5d   : > { %2967 = vmatprep.subr.bf16.mxu0 %v3560_v41 }
  0x5e   : > { %963 = vrot.lane.b32.xlu0 %v801_v53, %s3142_s8  ;;  %v320_v53 = vmul.f32 %v3228_v0, %v282_v39  ;;  %2969 = vmatpush3.bf16.msra.mxu0 %v3560_v41  ;;  %v392_v39 = vmax.f32 %v360_v15, 0.0  ;;  %v833_v43 = vsel %vm786_vm2, %v830_v25, %v832_v26 }
  0x5f   : > { %981 = vrot.lane.b32.xlu1 %v820_v56, %s3142_s8  ;;  %v760_v56 = vsel %vm717_vm1, %v757_v34, %v759_v35  ;;  %2971 = vmatprep.subr.bf16.mxu0 %v3569_v51 }
  0x60   : > { %v358_v12 = vadd.f32 %v3239_v3, %v320_v53 }
  0x62   : > { %965 = vrot.lane.b32.xlu0 %v803_v11, %s3142_s8  ;;  %v763_v11 = vrot.slane %v3583_v5, 1  ;;  %2973 = vmatpush3.bf16.msra.mxu0 %v3569_v51  ;;  %v390_v28 = vmax.f32 %v358_v12, 0.0 }
  0x63   : > { %889 = vrot.lane.b32.xlu1 %v756_v14, %s3141_s7  ;;  %v359_v14 = vadd.f32 %v3239_v3, %v321_v1  ;;  %v288_v1 = vld [vmem:[%s3242_s27 + $0xb0] sm:$0xff] }
  0x64   : > { %v764_v61 = vsel %vm717_vm1, %v761_v7, %v763_v11  ;;  %v326_v12 = vmul.f32 %v3228_v0, %v288_v1 }
  0x65   : > { %v391_v34 = vmax.f32 %v359_v14, 0.0  ;;  %v393_v14 = vmax.f32 %v361_v48, 0.0 }
  0x66   : > { %887 = vrot.lane.b32.xlu0 %v754_v42, %s3141_s7  ;;  %v762_v42 = vsel %vm717_vm1, %v759_v35, %v761_v7  ;;  %v831_v35 = vsel %vm786_vm2, %v828_v60, %v830_v25  ;;  %v836_v7 = vrot.slane %v705_v59, 2  ;;  %v394_v60 = vmax.f32 %v362_v57, 0.0  ;;  %v289_v59 = vld [vmem:[%s3242_s27 + $0xb8] sm:$0xff] }
  0x67   : > { %985 = vrot.lane.b32.xlu1 %v825_v27, %s3142_s8  ;;  %v3611_v27 = vsel %vm552_vm0, %v594_v46, %v596_v55  ;;  %v287_v46 = vld [vmem:[%s3242_s27 + $0xa8] sm:$0xff]  ;;  %v599_v53 = vrot.slane %v391_v34, 7  ;;  %v364_v25 = vadd.f32 %v3239_v3, %v326_v12  ;;  %v603_v31 = vrot.slane %v393_v14, 7  ;;  %v290_v12 = vld [vmem:[%s3242_s27 + $0xc0] sm:$0xff] }
  0x68   : > { %v765_v47 = vrot.slane %v3611_v27, 1  ;;  %v325_v6 = vmul.f32 %v3228_v0, %v287_v46  ;;  %v605_v32 = vrot.slane %v394_v60, 7  ;;  %v327_v46 = vmul.f32 %v3228_v0, %v289_v59  ;;  %v291_v14 = vld [vmem:[%s3242_s27 + $0xc8] sm:$0xff]  ;;  %v292_v60 = vld [vmem:[%s3242_s27 + $0xd0] sm:$0xff] }
  0x69   : > { %v329_v59 = vmul.f32 %v3228_v0, %v291_v14 }
  0x6a   : > { %983 = vrot.lane.b32.xlu0 %v823_v52, %s3142_s8  ;;  %v598_v52 = vrot.slane %v390_v28, 7  ;;  %v768_v54 = vsel %vm717_vm1, %v765_v47, %v767_v50  ;;  %v363_v15 = vadd.f32 %v3239_v3, %v325_v6  ;;  %v3659_v48 = vsel %vm552_vm0, %v603_v31, %v605_v32 }
  0x6b   : > { %893 = vrot.lane.b32.xlu1 %v760_v56, %s3141_s7  ;;  %v601_v56 = vrot.slane %v392_v39, 7 }
  0x6c   : > { %v3645_v28 = vsel %vm552_vm0, 0.0, %v598_v52  ;;  %v395_v39 = vmax.f32 %v363_v15, 0.0 }
  0x6d   : > { %v3634_v55 = vsel %vm552_vm0, %v599_v53, %v601_v56 }
  0x6e   : > { %891 = vrot.lane.b32.xlu0 %v758_v13, %s3141_s7  ;;  %v3631_v13 = vsel %vm552_vm0, %v598_v52, %v599_v53  ;;  %v607_v52 = vrot.slane %v395_v39, 7  ;;  %v2613_v53 = vld [vmem:[%s4737_s3 + $0x60] sm:$0xff] }
  0x6f   : > { %989 = vrot.lane.b32.xlu1 %v829_v8, %s3142_s8  ;;  %v834_v8 = vrot.slane %v3611_v27, 2  ;;  %v770_v23 = vrot.slane %v3631_v13, 1  ;;  %v839_v50 = vrot.slane %v3631_v13, 2 }
  0x71   : > { %v837_v16 = vsel %vm786_vm2, %v834_v8, %v836_v7  ;;  %v835_v34 = vsel %vm786_vm2, %v832_v26, %v834_v8  ;;  %v396_v26 = vmax.f32 %v364_v25, 0.0  ;;  %v365_v7 = vadd.f32 %v3239_v3, %v327_v46 }
  0x72   : > { %987 = vrot.lane.b32.xlu0 %v827_v24, %s3142_s8  ;;  %v772_v24 = vrot.slane %v3634_v55, 1  ;;  %v3684_v25 = vsel %vm552_vm0, %v605_v32, %v607_v52 }
  0x73   : > { %897 = vrot.lane.b32.xlu1 %v764_v61, %s3141_s7  ;;  %v766_v61 = vsel %vm717_vm1, %v763_v11, %v765_v47  ;;  %v841_v11 = vrot.slane %v3634_v55, 2  ;;  %v3656_v47 = vsel %vm552_vm0, %v601_v56, %v603_v31  ;;  %v2614_v56 = vld [vmem:[%s4737_s3 + $0x68] sm:$0xff]  ;;  %v609_v8 = vrot.slane %v396_v26, 7 }
  0x74   : > { %v774_v1 = vrot.slane %v3656_v47, 1  ;;  %v3679_v15 = vpack.c.bf16 %v2614_v56, %v2613_v53  ;;  %v328_v31 = vmul.f32 %v3228_v0, %v290_v12  ;;  %v397_v32 = vmax.f32 %v365_v7, 0.0 }
  0x75   : > { %v842_v57 = vsel %vm786_vm2, %v839_v50, %v841_v11  ;;  %v3694_v39 = vsel %vm552_vm0, %v607_v52, %v609_v8  ;;  %v847_v12 = vrot.slane %v3684_v25, 2 }
  0x76   : > { %895 = vrot.lane.b32.xlu0 %v762_v42, %s3141_s7  ;;  %v773_v42 = vsel %vm717_vm1, %v770_v23, %v772_v24  ;;  %2975 = vmatprep.subr.bf16.mxu0 %v3679_v15  ;;  %4750 = vst [vmem:[#allocation2_spill] sm:$0xff] %v3694_v39  ;;  %v780_v46 = vrot.slane %v3694_v39, 1  ;;  %v366_v53 = vadd.f32 %v3239_v3, %v328_v31  ;;  %v611_v56 = vrot.slane %v397_v32, 7  ;;  %v295_v32 = vld [vmem:[%s3242_s27 + $0xe8] sm:$0xff] }
  0x77   : > { %993 = vrot.lane.b32.xlu1 %v833_v43, %s3142_s8  ;;  %v769_v43 = vrot.slane %v3645_v28, 1  ;;  %v775_v52 = vsel %vm717_vm1, %v772_v24, %v774_v1  ;;  %v849_v14 = vrot.slane %v3694_v39, 2  ;;  %v451_v39 = vld [vmem:[%s3790_s13 + $0x18] sm:$0xff] }
  0x78   : > { %v3718_v31 = vsel %vm552_vm0, %v609_v8, %v611_v56 }
  0x79   : > { %v771_v6 = vsel %vm717_vm1, %v769_v43, %v770_v23  ;;  %v778_v43 = vrot.slane %v3684_v25, 1  ;;  %4751 = vst [vmem:[#allocation3_spill] sm:$0xff] %v3718_v31 }
  0x7a   : > { %991 = vrot.lane.b32.xlu0 %v831_v35, %s3142_s8  ;;  %v776_v35 = vrot.slane %v3659_v48, 1 }
  0x7b   : > { %901 = vrot.lane.b32.xlu1 %v768_v54, %s3141_s7  ;;  %v838_v54 = vrot.slane %v3645_v28, 2  ;;  %v781_v24 = vsel %vm717_vm1, %v778_v43, %v780_v46 }
  0x7c   : > { %v777_v23 = vsel %vm717_vm1, %v774_v1, %v776_v35  ;;  %v398_v1 = vmax.f32 %v366_v53, 0.0 }
  0x7e   : > { %899 = vrot.lane.b32.xlu0 %v766_v61, %s3141_s7  ;;  %v845_v61 = vrot.slane %v3659_v48, 2  ;;  %v613_v8 = vrot.slane %v398_v1, 7  ;;  %v333_v1 = vmul.f32 %v3228_v0, %v295_v32 }
  0x7f   : > { %997 = vrot.lane.b32.xlu1 %v837_v16, %s3142_s8  ;;  %v843_v16 = vrot.slane %v3656_v47, 2 }
  0x81   : > { %v846_v26 = vsel %vm786_vm2, %v843_v16, %v845_v61  ;;  %v844_v7 = vsel %vm786_vm2, %v841_v11, %v843_v16  ;;  %v706_v11 = vsel %vm552_vm0, %v611_v56, 0.0 }
  0x82   : > { %995 = vrot.lane.b32.xlu0 %v835_v34, %s3142_s8  ;;  %v840_v34 = vsel %vm786_vm2, %v838_v54, %v839_v50  ;;  %v367_v50 = vadd.f32 %v3239_v3, %v329_v59  ;;  %v294_v54 = vld [vmem:[%s3242_s27 + $0xe0] sm:$0xff] }
  0x83   : > { %905 = vrot.lane.b32.xlu1 %v773_v42, %s3141_s7  ;;  %v330_v42 = vmul.f32 %v3228_v0, %v292_v60  ;;  %v332_v59 = vmul.f32 %v3228_v0, %v294_v54 }
  0x84   : > { %v399_v60 = vmax.f32 %v367_v50, 0.0  ;;  %v296_v50 = vld [vmem:[%s3242_s27 + $0xf0] sm:$0xff] }
  0x85   : > { %v370_v54 = vadd.f32 %v3239_v3, %v332_v59 }
  0x86   : > { %903 = vrot.lane.b32.xlu0 %v771_v6, %s3141_s7  ;;  %v293_v6 = vld [vmem:[%s3242_s27 + $0xd8] sm:$0xff]  ;;  %v614_v53 = vrot.slane %v399_v60, 7  ;;  %v334_v60 = vmul.f32 %v3228_v0, %v296_v50 }
  0x87   : > { %1001 = vrot.lane.b32.xlu1 %v842_v57, %s3142_s8  ;;  %v368_v57 = vadd.f32 %v3239_v3, %v330_v42  ;;  %v782_v42 = vrot.slane %v3718_v31, 1 }
  0x89   : > { %v400_v16 = vmax.f32 %v368_v57, 0.0 }
  0x8a   : > { %999 = vrot.lane.b32.xlu0 %v840_v34, %s3142_s8  ;;  %v850_v34 = vsel %vm786_vm2, %v847_v12, %v849_v14 }
  0x8b   : > { %909 = vrot.lane.b32.xlu1 %v777_v23, %s3141_s7  ;;  %v331_v23 = vmul.f32 %v3228_v0, %v293_v6  ;;  %v616_v57 = vrot.slane %v400_v16, 7  ;;  %v3746_v16 = vsel %vm552_vm0, %v613_v8, %v614_v53 }
  0x8c   : > { %4753 = vst [vmem:[#allocation4_spill] sm:$0xff] %v3746_v16 }
  0x8d   : > { %v369_v6 = vadd.f32 %v3239_v3, %v331_v23  ;;  %v853_v23 = vrot.slane %v706_v11, 2  ;;  %v3755_v0 = vsel %vm552_vm0, %v614_v53, %v616_v57  ;;  %v1122_v53 = vrot.slane %v3746_v16, 1 }
  0x8e   : > { %907 = vrot.lane.b32.xlu0 %v775_v52, %s3141_s7  ;;  %v779_v52 = vsel %vm717_vm1, %v776_v35, %v778_v43  ;;  %v851_v43 = vrot.slane %v3718_v31, 2  ;;  %v4741_v50 = vrot.slane %v3755_v0, 1  ;;  %v452_v31 = vld [vmem:[%s3790_s13 + $0x20] sm:$0xff] }
  0x8f   : > { %1005 = vrot.lane.b32.xlu1 %v846_v26, %s3142_s8  ;;  %v784_v26 = vrot.slane %v706_v11, 1  ;;  %v401_v59 = vmax.f32 %v369_v6, 0.0  ;;  %v371_v11 = vadd.f32 %v3239_v3, %v333_v1 }
  0x91   : > { %v785_v35 = vsel %vm717_vm1, %v782_v42, %v784_v26  ;;  %v372_v26 = vadd.f32 %v3239_v3, %v334_v60  ;;  %v783_v3 = vsel %vm717_vm1, %v780_v46, %v782_v42  ;;  %v1125_v46 = vsel %vm717_vm1, %v1122_v53, %v4741_v50 }
  0x92   : > { %1003 = vrot.lane.b32.xlu0 %v844_v7, %s3142_s8  ;;  %v1139_v42 = vrot.slane %v3746_v16, 2 }
  0x93   : > { %913 = vrot.lane.b32.xlu1 %v781_v24, %s3141_s7  ;;  %v848_v24 = vsel %vm786_vm2, %v845_v61, %v847_v12 }
  0x95   : > { %v874_v56 = vpop.permute.xlu1 %873  ;;  %v872_v7 = vpop.permute.xlu0 %871 }
  0x96   : > { %911 = vrot.lane.b32.xlu0 %v779_v52, %s3141_s7  ;;  %v1056_v61 = vsel %vm1047_vm4, %v3285_v38, %v872_v7  ;;  %v854_v38 = vsel %vm786_vm2, %v851_v43, %v853_v23  ;;  %v3770_v52 = vsel %vm552_vm0, 0.0, %v613_v8  ;;  %v1057_v6 = vsel %vm1047_vm4, %v3279_v36, %v874_v56 }
  0x97   : > { %1009 = vrot.lane.b32.xlu1 %v850_v34, %s3142_s8  ;;  %v402_v34 = vmax.f32 %v370_v54, 0.0  ;;  %4754 = vst [vmem:[#allocation5_spill] sm:$0xff] %v3770_v52  ;;  %v618_v7 = vrot.slane %v401_v59, 7  ;;  %v852_v8 = vsel %vm786_vm2, %v849_v14, %v851_v43  ;;  %v1121_v36 = vrot.slane %v3770_v52, 1  ;;  %v3811_v59 = vld [vmem:[%s4735_s1] ss:$0 sm:$0xff] }
  0x98   : > { %v4740_v56 = vrot.slane %v3755_v0, 2  ;;  %v403_v14 = vmax.f32 %v371_v11, 0.0 }
  0x99   : > { %v968_v12 = vpop.permute.xlu1 %967  ;;  %v3803_v23 = vsel %vm552_vm0, %v616_v57, %v618_v7 }
  0x9a   : > { %v3758_v32 = vsel %vm1080_vm5, %v1056_v61, %v968_v12  ;;  %1007 = vrot.lane.b32.xlu0 %v848_v24, %s3142_s8  ;;  %v620_v24 = vrot.slane %v402_v34, 7  ;;  %4755 = vst [vmem:[#allocation6_spill] sm:$0xff] %v3803_v23  ;;  %v404_v12 = vmax.f32 %v372_v26, 0.0  ;;  %v1138_v26 = vrot.slane %v3770_v52, 2 }
  0x9b   : > { %917 = vrot.lane.b32.xlu1 %v785_v35, %s3141_s7  ;;  %2782 = vmatprep.mubr.msk.f32.mxu1 %vm1226_vm6, %v3758_v32  ;;  %v297_v35 = vld [vmem:[%s3242_s27 + $0xf8] sm:$0xff] }
  0x9c   : > { %v856_v1 = vpop.permute.xlu0 %855  ;;  %v3806_v61 = vsel %vm552_vm0, %v618_v7, %v620_v24  ;;  %v335_v34 = vmul.f32 %v3811_v59, %v297_v35  ;;  %v1123_v35 = vsel %vm717_vm1, %v1121_v36, %v1122_v53  ;;  %v494_v36 = vstv %s3825_s14 }
  0x9d   : > { %v970_v54 = vpop.permute.xlu1 %969  ;;  %v4746_v7 = vrot.slane %v3806_v61, 1  ;;  %vm3883_vm7 = vcmp.eq.s32.totalorder %v494_v36, 1  ;;  %v460_v36 = vmul.f32 %v3811_v59, %v452_v31 }
  0x9e   : > { %v3779_v60 = vsel %vm1080_vm5, %v1057_v6, %v970_v54  ;;  %915 = vrot.lane.b32.xlu0 %v783_v3, %s3141_s7  ;;  %v449_v6 = vld [vmem:[%s3790_s13 + $0x8] sm:$0xff]  ;;  %v450_v3 = vld [vmem:[%s3790_s13 + $0x10] sm:$0xff]  ;;  %v1126_v54 = vrot.slane %v3803_v23, 1 }
  0x9f   : > { %1013 = vrot.lane.b32.xlu1 %v854_v38, %s3142_s8  ;;  %2783 = vmatmul.mubr.msk.f32.vlgmr.msra.gmra.mrb[0].mxu1 %vm1226_vm6, %v3779_v60  ;;  %v448_v38 = vld [vmem:[%s3790_s13] sm:$0xff]  ;;  %v458_v53 = vmul.f32 %v3811_v59, %v450_v3 }
  0xa0   : > { %2989 = vmatpush3.bf16.msra.mxu1 %v3544_v29  ;;  %v1048_v29 = vsel %vm1047_vm4, %v3316_v4, %v856_v1  ;;  %v952_v11 = vpop.permute.xlu0 %951  ;;  %v1142_v4 = vsel %vm786_vm2, %v1139_v42, %v4740_v56  ;;  %v622_v1 = vrot.slane %v403_v14, 7  ;;  %v457_v14 = vmul.f32 %v3811_v59, %v449_v6 }
  0xa1   : > { %v3800_v43 = vpop.permute.xlu1 %875  ;;  %2987 = vmatprep.subr.bf16.mxu1 %v3560_v41  ;;  %v1081_v57 = vsel %vm1080_vm5, %v1048_v29, %v952_v11  ;;  %v3837_v29 = vrot.slane %v404_v12, 7  ;;  %v2615_v12 = vld [vmem:[%s4737_s3 + $0x70] sm:$0xff] }
  0xa2   : > { %1011 = vrot.lane.b32.xlu0 %v852_v8, %s3142_s8  ;;  %2842 = vmatprep.mubr.msk.f32.mxu0 %vm1226_vm6, %v1081_v57  ;;  %v3842_v8 = vld [vmem:[%s4736_s2] ss:$0 sm:$0xff]  ;;  %v456_v57 = vmul.f32 %v3811_v59, %v448_v38  ;;  %v1143_v38 = vrot.slane %v3803_v23, 2  ;;  %v3865_v3 = vsel %vm552_vm0, %v620_v24, %v622_v1 }
  0xa3   : > { %1157 = vrot.lane.b32.xlu1 %v1125_v46, %s3141_s7  ;;  %v373_v11 = vadd.f32 %v3842_v8, %v335_v34  ;;  %v1129_v34 = vsel %vm717_vm1, %v1126_v54, %v4746_v7  ;;  %v3870_v52 = vsel %vm552_vm0, %v622_v1, %v3837_v29  ;;  %v465_v24 = vadd.f32 %v3842_v8, %v457_v14 }
  0xa4   : > { %2990 = vmatpush3.bf16.msra.mxu1 %v3560_v41  ;;  %v954_v56 = vpop.permute.xlu0 %953  ;;  %v2616_v41 = vld [vmem:[%s4737_s3 + $0x78] sm:$0xff] }
  0xa5   : > { %v3835_v46 = vpop.permute.xlu1 %877  ;;  %2988 = vmatprep.subr.bf16.mxu1 %v3569_v51  ;;  %v405_v16 = vmax.f32 %v373_v11, 0.0  ;;  %v1130_v11 = vrot.slane %v3865_v3, 1 }
  0xa6   : > { %1155 = vrot.lane.b32.xlu0 %v1123_v35, %s3141_s7  ;;  %v464_v35 = vadd.f32 %v3842_v8, %v456_v57 }
  0xa7   : > { %1181 = vrot.lane.b32.xlu1 %v1142_v4, %s3142_s8  ;;  %v1140_v4 = vsel %vm786_vm2, %v1138_v26, %v1139_v42  ;;  %v466_v42 = vadd.f32 %v3842_v8, %v458_v53  ;;  %v2978_v26 = vpack.c.bf16 %v2616_v41, %v2615_v12  ;;  %v459_v53 = vmul.f32 %v3811_v59, %v451_v39 }
  0xa8   : > { %2991 = vmatpush3.bf16.msra.mxu1 %v3569_v51  ;;  %v860_v7 = vpop.permute.xlu0 %859  ;;  %v2617_v51 = vld [vmem:[%s4737_s3 + $0x80] sm:$0xff]  ;;  %v1058_v12 = vsel %vm1047_vm4, %v3282_v37, %v3800_v43  ;;  %v4759_v41 = vrot.slane %v3755_v0, 1  ;;  %v473_v39 = vmax.f32 %v465_v24, 0.0  ;;  %v4760_v37 = vrot.slane %v3755_v0, 2 }
  0xa9   : > { %v858_v50 = vpop.permute.xlu1 %857  ;;  %v474_v23 = vmax.f32 %v466_v42, 0.0  ;;  %v467_v24 = vadd.f32 %v3842_v8, %v459_v53  ;;  %v468_v42 = vadd.f32 %v3842_v8, %v460_v36  ;;  %v1050_v53 = vsel %vm1047_vm4, %v3341_v19, %v860_v7  ;;  %v454_v19 = vld [vmem:[%s3790_s13 + $0x30] sm:$0xff] }
  0xaa   : > { %v1049_v6 = vsel %vm1047_vm4, %v3327_v10, %v858_v50  ;;  %v2618_v10 = vld [vmem:[%s4737_s3 + $0x88] sm:$0xff]  ;;  %1179 = vrot.lane.b32.xlu0 %v1140_v4, %s3142_s8  ;;  %v4758_v50 = vrot.slane %v3806_v61, 2  ;;  %v626_v4 = vrot.slane %v405_v16, 7  ;;  %v1144_v43 = vsel %vm786_vm2, %v4760_v37, %v1143_v38 }
  0xab   : > { %1161 = vrot.lane.b32.xlu1 %v1129_v34, %s3141_s7  ;;  %v1082_v1 = vsel %vm1080_vm5, %v1049_v6, %v954_v56  ;;  %v1127_v34 = vsel %vm717_vm1, %v4759_v41, %v1126_v54  ;;  %v2982_v31 = vpack.c.bf16 %v2618_v10, %v2617_v51  ;;  %v1147_v16 = vrot.slane %v3865_v3, 2 }
  0xac   : > { %2843 = vmatmul.mubr.msk.f32.vlgmr.msra.gmra.mrb[0].mxu0 %vm1226_vm6, %v1082_v1  ;;  %v1146_v56 = vsel %vm786_vm2, %v1143_v38, %v4758_v50  ;;  %v472_v1 = vmax.f32 %v464_v35, 0.0  ;;  %v862_v50 = vpop.permute.xlu0 %861  ;;  %v1149_v35 = vrot.slane %v3870_v52, 2  ;;  %v1059_v38 = vsel %vm1047_vm4, %v3311_v62, %v3835_v46 }
  0xad   : > { %v972_v6 = vpop.permute.xlu1 %971  ;;  %2977 = vmatpush3.bf16.msra.mxu0 %v3679_v15  ;;  %v4761_v15 = vrot.slane %v3870_v52, 1  ;;  %v3930_v10 = vsel %vm552_vm0, %v3837_v29, %v626_v4  ;;  %v497_v62 = vsel %vm3883_vm7, 0.0, %v473_v39  ;;  %v3944_v46 = vsel %vm3883_vm7, 0.0, %v474_v23  ;;  %v453_v29 = vld [vmem:[%s3790_s13 + $0x28] sm:$0xff] }
  0xae   : > { %v3909_v14 = vsel %vm1080_vm5, %v1058_v12, %v972_v6  ;;  %2979 = vmatprep.subr.bf16.mxu0 %v2978_v26  ;;  %1159 = vrot.lane.b32.xlu0 %v1127_v34, %s3141_s7  ;;  %v496_v12 = vsel %vm3883_vm7, 0.0, %v472_v1  ;;  %v4762_v7 = vrot.slane %v3806_v61, 1  ;;  %v1150_v23 = vsel %vm786_vm2, %v1147_v16, %v1149_v35 }
  0xaf   : > { %1185 = vrot.lane.b32.xlu1 %v1146_v56, %s3142_s8  ;;  %2785 = vmatprep.mubr.msk.f32.mxu1 %vm1226_vm6, %v3909_v14  ;;  %v1133_v54 = vsel %vm717_vm1, %v1130_v11, %v4761_v15  ;;  %v707_v56 = vsel %vm552_vm0, %v626_v4, 0.0  ;;  %v1134_v6 = vrot.slane %v3930_v10, 1  ;;  %v628_v39 = vrot.slane %v496_v12, 7 }
  0xb0   : > { %v956_v36 = vpop.permute.xlu0 %955  ;;  %v1136_v4 = vrot.slane %v707_v56, 1  ;;  %v629_v37 = vrot.slane %v497_v62, 7  ;;  %v631_v15 = vrot.slane %v3944_v46, 7  ;;  %v1153_v62 = vrot.slane %v707_v56, 2 }
  0xb1   : > { %v974_v51 = vpop.permute.xlu1 %973  ;;  %2981 = vmatpush3.bf16.msra.mxu0 %v2978_v26  ;;  %v1083_v34 = vsel %vm1080_vm5, %v1050_v53, %v956_v36  ;;  %v1131_v26 = vsel %vm717_vm1, %v4762_v7, %v1130_v11  ;;  %v475_v11 = vmax.f32 %v467_v24, 0.0  ;;  %v462_v53 = vmul.f32 %v3811_v59, %v454_v19 }
  0xb2   : > { %v3938_v41 = vsel %vm1080_vm5, %v1059_v38, %v974_v51  ;;  %2983 = vmatprep.subr.bf16.mxu0 %v2982_v31  ;;  %1183 = vrot.lane.b32.xlu0 %v1144_v43, %s3142_s8  ;;  %v461_v43 = vmul.f32 %v3811_v59, %v453_v29  ;;  %v476_v51 = vmax.f32 %v468_v42, 0.0  ;;  %v1137_v12 = vsel %vm717_vm1, %v1134_v6, %v1136_v4 }
  0xb3   : > { %1165 = vrot.lane.b32.xlu1 %v1133_v54, %s3141_s7  ;;  %2786 = vmatmul.mubr.msk.f32.gmra.mrb[2].mxu1 %vm1226_vm6, %v3938_v41  ;;  %v1051_v54 = vsel %vm1047_vm4, %v3361_v40, %v862_v50  ;;  %v4763_v40 = vrot.slane %v3806_v61, 2  ;;  %v3976_v42 = vsel %vm552_vm0, %v628_v39, %v629_v37  ;;  %v3979_v46 = vsel %vm552_vm0, %v629_v37, %v631_v15 }
  0xb4   : > { %2845 = vmatprep.mubr.msk.f32.mxu0 %vm1226_vm6, %v1083_v34  ;;  %v958_v38 = vpop.permute.xlu0 %957  ;;  %v469_v29 = vadd.f32 %v3842_v8, %v461_v43  ;;  %v499_v19 = vsel %vm3883_vm7, 0.0, %v475_v11  ;;  %v3986_v56 = vsel %vm3883_vm7, 0.0, %v476_v51  ;;  %v470_v7 = vadd.f32 %v3842_v8, %v462_v53 }
  0xb5   : > { %v880_v1 = vpop.permute.xlu1 %879  ;;  %2985 = vmatpush3.bf16.msra.mxu0 %v2982_v31  ;;  %v1084_v36 = vsel %vm1080_vm5, %v1051_v54, %v958_v38  ;;  %v1151_v31 = vrot.slane %v3930_v10, 2  ;;  %v1148_v50 = vsel %vm786_vm2, %v4763_v40, %v1147_v16  ;;  %v3991_v16 = vsel %vm552_vm0, 0.0, %v628_v39 }
  0xb6   : > { %1163 = vrot.lane.b32.xlu0 %v1131_v26, %s3141_s7  ;;  %2846 = vmatmul.mubr.msk.f32.gmra.mrb[2].mxu0 %vm1226_vm6, %v1084_v36  ;;  %v455_v26 = vld [vmem:[%s3790_s13 + $0x38] sm:$0xff]  ;;  %v1800_v43 = vrot.slane %v3976_v42, 1  ;;  %v1802_v54 = vrot.slane %v3979_v46, 1  ;;  %v1060_v38 = vsel %vm1047_vm4, %v3338_v18, %v880_v1  ;;  %v633_v51 = vrot.slane %v499_v19, 7 }
  0xb7   : > { %1189 = vrot.lane.b32.xlu1 %v1150_v23, %s3142_s8  ;;  %v4764_v23 = vrot.slane %v3870_v52, 1  ;;  %v1154_v37 = vsel %vm786_vm2, %v1151_v31, %v1153_v62  ;;  %v635_v39 = vrot.slane %v3986_v56, 7  ;;  %v477_v53 = vmax.f32 %v469_v29, 0.0 }
  0xb8   : > { %v864_v34 = vpop.permute.xlu0 %863  ;;  %v478_v40 = vmax.f32 %v470_v7, 0.0  ;;  %v1152_v62 = vsel %vm786_vm2, %v1149_v35, %v1151_v31  ;;  %v1803_v18 = vsel %vm717_vm1, %v1800_v43, %v1802_v54  ;;  %v1799_v1 = vrot.slane %v3991_v16, 1 }
  0xb9   : > { %v882_v24 = vpop.permute.xlu1 %881  ;;  %v1135_v4 = vsel %vm717_vm1, %v4764_v23, %v1134_v6  ;;  %v463_v6 = vmul.f32 %v3811_v59, %v455_v26  ;;  %v1819_v59 = vrot.slane %v3979_v46, 2  ;;  %v4024_v35 = vsel %vm552_vm0, %v631_v15, %v633_v51 }
  0xba   : > { %1187 = vrot.lane.b32.xlu0 %v1148_v50, %s3142_s8  ;;  %v1817_v50 = vrot.slane %v3976_v42, 2  ;;  %v1061_v29 = vsel %vm1047_vm4, %v3396_v9, %v882_v24  ;;  %v4027_v31 = vsel %vm552_vm0, %v633_v51, %v635_v39  ;;  %v501_v56 = vsel %vm3883_vm7, 0.0, %v477_v53 }
  0xbb   : > { %1169 = vrot.lane.b32.xlu1 %v1137_v12, %s3141_s7  ;;  %v1052_v7 = vsel %vm1047_vm4, %v3372_v49, %v864_v34  ;;  %v502_v9 = vsel %vm3883_vm7, 0.0, %v478_v40  ;;  %v471_v24 = vadd.f32 %v3842_v8, %v463_v6  ;;  %v1804_v34 = vrot.slane %v4024_v35, 1 }
  0xbc   : > { %v866_v36 = vpop.permute.xlu0 %865  ;;  %v1820_v49 = vsel %vm786_vm2, %v1817_v50, %v1819_v59  ;;  %v639_v51 = vrot.slane %v502_v9, 7 }
  0xbd   : > { %v976_v11 = vpop.permute.xlu1 %975  ;;  %v1053_v53 = vsel %vm1047_vm4, %v3412_v21, %v866_v36  ;;  %v479_v6 = vmax.f32 %v471_v24, 0.0  ;;  %v1805_v24 = vsel %vm717_vm1, %v1802_v54, %v1804_v34 }
  0xbe   : > { %v4005_v12 = vsel %vm1080_vm5, %v1060_v38, %v976_v11  ;;  %1167 = vrot.lane.b32.xlu0 %v1135_v4, %s3141_s7  ;;  %v1806_v4 = vrot.slane %v4027_v31, 1  ;;  %v1816_v38 = vrot.slane %v3991_v16, 2  ;;  %v637_v11 = vrot.slane %v501_v56, 7 }
  0xbf   : > { %1193 = vrot.lane.b32.xlu1 %v1154_v37, %s3142_s8  ;;  %2788 = vmatprep.mubr.msk.f32.mxu1 %vm1226_vm6, %v4005_v12  ;;  %v1801_v37 = vsel %vm717_vm1, %v1799_v1, %v1800_v43  ;;  %v1823_v1 = vrot.slane %v4027_v31, 2 }
  0xc0   : > { %v960_v26 = vpop.permute.xlu0 %959  ;;  %v1807_v43 = vsel %vm717_vm1, %v1804_v34, %v1806_v4  ;;  %v4061_v21 = vsel %vm552_vm0, %v635_v39, %v637_v11  ;;  %v4064_v36 = vsel %vm552_vm0, %v637_v11, %v639_v51 }
  0xc1   : > { %v978_v19 = vpop.permute.xlu1 %977  ;;  %v1085_v15 = vsel %vm1080_vm5, %v1052_v7, %v960_v26  ;;  %v503_v7 = vsel %vm3883_vm7, 0.0, %v479_v6  ;;  %v1808_v9 = vrot.slane %v4061_v21, 1 }
  0xc2   : > { %v4034_v23 = vsel %vm1080_vm5, %v1061_v29, %v978_v19  ;;  %1191 = vrot.lane.b32.xlu0 %v1152_v62, %s3142_s8  ;;  %2848 = vmatprep.mubr.msk.f32.mxu0 %vm1226_vm6, %v1085_v15  ;;  %v1818_v29 = vsel %vm786_vm2, %v1816_v38, %v1817_v50  ;;  %v1810_v50 = vrot.slane %v4064_v36, 1  ;;  %v641_v57 = vrot.slane %v503_v7, 7 }
  0xc3   : > { %1835 = vrot.lane.b32.xlu1 %v1803_v18, %s3141_s7  ;;  %2789 = vmatmul.mubr.msk.f32.gmra.mrb[4].mxu1 %vm1226_vm6, %v4034_v23  ;;  %v1821_v18 = vrot.slane %v4024_v35, 2 }
  0xc4   : > { %v962_v40 = vpop.permute.xlu0 %961  ;;  %v1811_v38 = vsel %vm717_vm1, %v1808_v9, %v1810_v50 }
  0xc5   : > { %v884_v8 = vpop.permute.xlu1 %883  ;;  %v1086_v62 = vsel %vm1080_vm5, %v1053_v53, %v962_v40  ;;  %v1824_v26 = vsel %vm786_vm2, %v1821_v18, %v1823_v1  ;;  %v1822_v34 = vsel %vm786_vm2, %v1819_v59, %v1821_v18  ;;  %v4092_v53 = vsel %vm552_vm0, %v639_v51, %v641_v57 }
  0xc6   : > { %1833 = vrot.lane.b32.xlu0 %v1801_v37, %s3141_s7  ;;  %2849 = vmatmul.mubr.msk.f32.gmra.mrb[4].mxu0 %vm1226_vm6, %v1086_v62  ;;  %v1062_v39 = vsel %vm1047_vm4, %v3408_v17, %v884_v8  ;;  %v1825_v17 = vrot.slane %v4061_v21, 2  ;;  %v1827_v8 = vrot.slane %v4064_v36, 2  ;;  %v708_v40 = vsel %vm552_vm0, %v641_v57, 0.0 }
  0xc7   : > { %1859 = vrot.lane.b32.xlu1 %v1820_v49, %s3142_s8  ;;  %v1812_v59 = vrot.slane %v4092_v53, 1  ;;  %v1814_v51 = vrot.slane %v708_v40, 1 }
  0xc8   : > { %v868_v56 = vpop.permute.xlu0 %867 }
  0xc9   : > { %v886_v19 = vpop.permute.xlu1 %885  ;;  %v1054_v6 = vsel %vm1047_vm4, %v3422_v30, %v868_v56  ;;  %v1809_v30 = vsel %vm717_vm1, %v1806_v4, %v1808_v9  ;;  %v1826_v4 = vsel %vm786_vm2, %v1823_v1, %v1825_v17 }
  0xca   : > { %1857 = vrot.lane.b32.xlu0 %v1818_v29, %s3142_s8  ;;  %v1063_v54 = vsel %vm1047_vm4, %v3444_v33, %v886_v19  ;;  %v1828_v33 = vsel %vm786_vm2, %v1825_v17, %v1827_v8 }
  0xcb   : > { %1839 = vrot.lane.b32.xlu1 %v1807_v43, %s3141_s7 }
  0xcc   : > { %v870_v49 = vpop.permute.xlu0 %869 }
  0xcd   : > { %v980_v15 = vpop.permute.xlu1 %979  ;;  %v1055_v19 = vsel %vm1047_vm4, %v3456_v63, %v870_v49 }
  0xce   : > { %v4079_v37 = vsel %vm1080_vm5, %v1062_v39, %v980_v15  ;;  %1837 = vrot.lane.b32.xlu0 %v1805_v24, %s3141_s7  ;;  %v1829_v39 = vrot.slane %v4092_v53, 2  ;;  %v1831_v24 = vrot.slane %v708_v40, 2 }
  0xcf   : > { %1863 = vrot.lane.b32.xlu1 %v1824_v26, %s3142_s8  ;;  %2791 = vmatprep.mubr.msk.f32.mxu1 %vm1226_vm6, %v4079_v37  ;;  %v1815_v26 = vsel %vm717_vm1, %v1812_v59, %v1814_v51 }
  0xd0   : > { %v964_v62 = vpop.permute.xlu0 %963  ;;  %v1832_v15 = vsel %vm786_vm2, %v1829_v39, %v1831_v24 }
  0xd1   : > { %v982_v11 = vpop.permute.xlu1 %981  ;;  %v1087_v29 = vsel %vm1080_vm5, %v1054_v6, %v964_v62 }
  0xd2   : > { %v1096_v43 = vsel %vm1080_vm5, %v1063_v54, %v982_v11  ;;  %1861 = vrot.lane.b32.xlu0 %v1822_v34, %s3142_s8  ;;  %2851 = vmatprep.mubr.msk.f32.mxu0 %vm1226_vm6, %v1087_v29 }
  0xd3   : > { %1843 = vrot.lane.b32.xlu1 %v1811_v38, %s3141_s7  ;;  %2792 = vmatmul.mubr.msk.f32.gmra.mrb[6].mxu1 %vm1226_vm6, %v1096_v43 }
  0xd4   : > { %v966_v56 = vpop.permute.xlu0 %965 }
  0xd5   : > { %v890_v18 = vpop.permute.xlu1 %889  ;;  %v1088_v7 = vsel %vm1080_vm5, %v1055_v19, %v966_v56 }
  0xd6   : > { %1841 = vrot.lane.b32.xlu0 %v1809_v30, %s3141_s7  ;;  %2852 = vmatmul.mubr.msk.f32.gmra.mrb[6].mxu0 %vm1226_vm6, %v1088_v7  ;;  %v1065_v57 = vsel %vm1047_vm4, %v3487_v44, %v890_v18  ;;  %v1830_v44 = vsel %vm786_vm2, %v1827_v8, %v1829_v39 }
  0xd7   : > { %1867 = vrot.lane.b32.xlu1 %v1828_v33, %s3142_s8  ;;  %2854 = vmatprep.mubr.msk.f32.mxu0 %vm1226_vm6, %v3758_v32  ;;  %v1813_v32 = vsel %vm717_vm1, %v1810_v50, %v1812_v59 }
  0xd8   : > { %v888_v9 = vpop.permute.xlu0 %887 }
  0xd9   : > { %v986_v63 = vpop.permute.xlu1 %985  ;;  %v1064_v49 = vsel %vm1047_vm4, %v3508_v58, %v888_v9 }
  0xda   : > { %1865 = vrot.lane.b32.xlu0 %v1826_v4, %s3142_s8  ;;  %2855 = vmatmul.mubr.msk.f32.gmra.mrb[8].mxu0 %vm1226_vm6, %v3779_v60  ;;  %v4130_v38 = vsel %vm1080_vm5, %v1065_v57, %v986_v63 }
  0xdb   : > { %1847 = vrot.lane.b32.xlu1 %v1815_v26, %s3141_s7  ;;  %2857 = vmatprep.mubr.msk.f32.mxu0 %vm1226_vm6, %v3909_v14 }
  0xdc   : > { %v984_v17 = vpop.permute.xlu0 %983 }
  0xdd   : > { %v894_v1 = vpop.permute.xlu1 %893  ;;  %v4133_v60 = vsel %vm1080_vm5, %v1064_v49, %v984_v17 }
  0xde   : > { %1845 = vrot.lane.b32.xlu0 %v1813_v32, %s3141_s7  ;;  %2794 = vmatprep.mubr.msk.f32.mxu1 %vm1226_vm6, %v4133_v60  ;;  %v1067_v50 = vsel %vm1047_vm4, %v3533_v20, %v894_v1  ;;  %s2532_s7 = sshll.u32 %s4787_s26, 3 }
  0xdf   : > { %1871 = vrot.lane.b32.xlu1 %v1832_v15, %s3142_s8  ;;  %2858 = vmatmul.mubr.msk.f32.gmra.mrb[10].mxu0 %vm1226_vm6, %v3938_v41 }
  0xe0   : > { %2795 = vmatmul.mubr.msk.f32.gmra.mrb[8].mxu1 %vm1226_vm6, %v4130_v38  ;;  %2860 = vmatprep.mubr.msk.f32.mxu0 %vm1226_vm6, %v4005_v12  ;;  %v892_v14 = vpop.permute.xlu0 %891 }
  0xe1   : > { %v990_v58 = vpop.permute.xlu1 %989  ;;  %v1066_v41 = vsel %vm1047_vm4, %v3490_v45, %v892_v14  ;;  %v4765_v14 = vld [vmem:[#allocation3_spill] sm:$0xff] }
  0xe2   : > { %1869 = vrot.lane.b32.xlu0 %v1830_v44, %s3142_s8  ;;  %v4156_v8 = vsel %vm1080_vm5, %v1067_v50, %v990_v58  ;;  %s2533_s8 = sshll.u32 %s4781_s19, 9 }
  0xe3   : > { %2861 = vmatmul.mubr.msk.f32.gmra.mrb[12].mxu0 %vm1226_vm6, %v4034_v23  ;;  %s253_s13 = sadd.s32 %s2533_s8, %s2532_s7 }
  0xe4   : > { %2863 = vmatprep.mubr.msk.f32.mxu0 %vm1226_vm6, %v4079_v37  ;;  %v988_v12 = vpop.permute.xlu0 %987  ;;  %s2534_s6 = sshll.u32 %s253_s13, 3 }
  0xe5   : > { %v898_v54 = vpop.permute.xlu1 %897  ;;  %v4159_v34 = vsel %vm1080_vm5, %v1066_v41, %v988_v12  ;;  %v4766_v41 = vld [vmem:[#allocation2_spill] sm:$0xff]  ;;  %s4392_s15 = scalar_lea.vmem %s4738_s4, %s2534_s6 }
  0xe6   : > { %2797 = vmatprep.mubr.msk.f32.mxu1 %vm1226_vm6, %v4159_v34  ;;  %v1069_v23 = vsel %vm1047_vm4, %v3580_v2, %v898_v54 }
  0xe7   : > { %2864 = vmatmul.mubr.msk.f32.gmra.mrb[14].mxu0 %vm1226_vm6, %v1096_v43  ;;  %2798 = vmatmul.mubr.msk.f32.gmra.mrb[10].mxu1 %vm1226_vm6, %v4156_v8 }
  0xe8   : > { %2902 = vmatprep.mubr.msk.f32.mxu0 %vm1226_vm6, %v4133_v60  ;;  %v896_v45 = vpop.permute.xlu0 %895 }
  0xe9   : > { %v994_v20 = vpop.permute.xlu1 %993  ;;  %v1068_v11 = vsel %vm1047_vm4, %v3536_v22, %v896_v45 }
  0xea   : > { %v4177_v40 = vsel %vm1080_vm5, %v1069_v23, %v994_v20 }
  0xeb   : > { %2903 = vmatmul.mubr.msk.f32.vlgmr.msra.gmra.mrb[0].mxu0 %vm1226_vm6, %v4130_v38 }
  0xec   : > { %2905 = vmatprep.mubr.msk.f32.mxu0 %vm1226_vm6, %v4159_v34  ;;  %v992_v6 = vpop.permute.xlu0 %991 }
  0xed   : > { %v902_v37 = vpop.permute.xlu1 %901  ;;  %v4180_v62 = vsel %vm1080_vm5, %v1068_v11, %v992_v6  ;;  %v4767_v6 = vld [vmem:[#allocation4_spill] sm:$0xff] }
  0xee   : > { %2800 = vmatprep.mubr.msk.f32.mxu1 %vm1226_vm6, %v4180_v62  ;;  %v1071_v43 = vsel %vm1047_vm4, %v3611_v27, %v902_v37 }
  0xef   : > { %2906 = vmatmul.mubr.msk.f32.gmra.mrb[2].mxu0 %vm1226_vm6, %v4156_v8  ;;  %2801 = vmatmul.mubr.msk.f32.gmra.mrb[12].mxu1 %vm1226_vm6, %v4177_v40 }
  0xf0   : > { %2908 = vmatprep.mubr.msk.f32.mxu0 %vm1226_vm6, %v4180_v62  ;;  %v900_v2 = vpop.permute.xlu0 %899 }
  0xf1   : > { %v998_v22 = vpop.permute.xlu1 %997  ;;  %v1070_v33 = vsel %vm1047_vm4, %v3583_v5, %v900_v2 }
  0xf2   : > { %v4197_v59 = vsel %vm1080_vm5, %v1071_v43, %v998_v22  ;;  %v4768_v43 = vld [vmem:[#allocation5_spill] sm:$0xff] }
  0xf3   : > { %2909 = vmatmul.mubr.msk.f32.gmra.mrb[4].mxu0 %vm1226_vm6, %v4177_v40 }
  0xf4   : > { %v996_v51 = vpop.permute.xlu0 %995 }
  0xf5   : > { %v906_v29 = vpop.permute.xlu1 %905  ;;  %v4200_v30 = vsel %vm1080_vm5, %v1070_v33, %v996_v51 }
  0xf6   : > { %2803 = vmatprep.mubr.msk.f32.mxu1 %vm1226_vm6, %v4200_v30  ;;  %2911 = vmatprep.mubr.msk.f32.mxu0 %vm1226_vm6, %v4200_v30  ;;  %v1073_v18 = vsel %vm1047_vm4, %v3631_v13, %v906_v29 }
  0xf7   : > { %2804 = vmatmul.mubr.msk.f32.gmra.mrb[14].mxu1 %vm1226_vm6, %v4197_v59  ;;  %2912 = vmatmul.mubr.msk.f32.gmra.mrb[6].mxu0 %vm1226_vm6, %v4197_v59 }
  0xf8   : > { %v904_v27 = vpop.permute.xlu0 %903 }
  0xf9   : > { %v1002_v5 = vpop.permute.xlu1 %1001  ;;  %v1072_v56 = vsel %vm1047_vm4, %v3645_v28, %v904_v27 }
  0xfa   : > { %v4215_v7 = vsel %vm1080_vm5, %v1073_v18, %v1002_v5 }
  0xfc   : > { %v1000_v26 = vpop.permute.xlu0 %999 }
  0xfd   : > { %v910_v19 = vpop.permute.xlu1 %909  ;;  %v4218_v39 = vsel %vm1080_vm5, %v1072_v56, %v1000_v26 }
  0xfe   : > { %2806 = vmatprep.mubr.msk.f32.mxu1 %vm1226_vm6, %v4218_v39  ;;  %2914 = vmatprep.mubr.msk.f32.mxu0 %vm1226_vm6, %v4218_v39  ;;  %v1075_v24 = vsel %vm1047_vm4, %v3656_v47, %v910_v19  ;;  %v4769_v19 = vld [vmem:[#allocation6_spill] sm:$0xff] }
  0xff   : > { %2807 = vmatmul.mubr.msk.f32.gmra.mrb[16].mxu1 %vm1226_vm6, %v4215_v7  ;;  %2915 = vmatmul.mubr.msk.f32.gmra.mrb[8].mxu0 %vm1226_vm6, %v4215_v7 }
 0x100   : > { %v908_v28 = vpop.permute.xlu0 %907 }
 0x101   : > { %v1006_v13 = vpop.permute.xlu1 %1005  ;;  %v1074_v63 = vsel %vm1047_vm4, %v3634_v55, %v908_v28 }
 0x102   : > { %v4233_v9 = vsel %vm1080_vm5, %v1075_v24, %v1006_v13 }
 0x104   : > { %v1004_v15 = vpop.permute.xlu0 %1003 }
 0x105   : > { %v914_v4 = vpop.permute.xlu1 %913  ;;  %v4236_v57 = vsel %vm1080_vm5, %v1074_v63, %v1004_v15 }
 0x106   : > { %2809 = vmatprep.mubr.msk.f32.mxu1 %vm1226_vm6, %v4236_v57  ;;  %2917 = vmatprep.mubr.msk.f32.mxu0 %vm1226_vm6, %v4236_v57  ;;  %v1077_v32 = vsel %vm1047_vm4, %v3684_v25, %v914_v4 }
 0x107   : > { %2810 = vmatmul.mubr.msk.f32.gmra.mrb[18].mxu1 %vm1226_vm6, %v4233_v9  ;;  %2918 = vmatmul.mubr.msk.f32.gmra.mrb[10].mxu0 %vm1226_vm6, %v4233_v9 }
 0x108   : > { %v912_v47 = vpop.permute.xlu0 %911 }
 0x109   : > { %v1010_v55 = vpop.permute.xlu1 %1009  ;;  %v1076_v49 = vsel %vm1047_vm4, %v3659_v48, %v912_v47 }
 0x10a   : > { %v4251_v17 = vsel %vm1080_vm5, %v1077_v32, %v1010_v55 }
 0x10c   : > { %v1008_v44 = vpop.permute.xlu0 %1007 }
 0x10d   : > { %v918_v1 = vpop.permute.xlu1 %917  ;;  %v4254_v58 = vsel %vm1080_vm5, %v1076_v49, %v1008_v44 }
 0x10e   : > { %2812 = vmatprep.mubr.msk.f32.mxu1 %vm1226_vm6, %v4254_v58  ;;  %2920 = vmatprep.mubr.msk.f32.mxu0 %vm1226_vm6, %v4254_v58  ;;  %v1079_v50 = vsel %vm1047_vm4, %v4765_v14, %v918_v1 }
 0x10f   : > { %2813 = vmatmul.mubr.msk.f32.gmra.mrb[20].mxu1 %vm1226_vm6, %v4251_v17  ;;  %2921 = vmatmul.mubr.msk.f32.gmra.mrb[12].mxu0 %vm1226_vm6, %v4251_v17 }
 0x110   : > { %v916_v25 = vpop.permute.xlu0 %915 }
 0x111   : > { %v1014_v48 = vpop.permute.xlu1 %1013  ;;  %v1078_v12 = vsel %vm1047_vm4, %v4766_v41, %v916_v25 }
 0x112   : > { %v4269_v20 = vsel %vm1080_vm5, %v1079_v50, %v1014_v48 }
 0x114   : > { %v1012_v45 = vpop.permute.xlu0 %1011 }
 0x115   : > { %v1158_v54 = vpop.permute.xlu1 %1157  ;;  %v4272_v23 = vsel %vm1080_vm5, %v1078_v12, %v1012_v45 }
 0x116   : > { %2815 = vmatprep.mubr.msk.f32.mxu1 %vm1226_vm6, %v4272_v23  ;;  %2923 = vmatprep.mubr.msk.f32.mxu0 %vm1226_vm6, %v4272_v23  ;;  %v1204_v22 = vsel %vm1047_vm4, %v4767_v6, %v1158_v54 }
 0x117   : > { %2816 = vmatmul.mubr.msk.f32.gmra.mrb[22].mxu1 %vm1226_vm6, %v4269_v20  ;;  %2924 = vmatmul.mubr.msk.f32.gmra.mrb[14].mxu0 %vm1226_vm6, %v4269_v20 }
 0x118   : > { %v1156_v11 = vpop.permute.xlu0 %1155 }
 0x119   : > { %v1182_v37 = vpop.permute.xlu1 %1181  ;;  %v1203_v29 = vsel %vm1047_vm4, %v4768_v43, %v1156_v11 }
 0x11a   : > { %v1212_v33 = vsel %vm1080_vm5, %v1204_v22, %v1182_v37 }
 0x11c   : > { %v1180_v51 = vpop.permute.xlu0 %1179 }
 0x11d   : > { %v1162_v2 = vpop.permute.xlu1 %1161  ;;  %v1211_v5 = vsel %vm1080_vm5, %v1203_v29, %v1180_v51 }
 0x11e   : > { %2818 = vmatprep.mubr.msk.f32.mxu1 %vm1226_vm6, %v1211_v5  ;;  %2926 = vmatprep.mubr.msk.f32.mxu0 %vm1226_vm6, %v1211_v5  ;;  %v1206_v56 = vsel %vm1047_vm4, %v4769_v19, %v1162_v2 }
 0x11f   : > { %2819 = vmatmul.mubr.msk.f32.gmra.mrb[24].mxu1 %vm1226_vm6, %v1212_v33  ;;  %2927 = vmatmul.mubr.msk.f32.gmra.mrb[16].mxu0 %vm1226_vm6, %v1212_v33 }
 0x120   : > { %v1160_v18 = vpop.permute.xlu0 %1159 }
 0x121   : > { %v1186_v27 = vpop.permute.xlu1 %1185  ;;  %v1205_v13 = vsel %vm1047_vm4, %v3755_v0, %v1160_v18 }
 0x122   : > { %v1214_v28 = vsel %vm1080_vm5, %v1206_v56, %v1186_v27 }
 0x124   : > { %v1184_v24 = vpop.permute.xlu0 %1183 }
 0x125   : > { %v1166_v26 = vpop.permute.xlu1 %1165  ;;  %v1213_v4 = vsel %vm1080_vm5, %v1205_v13, %v1184_v24 }
 0x126   : > { %2821 = vmatprep.mubr.msk.f32.mxu1 %vm1226_vm6, %v1213_v4  ;;  %2929 = vmatprep.mubr.msk.f32.mxu0 %vm1226_vm6, %v1213_v4  ;;  %v1208_v55 = vsel %vm1047_vm4, %v3865_v3, %v1166_v26 }
 0x127   : > { %2822 = vmatmul.mubr.msk.f32.gmra.mrb[26].mxu1 %vm1226_vm6, %v1214_v28  ;;  %2930 = vmatmul.mubr.msk.f32.gmra.mrb[18].mxu0 %vm1226_vm6, %v1214_v28 }
 0x128   : > { %v1164_v15 = vpop.permute.xlu0 %1163 }
 0x129   : > { %v1190_v63 = vpop.permute.xlu1 %1189  ;;  %v1207_v0 = vsel %vm1047_vm4, %v3806_v61, %v1164_v15 }
 0x12a   : > { %v1216_v32 = vsel %vm1080_vm5, %v1208_v55, %v1190_v63 }
 0x12c   : > { %v1188_v1 = vpop.permute.xlu0 %1187 }
 0x12d   : > { %v1170_v47 = vpop.permute.xlu1 %1169  ;;  %v1215_v49 = vsel %vm1080_vm5, %v1207_v0, %v1188_v1 }
 0x12e   : > { %2824 = vmatprep.mubr.msk.f32.mxu1 %vm1226_vm6, %v1215_v49  ;;  %2932 = vmatprep.mubr.msk.f32.mxu0 %vm1226_vm6, %v1215_v49  ;;  %v1210_v3 = vsel %vm1047_vm4, %v3930_v10, %v1170_v47 }
 0x12f   : > { %2825 = vmatmul.mubr.msk.f32.gmra.mrb[28].mxu1 %vm1226_vm6, %v1216_v32  ;;  %2933 = vmatmul.mubr.msk.f32.gmra.mrb[20].mxu0 %vm1226_vm6, %v1216_v32 }
 0x130   : > { %v1168_v48 = vpop.permute.xlu0 %1167 }
 0x131   : > { %v1194_v44 = vpop.permute.xlu1 %1193  ;;  %v1209_v61 = vsel %vm1047_vm4, %v3870_v52, %v1168_v48 }
 0x132   : > { %v1218_v14 = vsel %vm1080_vm5, %v1210_v3, %v1194_v44 }
 0x134   : > { %v1192_v50 = vpop.permute.xlu0 %1191 }
 0x135   : > { %v1836_v25 = vpop.permute.xlu1 %1835  ;;  %v1217_v54 = vsel %vm1080_vm5, %v1209_v61, %v1192_v50 }
 0x136   : > { %2827 = vmatprep.mubr.msk.f32.mxu1 %vm1226_vm6, %v1217_v54  ;;  %2935 = vmatprep.mubr.msk.f32.mxu0 %vm1226_vm6, %v1217_v54  ;;  %v1882_v52 = vsel %vm1047_vm4, %v3976_v42, %v1836_v25 }
 0x137   : > { %2828 = vmatmul.mubr.msk.f32.gmra.mrb[30].mxu1 %vm1226_vm6, %v1218_v14  ;;  %2936 = vmatmul.mubr.msk.f32.gmra.mrb[22].mxu0 %vm1226_vm6, %v1218_v14 }
 0x138   : > { %2866 = vmatprep.mubr.msk.f32.mxu1 %vm1226_vm6, %v4133_v60  ;;  %v1834_v10 = vpop.permute.xlu0 %1833 }
 0x139   : > { %v1860_v41 = vpop.permute.xlu1 %1859  ;;  %v1881_v45 = vsel %vm1047_vm4, %v3991_v16, %v1834_v10 }
 0x13a   : > { %v1890_v37 = vsel %vm1080_vm5, %v1882_v52, %v1860_v41 }
 0x13b   : > { %2867 = vmatmul.mubr.msk.f32.vlgmr.msra.gmra.mrb[16].mxu1 %vm1226_vm6, %v4130_v38 }
 0x13c   : > { %2869 = vmatprep.mubr.msk.f32.mxu1 %vm1226_vm6, %v4159_v34  ;;  %v1858_v11 = vpop.permute.xlu0 %1857 }
 0x13d   : > { %v1840_v12 = vpop.permute.xlu1 %1839  ;;  %v1889_v6 = vsel %vm1080_vm5, %v1881_v45, %v1858_v11 }
 0x13e   : > { %2938 = vmatprep.mubr.msk.f32.mxu0 %vm1226_vm6, %v1889_v6  ;;  %v1884_v38 = vsel %vm1047_vm4, %v4024_v35, %v1840_v12 }
 0x13f   : > { %2870 = vmatmul.mubr.msk.f32.gmra.mrb[18].mxu1 %vm1226_vm6, %v4156_v8  ;;  %2939 = vmatmul.mubr.msk.f32.gmra.mrb[24].mxu0 %vm1226_vm6, %v1890_v37 }
 0x140   : > { %2872 = vmatprep.mubr.msk.f32.mxu1 %vm1226_vm6, %v4180_v62  ;;  %v1838_v16 = vpop.permute.xlu0 %1837 }
 0x141   : > { %v1864_v42 = vpop.permute.xlu1 %1863  ;;  %v1883_v34 = vsel %vm1047_vm4, %v3979_v46, %v1838_v16 }
 0x142   : > { %v1892_v22 = vsel %vm1080_vm5, %v1884_v38, %v1864_v42 }
 0x143   : > { %2873 = vmatmul.mubr.msk.f32.gmra.mrb[20].mxu1 %vm1226_vm6, %v4177_v40 }
 0x144   : > { %2875 = vmatprep.mubr.msk.f32.mxu1 %vm1226_vm6, %v4200_v30  ;;  %v1862_v8 = vpop.permute.xlu0 %1861 }
 0x145   : > { %v1844_v60 = vpop.permute.xlu1 %1843  ;;  %v1891_v2 = vsel %vm1080_vm5, %v1883_v34, %v1862_v8 }
 0x146   : > { %2941 = vmatprep.mubr.msk.f32.mxu0 %vm1226_vm6, %v1891_v2  ;;  %v1886_v40 = vsel %vm1047_vm4, %v4061_v21, %v1844_v60 }
 0x147   : > { %2876 = vmatmul.mubr.msk.f32.gmra.mrb[22].mxu1 %vm1226_vm6, %v4197_v59  ;;  %2942 = vmatmul.mubr.msk.f32.gmra.mrb[26].mxu0 %vm1226_vm6, %v1892_v22 }
 0x148   : > { %2878 = vmatprep.mubr.msk.f32.mxu1 %vm1226_vm6, %v4218_v39  ;;  %v1842_v46 = vpop.permute.xlu0 %1841 }
 0x149   : > { %v1868_v35 = vpop.permute.xlu1 %1867  ;;  %v1885_v30 = vsel %vm1047_vm4, %v4027_v31, %v1842_v46 }
 0x14a   : > { %v1894_v43 = vsel %vm1080_vm5, %v1886_v40, %v1868_v35 }
 0x14b   : > { %2879 = vmatmul.mubr.msk.f32.gmra.mrb[24].mxu1 %vm1226_vm6, %v4215_v7 }
 0x14c   : > { %2881 = vmatprep.mubr.msk.f32.mxu1 %vm1226_vm6, %v4236_v57  ;;  %v1866_v59 = vpop.permute.xlu0 %1865 }
 0x14d   : > { %v1848_v62 = vpop.permute.xlu1 %1847  ;;  %v1893_v29 = vsel %vm1080_vm5, %v1885_v30, %v1866_v59 }
 0x14e   : > { %2944 = vmatprep.mubr.msk.f32.mxu0 %vm1226_vm6, %v1893_v29  ;;  %v1888_v7 = vsel %vm1047_vm4, %v4092_v53, %v1848_v62 }
 0x14f   : > { %2882 = vmatmul.mubr.msk.f32.gmra.mrb[26].mxu1 %vm1226_vm6, %v4233_v9  ;;  %2945 = vmatmul.mubr.msk.f32.gmra.mrb[28].mxu0 %vm1226_vm6, %v1894_v43 }
 0x150   : > { %2884 = vmatprep.mubr.msk.f32.mxu1 %vm1226_vm6, %v4254_v58  ;;  %v1846_v21 = vpop.permute.xlu0 %1845 }
 0x151   : > { %v1872_v31 = vpop.permute.xlu1 %1871  ;;  %v1887_v39 = vsel %vm1047_vm4, %v4064_v36, %v1846_v21 }
 0x152   : > { %v1896_v57 = vsel %vm1080_vm5, %v1888_v7, %v1872_v31 }
 0x153   : > { %2885 = vmatmul.mubr.msk.f32.gmra.mrb[28].mxu1 %vm1226_vm6, %v4251_v17 }
 0x154   : > { %2887 = vmatprep.mubr.msk.f32.mxu1 %vm1226_vm6, %v4272_v23  ;;  %v1870_v9 = vpop.permute.xlu0 %1869 }
 0x155   : > { %v1895_v58 = vsel %vm1080_vm5, %v1887_v39, %v1870_v9 }
 0x156   : > { %2947 = vmatprep.mubr.msk.f32.mxu0 %vm1226_vm6, %v1895_v58 }
 0x157   : > { %2888 = vmatmul.mubr.msk.f32.gmra.mrb[30].mxu1 %vm1226_vm6, %v4269_v20  ;;  %2948 = vmatmul.mubr.msk.f32.gmra.mrb[30].mxu0 %vm1226_vm6, %v1896_v57 }
 0x172   : > { %v2784_v53 = vpop.f32.mrb[0].mxu1 }
 0x173   : > { %v1389_v36 = vpop.f32.mrb[1].mxu1 }
 0x186   : > { %v2787_v17 = vpop.f32.mrb[2].mxu1 }
 0x187   : > { %v1399_v33 = vpop.f32.mrb[3].mxu1 }
 0x196   : > { %v2790_v51 = vpop.f32.mrb[4].mxu1 }
 0x197   : > { %v1409_v5 = vpop.f32.mrb[5].mxu1 }
 0x1a6   : > { %v2793_v27 = vpop.f32.mrb[6].mxu1 }
 0x1a7   : > { %v1419_v18 = vpop.f32.mrb[7].mxu1 }
 0x1b3   : > { %v2796_v23 = vpop.f32.mrb[8].mxu1 }
 0x1b4   : > { %v1429_v19 = vpop.f32.mrb[9].mxu1 }
 0x1ba   : > { %v2799_v56 = vpop.f32.mrb[10].mxu1 }
 0x1bb   : > { %v1439_v26 = vpop.f32.mrb[11].mxu1 }
 0x1be   : > { %v2904_v20 = vpop.f32.mrb[0].mxu0 }
 0x1bf   : > { %v4394_v13 = vadd.f32 %v2904_v20, %v2784_v53  ;;  %v1994_v28 = vpop.f32.mrb[1].mxu0 }
 0x1c0   : > { %v4396_v24 = vadd.f32 %v1994_v28, %v1389_v36 }
 0x1c1   : > { %2186 = vst.msk [vmem:[%s4392_s15 + $0x8] sm:$0xff] %vm1047_vm4, %v4394_v13 }
 0x1c2   : > { %2185 = vst.msk [vmem:[%s4392_s15] sm:$0xff] %vm1047_vm4, %v4396_v24  ;;  %v2907_v4 = vpop.f32.mrb[2].mxu0  ;;  %v2802_v63 = vpop.f32.mrb[12].mxu1 }
 0x1c3   : > { %v4404_v15 = vadd.f32 %v2907_v4, %v2787_v17  ;;  %v2004_v55 = vpop.f32.mrb[3].mxu0  ;;  %v1449_v47 = vpop.f32.mrb[13].mxu1 }
 0x1c4   : > { %v4406_v0 = vadd.f32 %v2004_v55, %v1399_v33 }
 0x1c5   : > { %2188 = vst.msk [vmem:[%s4392_s15 + $0x18] sm:$0xff] %vm1047_vm4, %v4404_v15 }
 0x1c6   : > { %2187 = vst.msk [vmem:[%s4392_s15 + $0x10] sm:$0xff] %vm1047_vm4, %v4406_v0  ;;  %v2910_v32 = vpop.f32.mrb[4].mxu0 }
 0x1c7   : > { %v4414_v1 = vadd.f32 %v2910_v32, %v2790_v51  ;;  %v2014_v49 = vpop.f32.mrb[5].mxu0 }
 0x1c8   : > { %v4416_v44 = vadd.f32 %v2014_v49, %v1409_v5 }
 0x1c9   : > { %2190 = vst.msk [vmem:[%s4392_s15 + $0x28] sm:$0xff] %vm1047_vm4, %v4414_v1 }
 0x1ca   : > { %2189 = vst.msk [vmem:[%s4392_s15 + $0x20] sm:$0xff] %vm1047_vm4, %v4416_v44  ;;  %v2805_v48 = vpop.f32.mrb[14].mxu1  ;;  %v2913_v3 = vpop.f32.mrb[6].mxu0 }
 0x1cb   : > { %v4424_v25 = vadd.f32 %v2913_v3, %v2793_v27  ;;  %v1459_v61 = vpop.f32.mrb[15].mxu1  ;;  %v2024_v14 = vpop.f32.mrb[7].mxu0 }
 0x1cc   : > { %v4426_v50 = vadd.f32 %v2024_v14, %v1419_v18 }
 0x1cd   : > { %2192 = vst.msk [vmem:[%s4392_s15 + $0x38] sm:$0xff] %vm1047_vm4, %v4424_v25 }
 0x1ce   : > { %2191 = vst.msk [vmem:[%s4392_s15 + $0x30] sm:$0xff] %vm1047_vm4, %v4426_v50 }
 0x1d2   : > { %v2916_v54 = vpop.f32.mrb[8].mxu0 }
 0x1d3   : > { %v4434_v41 = vadd.f32 %v2916_v54, %v2796_v23  ;;  %v2034_v10 = vpop.f32.mrb[9].mxu0 }
 0x1d4   : > { %v4436_v52 = vadd.f32 %v2034_v10, %v1429_v19 }
 0x1d5   : > { %2194 = vst.msk [vmem:[%s4392_s15 + $0x48] sm:$0xff] %vm1047_vm4, %v4434_v41 }
 0x1d6   : > { %2193 = vst.msk [vmem:[%s4392_s15 + $0x40] sm:$0xff] %vm1047_vm4, %v4436_v52 }
 0x1da   : > { %v2919_v12 = vpop.f32.mrb[10].mxu0 }
 0x1db   : > { %v4444_v45 = vadd.f32 %v2919_v12, %v2799_v56  ;;  %v2044_v37 = vpop.f32.mrb[11].mxu0 }
 0x1dc   : > { %v4446_v11 = vadd.f32 %v2044_v37, %v1439_v26 }
 0x1dd   : > { %2196 = vst.msk [vmem:[%s4392_s15 + $0x58] sm:$0xff] %vm1047_vm4, %v4444_v45 }
 0x1de   : > { %2195 = vst.msk [vmem:[%s4392_s15 + $0x50] sm:$0xff] %vm1047_vm4, %v4446_v11 }
 0x1e2   : > { %v2922_v6 = vpop.f32.mrb[12].mxu0 }
 0x1e3   : > { %v4454_v42 = vadd.f32 %v2922_v6, %v2802_v63  ;;  %v2054_v16 = vpop.f32.mrb[13].mxu0 }
 0x1e4   : > { %v4456_v38 = vadd.f32 %v2054_v16, %v1449_v47 }
 0x1e5   : > { %2198 = vst.msk [vmem:[%s4392_s15 + $0x68] sm:$0xff] %vm1047_vm4, %v4454_v42 }
 0x1e6   : > { %2197 = vst.msk [vmem:[%s4392_s15 + $0x60] sm:$0xff] %vm1047_vm4, %v4456_v38 }
 0x1ea   : > { %v2925_v60 = vpop.f32.mrb[14].mxu0 }
 0x1eb   : > { %v4464_v34 = vadd.f32 %v2925_v60, %v2805_v48  ;;  %v2064_v22 = vpop.f32.mrb[15].mxu0 }
 0x1ec   : > { %v4466_v8 = vadd.f32 %v2064_v22, %v1459_v61 }
 0x1ed   : > { %2200 = vst.msk [vmem:[%s4392_s15 + $0x78] sm:$0xff] %vm1047_vm4, %v4464_v34 }
 0x1ee   : > { %2199 = vst.msk [vmem:[%s4392_s15 + $0x70] sm:$0xff] %vm1047_vm4, %v4466_v8 }
 0x1f2   : > { %v2928_v2 = vpop.f32.mrb[16].mxu0 }
 0x1f3   : > { %v2074_v35 = vpop.f32.mrb[17].mxu0 }
 0x1fa   : > { %v2931_v46 = vpop.f32.mrb[18].mxu0 }
 0x1fb   : > { %v2084_v40 = vpop.f32.mrb[19].mxu0 }
 0x202   : > { %v2934_v62 = vpop.f32.mrb[20].mxu0 }
 0x203   : > { %v2094_v30 = vpop.f32.mrb[21].mxu0 }
 0x20a   : > { %v2937_v43 = vpop.f32.mrb[22].mxu0 }
 0x20b   : > { %v2104_v59 = vpop.f32.mrb[23].mxu0 }
 0x20e   : > { %v2868_v29 = vpop.f32.mrb[16].mxu1 }
 0x20f   : > { %v4474_v21 = vadd.f32 %v2928_v2, %v2868_v29  ;;  %v1718_v31 = vpop.f32.mrb[17].mxu1  ;;  %v3143_v2 = vmov (!%p2651_p11), 0.0  }
 0x210   : > { %v4476_v7 = vadd.f32 %v2074_v35, %v1718_v31  ;;  %2221 = vst.msk [vmem:[%s3223_s9] sm:$0x3] (!%p2651_p11), %vm2220_vm8, %v3143_v2 }
 0x211   : > { %2202 = vst.msk [vmem:[%s4392_s15 + $0x88] sm:$0xff] %vm1047_vm4, %v4474_v21 }
 0x212   : > { %2201 = vst.msk [vmem:[%s4392_s15 + $0x80] sm:$0xff] %vm1047_vm4, %v4476_v7  ;;  %v2871_v39 = vpop.f32.mrb[18].mxu1  ;;  %v2940_v57 = vpop.f32.mrb[24].mxu0 }
 0x213   : > { %v4484_v9 = vadd.f32 %v2931_v46, %v2871_v39  ;;  %v1728_v58 = vpop.f32.mrb[19].mxu1  ;;  %v2114_v53 = vpop.f32.mrb[25].mxu0 }
 0x214   : > { %v4486_v36 = vadd.f32 %v2084_v40, %v1728_v58 }
 0x215   : > { %2204 = vst.msk [vmem:[%s4392_s15 + $0x98] sm:$0xff] %vm1047_vm4, %v4484_v9 }
 0x216   : > { %2203 = vst.msk [vmem:[%s4392_s15 + $0x90] sm:$0xff] %vm1047_vm4, %v4486_v36  ;;  %v2874_v17 = vpop.f32.mrb[20].mxu1 }
 0x217   : > { %v4494_v33 = vadd.f32 %v2934_v62, %v2874_v17  ;;  %v1738_v51 = vpop.f32.mrb[21].mxu1 }
 0x218   : > { %v4496_v5 = vadd.f32 %v2094_v30, %v1738_v51 }
 0x219   : > { %2206 = vst.msk [vmem:[%s4392_s15 + $0xa8] sm:$0xff] %vm1047_vm4, %v4494_v33 }
 0x21a   : > { %2205 = vst.msk [vmem:[%s4392_s15 + $0xa0] sm:$0xff] %vm1047_vm4, %v4496_v5  ;;  %v2877_v27 = vpop.f32.mrb[22].mxu1  ;;  %v2943_v18 = vpop.f32.mrb[26].mxu0 }
 0x21b   : > { %v4504_v23 = vadd.f32 %v2937_v43, %v2877_v27  ;;  %v1748_v19 = vpop.f32.mrb[23].mxu1  ;;  %v2124_v56 = vpop.f32.mrb[27].mxu0 }
 0x21c   : > { %v4506_v26 = vadd.f32 %v2104_v59, %v1748_v19 }
 0x21d   : > { %2208 = vst.msk [vmem:[%s4392_s15 + $0xb8] sm:$0xff] %vm1047_vm4, %v4504_v23 }
 0x21e   : > { %2207 = vst.msk [vmem:[%s4392_s15 + $0xb0] sm:$0xff] %vm1047_vm4, %v4506_v26  ;;  %v2880_v20 = vpop.f32.mrb[24].mxu1 }
 0x21f   : > { %v4514_v28 = vadd.f32 %v2940_v57, %v2880_v20  ;;  %v1758_v4 = vpop.f32.mrb[25].mxu1 }
 0x220   : > { %v4516_v63 = vadd.f32 %v2114_v53, %v1758_v4 }
 0x221   : > { %2210 = vst.msk [vmem:[%s4392_s15 + $0xc8] sm:$0xff] %vm1047_vm4, %v4514_v28 }
 0x222   : > { %2209 = vst.msk [vmem:[%s4392_s15 + $0xc0] sm:$0xff] %vm1047_vm4, %v4516_v63  ;;  %v2883_v55 = vpop.f32.mrb[26].mxu1  ;;  %v2946_v47 = vpop.f32.mrb[28].mxu0 }
 0x223   : > { %v4524_v32 = vadd.f32 %v2943_v18, %v2883_v55  ;;  %v1768_v49 = vpop.f32.mrb[27].mxu1  ;;  %v2134_v48 = vpop.f32.mrb[29].mxu0 }
 0x224   : > { %v4526_v3 = vadd.f32 %v2124_v56, %v1768_v49 }
 0x225   : > { %2212 = vst.msk [vmem:[%s4392_s15 + $0xd8] sm:$0xff] %vm1047_vm4, %v4524_v32 }
 0x226   : > { %2211 = vst.msk [vmem:[%s4392_s15 + $0xd0] sm:$0xff] %vm1047_vm4, %v4526_v3  ;;  %v2886_v61 = vpop.f32.mrb[28].mxu1 }
 0x227   : > { %v4534_v14 = vadd.f32 %v2946_v47, %v2886_v61  ;;  %v1778_v54 = vpop.f32.mrb[29].mxu1 }
 0x228   : > { %v4536_v10 = vadd.f32 %v2134_v48, %v1778_v54  ;;  %2219 = sbr.rel (%p2651_p11) target bundleno = 559 (0x22f), region = 40 }
 0x229   : > { %2214 = vst.msk [vmem:[%s4392_s15 + $0xe8] sm:$0xff] %vm1047_vm4, %v4534_v14 }
 0x22a   : > { %2213 = vst.msk [vmem:[%s4392_s15 + $0xe0] sm:$0xff] %vm1047_vm4, %v4536_v10  ;;  %v2889_v12 = vpop.f32.mrb[30].mxu1  ;;  %v2949_v37 = vpop.f32.mrb[30].mxu0 }
 0x22b   : > { %v4544_v6 = vadd.f32 %v2949_v37, %v2889_v12  ;;  %v1788_v16 = vpop.f32.mrb[31].mxu1  ;;  %v2144_v60 = vpop.f32.mrb[31].mxu0 }
 0x22c   : > { %v4546_v22 = vadd.f32 %v2144_v60, %v1788_v16 }
 0x22d   : > { %2216 = vst.msk [vmem:[%s4392_s15 + $0xf8] sm:$0xff] %vm1047_vm4, %v4544_v6 }
 0x22e   : > { %2215 = vst.msk [vmem:[%s4392_s15 + $0xf0] sm:$0xff] %vm1047_vm4, %v4546_v22 }
 0x22f PF: > { %v2222_v35 = vsel %vm1047_vm4, %v4396_v24, 0.0  ;;  %v2223_v46 = vsel %vm1047_vm4, %v4394_v13, 0.0  ;;  %v2225_v40 = vsel %vm1047_vm4, %v4406_v0, 0.0  ;;  %v2227_v30 = vsel %vm1047_vm4, %v4404_v15, 0.0 }
 0x230   : > { %v2224_v62 = vadd.f32 %v2223_v46, %v2222_v35  ;;  %v2229_v59 = vsel %vm1047_vm4, %v4416_v44, 0.0  ;;  %v2231_v31 = vsel %vm1047_vm4, %v4414_v1, 0.0  ;;  %v2233_v57 = vsel %vm1047_vm4, %v4426_v50, 0.0 }
 0x231   : > { %v2235_v53 = vsel %vm1047_vm4, %v4424_v25, 0.0  ;;  %v2237_v51 = vsel %vm1047_vm4, %v4436_v52, 0.0  ;;  %v2239_v18 = vsel %vm1047_vm4, %v4434_v41, 0.0  ;;  %v2291_v19 = vmul.f32 %v4396_v24, %v4396_v24 }
 0x232   : > { %v2226_v43 = vadd.f32 %v2225_v40, %v2224_v62  ;;  %v2292_v56 = vmul.f32 %v4394_v13, %v4394_v13  ;;  %v2293_v20 = vmul.f32 %v4406_v0, %v4406_v0  ;;  %v2241_v55 = vsel %vm1047_vm4, %v4446_v11, 0.0 }
 0x233   : > { %v2294_v47 = vmul.f32 %v4404_v15, %v4404_v15  ;;  %v2243_v48 = vsel %vm1047_vm4, %v4444_v45, 0.0  ;;  %v2295_v24 = vmul.f32 %v4416_v44, %v4416_v44  ;;  %v2323_v61 = vsel %vm1047_vm4, %v2291_v19, 0.0 }
 0x234   : > { %v2228_v29 = vadd.f32 %v2227_v30, %v2226_v43  ;;  %v2324_v13 = vsel %vm1047_vm4, %v2292_v56, 0.0  ;;  %v2326_v0 = vsel %vm1047_vm4, %v2293_v20, 0.0  ;;  %v2245_v37 = vsel %vm1047_vm4, %v4456_v38, 0.0 }
 0x235   : > { %v2325_v12 = vadd.f32 %v2324_v13, %v2323_v61  ;;  %v2296_v15 = vmul.f32 %v4414_v1, %v4414_v1  ;;  %v2328_v16 = vsel %vm1047_vm4, %v2294_v47, 0.0  ;;  %v2247_v44 = vsel %vm1047_vm4, %v4454_v42, 0.0 }
 0x236   : > { %v2230_v39 = vadd.f32 %v2229_v59, %v2228_v29  ;;  %v2297_v35 = vmul.f32 %v4426_v50, %v4426_v50  ;;  %v2330_v46 = vsel %vm1047_vm4, %v2295_v24, 0.0  ;;  %v2249_v30 = vsel %vm1047_vm4, %v4466_v8, 0.0 }
 0x237   : > { %v2327_v2 = vadd.f32 %v2326_v0, %v2325_v12  ;;  %v2298_v1 = vmul.f32 %v4424_v25, %v4424_v25  ;;  %v2332_v43 = vsel %vm1047_vm4, %v2296_v15, 0.0  ;;  %v2299_v50 = vmul.f32 %v4436_v52, %v4436_v52 }
 0x238   : > { %v2232_v58 = vadd.f32 %v2231_v31, %v2230_v39  ;;  %v2251_v31 = vsel %vm1047_vm4, %v4464_v34, 0.0  ;;  %v2334_v39 = vsel %vm1047_vm4, %v2297_v35, 0.0  ;;  %v2300_v25 = vmul.f32 %v4434_v41, %v4434_v41 }
 0x239   : > { %v2329_v62 = vadd.f32 %v2328_v16, %v2327_v2  ;;  %v2301_v52 = vmul.f32 %v4446_v11, %v4446_v11  ;;  %v2338_v19 = vsel %vm1047_vm4, %v2299_v50, 0.0  ;;  %v2302_v41 = vmul.f32 %v4444_v45, %v4444_v45 }
 0x23a   : > { %v2234_v17 = vadd.f32 %v2233_v57, %v2232_v58  ;;  %v2303_v11 = vmul.f32 %v4456_v38, %v4456_v38  ;;  %v2261_v0 = vsel %vm1047_vm4, %v4496_v5, 0.0  ;;  %v2304_v45 = vmul.f32 %v4454_v42, %v4454_v42 }
 0x23b   : > { %v2331_v29 = vadd.f32 %v2330_v46, %v2329_v62  ;;  %v2342_v24 = vsel %vm1047_vm4, %v2301_v52, 0.0  ;;  %v2263_v15 = vsel %vm1047_vm4, %v4494_v33, 0.0  ;;  %v2305_v38 = vmul.f32 %v4466_v8, %v4466_v8 }
 0x23c   : > { %v2236_v27 = vadd.f32 %v2235_v53, %v2234_v17  ;;  %v2253_v53 = vsel %vm1047_vm4, %v4476_v7, 0.0  ;;  %v2336_v17 = vsel %vm1047_vm4, %v2298_v1, 0.0  ;;  %v2346_v16 = vsel %vm1047_vm4, %v2303_v11, 0.0 }
 0x23d   : > { %v2333_v58 = vadd.f32 %v2332_v43, %v2331_v29  ;;  %v2306_v42 = vmul.f32 %v4464_v34, %v4464_v34  ;;  %v2348_v35 = vsel %vm1047_vm4, %v2304_v45, 0.0  ;;  %v2267_v62 = vsel %vm1047_vm4, %v4504_v23, 0.0 }
 0x23e   : > { %v2238_v4 = vadd.f32 %v2237_v51, %v2236_v27  ;;  %v2307_v8 = vmul.f32 %v4476_v7, %v4476_v7  ;;  %v2308_v34 = vmul.f32 %v4474_v21, %v4474_v21  ;;  %v2309_v7 = vmul.f32 %v4486_v36, %v4486_v36 }
 0x23f   : > { %v2335_v27 = vadd.f32 %v2334_v39, %v2333_v58  ;;  %v2352_v29 = vsel %vm1047_vm4, %v2306_v42, 0.0  ;;  %v2271_v39 = vsel %vm1047_vm4, %v4514_v28, 0.0  ;;  %v2315_v45 = vmul.f32 %v4516_v63, %v4516_v63 }
 0x240   : > { %v2240_v49 = vadd.f32 %v2239_v18, %v2238_v4  ;;  %v2255_v18 = vsel %vm1047_vm4, %v4474_v21, 0.0  ;;  %v2257_v4 = vsel %vm1047_vm4, %v4486_v36, 0.0  ;;  %v2310_v21 = vmul.f32 %v4484_v9, %v4484_v9 }
 0x241   : > { %v2337_v20 = vadd.f32 %v2336_v17, %v2335_v27  ;;  %v2356_v17 = vsel %vm1047_vm4, %v2308_v34, 0.0  ;;  %v2311_v36 = vmul.f32 %v4496_v5, %v4496_v5  ;;  %v2358_v52 = vsel %vm1047_vm4, %v2309_v7, 0.0 }
 0x242   : > { %v2242_v54 = vadd.f32 %v2241_v55, %v2240_v49  ;;  %v2340_v55 = vsel %vm1047_vm4, %v2300_v25, 0.0  ;;  %v2273_v25 = vsel %vm1047_vm4, %v4526_v3, 0.0  ;;  %v2313_v5 = vmul.f32 %v4506_v26, %v4506_v26 }
 0x243   : > { %v2339_v49 = vadd.f32 %v2338_v19, %v2337_v20  ;;  %v2277_v20 = vsel %vm1047_vm4, %v4536_v10, 0.0  ;;  %vm2395_vm9 = vcmask 123904  }
 0x244   : > { %v2244_v60 = vadd.f32 %v2243_v48, %v2242_v54  ;;  %v2259_v48 = vsel %vm1047_vm4, %v4484_v9, 0.0  ;;  %v2344_v54 = vsel %vm1047_vm4, %v2302_v41, 0.0  ;;  %v2312_v9 = vmul.f32 %v4494_v33, %v4494_v33 }
 0x245   : > { %v2341_v13 = vadd.f32 %v2340_v55, %v2339_v49  ;;  %v2362_v49 = vsel %vm1047_vm4, %v2311_v36, 0.0 }
 0x246   : > { %v2246_v40 = vadd.f32 %v2245_v37, %v2244_v60 }
 0x247   : > { %v2343_v37 = vadd.f32 %v2342_v24, %v2341_v13  ;;  %v2314_v24 = vmul.f32 %v4504_v23, %v4504_v23 }
 0x248   : > { %v2248_v59 = vadd.f32 %v2247_v44, %v2246_v40  ;;  %v2265_v44 = vsel %vm1047_vm4, %v4506_v26, 0.0 }
 0x249   : > { %v2345_v2 = vadd.f32 %v2344_v54, %v2343_v37  ;;  %v2366_v54 = vsel %vm1047_vm4, %v2313_v5, 0.0  ;;  %v2368_v37 = vsel %vm1047_vm4, %v2314_v24, 0.0 }
 0x24a   : > { %v2250_v57 = vadd.f32 %v2249_v30, %v2248_v59  ;;  %v2350_v30 = vsel %vm1047_vm4, %v2305_v38, 0.0  ;;  %v2269_v59 = vsel %vm1047_vm4, %v4516_v63, 0.0  ;;  %v2283_v38 = vsel %vm1047_vm4, %v4544_v6, 0.0 }
 0x24b   : > { %v2347_v40 = vadd.f32 %v2346_v16, %v2345_v2  ;;  %v2317_v16 = vmul.f32 %v4526_v3, %v4526_v3  ;;  %v2318_v63 = vmul.f32 %v4524_v32, %v4524_v32 }
 0x24c   : > { %v2252_v51 = vadd.f32 %v2251_v31, %v2250_v57  ;;  %v2354_v57 = vsel %vm1047_vm4, %v2307_v8, 0.0 }
 0x24d   : > { %v2349_v43 = vadd.f32 %v2348_v35, %v2347_v40  ;;  %v2319_v35 = vmul.f32 %v4536_v10, %v4536_v10  ;;  %v2376_v3 = vsel %vm1047_vm4, %v2318_v63, 0.0 }
 0x24e   : > { %v2254_v56 = vadd.f32 %v2253_v53, %v2252_v51 }
 0x24f   : > { %v2351_v50 = vadd.f32 %v2350_v30, %v2349_v43 }
 0x250   : > { %v2256_v47 = vadd.f32 %v2255_v18, %v2254_v56  ;;  %v2275_v18 = vsel %vm1047_vm4, %v4524_v32, 0.0  ;;  %v2321_v32 = vmul.f32 %v4546_v22, %v4546_v22 }
 0x251   : > { %v2353_v53 = vadd.f32 %v2352_v29, %v2351_v50 }
 0x252   : > { %v2258_v61 = vadd.f32 %v2257_v4, %v2256_v47  ;;  %v2360_v4 = vsel %vm1047_vm4, %v2310_v21, 0.0  ;;  %v2279_v47 = vsel %vm1047_vm4, %v4534_v14, 0.0 }
 0x253   : > { %v2355_v27 = vadd.f32 %v2354_v57, %v2353_v53 }
 0x254   : > { %v2260_v12 = vadd.f32 %v2259_v48, %v2258_v61  ;;  %v2364_v61 = vsel %vm1047_vm4, %v2312_v9, 0.0 }
 0x255   : > { %v2357_v56 = vadd.f32 %v2356_v17, %v2355_v27 }
 0x256   : > { %v2262_v60 = vadd.f32 %v2261_v0, %v2260_v12  ;;  %v2281_v0 = vsel %vm1047_vm4, %v4546_v22, 0.0  ;;  %v2316_v12 = vmul.f32 %v4514_v28, %v4514_v28 }
 0x257   : > { %v2359_v55 = vadd.f32 %v2358_v52, %v2357_v56 }
 0x258   : > { %v2264_v46 = vadd.f32 %v2263_v15, %v2262_v60  ;;  %v2370_v60 = vsel %vm1047_vm4, %v2315_v45, 0.0 }
 0x259   : > { %v2361_v11 = vadd.f32 %v2360_v4, %v2359_v55 }
 0x25a   : > { %v2266_v1 = vadd.f32 %v2265_v44, %v2264_v46  ;;  %v2372_v44 = vsel %vm1047_vm4, %v2316_v12, 0.0  ;;  %v2374_v46 = vsel %vm1047_vm4, %v2317_v16, 0.0 }
 0x25b   : > { %v2363_v13 = vadd.f32 %v2362_v49, %v2361_v11 }
 0x25c   : > { %v2268_v31 = vadd.f32 %v2267_v62, %v2266_v1  ;;  %v2320_v62 = vmul.f32 %v4534_v14, %v4534_v14  ;;  %v2378_v1 = vsel %vm1047_vm4, %v2319_v35, 0.0  ;;  %v2382_v14 = vsel %vm1047_vm4, %v2321_v32, 0.0 }
 0x25d   : > { %v2365_v26 = vadd.f32 %v2364_v61, %v2363_v13 }
 0x25e   : > { %v2270_v58 = vadd.f32 %v2269_v59, %v2268_v31  ;;  %v2322_v59 = vmul.f32 %v4544_v6, %v4544_v6  ;;  %v2380_v10 = vsel %vm1047_vm4, %v2320_v62, 0.0 }
 0x25f   : > { %v2367_v23 = vadd.f32 %v2366_v54, %v2365_v26 }
 0x260   : > { %v2272_v51 = vadd.f32 %v2271_v39, %v2270_v58  ;;  %v2384_v50 = vsel %vm1047_vm4, %v2322_v59, 0.0 }
 0x261   : > { %v2369_v2 = vadd.f32 %v2368_v37, %v2367_v23 }
 0x262   : > { %v2274_v19 = vadd.f32 %v2273_v25, %v2272_v51 }
 0x263   : > { %v2371_v28 = vadd.f32 %v2370_v60, %v2369_v2 }
 0x264   : > { %v2276_v41 = vadd.f32 %v2275_v18, %v2274_v19  ;;  %v2392_v18 = vld [vmem:[%s3223_s9] sm:$0x3] }
 0x265   : > { %v2373_v40 = vadd.f32 %v2372_v44, %v2371_v28 }
 0x266   : > { %v2278_v48 = vadd.f32 %v2277_v20, %v2276_v41 }
 0x267   : > { %v2375_v30 = vadd.f32 %v2374_v46, %v2373_v40 }
 0x268   : > { %v2280_v33 = vadd.f32 %v2279_v47, %v2278_v48 }
 0x269   : > { %v2377_v43 = vadd.f32 %v2376_v3, %v2375_v30 }
 0x26a   : > { %v2282_v15 = vadd.f32 %v2281_v0, %v2280_v33 }
 0x26b   : > { %v2379_v29 = vadd.f32 %v2378_v1, %v2377_v43 }
 0x26c   : > { %v2284_v42 = vadd.f32 %v2283_v38, %v2282_v15 }
 0x26d   : > { %v2381_v31 = vadd.f32 %v2380_v10, %v2379_v29 }
 0x26e   : > { %v2285_v8 = vrot.slane %v2284_v42, 4 }
 0x26f   : > { %v2383_v7 = vadd.f32 %v2382_v14, %v2381_v31 }
 0x270   : > { %v2286_v34 = vadd.f32 %v2285_v8, %v2284_v42 }
 0x271   : > { %v2385_v22 = vadd.f32 %v2384_v50, %v2383_v7 }
 0x272   : > { %v2287_v39 = vrot.slane %v2286_v34, 2 }
 0x273   : > { %v2386_v58 = vrot.slane %v2385_v22, 4 }
 0x274   : > { %v2288_v57 = vadd.f32 %v2287_v39, %v2286_v34 }
 0x275   : > { %v2387_v53 = vadd.f32 %v2386_v58, %v2385_v22 }
 0x276   : > { %v2289_v25 = vrot.slane %v2288_v57, 1 }
 0x277   : > { %v2388_v21 = vrot.slane %v2387_v53, 2 }
 0x278   : > { %v2290_v17 = vadd.f32 %v2289_v25, %v2288_v57 }
 0x279   : > { %v2389_v6 = vadd.f32 %v2388_v21, %v2387_v53 }
 0x27b   : > { %v2390_v51 = vrot.slane %v2389_v6, 1 }
 0x27d   : > { %v2391_v27 = vadd.f32 %v2390_v51, %v2389_v6 }
 0x27f   : > { %v2393_v36 = vsel %vm552_vm0, %v2290_v17, %v2391_v27 }
 0x280   : > { %v2394_v52 = vadd.f32 %v2393_v36, %v2392_v18 }
 0x282   : > { %2396 = vst.msk [vmem:[%s3223_s9] sm:$0x3] %vm2395_vm9, %v2394_v52 }
 0x283 PF: > { %s16_s22 = sadd.s32 1, %s3139_s22   ;;  %s4770_s18 = smov %s3131_s20 }
 0x284   : > { %p13_p12 = scmp.ge.s32.totalorder %s16_s22, 34   ;;  %s4771_s19 = smov %s3135_s21 }
 0x285   : > { %s4772_s20 = smov %s4775_s23  ;;  %s4773_s21 = smov %s4779_s24 }
 0x286   :  { %15 = sbr.rel (!%p13_p12) target bundleno = 3 (0x3), region = 87 }

// kernel: tiny_ssd_forward.6
= control target key start
LH: loop header
LB: loop body
LE: loop exit
PB: predicated region body
PF: predicated region fallthrough
CT: control target
= control target key end

     0   :  { %s3006_s18 = smov 0   ;;  %s3008_s19 = smov 0   ;;  %s4366_s0 = inlined_call_operand.vmem [shape: f32[2,32,32,16], index: 0, kind: input, shape index: {}]   ;;  %s4367_s1 = inlined_call_operand.vmem [shape: f32[1,1,16], index: 1, kind: input, shape index: {}]   ;;  %s4368_s2 = inlined_call_operand.vmem [shape: f32[1,1,16], index: 2, kind: input, shape index: {}]   ;;  %s4369_s3 = inlined_call_operand.vmem [shape: f32[3,48,32], index: 3, kind: input, shape index: {}]   ;;  %s4370_s4 = inlined_call_operand.vmem [shape: f32[2,32,32,32], index: 4, kind: output, shape index: {0}]   ;;  %s4371_s5 = inlined_call_operand.vmem [shape: f32[2,2,32], index: 5, kind: output, shape index: {1}]  }
   0x1   :  { %s3010_s20 = smov 0   ;;  %s3012_s21 = smov 0  }
   0x2   :  { %s3014_s22 = smov 0  }
   0x3 LB: > { %s25_s23 = sadd.s32 1, %s2963_s20  ;;  %s28_s24 = sadd.s32 1, %s2967_s21  ;;  %s2971_s22 = sphi %s3014_s22, %s16_s22   ;;  %s2967_s21 = sphi %s3012_s21, %s4380_s21   ;;  %s2963_s20 = sphi %s3010_s20, %s4379_s20   ;;  %s2959_s19 = sphi %s3008_s19, %s4378_s19   ;;  %s2955_s18 = sphi %s3006_s18, %s4377_s18  }
   0x4   : > { %p26_p0 = scmp.ge.s32.totalorder %s25_s23, 4  ;;  %p2360_p1 = scmp.ge.s32.totalorder %s2971_s22, 1 }
   0x5   : > { %p204_p2 = scmp.lt.s32.totalorder %s2971_s22, 9 }
   0x6   : > { %s4382_s23 = smov (%p26_p0, %s25_s23), 0  ;;  %s4384_s24 = smov (!%p26_p0, %s28_s24), %s2967_s21 }
   0x7   : > { %p205_p3 = pnand %p2360_p1, %p204_p2  ;;  %p30_p4 = scmp.ge.s32.totalorder %s4384_s24, 2 }
   0x8   : > { %p241_p5 = scmp.lt.s32.totalorder (!%p205_p3), %s2959_s19, 1  ;;  %s2487_s25 = sshll.u32 (!%p205_p3), %s2955_s18, 8  ;;  %v3060_v0 = vld [vmem:[%s4367_s1] ss:$0 sm:$0xff] (!%p205_p3)  ;;  %v2375_v1 = vld [vmem:[%s4369_s3 + $0x30] sm:$0xff] (!%p205_p3)  ;;  %v2376_v2 = vld [vmem:[%s4369_s3 + $0x38] sm:$0xff] (!%p205_p3) }
   0x9   : > { %s4386_s24 = smov (%p30_p4, %s4384_s24), 0  ;;  %208 = sbr.rel (%p205_p3) target bundleno = 625 (0x271), region = 36 }
   0xa   : > { %s3042_s26 = sshll.u32 (!%p205_p3), %s2955_s18, 3  ;;  %p448_p6 = scmp.eq.s32.totalorder (!%p205_p3), %s2955_s18, 0  ;;  %v3071_v3 = vld [vmem:[%s4368_s2] ss:$0 sm:$0xff] (!%p205_p3)  ;;  %v2782_v4 = vpack.c.bf16 (!%p205_p3), %v2376_v2, %v2375_v1  ;;  %vm504_vm0 = vcmask (!%p205_p3), 1040384   ;;  %vm661_vm1 = vcmask (!%p205_p3), 1046528  }
   0xb   : > { %vm734_vm2 = vcmask (!%p205_p3), 1045504   ;;  %s2973_s7 = smov (!%p205_p3), 16   ;;  %s2974_s8 = smov (!%p205_p3), 32   ;;  %vm999_vm4 = vcmask (!%p205_p3), 130048   ;;  %vm1032_vm5 = vcmask (!%p205_p3), 261120   ;;  %vm1130_vm6 = vcmask (!%p205_p3), 392192  }
   0xc   : > { %2783 = vmatprep.subr.bf16.mxu1 (!%p205_p3), %v2782_v4  ;;  %s409_s10 = sadd.s32 (!%p205_p3), 8, %s3042_s26  ;;  %p456_p9 = scmp.eq.s32.totalorder (!%p205_p3), %s2955_s18, 3 }
   0xd   : > { %2785 = vmatpush3.bf16.msra.mxu1 (!%p205_p3), %v2782_v4  ;;  %p3492_p8 = scmp.lt.s32.totalorder (!%p205_p3), %s409_s10, 31  ;;  %p249_p10 = scmp.lt.s32.totalorder (!%p205_p3), %s3042_s26, 31 }
   0xe   : > { %p2483_p11 = scmp.ne.s32.totalorder (!%p205_p3), %s2955_s18, 0 }
  0x10   : > { %s4388_s19 = smov (!%p241_p5, %s2959_s19), 1  ;;  %s4392_s10 = smov (!%p3492_p8, %s409_s10), 31 }
  0x11   : > { %s2486_s27 = sshll.u32 %s4388_s19, 10  ;;  %s2367_s28 = sshll.u32 %s4388_s19, 1  ;;  %vm2052_vm8 = vcmask (!%p2483_p11), 254976  }
  0x12   : > { %s3050_s6 = scalar_lea.vmem %s4366_s0, %s2486_s27  ;;  %s3055_s9 = scalar_lea.vmem %s4371_s5, %s2367_s28 }
  0x13   : > { %s3074_s27 = scalar_lea.vmem %s3050_s6, %s2487_s25  ;;  %s2372_s28 = sadd.s32 4294967295, %s3042_s26 }
  0x14   : > { %v266_v5 = vld [vmem:[%s3074_s27] sm:$0xff]  ;;  %v267_v6 = vld [vmem:[%s3074_s27 + $0x8] sm:$0xff]  ;;  %v268_v7 = vld [vmem:[%s3074_s27 + $0x10] sm:$0xff]  ;;  %p407_p7 = scmp.gt.s32.totalorder %s2372_s28, 0  ;;  %s2374_s12 = sshll.u32 %s4392_s10, 5 }
  0x15   : > { %v304_v8 = vmul.f32 %v3060_v0, %v266_v5  ;;  %v305_v9 = vmul.f32 %v3060_v0, %v267_v6  ;;  %v306_v10 = vmul.f32 %v3060_v0, %v268_v7  ;;  %s449_s25 = scalar_select %p448_p6, 1, 0  ;;  %v269_v11 = vld [vmem:[%s3074_s27 + $0x18] sm:$0xff]  ;;  %v270_v51 = vld [vmem:[%s3074_s27 + $0x20] sm:$0xff]  ;;  %v271_v56 = vld [vmem:[%s3074_s27 + $0x28] sm:$0xff] }
  0x16   : > { %s4390_s28 = smov (!%p407_p7, %s2372_s28), 0  ;;  %v307_v12 = vmul.f32 %v3060_v0, %v269_v11  ;;  %v272_v57 = vld [vmem:[%s3074_s27 + $0x30] sm:$0xff]  ;;  %v308_v1 = vmul.f32 %v3060_v0, %v270_v51  ;;  %v309_v5 = vmul.f32 %v3060_v0, %v271_v56  ;;  %s3536_s13 = scalar_lea.vmem %s3050_s6, %s2374_s12 }
  0x17   : > { %v342_v13 = vadd.f32 %v3071_v3, %v304_v8  ;;  %v343_v14 = vadd.f32 %v3071_v3, %v305_v9  ;;  %v344_v15 = vadd.f32 %v3071_v3, %v306_v10  ;;  %s2373_s29 = sshll.u32 %s4390_s28, 5  ;;  %v450_v20 = vstv %s449_s25  ;;  %s4394_s26 = smov (!%p249_p10, %s3042_s26), 31 }
  0x18   : > { %v345_v16 = vadd.f32 %v3071_v3, %v307_v12  ;;  %s413_s30 = scalar_lea.vmem %s3050_s6, %s2373_s29  ;;  %vm3094_vm3 = vcmp.eq.s32.totalorder %v450_v20, 1  ;;  %v310_v6 = vmul.f32 %v3060_v0, %v272_v57 }
  0x19   : > { %v374_v17 = vmax.f32 %v342_v13, 0.0  ;;  %v375_v18 = vmax.f32 %v343_v14, 0.0  ;;  %v376_v19 = vmax.f32 %v344_v15, 0.0  ;;  %v414_v21 = vld [vmem:[%s413_s30] sm:$0xff]  ;;  %v415_v22 = vld [vmem:[%s413_s30 + $0x8] sm:$0xff]  ;;  %v416_v24 = vld [vmem:[%s413_s30 + $0x10] sm:$0xff] }
  0x1a   : > { %v377_v23 = vmax.f32 %v345_v16, 0.0  ;;  %v418_v28 = vmul.f32 %v3060_v0, %v414_v21  ;;  %v419_v29 = vmul.f32 %v3060_v0, %v415_v22  ;;  %v420_v32 = vmul.f32 %v3060_v0, %v416_v24  ;;  %v417_v33 = vld [vmem:[%s413_s30 + $0x18] sm:$0xff]  ;;  %s3567_s6 = scalar_select %p456_p9, 1, 0 }
  0x1b   : > { %v512_v25 = vrot.slane %v374_v17, 7  ;;  %v513_v26 = vrot.slane %v375_v18, 7  ;;  %v515_v27 = vrot.slane %v376_v19, 7  ;;  %v421_v45 = vmul.f32 %v3060_v0, %v417_v33 }
  0x1c   : > { %v517_v31 = vrot.slane %v377_v23, 7  ;;  %v422_v37 = vadd.f32 %v3071_v3, %v418_v28  ;;  %v423_v43 = vadd.f32 %v3071_v3, %v419_v29  ;;  %v424_v48 = vadd.f32 %v3071_v3, %v420_v32 }
  0x1d   : > { %v3100_v34 = vsel %vm504_vm0, %v512_v25, %v513_v26  ;;  %v3103_v35 = vsel %vm504_vm0, %v513_v26, %v515_v27  ;;  %v3106_v36 = vsel %vm504_vm0, 0.0, %v512_v25  ;;  %v425_v60 = vadd.f32 %v3071_v3, %v421_v45  ;;  %v273_v26 = vld [vmem:[%s3074_s27 + $0x38] sm:$0xff] }
  0x1e   : > { %v672_v38 = vrot.slane %v3100_v34, 1  ;;  %v674_v39 = vrot.slane %v3103_v35, 1  ;;  %v671_v40 = vrot.slane %v3106_v36, 1  ;;  %v744_v41 = vrot.slane %v3106_v36, 2 }
  0x1f   : > { %v745_v42 = vrot.slane %v3100_v34, 2  ;;  %v426_v44 = vmax.f32 %v422_v37, 0.0  ;;  %v427_v49 = vmax.f32 %v423_v43, 0.0  ;;  %v747_v54 = vrot.slane %v3103_v35, 2 }
  0x20   : > { %v675_v46 = vsel %vm661_vm1, %v672_v38, %v674_v39  ;;  %v673_v47 = vsel %vm661_vm1, %v671_v40, %v672_v38  ;;  %v428_v55 = vmax.f32 %v424_v48, 0.0  ;;  %v3131_v59 = vsel %vm504_vm0, %v515_v27, %v517_v31  ;;  %v274_v48 = vld [vmem:[%s3074_s27 + $0x40] sm:$0xff] }
  0x21   : > { %817 = vrot.lane.b32.xlu1 %v675_v46, %s2973_s7  ;;  %815 = vrot.lane.b32.xlu0 %v673_v47, %s2973_s7  ;;  %v452_v50 = vsel %vm3094_vm3, 0.0, %v426_v44  ;;  %v746_v52 = vsel %vm734_vm2, %v744_v41, %v745_v42  ;;  %v453_v58 = vsel %vm3094_vm3, 0.0, %v427_v49  ;;  %v748_v8 = vsel %vm734_vm2, %v745_v42, %v747_v54  ;;  %v275_v49 = vld [vmem:[%s3074_s27 + $0x48] sm:$0xff] }
  0x22   : > { %v505_v53 = vrot.slane %v452_v50, 7  ;;  %v506_v61 = vrot.slane %v453_v58, 7  ;;  %v454_v63 = vsel %vm3094_vm3, 0.0, %v428_v55  ;;  %v676_v9 = vrot.slane %v3131_v59, 1  ;;  %v276_v50 = vld [vmem:[%s3074_s27 + $0x50] sm:$0xff] }
  0x23   : > { %v508_v4 = vrot.slane %v454_v63, 7  ;;  %v429_v10 = vmax.f32 %v425_v60, 0.0  ;;  %v636_v14 = vsel %vm504_vm0, %v517_v31, 0.0  ;;  %v346_v19 = vadd.f32 %v3071_v3, %v308_v1 }
  0x24   : > { %v3135_v62 = vsel %vm504_vm0, 0.0, %v505_v53  ;;  %v3145_v7 = vsel %vm504_vm0, %v505_v53, %v506_v61  ;;  %v677_v20 = vsel %vm661_vm1, %v674_v39, %v676_v9  ;;  %v678_v21 = vrot.slane %v636_v14, 1 }
  0x25   : > { %911 = vrot.lane.b32.xlu1 %v746_v52, %s2974_s8  ;;  %v662_v2 = vrot.slane %v3135_v62, 1  ;;  %v663_v11 = vrot.slane %v3145_v7, 1  ;;  %v735_v12 = vrot.slane %v3135_v62, 2  ;;  %v736_v13 = vrot.slane %v3145_v7, 2 }
  0x26   : > { %v3156_v15 = vsel %vm504_vm0, %v506_v61, %v508_v4  ;;  %v455_v16 = vsel %vm3094_vm3, 0.0, %v429_v10  ;;  %v347_v22 = vadd.f32 %v3071_v3, %v309_v5  ;;  %v348_v23 = vadd.f32 %v3071_v3, %v310_v6 }
  0x27   : > { %v664_v17 = vsel %vm661_vm1, %v662_v2, %v663_v11  ;;  %v510_v18 = vrot.slane %v455_v16, 7  ;;  %v737_v24 = vsel %vm734_vm2, %v735_v12, %v736_v13  ;;  %v738_v25 = vrot.slane %v3156_v15, 2  ;;  %v277_v12 = vld [vmem:[%s3074_s27 + $0x58] sm:$0xff] }
  0x28   : > { %807 = vrot.lane.b32.xlu0 %v664_v17, %s2973_s7  ;;  %v378_v28 = vmax.f32 %v346_v19, 0.0  ;;  %v679_v29 = vsel %vm661_vm1, %v676_v9, %v678_v21  ;;  %v379_v30 = vmax.f32 %v347_v22, 0.0  ;;  %v380_v31 = vmax.f32 %v348_v23, 0.0 }
  0x29   : > { %913 = vrot.lane.b32.xlu1 %v748_v8, %s2974_s8  ;;  %v3171_v27 = vsel %vm504_vm0, %v508_v4, %v510_v18  ;;  %v311_v32 = vmul.f32 %v3060_v0, %v273_v26  ;;  %v739_v33 = vsel %vm734_vm2, %v736_v13, %v738_v25  ;;  %v665_v37 = vrot.slane %v3156_v15, 1 }
  0x2a   : > { %v667_v38 = vrot.slane %v3171_v27, 1  ;;  %v635_v39 = vsel %vm504_vm0, %v510_v18, 0.0  ;;  %v749_v41 = vrot.slane %v3131_v59, 2  ;;  %v519_v42 = vrot.slane %v378_v28, 7 }
  0x2b   : > { %v666_v40 = vsel %vm661_vm1, %v663_v11, %v665_v37  ;;  %v520_v43 = vrot.slane %v379_v30, 7  ;;  %v522_v44 = vrot.slane %v380_v31, 7  ;;  %v349_v45 = vadd.f32 %v3071_v3, %v311_v32 }
  0x2c   : > { %903 = vrot.lane.b32.xlu0 %v737_v24, %s2974_s8  ;;  %v668_v46 = vsel %vm661_vm1, %v665_v37, %v667_v38  ;;  %v669_v47 = vrot.slane %v635_v39, 1  ;;  %v750_v51 = vsel %vm734_vm2, %v747_v54, %v749_v41  ;;  %v751_v52 = vrot.slane %v636_v14, 2 }
  0x2d   : > { %819 = vrot.lane.b32.xlu1 %v677_v20, %s2973_s7  ;;  %v740_v53 = vrot.slane %v3171_v27, 2  ;;  %v3197_v55 = vsel %vm504_vm0, %v519_v42, %v520_v43  ;;  %v3200_v56 = vsel %vm504_vm0, %v520_v43, %v522_v44  ;;  %v381_v57 = vmax.f32 %v349_v45, 0.0 }
  0x2e   : > { %v670_v58 = vsel %vm661_vm1, %v667_v38, %v669_v47  ;;  %v312_v60 = vmul.f32 %v3060_v0, %v274_v48  ;;  %v313_v61 = vmul.f32 %v3060_v0, %v275_v49  ;;  %v314_v54 = vmul.f32 %v3060_v0, %v276_v50  ;;  %v278_v38 = vld [vmem:[%s3074_s27 + $0x60] sm:$0xff] }
  0x2f   : > { %v752_v63 = vsel %vm734_vm2, %v749_v41, %v751_v52  ;;  %v742_v1 = vrot.slane %v635_v39, 2  ;;  %v681_v2 = vrot.slane %v3197_v55, 1  ;;  %v683_v4 = vrot.slane %v3200_v56, 1  ;;  %v279_v39 = vld [vmem:[%s3074_s27 + $0x68] sm:$0xff] }
  0x30   : > { %905 = vrot.lane.b32.xlu0 %v739_v33, %s2974_s8  ;;  %v3212_v5 = vsel %vm504_vm0, 0.0, %v519_v42  ;;  %v524_v6 = vrot.slane %v381_v57, 7  ;;  %v741_v8 = vsel %vm734_vm2, %v738_v25, %v740_v53  ;;  %v350_v9 = vadd.f32 %v3071_v3, %v312_v60  ;;  %v281_v60 = vld [vmem:[%s3074_s27 + $0x78] sm:$0xff] }
  0x31   : > { %821 = vrot.lane.b32.xlu1 %v679_v29, %s2973_s7  ;;  %v351_v10 = vadd.f32 %v3071_v3, %v313_v61  ;;  %v352_v11 = vadd.f32 %v3071_v3, %v314_v54  ;;  %v743_v13 = vsel %vm734_vm2, %v740_v53, %v742_v1  ;;  %v680_v14 = vrot.slane %v3212_v5, 1 }
  0x32   : > { %v754_v16 = vrot.slane %v3197_v55, 2  ;;  %v684_v17 = vsel %vm661_vm1, %v681_v2, %v683_v4  ;;  %v756_v18 = vrot.slane %v3200_v56, 2  ;;  %v3227_v19 = vsel %vm504_vm0, %v522_v44, %v524_v6 }
  0x33   : > { %v315_v20 = vmul.f32 %v3060_v0, %v277_v12  ;;  %v637_v21 = vsel %vm504_vm0, %v524_v6, 0.0  ;;  %v382_v22 = vmax.f32 %v350_v9, 0.0  ;;  %v383_v23 = vmax.f32 %v351_v10, 0.0 }
  0x34   : > { %811 = vrot.lane.b32.xlu0 %v668_v46, %s2973_s7  ;;  %v384_v24 = vmax.f32 %v352_v11, 0.0  ;;  %v753_v25 = vrot.slane %v3212_v5, 2  ;;  %v757_v26 = vsel %vm734_vm2, %v754_v16, %v756_v18  ;;  %v685_v28 = vrot.slane %v3227_v19, 1 }
  0x35   : > { %809 = vrot.lane.b32.xlu1 %v666_v40, %s2973_s7  ;;  %v687_v29 = vrot.slane %v637_v21, 1  ;;  %v353_v30 = vadd.f32 %v3071_v3, %v315_v20  ;;  %v682_v31 = vsel %vm661_vm1, %v680_v14, %v681_v2  ;;  %v526_v32 = vrot.slane %v382_v22, 7  ;;  %v280_v40 = vld [vmem:[%s3074_s27 + $0x70] sm:$0xff] }
  0x36   : > { %v527_v33 = vrot.slane %v383_v23, 7  ;;  %v529_v37 = vrot.slane %v384_v24, 7  ;;  %v758_v41 = vrot.slane %v3227_v19, 2  ;;  %v760_v42 = vrot.slane %v637_v21, 2 }
  0x37   : > { %v755_v43 = vsel %vm734_vm2, %v753_v25, %v754_v16  ;;  %v688_v44 = vsel %vm661_vm1, %v685_v28, %v687_v29  ;;  %v385_v45 = vmax.f32 %v353_v30, 0.0  ;;  %v316_v46 = vmul.f32 %v3060_v0, %v278_v38  ;;  %v2377_v29 = vld [vmem:[%s4369_s3 + $0x40] sm:$0xff]  ;;  %v2378_v30 = vld [vmem:[%s4369_s3 + $0x48] sm:$0xff] }
  0x38   : > { %813 = vrot.lane.b32.xlu0 %v670_v58, %s2973_s7  ;;  %v3248_v47 = vsel %vm504_vm0, %v526_v32, %v527_v33  ;;  %v3251_v48 = vsel %vm504_vm0, %v527_v33, %v529_v37  ;;  %v317_v49 = vmul.f32 %v3060_v0, %v279_v39  ;;  %v318_v50 = vmul.f32 %v3060_v0, %v280_v40 }
  0x39   : > { %915 = vrot.lane.b32.xlu1 %v750_v51, %s2974_s8  ;;  %v761_v51 = vsel %vm734_vm2, %v758_v41, %v760_v42  ;;  %v690_v52 = vrot.slane %v3248_v47, 1  ;;  %v692_v53 = vrot.slane %v3251_v48, 1  ;;  %v3261_v57 = vsel %vm504_vm0, 0.0, %v526_v32  ;;  %v284_v32 = vld [vmem:[%s3074_s27 + $0x90] sm:$0xff] }
  0x3a   : > { %v531_v58 = vrot.slane %v385_v45, 7  ;;  %v686_v61 = vsel %vm661_vm1, %v683_v4, %v685_v28  ;;  %v354_v54 = vadd.f32 %v3071_v3, %v316_v46  ;;  %v356_v1 = vadd.f32 %v3071_v3, %v318_v50  ;;  %v282_v28 = vld [vmem:[%s3074_s27 + $0x80] sm:$0xff]  ;;  %v285_v50 = vld [vmem:[%s3074_s27 + $0x98] sm:$0xff] }
  0x3b   : > { %v759_v2 = vsel %vm734_vm2, %v756_v18, %v758_v41  ;;  %v689_v6 = vrot.slane %v3261_v57, 1  ;;  %v693_v4 = vsel %vm661_vm1, %v690_v52, %v692_v53  ;;  %v763_v9 = vrot.slane %v3248_v47, 2 }
  0x3c   : > { %907 = vrot.lane.b32.xlu0 %v741_v8, %s2974_s8  ;;  %v319_v8 = vmul.f32 %v3060_v0, %v281_v60  ;;  %v765_v10 = vrot.slane %v3251_v48, 2  ;;  %v3279_v11 = vsel %vm504_vm0, %v529_v37, %v531_v58  ;;  %v638_v12 = vsel %vm504_vm0, %v531_v58, 0.0 }
  0x3d   : > { %917 = vrot.lane.b32.xlu1 %v752_v63, %s2974_s8  ;;  %v355_v63 = vadd.f32 %v3071_v3, %v317_v49  ;;  %v388_v16 = vmax.f32 %v356_v1, 0.0  ;;  %v694_v20 = vrot.slane %v3279_v11, 1  ;;  %v696_v21 = vrot.slane %v638_v12, 1 }
  0x3e   : > { %v766_v18 = vsel %vm734_vm2, %v763_v9, %v765_v10  ;;  %v357_v22 = vadd.f32 %v3071_v3, %v319_v8  ;;  %v691_v23 = vsel %vm661_vm1, %v689_v6, %v690_v52  ;;  %v767_v37 = vrot.slane %v3279_v11, 2 }
  0x3f   : > { %v387_v14 = vmax.f32 %v355_v63, 0.0  ;;  %v769_v38 = vrot.slane %v638_v12, 2  ;;  %v697_v39 = vsel %vm661_vm1, %v694_v20, %v696_v21  ;;  %v320_v41 = vmul.f32 %v3060_v0, %v282_v28 }
  0x40   : > { %909 = vrot.lane.b32.xlu0 %v743_v13, %s2974_s8  ;;  %v386_v13 = vmax.f32 %v354_v54, 0.0  ;;  %v389_v40 = vmax.f32 %v357_v22, 0.0  ;;  %v2786_v42 = vpack.c.bf16 %v2378_v30, %v2377_v29  ;;  %v322_v46 = vmul.f32 %v3060_v0, %v284_v32  ;;  %v2380_v54 = vld [vmem:[%s4369_s3 + $0x58] sm:$0xff]  ;;  %v1069_v32 = vld [vmem:[%s4369_s3 + $0x20] sm:$0xff] }
  0x41   : > { %825 = vrot.lane.b32.xlu1 %v684_v17, %s2973_s7  ;;  %v762_v17 = vrot.slane %v3261_v57, 2  ;;  %v534_v25 = vrot.slane %v387_v14, 7  ;;  %v770_v49 = vsel %vm734_vm2, %v767_v37, %v769_v38  ;;  %v695_v63 = vsel %vm661_vm1, %v692_v53, %v694_v20 }
  0x42   : > { %v533_v24 = vrot.slane %v386_v13, 7  ;;  %2787 = vmatprep.subr.bf16.mxu1 %v2786_v42  ;;  %v538_v60 = vrot.slane %v389_v40, 7  ;;  %v358_v1 = vadd.f32 %v3071_v3, %v320_v41  ;;  %v360_v6 = vadd.f32 %v3071_v3, %v322_v46  ;;  %v286_v41 = vld [vmem:[%s3074_s27 + $0xa0] sm:$0xff] }
  0x43   : > { %v764_v33 = vsel %vm734_vm2, %v762_v17, %v763_v9  ;;  %2789 = vmatpush3.bf16.msra.mxu1 %v2786_v42  ;;  %v768_v8 = vsel %vm734_vm2, %v765_v10, %v767_v37  ;;  %v323_v9 = vmul.f32 %v3060_v0, %v285_v50  ;;  %v1065_v10 = vld [vmem:[%s4369_s3] sm:$0xff]  ;;  %v1066_v17 = vld [vmem:[%s4369_s3 + $0x8] sm:$0xff] }
  0x44   : > { %823 = vrot.lane.b32.xlu0 %v682_v31, %s2973_s7  ;;  %v283_v31 = vld [vmem:[%s3074_s27 + $0x88] sm:$0xff]  ;;  %v3319_v58 = vsel %vm504_vm0, 0.0, %v533_v24  ;;  %v390_v20 = vmax.f32 %v358_v1, 0.0  ;;  %v392_v22 = vmax.f32 %v360_v6, 0.0 }
  0x45   : > { %921 = vrot.lane.b32.xlu1 %v757_v26, %s2974_s8  ;;  %v536_v26 = vrot.slane %v388_v16, 7  ;;  %v321_v45 = vmul.f32 %v3060_v0, %v283_v31  ;;  %v361_v31 = vadd.f32 %v3071_v3, %v323_v9  ;;  %v287_v42 = vld [vmem:[%s3074_s27 + $0xa8] sm:$0xff] }
  0x46   : > { %v540_v38 = vrot.slane %v390_v20, 7  ;;  %v543_v40 = vrot.slane %v392_v22, 7  ;;  %v325_v6 = vmul.f32 %v3060_v0, %v287_v42 }
  0x47   : > { %v3344_v16 = vsel %vm504_vm0, %v536_v26, %v538_v60 }
  0x48   : > { %919 = vrot.lane.b32.xlu0 %v755_v43, %s2974_s8  ;;  %v3305_v43 = vsel %vm504_vm0, %v533_v24, %v534_v25  ;;  %v3355_v24 = vpack.c.bf16 %v1066_v17, %v1065_v10  ;;  %v703_v29 = vrot.slane %v3344_v16, 1  ;;  %v289_v10 = vld [vmem:[%s3074_s27 + $0xb8] sm:$0xff]  ;;  %v363_v20 = vadd.f32 %v3071_v3, %v325_v6  ;;  %v292_v6 = vld [vmem:[%s3074_s27 + $0xd0] sm:$0xff] }
  0x49   : > { %829 = vrot.lane.b32.xlu1 %v688_v44, %s2973_s7  ;;  %v3308_v44 = vsel %vm504_vm0, %v534_v25, %v536_v26  ;;  %v772_v13 = vrot.slane %v3305_v43, 2  ;;  %v1067_v25 = vld [vmem:[%s4369_s3 + $0x10] sm:$0xff]  ;;  %v1068_v26 = vld [vmem:[%s4369_s3 + $0x18] sm:$0xff] }
  0x4a   : > { %v701_v52 = vrot.slane %v3308_v44, 1  ;;  %v774_v14 = vrot.slane %v3308_v44, 2  ;;  %2795 = vmatprep.subr.bf16.mxu0 %v3355_v24  ;;  %v3381_v46 = vpack.c.bf16 %v1068_v26, %v1067_v25  ;;  %v327_v25 = vmul.f32 %v3060_v0, %v289_v10 }
  0x4b   : > { %2797 = vmatpush3.bf16.msra.mxu0 %v3355_v24 }
  0x4c   : > { %827 = vrot.lane.b32.xlu0 %v686_v61, %s2973_s7  ;;  %v2379_v61 = vld [vmem:[%s4369_s3 + $0x50] sm:$0xff]  ;;  %v775_v28 = vsel %vm734_vm2, %v772_v13, %v774_v14  ;;  %2799 = vmatprep.subr.bf16.mxu0 %v3381_v46  ;;  %v704_v17 = vsel %vm661_vm1, %v701_v52, %v703_v29 }
  0x4d   : > { %925 = vrot.lane.b32.xlu1 %v761_v51, %s2974_s8  ;;  %v699_v51 = vrot.slane %v3305_v43, 1  ;;  %v2790_v12 = vpack.c.bf16 %v2380_v54, %v2379_v61  ;;  %v393_v54 = vmax.f32 %v361_v31, 0.0 }
  0x4f   : > { %v702_v53 = vsel %vm661_vm1, %v699_v51, %v701_v52  ;;  %2791 = vmatprep.subr.bf16.mxu1 %v2790_v12  ;;  %2801 = vmatpush3.bf16.msra.mxu0 %v3381_v46 }
  0x50   : > { %923 = vrot.lane.b32.xlu0 %v759_v2, %s2974_s8  ;;  %v359_v2 = vadd.f32 %v3071_v3, %v321_v45  ;;  %2793 = vmatpush3.bf16.msra.mxu1 %v2790_v12  ;;  %v288_v45 = vld [vmem:[%s3074_s27 + $0xb0] sm:$0xff] }
  0x51   : > { %833 = vrot.lane.b32.xlu1 %v693_v4, %s2973_s7  ;;  %v698_v4 = vrot.slane %v3319_v58, 1  ;;  %2818 = vmatprep.subr.bf16.mxu1 %v3355_v24 }
  0x52   : > { %v391_v21 = vmax.f32 %v359_v2, 0.0 }
  0x53   : > { %v700_v37 = vsel %vm661_vm1, %v698_v4, %v699_v51 }
  0x54   : > { %831 = vrot.lane.b32.xlu0 %v691_v23, %s2973_s7  ;;  %v771_v23 = vrot.slane %v3319_v58, 2 }
  0x55   : > { %929 = vrot.lane.b32.xlu1 %v766_v18, %s2974_s8  ;;  %v639_v18 = vsel %vm504_vm0, %v538_v60, 0.0 }
  0x56   : > { %v705_v30 = vrot.slane %v639_v18, 1  ;;  %v778_v50 = vrot.slane %v639_v18, 2  ;;  %v773_v51 = vsel %vm734_vm2, %v771_v23, %v772_v13  ;;  %v545_v13 = vrot.slane %v393_v54, 7  ;;  %v291_v54 = vld [vmem:[%s3074_s27 + $0xc8] sm:$0xff] }
  0x58   : > { %927 = vrot.lane.b32.xlu0 %v764_v33, %s2974_s8  ;;  %v1070_v33 = vld [vmem:[%s4369_s3 + $0x28] sm:$0xff]  ;;  %v706_v61 = vsel %vm661_vm1, %v703_v29, %v705_v30  ;;  %v3430_v29 = vsel %vm504_vm0, %v543_v40, %v545_v13  ;;  %v640_v30 = vsel %vm504_vm0, %v545_v13, 0.0 }
  0x59   : > { %837 = vrot.lane.b32.xlu1 %v697_v39, %s2973_s7  ;;  %v541_v39 = vrot.slane %v391_v21, 7  ;;  %v3385_v60 = vpack.c.bf16 %v1070_v33, %v1069_v32  ;;  %v2445_v33 = vld [vmem:[%s4369_s3 + $0x60] sm:$0xff]  ;;  %v714_v42 = vrot.slane %v640_v30, 1 }
  0x5b   : > { %v3394_v1 = vsel %vm504_vm0, %v540_v38, %v541_v39  ;;  %v3397_v2 = vsel %vm504_vm0, %v541_v39, %v543_v40  ;;  %2803 = vmatprep.subr.bf16.mxu0 %v3385_v60 }
  0x5c   : > { %835 = vrot.lane.b32.xlu0 %v695_v63, %s2973_s7  ;;  %v324_v63 = vmul.f32 %v3060_v0, %v286_v41  ;;  %v708_v9 = vrot.slane %v3394_v1, 1  ;;  %v710_v12 = vrot.slane %v3397_v2, 1  ;;  %2805 = vmatpush3.bf16.msra.mxu0 %v3385_v60  ;;  %v781_v26 = vrot.slane %v3394_v1, 2 }
  0x5d   : > { %933 = vrot.lane.b32.xlu1 %v770_v49, %s2974_s8  ;;  %v776_v49 = vrot.slane %v3344_v16, 2  ;;  %v712_v41 = vrot.slane %v3430_v29, 1 }
  0x5e   : > { %v362_v18 = vadd.f32 %v3071_v3, %v324_v63  ;;  %v711_v52 = vsel %vm661_vm1, %v708_v9, %v710_v12 }
  0x5f   : > { %v779_v4 = vsel %vm734_vm2, %v776_v49, %v778_v50  ;;  %v777_v22 = vsel %vm734_vm2, %v774_v14, %v776_v49  ;;  %v395_v14 = vmax.f32 %v363_v20, 0.0  ;;  %v715_v13 = vsel %vm661_vm1, %v712_v41, %v714_v42 }
  0x60   : > { %931 = vrot.lane.b32.xlu0 %v768_v8, %s2974_s8  ;;  %v326_v8 = vmul.f32 %v3060_v0, %v288_v45  ;;  %v394_v31 = vmax.f32 %v362_v18, 0.0  ;;  %v365_v45 = vadd.f32 %v3071_v3, %v327_v25 }
  0x61   : > { %841 = vrot.lane.b32.xlu1 %v702_v53, %s2973_s7  ;;  %v3409_v53 = vsel %vm504_vm0, 0.0, %v540_v38  ;;  %v548_v50 = vrot.slane %v395_v14, 7 }
  0x62   : > { %v364_v21 = vadd.f32 %v3071_v3, %v326_v8  ;;  %v707_v23 = vrot.slane %v3409_v53, 1  ;;  %v780_v39 = vrot.slane %v3409_v53, 2  ;;  %v547_v49 = vrot.slane %v394_v31, 7 }
  0x63   : > { %v785_v8 = vrot.slane %v3430_v29, 2  ;;  %v713_v31 = vsel %vm661_vm1, %v710_v12, %v712_v41 }
  0x64   : > { %839 = vrot.lane.b32.xlu0 %v700_v37, %s2973_s7  ;;  %v396_v32 = vmax.f32 %v364_v21, 0.0  ;;  %v2446_v37 = vld [vmem:[%s4369_s3 + $0x68] sm:$0xff]  ;;  %v709_v38 = vsel %vm661_vm1, %v707_v23, %v708_v9  ;;  %v782_v9 = vsel %vm734_vm2, %v780_v39, %v781_v26  ;;  %v3460_v18 = vsel %vm504_vm0, %v547_v49, %v548_v50 }
  0x65   : > { %937 = vrot.lane.b32.xlu1 %v775_v28, %s2974_s8  ;;  %v783_v28 = vrot.slane %v3397_v2, 2  ;;  %v3448_v63 = vpack.c.bf16 %v2446_v37, %v2445_v33  ;;  %v397_v21 = vmax.f32 %v365_v45, 0.0  ;;  %v717_v25 = vrot.slane %v3460_v18, 1  ;;  %v293_v37 = vld [vmem:[%s3074_s27 + $0xd8] sm:$0xff] }
  0x66   : > { %v3475_v14 = vsel %vm504_vm0, 0.0, %v547_v49  ;;  %v790_v39 = vrot.slane %v3460_v18, 2 }
  0x67   : > { %v784_v40 = vsel %vm734_vm2, %v781_v26, %v783_v28  ;;  %2807 = vmatprep.subr.bf16.mxu0 %v3448_v63  ;;  %v716_v41 = vrot.slane %v3475_v14, 1 }
  0x68   : > { %935 = vrot.lane.b32.xlu0 %v773_v51, %s2974_s8  ;;  %v550_v51 = vrot.slane %v396_v32, 7  ;;  %v552_v32 = vrot.slane %v397_v21, 7  ;;  %v294_v21 = vld [vmem:[%s3074_s27 + $0xe0] sm:$0xff] }
  0x69   : > { %845 = vrot.lane.b32.xlu1 %v706_v61, %s2973_s7  ;;  %v290_v61 = vld [vmem:[%s3074_s27 + $0xc0] sm:$0xff] }
  0x6a   : > { %v328_v10 = vmul.f32 %v3060_v0, %v290_v61  ;;  %v3463_v20 = vsel %vm504_vm0, %v548_v50, %v550_v51  ;;  %v3488_v49 = vsel %vm504_vm0, %v550_v51, %v552_v32  ;;  %v641_v50 = vsel %vm504_vm0, %v552_v32, 0.0 }
  0x6b   : > { %v331_v61 = vmul.f32 %v3060_v0, %v293_v37  ;;  %v789_v51 = vrot.slane %v3475_v14, 2  ;;  %v796_v32 = vrot.slane %v641_v50, 2 }
  0x6c   : > { %843 = vrot.lane.b32.xlu0 %v704_v17, %s2973_s7  ;;  %v329_v17 = vmul.f32 %v3060_v0, %v291_v54  ;;  %v366_v26 = vadd.f32 %v3071_v3, %v328_v10 }
  0x6d   : > { %941 = vrot.lane.b32.xlu1 %v779_v4, %s2974_s8  ;;  %v787_v4 = vrot.slane %v640_v30, 2 }
  0x6e   : > { %v367_v30 = vadd.f32 %v3071_v3, %v329_v17  ;;  %v398_v42 = vmax.f32 %v366_v26, 0.0  ;;  %v369_v17 = vadd.f32 %v3071_v3, %v331_v61  ;;  %v791_v26 = vsel %vm734_vm2, %v789_v51, %v790_v39 }
  0x6f   : > { %v788_v23 = vsel %vm734_vm2, %v785_v8, %v787_v4 }
  0x70   : > { %939 = vrot.lane.b32.xlu0 %v777_v22, %s2974_s8  ;;  %v330_v22 = vmul.f32 %v3060_v0, %v292_v6  ;;  %v399_v45 = vmax.f32 %v367_v30, 0.0  ;;  %v721_v6 = vrot.slane %v3488_v49, 1  ;;  %v554_v4 = vrot.slane %v398_v42, 7 }
  0x71   : > { %849 = vrot.lane.b32.xlu1 %v711_v52, %s2973_s7  ;;  %v719_v52 = vrot.slane %v3463_v20, 1  ;;  %v794_v30 = vrot.slane %v3488_v49, 2 }
  0x72   : > { %v368_v33 = vadd.f32 %v3071_v3, %v330_v22  ;;  %v295_v22 = vld [vmem:[%s3074_s27 + $0xe8] sm:$0xff] }
  0x73   : > { %v720_v12 = vsel %vm661_vm1, %v717_v25, %v719_v52  ;;  %v797_v42 = vsel %vm734_vm2, %v794_v30, %v796_v32  ;;  %v722_v61 = vsel %vm661_vm1, %v719_v52, %v721_v6 }
  0x74   : > { %847 = vrot.lane.b32.xlu0 %v709_v38, %s2973_s7  ;;  %v786_v38 = vsel %vm734_vm2, %v783_v28, %v785_v8  ;;  %v400_v28 = vmax.f32 %v368_v33, 0.0  ;;  %v723_v8 = vrot.slane %v641_v50, 1  ;;  %v332_v33 = vmul.f32 %v3060_v0, %v294_v21 }
  0x75   : > { %945 = vrot.lane.b32.xlu1 %v784_v40, %s2974_s8  ;;  %v792_v40 = vrot.slane %v3463_v20, 2 }
  0x76   : > { %v557_v10 = vrot.slane %v400_v28, 7  ;;  %v370_v28 = vadd.f32 %v3071_v3, %v332_v33  ;;  %v433_v33 = vld [vmem:[%s3536_s13 + $0x8] sm:$0xff] }
  0x77   : > { %v793_v54 = vsel %vm734_vm2, %v790_v39, %v792_v40  ;;  %v333_v39 = vmul.f32 %v3060_v0, %v295_v22 }
  0x78   : > { %943 = vrot.lane.b32.xlu0 %v782_v9, %s2974_s8  ;;  %v555_v9 = vrot.slane %v399_v45, 7  ;;  %v402_v21 = vmax.f32 %v370_v28, 0.0 }
  0x79   : > { %853 = vrot.lane.b32.xlu1 %v715_v13, %s2973_s7  ;;  %v718_v13 = vsel %vm661_vm1, %v716_v41, %v717_v25  ;;  %v3524_v41 = vsel %vm504_vm0, 0.0, %v554_v4  ;;  %v371_v51 = vadd.f32 %v3071_v3, %v333_v39  ;;  %v434_v39 = vld [vmem:[%s3536_s13 + $0x10] sm:$0xff] }
  0x7a   : > { %v3514_v25 = vsel %vm504_vm0, %v554_v4, %v555_v9  ;;  %v3518_v37 = vsel %vm504_vm0, %v555_v9, %v557_v10  ;;  %v297_v4 = vld [vmem:[%s3074_s27 + $0xf8] sm:$0xff]  ;;  %v795_v9 = vsel %vm734_vm2, %v792_v40, %v794_v30  ;;  %v798_v32 = vrot.slane %v3524_v41, 2 }
  0x7b   : > { %v726_v45 = vrot.slane %v3514_v25, 1  ;;  %v728_v50 = vrot.slane %v3518_v37, 1  ;;  %v335_v22 = vmul.f32 %v3060_v0, %v297_v4  ;;  %v403_v30 = vmax.f32 %v371_v51, 0.0 }
  0x7c   : > { %851 = vrot.lane.b32.xlu0 %v713_v31, %s2973_s7  ;;  %v724_v31 = vsel %vm661_vm1, %v721_v6, %v723_v8  ;;  %v801_v6 = vrot.slane %v3518_v37, 2 }
  0x7d   : > { %949 = vrot.lane.b32.xlu1 %v788_v23, %s2974_s8  ;;  %v296_v23 = vld [vmem:[%s3074_s27 + $0xf0] sm:$0xff]  ;;  %v729_v52 = vsel %vm661_vm1, %v726_v45, %v728_v50  ;;  %v562_v51 = vrot.slane %v403_v30, 7  ;;  %v373_v4 = vadd.f32 %v3071_v3, %v335_v22 }
  0x80   : > { %947 = vrot.lane.b32.xlu0 %v786_v38, %s2974_s8  ;;  %v401_v38 = vmax.f32 %v369_v17, 0.0  ;;  %v799_v17 = vrot.slane %v3514_v25, 2 }
  0x81   : > { %857 = vrot.lane.b32.xlu1 %v720_v12, %s2973_s7  ;;  %v334_v12 = vmul.f32 %v3060_v0, %v296_v23  ;;  %v432_v23 = vld [vmem:[%s3536_s13] sm:$0xff] }
  0x83   : > { %v372_v8 = vadd.f32 %v3071_v3, %v334_v12 }
  0x84   : > { %855 = vrot.lane.b32.xlu0 %v718_v13, %s2973_s7  ;;  %v725_v13 = vrot.slane %v3524_v41, 1 }
  0x85   : > { %953 = vrot.lane.b32.xlu1 %v793_v54, %s2974_s8  ;;  %v559_v54 = vrot.slane %v401_v38, 7  ;;  %v436_v38 = vmul.f32 %v3060_v0, %v432_v23 }
  0x86   : > { %v727_v12 = vsel %vm661_vm1, %v725_v13, %v726_v45  ;;  %v437_v45 = vmul.f32 %v3060_v0, %v433_v33  ;;  %v438_v13 = vmul.f32 %v3060_v0, %v434_v39 }
  0x87   : > { %v3551_v40 = vsel %vm504_vm0, %v557_v10, %v559_v54  ;;  %v802_v10 = vsel %vm734_vm2, %v799_v17, %v801_v6  ;;  %v440_v23 = vadd.f32 %v3071_v3, %v436_v38 }
  0x88   : > { %951 = vrot.lane.b32.xlu0 %v791_v26, %s2974_s8  ;;  %v642_v26 = vsel %vm504_vm0, %v559_v54, 0.0  ;;  %v561_v54 = vrot.slane %v402_v21, 7  ;;  %v803_v22 = vrot.slane %v3551_v40, 2 }
  0x89   : > { %861 = vrot.lane.b32.xlu1 %v724_v31, %s2973_s7  ;;  %v404_v31 = vmax.f32 %v372_v8, 0.0  ;;  %v732_v28 = vrot.slane %v642_v26, 1  ;;  %v805_v30 = vrot.slane %v642_v26, 2  ;;  %v435_v26 = vld [vmem:[%s3536_s13 + $0x18] sm:$0xff] }
  0x8a   : > { %v3582_v39 = vsel %vm504_vm0, %v561_v54, %v562_v51 }
  0x8b   : > { %v564_v8 = vrot.slane %v404_v31, 7  ;;  %v458_v31 = vstv %s3567_s6 }
  0x8c   : > { %859 = vrot.lane.b32.xlu0 %v722_v61, %s2973_s7  ;;  %vm3600_vm7 = vcmp.eq.s32.totalorder %v458_v31, 1 }
  0x8d   : > { %957 = vrot.lane.b32.xlu1 %v797_v42, %s2974_s8  ;;  %v730_v42 = vrot.slane %v3551_v40, 1 }
  0x8f   : > { %v733_v21 = vsel %vm661_vm1, %v730_v42, %v732_v28  ;;  %v806_v28 = vsel %vm734_vm2, %v803_v22, %v805_v30 }
  0x90   : > { %955 = vrot.lane.b32.xlu0 %v795_v9, %s2974_s8 }
  0x91   : > { %865 = vrot.lane.b32.xlu1 %v729_v52, %s2973_s7  ;;  %v800_v52 = vsel %vm734_vm2, %v798_v32, %v799_v17  ;;  %v3585_v17 = vsel %vm504_vm0, %v562_v51, %v564_v8  ;;  %v405_v32 = vmax.f32 %v373_v4, 0.0  ;;  %v1074_v51 = vrot.slane %v3582_v39, 1 }
  0x92   : > { %v1076_v4 = vrot.slane %v3585_v17, 1 }
  0x93   : > { %v818_v61 = vpop.permute.xlu1 %817  ;;  %v816_v9 = vpop.permute.xlu0 %815 }
  0x94   : > { %863 = vrot.lane.b32.xlu0 %v727_v12, %s2973_s7  ;;  %v1004_v0 = vsel %vm999_vm4, %v3106_v36, %v816_v9  ;;  %v441_v12 = vadd.f32 %v3071_v3, %v437_v45  ;;  %v444_v36 = vmax.f32 %v440_v23, 0.0  ;;  %v731_v45 = vsel %vm661_vm1, %v728_v50, %v730_v42 }
  0x95   : > { %961 = vrot.lane.b32.xlu1 %v802_v10, %s2974_s8  ;;  %v442_v10 = vadd.f32 %v3071_v3, %v438_v13  ;;  %v1005_v3 = vsel %vm999_vm4, %v3100_v34, %v818_v61  ;;  %v566_v23 = vrot.slane %v405_v32, 7  ;;  %v804_v50 = vsel %vm734_vm2, %v801_v6, %v803_v22 }
  0x96   : > { %v445_v31 = vmax.f32 %v441_v12, 0.0  ;;  %v1077_v42 = vsel %vm661_vm1, %v1074_v51, %v1076_v4  ;;  %v1083_v61 = vrot.slane %v3582_v39, 2  ;;  %v460_v6 = vsel %vm3600_vm7, 0.0, %v444_v36 }
  0x97   : > { %v912_v33 = vpop.permute.xlu1 %911 }
  0x98   : > { %v3588_v38 = vsel %vm1032_vm5, %v1004_v0, %v912_v33  ;;  %959 = vrot.lane.b32.xlu0 %v800_v52, %s2974_s8  ;;  %v3610_v52 = vsel %vm504_vm0, 0.0, %v561_v54  ;;  %v446_v0 = vmax.f32 %v442_v10, 0.0  ;;  %v2931_v33 = vld [vmem:[%s4367_s1] ss:$0 sm:$0xff]  ;;  %v1085_v54 = vrot.slane %v3585_v17, 2 }
  0x99   : > { %869 = vrot.lane.b32.xlu1 %v733_v21, %s2973_s7  ;;  %2614 = vmatprep.mubr.msk.f32.mxu1 %vm1130_vm6, %v3588_v38  ;;  %v439_v34 = vmul.f32 %v2931_v33, %v435_v26  ;;  %v1073_v12 = vrot.slane %v3610_v52, 1  ;;  %v3633_v10 = vsel %vm504_vm0, %v564_v8, %v566_v23  ;;  %v643_v26 = vsel %vm504_vm0, %v566_v23, 0.0  ;;  %v2932_v8 = vld [vmem:[%s4368_s2] ss:$0 sm:$0xff] }
  0x9a   : > { %v808_v21 = vpop.permute.xlu0 %807  ;;  %v1078_v23 = vrot.slane %v3633_v10, 1  ;;  %v568_v33 = vrot.slane %v460_v6, 7  ;;  %v1089_v6 = vrot.slane %v643_v26, 2 }
  0x9b   : > { %v914_v13 = vpop.permute.xlu1 %913  ;;  %v1000_v22 = vsel %vm999_vm4, %v3135_v62, %v808_v21  ;;  %v1086_v62 = vsel %vm734_vm2, %v1083_v61, %v1085_v54  ;;  %v1080_v21 = vrot.slane %v643_v26, 1  ;;  %v2449_v26 = vld [vmem:[%s4369_s3 + $0x80] sm:$0xff] }
  0x9c   : > { %v3613_v30 = vsel %vm1032_vm5, %v1005_v3, %v914_v13  ;;  %867 = vrot.lane.b32.xlu0 %v731_v45, %s2973_s7  ;;  %v3645_v3 = vsel %vm3600_vm7, 0.0, %v446_v0  ;;  %v443_v45 = vadd.f32 %v2932_v8, %v439_v34  ;;  %v1082_v13 = vrot.slane %v3610_v52, 2 }
  0x9d   : > { %965 = vrot.lane.b32.xlu1 %v806_v28, %s2974_s8  ;;  %2615 = vmatmul.mubr.msk.f32.vlgmr.msra.gmra.mrb[0].mxu1 %vm1130_vm6, %v3613_v30 }
  0x9e   : > { %2821 = vmatpush3.bf16.msra.mxu1 %v3355_v24  ;;  %v904_v28 = vpop.permute.xlu0 %903  ;;  %v461_v24 = vsel %vm3600_vm7, 0.0, %v445_v31  ;;  %v1075_v31 = vsel %vm661_vm1, %v1073_v12, %v1074_v51  ;;  %v2448_v51 = vld [vmem:[%s4369_s3 + $0x78] sm:$0xff]  ;;  %v1081_v12 = vsel %vm661_vm1, %v1078_v23, %v1080_v21 }
  0x9f   : > { %v820_v32 = vpop.permute.xlu1 %819  ;;  %2819 = vmatprep.subr.bf16.mxu1 %v3381_v46  ;;  %v1033_v36 = vsel %vm1032_vm5, %v1000_v22, %v904_v28  ;;  %v569_v34 = vrot.slane %v461_v24, 7  ;;  %v447_v22 = vmax.f32 %v443_v45, 0.0  ;;  %v2447_v28 = vld [vmem:[%s4369_s3 + $0x70] sm:$0xff]  ;;  %v1084_v24 = vsel %vm734_vm2, %v1082_v13, %v1083_v61 }
  0xa0   : > { %963 = vrot.lane.b32.xlu0 %v804_v50, %s2974_s8  ;;  %2674 = vmatprep.mubr.msk.f32.mxu0 %vm1130_vm6, %v1033_v36 }
  0xa1   : > { %1093 = vrot.lane.b32.xlu1 %v1077_v42, %s2973_s7  ;;  %v571_v42 = vrot.slane %v3645_v3, 7  ;;  %v3675_v8 = vsel %vm504_vm0, %v568_v33, %v569_v34  ;;  %v463_v21 = vsel %vm3600_vm7, 0.0, %v447_v22 }
  0xa2   : > { %2822 = vmatpush3.bf16.msra.mxu1 %v3381_v46  ;;  %v906_v50 = vpop.permute.xlu0 %905  ;;  %v1087_v46 = vrot.slane %v3633_v10, 2  ;;  %v1692_v9 = vrot.slane %v3675_v8, 1 }
  0xa3   : > { %v822_v0 = vpop.permute.xlu1 %821  ;;  %2820 = vmatprep.subr.bf16.mxu1 %v3385_v60  ;;  %v3678_v45 = vsel %vm504_vm0, %v569_v34, %v571_v42  ;;  %v1006_v34 = vsel %vm999_vm4, %v3103_v35, %v820_v32 }
  0xa4   : > { %1091 = vrot.lane.b32.xlu0 %v1075_v31, %s2973_s7  ;;  %v2810_v31 = vpack.c.bf16 %v2448_v51, %v2447_v28  ;;  %v1694_v13 = vrot.slane %v3678_v45, 1  ;;  %v573_v28 = vrot.slane %v463_v21, 7  ;;  %v1088_v35 = vsel %vm734_vm2, %v1085_v54, %v1087_v46 }
  0xa5   : > { %1105 = vrot.lane.b32.xlu1 %v1086_v62, %s2974_s8  ;;  %v1703_v32 = vrot.slane %v3678_v45, 2 }
  0xa6   : > { %2823 = vmatpush3.bf16.msra.mxu1 %v3385_v60  ;;  %v812_v36 = vpop.permute.xlu0 %811  ;;  %v2450_v60 = vld [vmem:[%s4369_s3 + $0x88] sm:$0xff]  ;;  %v644_v21 = vsel %vm504_vm0, %v573_v28, 0.0 }
  0xa7   : > { %v810_v3 = vpop.permute.xlu1 %809  ;;  %v1002_v54 = vsel %vm999_vm4, %v3156_v15, %v812_v36 }
  0xa8   : > { %v1001_v62 = vsel %vm999_vm4, %v3145_v7, %v810_v3  ;;  %1103 = vrot.lane.b32.xlu0 %v1084_v24, %s2974_s8  ;;  %v1090_v7 = vsel %vm734_vm2, %v1087_v46, %v1089_v6  ;;  %v3706_v6 = vsel %vm504_vm0, 0.0, %v568_v33  ;;  %v2814_v24 = vpack.c.bf16 %v2450_v60, %v2449_v26 }
  0xa9   : > { %1097 = vrot.lane.b32.xlu1 %v1081_v12, %s2973_s7  ;;  %v1034_v61 = vsel %vm1032_vm5, %v1001_v62, %v906_v50  ;;  %v1079_v50 = vsel %vm661_vm1, %v1076_v4, %v1078_v23  ;;  %v1701_v4 = vrot.slane %v3675_v8, 2  ;;  %v1007_v23 = vsel %vm999_vm4, %v3131_v59, %v822_v0 }
  0xaa   : > { %2675 = vmatmul.mubr.msk.f32.vlgmr.msra.gmra.mrb[0].mxu0 %vm1130_vm6, %v1034_v61  ;;  %v814_v51 = vpop.permute.xlu0 %813  ;;  %v1691_v3 = vrot.slane %v3706_v6, 1  ;;  %v3723_v62 = vsel %vm504_vm0, %v571_v42, %v573_v28  ;;  %v1698_v42 = vrot.slane %v644_v21, 1 }
  0xab   : > { %v916_v22 = vpop.permute.xlu1 %915  ;;  %2809 = vmatpush3.bf16.msra.mxu0 %v3448_v63  ;;  %v1695_v63 = vsel %vm661_vm1, %v1692_v9, %v1694_v13  ;;  %v1704_v59 = vsel %vm734_vm2, %v1701_v4, %v1703_v32  ;;  %v1696_v0 = vrot.slane %v3723_v62, 1  ;;  %v1003_v60 = vsel %vm999_vm4, %v3171_v27, %v814_v51 }
  0xac   : > { %v1039_v12 = vsel %vm1032_vm5, %v1006_v34, %v916_v22  ;;  %2811 = vmatprep.subr.bf16.mxu0 %v2810_v31  ;;  %1095 = vrot.lane.b32.xlu0 %v1079_v50, %s2973_s7  ;;  %v1693_v36 = vsel %vm661_vm1, %v1691_v3, %v1692_v9  ;;  %v1705_v22 = vrot.slane %v3723_v62, 2  ;;  %v1707_v9 = vrot.slane %v644_v21, 2 }
  0xad   : > { %1109 = vrot.lane.b32.xlu1 %v1090_v7, %s2974_s8  ;;  %2617 = vmatprep.mubr.msk.f32.mxu1 %vm1130_vm6, %v1039_v12  ;;  %v1699_v50 = vsel %vm661_vm1, %v1696_v0, %v1698_v42 }
  0xae   : > { %v908_v46 = vpop.permute.xlu0 %907 }
  0xaf   : > { %v918_v33 = vpop.permute.xlu1 %917  ;;  %2813 = vmatpush3.bf16.msra.mxu0 %v2810_v31  ;;  %v1035_v26 = vsel %vm1032_vm5, %v1002_v54, %v908_v46  ;;  %v1700_v31 = vrot.slane %v3706_v6, 2 }
  0xb0   : > { %v1040_v61 = vsel %vm1032_vm5, %v1007_v23, %v918_v33  ;;  %2815 = vmatprep.subr.bf16.mxu0 %v2814_v24  ;;  %1107 = vrot.lane.b32.xlu0 %v1088_v35, %s2974_s8 }
  0xb1   : > { %2618 = vmatmul.mubr.msk.f32.gmra.mrb[2].mxu1 %vm1130_vm6, %v1040_v61  ;;  %1711 = vrot.lane.b32.xlu1 %v1695_v63, %s2973_s7  ;;  %v1702_v27 = vsel %vm734_vm2, %v1700_v31, %v1701_v4 }
  0xb2   : > { %2677 = vmatprep.mubr.msk.f32.mxu0 %vm1130_vm6, %v1035_v26  ;;  %v910_v7 = vpop.permute.xlu0 %909 }
  0xb3   : > { %v826_v15 = vpop.permute.xlu1 %825  ;;  %2817 = vmatpush3.bf16.msra.mxu0 %v2814_v24  ;;  %v1036_v34 = vsel %vm1032_vm5, %v1003_v60, %v910_v7  ;;  %v1708_v24 = vsel %vm734_vm2, %v1705_v22, %v1707_v9 }
  0xb4   : > { %2678 = vmatmul.mubr.msk.f32.gmra.mrb[2].mxu0 %vm1130_vm6, %v1036_v34  ;;  %1709 = vrot.lane.b32.xlu0 %v1693_v36, %s2973_s7  ;;  %v1009_v35 = vsel %vm999_vm4, %v3197_v55, %v826_v15 }
  0xb5   : > { %1723 = vrot.lane.b32.xlu1 %v1704_v59, %s2974_s8  ;;  %2680 = vmatprep.mubr.msk.f32.mxu0 %vm1130_vm6, %v3588_v38 }
  0xb6   : > { %v824_v51 = vpop.permute.xlu0 %823 }
  0xb7   : > { %v922_v28 = vpop.permute.xlu1 %921  ;;  %v1008_v38 = vsel %vm999_vm4, %v3212_v5, %v824_v51 }
  0xb8   : > { %2681 = vmatmul.mubr.msk.f32.gmra.mrb[4].mxu0 %vm1130_vm6, %v3613_v30  ;;  %1721 = vrot.lane.b32.xlu0 %v1702_v27, %s2974_s8  ;;  %v1042_v4 = vsel %vm1032_vm5, %v1009_v35, %v922_v28  ;;  %v1697_v30 = vsel %vm661_vm1, %v1694_v13, %v1696_v0 }
  0xb9   : > { %1715 = vrot.lane.b32.xlu1 %v1699_v50, %s2973_s7  ;;  %2683 = vmatprep.mubr.msk.f32.mxu0 %vm1130_vm6, %v1039_v12  ;;  %v1706_v12 = vsel %vm734_vm2, %v1703_v32, %v1705_v22 }
  0xba   : > { %v920_v23 = vpop.permute.xlu0 %919 }
  0xbb   : > { %v830_v63 = vpop.permute.xlu1 %829  ;;  %v1041_v33 = vsel %vm1032_vm5, %v1008_v38, %v920_v23 }
  0xbc   : > { %2620 = vmatprep.mubr.msk.f32.mxu1 %vm1130_vm6, %v1041_v33  ;;  %2684 = vmatmul.mubr.msk.f32.gmra.mrb[6].mxu0 %vm1130_vm6, %v1040_v61  ;;  %v1011_v13 = vsel %vm999_vm4, %v3227_v19, %v830_v63 }
  0xbd   : > { %1727 = vrot.lane.b32.xlu1 %v1708_v24, %s2974_s8  ;;  %2621 = vmatmul.mubr.msk.f32.gmra.mrb[4].mxu1 %vm1130_vm6, %v1042_v4 }
  0xbe   : > { %2686 = vmatprep.mubr.msk.f32.mxu0 %vm1130_vm6, %v1041_v33  ;;  %v828_v5 = vpop.permute.xlu0 %827  ;;  %1713 = vrot.lane.b32.xlu0 %v1697_v30, %s2973_s7  ;;  %s2364_s7 = sshll.u32 %s4394_s26, 2 }
  0xbf   : > { %v926_v55 = vpop.permute.xlu1 %925  ;;  %v1010_v21 = vsel %vm999_vm4, %v3200_v56, %v828_v5 }
  0xc0   : > { %2687 = vmatmul.mubr.msk.f32.gmra.mrb[8].mxu0 %vm1130_vm6, %v1042_v4  ;;  %v1044_v54 = vsel %vm1032_vm5, %v1011_v13, %v926_v55 }
  0xc2   : > { %v924_v46 = vpop.permute.xlu0 %923  ;;  %1725 = vrot.lane.b32.xlu0 %v1706_v12, %s2974_s8  ;;  %s2365_s8 = sshll.u32 %s4388_s19, 7 }
  0xc3   : > { %v834_v3 = vpop.permute.xlu1 %833  ;;  %v1043_v61 = vsel %vm1032_vm5, %v1010_v21, %v924_v46  ;;  %s253_s13 = sadd.s32 %s2365_s8, %s2364_s7 }
  0xc4   : > { %2623 = vmatprep.mubr.msk.f32.mxu1 %vm1130_vm6, %v1043_v61  ;;  %2689 = vmatprep.mubr.msk.f32.mxu0 %vm1130_vm6, %v1043_v61  ;;  %v1013_v56 = vsel %vm999_vm4, %v3248_v47, %v834_v3  ;;  %s2366_s6 = sshll.u32 %s253_s13, 3 }
  0xc5   : > { %2624 = vmatmul.mubr.msk.f32.gmra.mrb[6].mxu1 %vm1130_vm6, %v1044_v54  ;;  %2690 = vmatmul.mubr.msk.f32.gmra.mrb[10].mxu0 %vm1130_vm6, %v1044_v54  ;;  %s4024_s15 = scalar_lea.vmem %s4370_s4, %s2366_s6 }
  0xc6   : > { %v832_v32 = vpop.permute.xlu0 %831 }
  0xc7   : > { %v930_v19 = vpop.permute.xlu1 %929  ;;  %v1012_v59 = vsel %vm999_vm4, %v3261_v57, %v832_v32 }
  0xc8   : > { %v1046_v0 = vsel %vm1032_vm5, %v1013_v56, %v930_v19 }
  0xca   : > { %v928_v42 = vpop.permute.xlu0 %927 }
  0xcb   : > { %v838_v26 = vpop.permute.xlu1 %837  ;;  %v1045_v15 = vsel %vm1032_vm5, %v1012_v59, %v928_v42 }
  0xcc   : > { %2626 = vmatprep.mubr.msk.f32.mxu1 %vm1130_vm6, %v1045_v15  ;;  %2692 = vmatprep.mubr.msk.f32.mxu0 %vm1130_vm6, %v1045_v15  ;;  %v1015_v47 = vsel %vm999_vm4, %v3279_v11, %v838_v26 }
  0xcd   : > { %2627 = vmatmul.mubr.msk.f32.gmra.mrb[8].mxu1 %vm1130_vm6, %v1046_v0  ;;  %2693 = vmatmul.mubr.msk.f32.gmra.mrb[12].mxu0 %vm1130_vm6, %v1046_v0 }
  0xce   : > { %v836_v31 = vpop.permute.xlu0 %835 }
  0xcf   : > { %v934_v36 = vpop.permute.xlu1 %933  ;;  %v1014_v57 = vsel %vm999_vm4, %v3251_v48, %v836_v31 }
  0xd0   : > { %v1048_v7 = vsel %vm1032_vm5, %v1015_v47, %v934_v36 }
  0xd2   : > { %v932_v34 = vpop.permute.xlu0 %931 }
  0xd3   : > { %v842_v60 = vpop.permute.xlu1 %841  ;;  %v1047_v50 = vsel %vm1032_vm5, %v1014_v57, %v932_v34 }
  0xd4   : > { %2629 = vmatprep.mubr.msk.f32.mxu1 %vm1130_vm6, %v1047_v50  ;;  %2695 = vmatprep.mubr.msk.f32.mxu0 %vm1130_vm6, %v1047_v50  ;;  %v1017_v48 = vsel %vm999_vm4, %v3305_v43, %v842_v60 }
  0xd5   : > { %2630 = vmatmul.mubr.msk.f32.gmra.mrb[10].mxu1 %vm1130_vm6, %v1048_v7  ;;  %2696 = vmatmul.mubr.msk.f32.gmra.mrb[14].mxu0 %vm1130_vm6, %v1048_v7 }
  0xd6   : > { %2734 = vmatprep.mubr.msk.f32.mxu0 %vm1130_vm6, %v1041_v33  ;;  %v840_v11 = vpop.permute.xlu0 %839 }
  0xd7   : > { %v938_v22 = vpop.permute.xlu1 %937  ;;  %v1016_v28 = vsel %vm999_vm4, %v3319_v58, %v840_v11 }
  0xd8   : > { %v3810_v27 = vsel %vm1032_vm5, %v1017_v48, %v938_v22 }
  0xd9   : > { %2735 = vmatmul.mubr.msk.f32.vlgmr.msra.gmra.mrb[0].mxu0 %vm1130_vm6, %v1042_v4 }
  0xda   : > { %2737 = vmatprep.mubr.msk.f32.mxu0 %vm1130_vm6, %v1043_v61  ;;  %v936_v51 = vpop.permute.xlu0 %935 }
  0xdb   : > { %v846_v9 = vpop.permute.xlu1 %845  ;;  %v3814_v24 = vsel %vm1032_vm5, %v1016_v28, %v936_v51 }
  0xdc   : > { %2632 = vmatprep.mubr.msk.f32.mxu1 %vm1130_vm6, %v3814_v24  ;;  %v1019_v35 = vsel %vm999_vm4, %v3344_v16, %v846_v9 }
  0xdd   : > { %2633 = vmatmul.mubr.msk.f32.gmra.mrb[12].mxu1 %vm1130_vm6, %v3810_v27  ;;  %2738 = vmatmul.mubr.msk.f32.gmra.mrb[2].mxu0 %vm1130_vm6, %v1044_v54 }
  0xde   : > { %2740 = vmatprep.mubr.msk.f32.mxu0 %vm1130_vm6, %v1045_v15  ;;  %v844_v58 = vpop.permute.xlu0 %843 }
  0xdf   : > { %v942_v43 = vpop.permute.xlu1 %941  ;;  %v1018_v38 = vsel %vm999_vm4, %v3308_v44, %v844_v58 }
  0xe0   : > { %v3828_v4 = vsel %vm1032_vm5, %v1019_v35, %v942_v43 }
  0xe1   : > { %2741 = vmatmul.mubr.msk.f32.gmra.mrb[4].mxu0 %vm1130_vm6, %v1046_v0 }
  0xe2   : > { %2743 = vmatprep.mubr.msk.f32.mxu0 %vm1130_vm6, %v1047_v50  ;;  %v940_v23 = vpop.permute.xlu0 %939 }
  0xe3   : > { %v850_v63 = vpop.permute.xlu1 %849  ;;  %v3832_v33 = vsel %vm1032_vm5, %v1018_v38, %v940_v23 }
  0xe4   : > { %2635 = vmatprep.mubr.msk.f32.mxu1 %vm1130_vm6, %v3832_v33  ;;  %v1021_v30 = vsel %vm999_vm4, %v3394_v1, %v850_v63 }
  0xe5   : > { %2636 = vmatmul.mubr.msk.f32.gmra.mrb[14].mxu1 %vm1130_vm6, %v3828_v4  ;;  %2744 = vmatmul.mubr.msk.f32.gmra.mrb[6].mxu0 %vm1130_vm6, %v1048_v7 }
  0xe6   : > { %2746 = vmatprep.mubr.msk.f32.mxu0 %vm1130_vm6, %v3814_v24  ;;  %v848_v44 = vpop.permute.xlu0 %847 }
  0xe7   : > { %v946_v16 = vpop.permute.xlu1 %945  ;;  %v1020_v5 = vsel %vm999_vm4, %v3409_v53, %v848_v44 }
  0xe8   : > { %v3848_v12 = vsel %vm1032_vm5, %v1021_v30, %v946_v16 }
  0xe9   : > { %2747 = vmatmul.mubr.msk.f32.gmra.mrb[8].mxu0 %vm1130_vm6, %v3810_v27 }
  0xea   : > { %2749 = vmatprep.mubr.msk.f32.mxu0 %vm1130_vm6, %v3832_v33  ;;  %v944_v13 = vpop.permute.xlu0 %943 }
  0xeb   : > { %v854_v55 = vpop.permute.xlu1 %853  ;;  %v3853_v3 = vsel %vm1032_vm5, %v1020_v5, %v944_v13 }
  0xec   : > { %2638 = vmatprep.mubr.msk.f32.mxu1 %vm1130_vm6, %v3853_v3  ;;  %v1023_v21 = vsel %vm999_vm4, %v3430_v29, %v854_v55 }
  0xed   : > { %2639 = vmatmul.mubr.msk.f32.gmra.mrb[16].mxu1 %vm1130_vm6, %v3848_v12  ;;  %2750 = vmatmul.mubr.msk.f32.gmra.mrb[10].mxu0 %vm1130_vm6, %v3828_v4 }
  0xee   : > { %2752 = vmatprep.mubr.msk.f32.mxu0 %vm1130_vm6, %v3853_v3  ;;  %v852_v53 = vpop.permute.xlu0 %851 }
  0xef   : > { %v950_v1 = vpop.permute.xlu1 %949  ;;  %v1022_v46 = vsel %vm999_vm4, %v3397_v2, %v852_v53 }
  0xf0   : > { %v3870_v61 = vsel %vm1032_vm5, %v1023_v21, %v950_v1 }
  0xf1   : > { %2753 = vmatmul.mubr.msk.f32.gmra.mrb[12].mxu0 %vm1130_vm6, %v3848_v12 }
  0xf2   : > { %v948_v19 = vpop.permute.xlu0 %947 }
  0xf3   : > { %v858_v54 = vpop.permute.xlu1 %857  ;;  %v3873_v32 = vsel %vm1032_vm5, %v1022_v46, %v948_v19 }
  0xf4   : > { %2641 = vmatprep.mubr.msk.f32.mxu1 %vm1130_vm6, %v3873_v32  ;;  %2755 = vmatprep.mubr.msk.f32.mxu0 %vm1130_vm6, %v3873_v32  ;;  %v1025_v56 = vsel %vm999_vm4, %v3460_v18, %v858_v54 }
  0xf5   : > { %2642 = vmatmul.mubr.msk.f32.gmra.mrb[18].mxu1 %vm1130_vm6, %v3870_v61  ;;  %2756 = vmatmul.mubr.msk.f32.gmra.mrb[14].mxu0 %vm1130_vm6, %v3870_v61 }
  0xf6   : > { %v856_v29 = vpop.permute.xlu0 %855 }
  0xf7   : > { %v954_v2 = vpop.permute.xlu1 %953  ;;  %v1024_v59 = vsel %vm999_vm4, %v3475_v14, %v856_v29 }
  0xf8   : > { %v3888_v0 = vsel %vm1032_vm5, %v1025_v56, %v954_v2 }
  0xfa   : > { %v952_v42 = vpop.permute.xlu0 %951 }
  0xfb   : > { %v862_v26 = vpop.permute.xlu1 %861  ;;  %v3891_v15 = vsel %vm1032_vm5, %v1024_v59, %v952_v42 }
  0xfc   : > { %2644 = vmatprep.mubr.msk.f32.mxu1 %vm1130_vm6, %v3891_v15  ;;  %2758 = vmatprep.mubr.msk.f32.mxu0 %vm1130_vm6, %v3891_v15  ;;  %v1027_v36 = vsel %vm999_vm4, %v3488_v49, %v862_v26 }
  0xfd   : > { %2645 = vmatmul.mubr.msk.f32.gmra.mrb[20].mxu1 %vm1130_vm6, %v3888_v0  ;;  %2759 = vmatmul.mubr.msk.f32.gmra.mrb[16].mxu0 %vm1130_vm6, %v3888_v0 }
  0xfe   : > { %v860_v14 = vpop.permute.xlu0 %859 }
  0xff   : > { %v958_v18 = vpop.permute.xlu1 %957  ;;  %v1026_v47 = vsel %vm999_vm4, %v3463_v20, %v860_v14 }
 0x100   : > { %v3906_v60 = vsel %vm1032_vm5, %v1027_v36, %v958_v18 }
 0x102   : > { %v956_v57 = vpop.permute.xlu0 %955 }
 0x103   : > { %v866_v31 = vpop.permute.xlu1 %865  ;;  %v3909_v7 = vsel %vm1032_vm5, %v1026_v47, %v956_v57 }
 0x104   : > { %2647 = vmatprep.mubr.msk.f32.mxu1 %vm1130_vm6, %v3909_v7  ;;  %2761 = vmatprep.mubr.msk.f32.mxu0 %vm1130_vm6, %v3909_v7  ;;  %v1029_v34 = vsel %vm999_vm4, %v3514_v25, %v866_v31 }
 0x105   : > { %2648 = vmatmul.mubr.msk.f32.gmra.mrb[22].mxu1 %vm1130_vm6, %v3906_v60  ;;  %2762 = vmatmul.mubr.msk.f32.gmra.mrb[18].mxu0 %vm1130_vm6, %v3906_v60 }
 0x106   : > { %v864_v49 = vpop.permute.xlu0 %863 }
 0x107   : > { %v962_v20 = vpop.permute.xlu1 %961  ;;  %v1028_v22 = vsel %vm999_vm4, %v3524_v41, %v864_v49 }
 0x108   : > { %v3924_v11 = vsel %vm1032_vm5, %v1029_v34, %v962_v20 }
 0x10a   : > { %v960_v48 = vpop.permute.xlu0 %959 }
 0x10b   : > { %v870_v50 = vpop.permute.xlu1 %869  ;;  %v3927_v9 = vsel %vm1032_vm5, %v1028_v22, %v960_v48 }
 0x10c   : > { %2650 = vmatprep.mubr.msk.f32.mxu1 %vm1130_vm6, %v3927_v9  ;;  %2764 = vmatprep.mubr.msk.f32.mxu0 %vm1130_vm6, %v3927_v9  ;;  %v1031_v28 = vsel %vm999_vm4, %v3551_v40, %v870_v50 }
 0x10d   : > { %2651 = vmatmul.mubr.msk.f32.gmra.mrb[24].mxu1 %vm1130_vm6, %v3924_v11  ;;  %2765 = vmatmul.mubr.msk.f32.gmra.mrb[20].mxu0 %vm1130_vm6, %v3924_v11 }
 0x10e   : > { %v868_v41 = vpop.permute.xlu0 %867 }
 0x10f   : > { %v966_v25 = vpop.permute.xlu1 %965  ;;  %v1030_v43 = vsel %vm999_vm4, %v3518_v37, %v868_v41 }
 0x110   : > { %v3942_v58 = vsel %vm1032_vm5, %v1031_v28, %v966_v25 }
 0x112   : > { %v964_v35 = vpop.permute.xlu0 %963 }
 0x113   : > { %v1094_v51 = vpop.permute.xlu1 %1093  ;;  %v1063_v63 = vsel %vm1032_vm5, %v1030_v43, %v964_v35 }
 0x114   : > { %2653 = vmatprep.mubr.msk.f32.mxu1 %vm1130_vm6, %v1063_v63  ;;  %2767 = vmatprep.mubr.msk.f32.mxu0 %vm1130_vm6, %v1063_v63  ;;  %v1116_v37 = vsel %vm999_vm4, %v3582_v39, %v1094_v51 }
 0x115   : > { %2654 = vmatmul.mubr.msk.f32.gmra.mrb[26].mxu1 %vm1130_vm6, %v3942_v58  ;;  %2768 = vmatmul.mubr.msk.f32.gmra.mrb[22].mxu0 %vm1130_vm6, %v3942_v58 }
 0x116   : > { %v1092_v38 = vpop.permute.xlu0 %1091 }
 0x117   : > { %v1106_v40 = vpop.permute.xlu1 %1105  ;;  %v1115_v16 = vsel %vm999_vm4, %v3610_v52, %v1092_v38 }
 0x118   : > { %v1120_v44 = vsel %vm1032_vm5, %v1116_v37, %v1106_v40 }
 0x11a   : > { %v1104_v30 = vpop.permute.xlu0 %1103 }
 0x11b   : > { %v1098_v23 = vpop.permute.xlu1 %1097  ;;  %v1119_v55 = vsel %vm1032_vm5, %v1115_v16, %v1104_v30 }
 0x11c   : > { %2656 = vmatprep.mubr.msk.f32.mxu1 %vm1130_vm6, %v1119_v55  ;;  %2770 = vmatprep.mubr.msk.f32.mxu0 %vm1130_vm6, %v1119_v55  ;;  %v1118_v39 = vsel %vm999_vm4, %v3633_v10, %v1098_v23 }
 0x11d   : > { %2657 = vmatmul.mubr.msk.f32.gmra.mrb[28].mxu1 %vm1130_vm6, %v1120_v44  ;;  %2771 = vmatmul.mubr.msk.f32.gmra.mrb[24].mxu0 %vm1130_vm6, %v1120_v44 }
 0x11e   : > { %v1096_v13 = vpop.permute.xlu0 %1095 }
 0x11f   : > { %v1110_v5 = vpop.permute.xlu1 %1109  ;;  %v1117_v52 = vsel %vm999_vm4, %v3585_v17, %v1096_v13 }
 0x120   : > { %v1122_v53 = vsel %vm1032_vm5, %v1118_v39, %v1110_v5 }
 0x122   : > { %v1108_v21 = vpop.permute.xlu0 %1107 }
 0x123   : > { %v1712_v1 = vpop.permute.xlu1 %1711  ;;  %v1121_v54 = vsel %vm1032_vm5, %v1117_v52, %v1108_v21 }
 0x124   : > { %2659 = vmatprep.mubr.msk.f32.mxu1 %vm1130_vm6, %v1121_v54  ;;  %2773 = vmatprep.mubr.msk.f32.mxu0 %vm1130_vm6, %v1121_v54  ;;  %v1734_v17 = vsel %vm999_vm4, %v3675_v8, %v1712_v1 }
 0x125   : > { %2660 = vmatmul.mubr.msk.f32.gmra.mrb[30].mxu1 %vm1130_vm6, %v1122_v53  ;;  %2774 = vmatmul.mubr.msk.f32.gmra.mrb[26].mxu0 %vm1130_vm6, %v1122_v53 }
 0x126   : > { %2698 = vmatprep.mubr.msk.f32.mxu1 %vm1130_vm6, %v3814_v24  ;;  %v1710_v10 = vpop.permute.xlu0 %1709 }
 0x127   : > { %v1724_v46 = vpop.permute.xlu1 %1723  ;;  %v1733_v19 = vsel %vm999_vm4, %v3706_v6, %v1710_v10 }
 0x128   : > { %v1738_v29 = vsel %vm1032_vm5, %v1734_v17, %v1724_v46 }
 0x129   : > { %2699 = vmatmul.mubr.msk.f32.vlgmr.msra.gmra.mrb[16].mxu1 %vm1130_vm6, %v3810_v27 }
 0x12a   : > { %2701 = vmatprep.mubr.msk.f32.mxu1 %vm1130_vm6, %v3832_v33  ;;  %v1722_v2 = vpop.permute.xlu0 %1721 }
 0x12b   : > { %v1737_v56 = vsel %vm1032_vm5, %v1733_v19, %v1722_v2  ;;  %v1716_v26 = vpop.permute.xlu1 %1715 }
 0x12c   : > { %2776 = vmatprep.mubr.msk.f32.mxu0 %vm1130_vm6, %v1737_v56  ;;  %v1736_v6 = vsel %vm999_vm4, %v3723_v62, %v1716_v26 }
 0x12d   : > { %2702 = vmatmul.mubr.msk.f32.gmra.mrb[18].mxu1 %vm1130_vm6, %v3828_v4  ;;  %2777 = vmatmul.mubr.msk.f32.gmra.mrb[28].mxu0 %vm1130_vm6, %v1738_v29 }
 0x12e   : > { %2704 = vmatprep.mubr.msk.f32.mxu1 %vm1130_vm6, %v3853_v3 }
 0x12f   : > { %v1728_v27 = vpop.permute.xlu1 %1727 }
 0x130   : > { %v1714_v8 = vpop.permute.xlu0 %1713  ;;  %v1740_v33 = vsel %vm1032_vm5, %v1736_v6, %v1728_v27 }
 0x131   : > { %2705 = vmatmul.mubr.msk.f32.gmra.mrb[20].mxu1 %vm1130_vm6, %v3848_v12  ;;  %v1735_v24 = vsel %vm999_vm4, %v3678_v45, %v1714_v8 }
 0x132   : > { %2707 = vmatprep.mubr.msk.f32.mxu1 %vm1130_vm6, %v3873_v32 }
 0x134   : > { %v1726_v4 = vpop.permute.xlu0 %1725 }
 0x135   : > { %2708 = vmatmul.mubr.msk.f32.gmra.mrb[22].mxu1 %vm1130_vm6, %v3870_v61  ;;  %v1739_v3 = vsel %vm1032_vm5, %v1735_v24, %v1726_v4 }
 0x136   : > { %2710 = vmatprep.mubr.msk.f32.mxu1 %vm1130_vm6, %v3891_v15  ;;  %2779 = vmatprep.mubr.msk.f32.mxu0 %vm1130_vm6, %v1739_v3 }
 0x137   : > { %2780 = vmatmul.mubr.msk.f32.gmra.mrb[30].mxu0 %vm1130_vm6, %v1740_v33 }
 0x139   : > { %2711 = vmatmul.mubr.msk.f32.gmra.mrb[24].mxu1 %vm1130_vm6, %v3888_v0 }
 0x13a   : > { %2713 = vmatprep.mubr.msk.f32.mxu1 %vm1130_vm6, %v3909_v7 }
 0x13d   : > { %2714 = vmatmul.mubr.msk.f32.gmra.mrb[26].mxu1 %vm1130_vm6, %v3906_v60 }
 0x13e   : > { %2716 = vmatprep.mubr.msk.f32.mxu1 %vm1130_vm6, %v3927_v9 }
 0x141   : > { %2717 = vmatmul.mubr.msk.f32.gmra.mrb[28].mxu1 %vm1130_vm6, %v3924_v11 }
 0x142   : > { %2719 = vmatprep.mubr.msk.f32.mxu1 %vm1130_vm6, %v1063_v63 }
 0x145   : > { %2720 = vmatmul.mubr.msk.f32.gmra.mrb[30].mxu1 %vm1130_vm6, %v3942_v58 }
 0x170   : > { %v2616_v45 = vpop.f32.mrb[0].mxu1 }
 0x171   : > { %v1293_v62 = vpop.f32.mrb[1].mxu1 }
 0x184   : > { %v2619_v12 = vpop.f32.mrb[2].mxu1 }
 0x185   : > { %v1303_v61 = vpop.f32.mrb[3].mxu1 }
 0x190   : > { %v2622_v32 = vpop.f32.mrb[4].mxu1 }
 0x191   : > { %v1313_v59 = vpop.f32.mrb[5].mxu1 }
 0x198   : > { %v2625_v0 = vpop.f32.mrb[6].mxu1 }
 0x199   : > { %v1323_v42 = vpop.f32.mrb[7].mxu1 }
 0x1a0   : > { %v2628_v15 = vpop.f32.mrb[8].mxu1 }
 0x1a1   : > { %v1333_v18 = vpop.f32.mrb[9].mxu1 }
 0x1a8   : > { %v2631_v14 = vpop.f32.mrb[10].mxu1 }
 0x1a9   : > { %v1343_v36 = vpop.f32.mrb[11].mxu1 }
 0x1ac   : > { %v2736_v31 = vpop.f32.mrb[0].mxu0 }
 0x1ad   : > { %v4026_v47 = vadd.f32 %v2736_v31, %v2616_v45  ;;  %v1826_v60 = vpop.f32.mrb[1].mxu0 }
 0x1ae   : > { %v4028_v57 = vadd.f32 %v1826_v60, %v1293_v62 }
 0x1af   : > { %2018 = vst.msk [vmem:[%s4024_s15 + $0x8] sm:$0xff] %vm1032_vm5, %v4026_v47 }
 0x1b0   : > { %2017 = vst.msk [vmem:[%s4024_s15] sm:$0xff] %vm1032_vm5, %v4028_v57  ;;  %v2634_v7 = vpop.f32.mrb[12].mxu1  ;;  %v2739_v20 = vpop.f32.mrb[2].mxu0 }
 0x1b1   : > { %v4036_v49 = vadd.f32 %v2739_v20, %v2619_v12  ;;  %v1353_v34 = vpop.f32.mrb[13].mxu1  ;;  %v1836_v50 = vpop.f32.mrb[3].mxu0 }
 0x1b2   : > { %v4038_v22 = vadd.f32 %v1836_v50, %v1303_v61 }
 0x1b3   : > { %2020 = vst.msk [vmem:[%s4024_s15 + $0x18] sm:$0xff] %vm1032_vm5, %v4036_v49 }
 0x1b4   : > { %2019 = vst.msk [vmem:[%s4024_s15 + $0x10] sm:$0xff] %vm1032_vm5, %v4038_v22  ;;  %v2742_v11 = vpop.f32.mrb[4].mxu0 }
 0x1b5   : > { %v4046_v48 = vadd.f32 %v2742_v11, %v2622_v32  ;;  %v1846_v9 = vpop.f32.mrb[5].mxu0 }
 0x1b6   : > { %v4048_v25 = vadd.f32 %v1846_v9, %v1313_v59 }
 0x1b7   : > { %2022 = vst.msk [vmem:[%s4024_s15 + $0x28] sm:$0xff] %vm1032_vm5, %v4046_v48 }
 0x1b8   : > { %2021 = vst.msk [vmem:[%s4024_s15 + $0x20] sm:$0xff] %vm1032_vm5, %v4048_v25  ;;  %v2637_v41 = vpop.f32.mrb[14].mxu1  ;;  %v2745_v28 = vpop.f32.mrb[6].mxu0 }
 0x1b9   : > { %v4056_v51 = vadd.f32 %v2745_v28, %v2625_v0  ;;  %v1363_v43 = vpop.f32.mrb[15].mxu1  ;;  %v1856_v58 = vpop.f32.mrb[7].mxu0 }
 0x1ba   : > { %v4058_v35 = vadd.f32 %v1856_v58, %v1323_v42 }
 0x1bb   : > { %2024 = vst.msk [vmem:[%s4024_s15 + $0x38] sm:$0xff] %vm1032_vm5, %v4056_v51 }
 0x1bc   : > { %2023 = vst.msk [vmem:[%s4024_s15 + $0x30] sm:$0xff] %vm1032_vm5, %v4058_v35  ;;  %v2748_v63 = vpop.f32.mrb[8].mxu0 }
 0x1bd   : > { %v4066_v40 = vadd.f32 %v2748_v63, %v2628_v15  ;;  %v1866_v38 = vpop.f32.mrb[9].mxu0 }
 0x1be   : > { %v4068_v37 = vadd.f32 %v1866_v38, %v1333_v18 }
 0x1bf   : > { %2026 = vst.msk [vmem:[%s4024_s15 + $0x48] sm:$0xff] %vm1032_vm5, %v4066_v40 }
 0x1c0   : > { %2025 = vst.msk [vmem:[%s4024_s15 + $0x40] sm:$0xff] %vm1032_vm5, %v4068_v37  ;;  %v2751_v23 = vpop.f32.mrb[10].mxu0 }
 0x1c1   : > { %v4076_v16 = vadd.f32 %v2751_v23, %v2631_v14  ;;  %v1876_v44 = vpop.f32.mrb[11].mxu0 }
 0x1c2   : > { %v4078_v30 = vadd.f32 %v1876_v44, %v1343_v36 }
 0x1c3   : > { %2028 = vst.msk [vmem:[%s4024_s15 + $0x58] sm:$0xff] %vm1032_vm5, %v4076_v16 }
 0x1c4   : > { %2027 = vst.msk [vmem:[%s4024_s15 + $0x50] sm:$0xff] %vm1032_vm5, %v4078_v30  ;;  %v2754_v55 = vpop.f32.mrb[12].mxu0 }
 0x1c5   : > { %v4086_v5 = vadd.f32 %v2754_v55, %v2634_v7  ;;  %v1886_v13 = vpop.f32.mrb[13].mxu0 }
 0x1c6   : > { %v4088_v39 = vadd.f32 %v1886_v13, %v1353_v34 }
 0x1c7   : > { %2030 = vst.msk [vmem:[%s4024_s15 + $0x68] sm:$0xff] %vm1032_vm5, %v4086_v5 }
 0x1c8   : > { %2029 = vst.msk [vmem:[%s4024_s15 + $0x60] sm:$0xff] %vm1032_vm5, %v4088_v39  ;;  %v2757_v1 = vpop.f32.mrb[14].mxu0 }
 0x1c9   : > { %v4096_v52 = vadd.f32 %v2757_v1, %v2637_v41  ;;  %v1896_v53 = vpop.f32.mrb[15].mxu0 }
 0x1ca   : > { %v4098_v21 = vadd.f32 %v1896_v53, %v1363_v43 }
 0x1cb   : > { %2032 = vst.msk [vmem:[%s4024_s15 + $0x78] sm:$0xff] %vm1032_vm5, %v4096_v52 }
 0x1cc   : > { %2031 = vst.msk [vmem:[%s4024_s15 + $0x70] sm:$0xff] %vm1032_vm5, %v4098_v21 }
 0x1d0   : > { %v2760_v54 = vpop.f32.mrb[16].mxu0 }
 0x1d1   : > { %v1906_v46 = vpop.f32.mrb[17].mxu0 }
 0x1d8   : > { %v2763_v10 = vpop.f32.mrb[18].mxu0 }
 0x1d9   : > { %v1916_v17 = vpop.f32.mrb[19].mxu0 }
 0x1e0   : > { %v2766_v19 = vpop.f32.mrb[20].mxu0 }
 0x1e1   : > { %v1926_v2 = vpop.f32.mrb[21].mxu0 }
 0x1e8   : > { %v2769_v29 = vpop.f32.mrb[22].mxu0 }
 0x1e9   : > { %v1936_v56 = vpop.f32.mrb[23].mxu0 }
 0x1f0   : > { %v2772_v26 = vpop.f32.mrb[24].mxu0 }
 0x1f1   : > { %v1946_v8 = vpop.f32.mrb[25].mxu0 }
 0x1f8   : > { %v2775_v6 = vpop.f32.mrb[26].mxu0 }
 0x1f9   : > { %v1956_v27 = vpop.f32.mrb[27].mxu0 }
 0x1fc   : > { %v2700_v24 = vpop.f32.mrb[16].mxu1 }
 0x1fd   : > { %v4106_v4 = vadd.f32 %v2760_v54, %v2700_v24  ;;  %v1610_v33 = vpop.f32.mrb[17].mxu1  ;;  %v2975_v54 = vmov (!%p2483_p11), 0.0  }
 0x1fe   : > { %v4108_v3 = vadd.f32 %v1906_v46, %v1610_v33  ;;  %2053 = vst.msk [vmem:[%s3055_s9] sm:$0x3] (!%p2483_p11), %vm2052_vm8, %v2975_v54 }
 0x1ff   : > { %2034 = vst.msk [vmem:[%s4024_s15 + $0x88] sm:$0xff] %vm1032_vm5, %v4106_v4 }
 0x200   : > { %2033 = vst.msk [vmem:[%s4024_s15 + $0x80] sm:$0xff] %vm1032_vm5, %v4108_v3  ;;  %v2703_v45 = vpop.f32.mrb[18].mxu1  ;;  %v2778_v62 = vpop.f32.mrb[28].mxu0 }
 0x201   : > { %v4116_v12 = vadd.f32 %v2763_v10, %v2703_v45  ;;  %v1620_v61 = vpop.f32.mrb[19].mxu1  ;;  %v1966_v32 = vpop.f32.mrb[29].mxu0 }
 0x202   : > { %v4118_v59 = vadd.f32 %v1916_v17, %v1620_v61 }
 0x203   : > { %2036 = vst.msk [vmem:[%s4024_s15 + $0x98] sm:$0xff] %vm1032_vm5, %v4116_v12 }
 0x204   : > { %2035 = vst.msk [vmem:[%s4024_s15 + $0x90] sm:$0xff] %vm1032_vm5, %v4118_v59  ;;  %v2706_v0 = vpop.f32.mrb[20].mxu1 }
 0x205   : > { %v4126_v42 = vadd.f32 %v2766_v19, %v2706_v0  ;;  %v1630_v15 = vpop.f32.mrb[21].mxu1 }
 0x206   : > { %v4128_v18 = vadd.f32 %v1926_v2, %v1630_v15 }
 0x207   : > { %2038 = vst.msk [vmem:[%s4024_s15 + $0xa8] sm:$0xff] %vm1032_vm5, %v4126_v42 }
 0x208   : > { %2037 = vst.msk [vmem:[%s4024_s15 + $0xa0] sm:$0xff] %vm1032_vm5, %v4128_v18  ;;  %v2709_v14 = vpop.f32.mrb[22].mxu1 }
 0x209   : > { %v4136_v36 = vadd.f32 %v2769_v29, %v2709_v14  ;;  %v1640_v31 = vpop.f32.mrb[23].mxu1 }
 0x20a   : > { %v4138_v60 = vadd.f32 %v1936_v56, %v1640_v31  ;;  %v2781_v7 = vpop.f32.mrb[30].mxu0 }
 0x20b   : > { %2040 = vst.msk [vmem:[%s4024_s15 + $0xb8] sm:$0xff] %vm1032_vm5, %v4136_v36  ;;  %v1976_v20 = vpop.f32.mrb[31].mxu0 }
 0x20c   : > { %2039 = vst.msk [vmem:[%s4024_s15 + $0xb0] sm:$0xff] %vm1032_vm5, %v4138_v60  ;;  %v2712_v34 = vpop.f32.mrb[24].mxu1 }
 0x20d   : > { %v4146_v50 = vadd.f32 %v2772_v26, %v2712_v34  ;;  %v1650_v11 = vpop.f32.mrb[25].mxu1 }
 0x20e   : > { %v4148_v9 = vadd.f32 %v1946_v8, %v1650_v11 }
 0x20f   : > { %2042 = vst.msk [vmem:[%s4024_s15 + $0xc8] sm:$0xff] %vm1032_vm5, %v4146_v50 }
 0x210   : > { %2041 = vst.msk [vmem:[%s4024_s15 + $0xc0] sm:$0xff] %vm1032_vm5, %v4148_v9  ;;  %v2715_v41 = vpop.f32.mrb[26].mxu1 }
 0x211   : > { %v4156_v28 = vadd.f32 %v2775_v6, %v2715_v41  ;;  %v1660_v43 = vpop.f32.mrb[27].mxu1 }
 0x212   : > { %v4158_v58 = vadd.f32 %v1956_v27, %v1660_v43 }
 0x213   : > { %2044 = vst.msk [vmem:[%s4024_s15 + $0xd8] sm:$0xff] %vm1032_vm5, %v4156_v28 }
 0x214   : > { %2043 = vst.msk [vmem:[%s4024_s15 + $0xd0] sm:$0xff] %vm1032_vm5, %v4158_v58  ;;  %v2718_v63 = vpop.f32.mrb[28].mxu1 }
 0x215   : > { %v4166_v38 = vadd.f32 %v2778_v62, %v2718_v63  ;;  %v1670_v23 = vpop.f32.mrb[29].mxu1 }
 0x216   : > { %v4168_v44 = vadd.f32 %v1966_v32, %v1670_v23  ;;  %2051 = sbr.rel (%p2483_p11) target bundleno = 541 (0x21d), region = 40 }
 0x217   : > { %2046 = vst.msk [vmem:[%s4024_s15 + $0xe8] sm:$0xff] %vm1032_vm5, %v4166_v38 }
 0x218   : > { %2045 = vst.msk [vmem:[%s4024_s15 + $0xe0] sm:$0xff] %vm1032_vm5, %v4168_v44  ;;  %v2721_v55 = vpop.f32.mrb[30].mxu1 }
 0x219   : > { %v4176_v13 = vadd.f32 %v2781_v7, %v2721_v55  ;;  %v1680_v1 = vpop.f32.mrb[31].mxu1 }
 0x21a   : > { %v4178_v53 = vadd.f32 %v1976_v20, %v1680_v1 }
 0x21b   : > { %2048 = vst.msk [vmem:[%s4024_s15 + $0xf8] sm:$0xff] %vm1032_vm5, %v4176_v13 }
 0x21c   : > { %2047 = vst.msk [vmem:[%s4024_s15 + $0xf0] sm:$0xff] %vm1032_vm5, %v4178_v53 }
 0x21d PF: > { %v2054_v46 = vsel %vm1032_vm5, %v4028_v57, 0.0  ;;  %v2055_v10 = vsel %vm1032_vm5, %v4026_v47, 0.0  ;;  %v2057_v17 = vsel %vm1032_vm5, %v4038_v22, 0.0  ;;  %v2059_v2 = vsel %vm1032_vm5, %v4036_v49, 0.0 }
 0x21e   : > { %v2056_v19 = vadd.f32 %v2055_v10, %v2054_v46  ;;  %v2061_v56 = vsel %vm1032_vm5, %v4048_v25, 0.0  ;;  %v2063_v8 = vsel %vm1032_vm5, %v4046_v48, 0.0  ;;  %v2065_v27 = vsel %vm1032_vm5, %v4058_v35, 0.0 }
 0x21f   : > { %v2067_v33 = vsel %vm1032_vm5, %v4056_v51, 0.0  ;;  %v2069_v62 = vsel %vm1032_vm5, %v4068_v37, 0.0  ;;  %v2071_v32 = vsel %vm1032_vm5, %v4066_v40, 0.0  ;;  %v2123_v0 = vmul.f32 %v4028_v57, %v4028_v57 }
 0x220   : > { %v2058_v29 = vadd.f32 %v2057_v17, %v2056_v19  ;;  %v2124_v15 = vmul.f32 %v4026_v47, %v4026_v47  ;;  %v2125_v14 = vmul.f32 %v4038_v22, %v4038_v22  ;;  %v2073_v7 = vsel %vm1032_vm5, %v4078_v30, 0.0 }
 0x221   : > { %v2126_v20 = vmul.f32 %v4036_v49, %v4036_v49  ;;  %v2075_v11 = vsel %vm1032_vm5, %v4076_v16, 0.0  ;;  %v2127_v57 = vmul.f32 %v4048_v25, %v4048_v25  ;;  %v2155_v41 = vsel %vm1032_vm5, %v2123_v0, 0.0 }
 0x222   : > { %v2060_v26 = vadd.f32 %v2059_v2, %v2058_v29  ;;  %v2156_v47 = vsel %vm1032_vm5, %v2124_v15, 0.0  ;;  %v2158_v22 = vsel %vm1032_vm5, %v2125_v14, 0.0  ;;  %v2077_v23 = vsel %vm1032_vm5, %v4088_v39, 0.0 }
 0x223   : > { %v2157_v63 = vadd.f32 %v2156_v47, %v2155_v41  ;;  %v2128_v49 = vmul.f32 %v4046_v48, %v4046_v48  ;;  %v2160_v55 = vsel %vm1032_vm5, %v2126_v20, 0.0  ;;  %v2079_v25 = vsel %vm1032_vm5, %v4086_v5, 0.0 }
 0x224   : > { %v2062_v6 = vadd.f32 %v2061_v56, %v2060_v26  ;;  %v2129_v46 = vmul.f32 %v4058_v35, %v4058_v35  ;;  %v2162_v10 = vsel %vm1032_vm5, %v2127_v57, 0.0  ;;  %v2081_v2 = vsel %vm1032_vm5, %v4098_v21, 0.0 }
 0x225   : > { %v2159_v54 = vadd.f32 %v2158_v22, %v2157_v63  ;;  %v2130_v48 = vmul.f32 %v4056_v51, %v4056_v51  ;;  %v2164_v29 = vsel %vm1032_vm5, %v2128_v49, 0.0  ;;  %v2131_v35 = vmul.f32 %v4068_v37, %v4068_v37 }
 0x226   : > { %v2064_v24 = vadd.f32 %v2063_v8, %v2062_v6  ;;  %v2083_v8 = vsel %vm1032_vm5, %v4096_v52, 0.0  ;;  %v2166_v6 = vsel %vm1032_vm5, %v2129_v46, 0.0  ;;  %v2132_v51 = vmul.f32 %v4066_v40, %v4066_v40 }
 0x227   : > { %v2161_v19 = vadd.f32 %v2160_v55, %v2159_v54  ;;  %v2133_v37 = vmul.f32 %v4078_v30, %v4078_v30  ;;  %v2170_v0 = vsel %vm1032_vm5, %v2131_v35, 0.0  ;;  %v2134_v40 = vmul.f32 %v4076_v16, %v4076_v16 }
 0x228   : > { %v2066_v45 = vadd.f32 %v2065_v27, %v2064_v24  ;;  %v2135_v30 = vmul.f32 %v4088_v39, %v4088_v39  ;;  %v2093_v22 = vsel %vm1032_vm5, %v4128_v18, 0.0  ;;  %v2136_v16 = vmul.f32 %v4086_v5, %v4086_v5 }
 0x229   : > { %v2163_v26 = vadd.f32 %v2162_v10, %v2161_v19  ;;  %v2174_v57 = vsel %vm1032_vm5, %v2133_v37, 0.0  ;;  %v2095_v49 = vsel %vm1032_vm5, %v4126_v42, 0.0  ;;  %v2137_v39 = vmul.f32 %v4098_v21, %v4098_v21 }
 0x22a   : > { %v2068_v61 = vadd.f32 %v2067_v33, %v2066_v45  ;;  %v2085_v33 = vsel %vm1032_vm5, %v4108_v3, 0.0  ;;  %v2168_v45 = vsel %vm1032_vm5, %v2130_v48, 0.0  ;;  %v2178_v55 = vsel %vm1032_vm5, %v2135_v30, 0.0 }
 0x22b   : > { %v2165_v24 = vadd.f32 %v2164_v29, %v2163_v26  ;;  %v2138_v5 = vmul.f32 %v4096_v52, %v4096_v52  ;;  %v2180_v46 = vsel %vm1032_vm5, %v2136_v16, 0.0  ;;  %v2099_v19 = vsel %vm1032_vm5, %v4136_v36, 0.0 }
 0x22c   : > { %v2070_v31 = vadd.f32 %v2069_v62, %v2068_v61  ;;  %v2139_v21 = vmul.f32 %v4108_v3, %v4108_v3  ;;  %v2140_v52 = vmul.f32 %v4106_v4, %v4106_v4  ;;  %v2141_v3 = vmul.f32 %v4118_v59, %v4118_v59 }
 0x22d   : > { %v2167_v61 = vadd.f32 %v2166_v6, %v2165_v24  ;;  %v2184_v26 = vsel %vm1032_vm5, %v2138_v5, 0.0  ;;  %v2103_v6 = vsel %vm1032_vm5, %v4146_v50, 0.0  ;;  %v2147_v16 = vmul.f32 %v4148_v9, %v4148_v9 }
 0x22e   : > { %v2072_v34 = vadd.f32 %v2071_v32, %v2070_v31  ;;  %v2087_v32 = vsel %vm1032_vm5, %v4106_v4, 0.0  ;;  %v2089_v31 = vsel %vm1032_vm5, %v4118_v59, 0.0  ;;  %v2142_v4 = vmul.f32 %v4116_v12, %v4116_v12 }
 0x22f   : > { %v2169_v14 = vadd.f32 %v2168_v45, %v2167_v61  ;;  %v2188_v45 = vsel %vm1032_vm5, %v2140_v52, 0.0  ;;  %v2143_v59 = vmul.f32 %v4128_v18, %v4128_v18  ;;  %v2190_v37 = vsel %vm1032_vm5, %v2141_v3, 0.0 }
 0x230   : > { %v2074_v43 = vadd.f32 %v2073_v7, %v2072_v34  ;;  %v2172_v7 = vsel %vm1032_vm5, %v2132_v51, 0.0  ;;  %v2105_v51 = vsel %vm1032_vm5, %v4158_v58, 0.0  ;;  %v2145_v18 = vmul.f32 %v4138_v60, %v4138_v60 }
 0x231   : > { %v2171_v34 = vadd.f32 %v2170_v0, %v2169_v14  ;;  %v2109_v14 = vsel %vm1032_vm5, %v4168_v44, 0.0  ;;  %vm2227_vm9 = vcmask 254976  }
 0x232   : > { %v2076_v1 = vadd.f32 %v2075_v11, %v2074_v43  ;;  %v2091_v11 = vsel %vm1032_vm5, %v4116_v12, 0.0  ;;  %v2176_v43 = vsel %vm1032_vm5, %v2134_v40, 0.0  ;;  %v2144_v12 = vmul.f32 %v4126_v42, %v4126_v42 }
 0x233   : > { %v2173_v47 = vadd.f32 %v2172_v7, %v2171_v34  ;;  %v2194_v34 = vsel %vm1032_vm5, %v2143_v59, 0.0 }
 0x234   : > { %v2078_v17 = vadd.f32 %v2077_v23, %v2076_v1 }
 0x235   : > { %v2175_v23 = vadd.f32 %v2174_v57, %v2173_v47  ;;  %v2146_v57 = vmul.f32 %v4136_v36, %v4136_v36 }
 0x236   : > { %v2080_v56 = vadd.f32 %v2079_v25, %v2078_v17  ;;  %v2097_v25 = vsel %vm1032_vm5, %v4138_v60, 0.0 }
 0x237   : > { %v2177_v54 = vadd.f32 %v2176_v43, %v2175_v23  ;;  %v2198_v43 = vsel %vm1032_vm5, %v2145_v18, 0.0  ;;  %v2200_v23 = vsel %vm1032_vm5, %v2146_v57, 0.0 }
 0x238   : > { %v2082_v27 = vadd.f32 %v2081_v2, %v2080_v56  ;;  %v2182_v2 = vsel %vm1032_vm5, %v2137_v39, 0.0  ;;  %v2101_v56 = vsel %vm1032_vm5, %v4148_v9, 0.0  ;;  %v2115_v39 = vsel %vm1032_vm5, %v4176_v13, 0.0 }
 0x239   : > { %v2179_v17 = vadd.f32 %v2178_v55, %v2177_v54  ;;  %v2149_v55 = vmul.f32 %v4158_v58, %v4158_v58  ;;  %v2150_v9 = vmul.f32 %v4156_v28, %v4156_v28 }
 0x23a   : > { %v2084_v62 = vadd.f32 %v2083_v8, %v2082_v27  ;;  %v2186_v27 = vsel %vm1032_vm5, %v2139_v21, 0.0 }
 0x23b   : > { %v2181_v29 = vadd.f32 %v2180_v46, %v2179_v17  ;;  %v2151_v46 = vmul.f32 %v4168_v44, %v4168_v44  ;;  %v2208_v58 = vsel %vm1032_vm5, %v2150_v9, 0.0 }
 0x23c   : > { %v2086_v15 = vadd.f32 %v2085_v33, %v2084_v62 }
 0x23d   : > { %v2183_v35 = vadd.f32 %v2182_v2, %v2181_v29 }
 0x23e   : > { %v2088_v20 = vadd.f32 %v2087_v32, %v2086_v15  ;;  %v2107_v32 = vsel %vm1032_vm5, %v4156_v28, 0.0  ;;  %v2153_v28 = vmul.f32 %v4178_v53, %v4178_v53 }
 0x23f   : > { %v2185_v33 = vadd.f32 %v2184_v26, %v2183_v35 }
 0x240   : > { %v2090_v41 = vadd.f32 %v2089_v31, %v2088_v20  ;;  %v2192_v31 = vsel %vm1032_vm5, %v2142_v4, 0.0  ;;  %v2111_v20 = vsel %vm1032_vm5, %v4166_v38, 0.0 }
 0x241   : > { %v2187_v61 = vadd.f32 %v2186_v27, %v2185_v33 }
 0x242   : > { %v2092_v63 = vadd.f32 %v2091_v11, %v2090_v41  ;;  %v2196_v41 = vsel %vm1032_vm5, %v2144_v12, 0.0 }
 0x243   : > { %v2189_v15 = vadd.f32 %v2188_v45, %v2187_v61 }
 0x244   : > { %v2094_v1 = vadd.f32 %v2093_v22, %v2092_v63  ;;  %v2113_v22 = vsel %vm1032_vm5, %v4178_v53, 0.0  ;;  %v2148_v63 = vmul.f32 %v4146_v50, %v4146_v50 }
 0x245   : > { %v2191_v7 = vadd.f32 %v2190_v37, %v2189_v15 }
 0x246   : > { %v2096_v10 = vadd.f32 %v2095_v49, %v2094_v1  ;;  %v2202_v1 = vsel %vm1032_vm5, %v2147_v16, 0.0 }
 0x247   : > { %v2193_v30 = vadd.f32 %v2192_v31, %v2191_v7 }
 0x248   : > { %v2098_v48 = vadd.f32 %v2097_v25, %v2096_v10  ;;  %v2204_v25 = vsel %vm1032_vm5, %v2148_v63, 0.0  ;;  %v2206_v10 = vsel %vm1032_vm5, %v2149_v55, 0.0 }
 0x249   : > { %v2195_v47 = vadd.f32 %v2194_v34, %v2193_v30 }
 0x24a   : > { %v2100_v8 = vadd.f32 %v2099_v19, %v2098_v48  ;;  %v2152_v19 = vmul.f32 %v4166_v38, %v4166_v38  ;;  %v2210_v48 = vsel %vm1032_vm5, %v2151_v46, 0.0  ;;  %v2214_v38 = vsel %vm1032_vm5, %v2153_v28, 0.0 }
 0x24b   : > { %v2197_v60 = vadd.f32 %v2196_v41, %v2195_v47 }
 0x24c   : > { %v2102_v24 = vadd.f32 %v2101_v56, %v2100_v8  ;;  %v2154_v56 = vmul.f32 %v4176_v13, %v4176_v13  ;;  %v2212_v44 = vsel %vm1032_vm5, %v2152_v19, 0.0 }
 0x24d   : > { %v2199_v36 = vadd.f32 %v2198_v43, %v2197_v60 }
 0x24e   : > { %v2104_v62 = vadd.f32 %v2103_v6, %v2102_v24  ;;  %v2216_v35 = vsel %vm1032_vm5, %v2154_v56, 0.0 }
 0x24f   : > { %v2201_v54 = vadd.f32 %v2200_v23, %v2199_v36 }
 0x250   : > { %v2106_v0 = vadd.f32 %v2105_v51, %v2104_v62 }
 0x251   : > { %v2203_v50 = vadd.f32 %v2202_v1, %v2201_v54 }
 0x252   : > { %v2108_v40 = vadd.f32 %v2107_v32, %v2106_v0  ;;  %v2224_v32 = vld [vmem:[%s3055_s9] sm:$0x3] }
 0x253   : > { %v2205_v17 = vadd.f32 %v2204_v25, %v2203_v50 }
 0x254   : > { %v2110_v11 = vadd.f32 %v2109_v14, %v2108_v40 }
 0x255   : > { %v2207_v2 = vadd.f32 %v2206_v10, %v2205_v17 }
 0x256   : > { %v2112_v42 = vadd.f32 %v2111_v20, %v2110_v11 }
 0x257   : > { %v2209_v29 = vadd.f32 %v2208_v58, %v2207_v2 }
 0x258   : > { %v2114_v49 = vadd.f32 %v2113_v22, %v2112_v42 }
 0x259   : > { %v2211_v26 = vadd.f32 %v2210_v48, %v2209_v29 }
 0x25a   : > { %v2116_v5 = vadd.f32 %v2115_v39, %v2114_v49 }
 0x25b   : > { %v2213_v8 = vadd.f32 %v2212_v44, %v2211_v26 }
 0x25c   : > { %v2117_v21 = vrot.slane %v2116_v5, 4 }
 0x25d   : > { %v2215_v3 = vadd.f32 %v2214_v38, %v2213_v8 }
 0x25e   : > { %v2118_v52 = vadd.f32 %v2117_v21, %v2116_v5 }
 0x25f   : > { %v2217_v53 = vadd.f32 %v2216_v35, %v2215_v3 }
 0x260   : > { %v2119_v6 = vrot.slane %v2118_v52, 2 }
 0x261   : > { %v2218_v24 = vrot.slane %v2217_v53, 4 }
 0x262   : > { %v2120_v27 = vadd.f32 %v2119_v6, %v2118_v52 }
 0x263   : > { %v2219_v33 = vadd.f32 %v2218_v24, %v2217_v53 }
 0x264   : > { %v2121_v51 = vrot.slane %v2120_v27, 1 }
 0x265   : > { %v2220_v4 = vrot.slane %v2219_v33, 2 }
 0x266   : > { %v2122_v45 = vadd.f32 %v2121_v51, %v2120_v27 }
 0x267   : > { %v2221_v13 = vadd.f32 %v2220_v4, %v2219_v33 }
 0x269   : > { %v2222_v62 = vrot.slane %v2221_v13, 1 }
 0x26b   : > { %v2223_v61 = vadd.f32 %v2222_v62, %v2221_v13 }
 0x26d   : > { %v2225_v59 = vsel %vm504_vm0, %v2122_v45, %v2223_v61 }
 0x26e   : > { %v2226_v37 = vadd.f32 %v2225_v59, %v2224_v32 }
 0x270   : > { %2228 = vst.msk [vmem:[%s3055_s9] sm:$0x3] %vm2227_vm9, %v2226_v37 }
 0x271 PF: > { %s16_s22 = sadd.s32 1, %s2971_s22   ;;  %s4377_s18 = smov %s2963_s20 }
 0x272   : > { %p13_p12 = scmp.ge.s32.totalorder %s16_s22, 10   ;;  %s4378_s19 = smov %s2967_s21 }
 0x273   : > { %s4379_s20 = smov %s4382_s23  ;;  %s4380_s21 = smov %s4386_s24 }
 0x274   :  { %15 = sbr.rel (!%p13_p12) target bundleno = 3 (0x3), region = 87 }

// kernel: tiny_ssd_forward.7
= control target key start
LH: loop header
LB: loop body
LE: loop exit
PB: predicated region body
PF: predicated region fallthrough
CT: control target
= control target key end

     0   :  { %s3132_s18 = smov 0   ;;  %s3134_s19 = smov 0   ;;  %s4576_s0 = inlined_call_operand.vmem [shape: f32[2,32,32,32], index: 0, kind: input, shape index: {}]   ;;  %s4577_s1 = inlined_call_operand.vmem [shape: f32[1,1,32], index: 1, kind: input, shape index: {}]   ;;  %s4578_s2 = inlined_call_operand.vmem [shape: f32[1,1,32], index: 2, kind: input, shape index: {}]   ;;  %s4579_s3 = inlined_call_operand.vmem [shape: f32[3,96,32], index: 3, kind: input, shape index: {}]   ;;  %s4580_s4 = inlined_call_operand.vmem [shape: f32[2,32,32,32], index: 4, kind: output, shape index: {0}]   ;;  %s4581_s5 = inlined_call_operand.vmem [shape: f32[2,2,32], index: 5, kind: output, shape index: {1}]  }
   0x1   :  { %s3136_s20 = smov 0   ;;  %s3138_s21 = smov 0  }
   0x2   :  { %s3140_s22 = smov 0  }
   0x3 LB: > { %s25_s23 = sadd.s32 1, %s3089_s20  ;;  %s28_s24 = sadd.s32 1, %s3093_s21  ;;  %s3097_s22 = sphi %s3140_s22, %s16_s22   ;;  %s3093_s21 = sphi %s3138_s21, %s4603_s21   ;;  %s3089_s20 = sphi %s3136_s20, %s4602_s20   ;;  %s3085_s19 = sphi %s3134_s19, %s4601_s19   ;;  %s3081_s18 = sphi %s3132_s18, %s4600_s18  }
   0x4   : > { %p26_p0 = scmp.ge.s32.totalorder %s25_s23, 4  ;;  %p2378_p1 = scmp.ge.s32.totalorder %s3097_s22, 1 }
   0x5   : > { %p204_p2 = scmp.lt.s32.totalorder %s3097_s22, 9 }
   0x6   : > { %s4605_s23 = smov (%p26_p0, %s25_s23), 0  ;;  %s4607_s24 = smov (!%p26_p0, %s28_s24), %s3093_s21 }
   0x7   : > { %p205_p3 = pnand %p2378_p1, %p204_p2  ;;  %p30_p4 = scmp.ge.s32.totalorder %s4607_s24, 2 }
   0x9   : > { %s4609_s24 = smov (%p30_p4, %s4607_s24), 0  ;;  %208 = sbr.rel (%p205_p3) target bundleno = 627 (0x273), region = 36 }
  0x10   : > { %p241_p5 = scmp.lt.s32.totalorder %s3085_s19, 1  ;;  %s2517_s25 = sshll.u32 %s3081_s18, 8  ;;  %v2393_v0 = vld [vmem:[%s4579_s3 + $0x60] sm:$0xff]  ;;  %v2394_v1 = vld [vmem:[%s4579_s3 + $0x68] sm:$0xff]  ;;  %v2395_v2 = vld [vmem:[%s4579_s3 + $0x70] sm:$0xff]  ;;  %vm504_vm0 = vcmask 1040384  }
  0x11   : > { %v2396_v3 = vld [vmem:[%s4579_s3 + $0x78] sm:$0xff]  ;;  %s3180_s9 = sshll.u32 %s3081_s18, 3  ;;  %p448_p6 = scmp.eq.s32.totalorder %s3081_s18, 0  ;;  %v2866_v4 = vpack.c.bf16 %v2394_v1, %v2393_v0  ;;  %v2397_v6 = vld [vmem:[%s4579_s3 + $0x80] sm:$0xff]  ;;  %v2398_v7 = vld [vmem:[%s4579_s3 + $0x88] sm:$0xff]  ;;  %vm661_vm1 = vcmask 1046528  }
  0x12   : > { %s4611_s19 = smov (!%p241_p5, %s3085_s19), 1  ;;  %v2870_v5 = vpack.c.bf16 %v2396_v3, %v2395_v2  ;;  %v3204_v8 = vld [vmem:[%s4577_s1] ss:$0 sm:$0xff]  ;;  %v2874_v13 = vpack.c.bf16 %v2398_v7, %v2397_v6  ;;  %v2399_v18 = vld [vmem:[%s4579_s3 + $0x90] sm:$0xff]  ;;  %v2400_v19 = vld [vmem:[%s4579_s3 + $0x98] sm:$0xff]  ;;  %vm734_vm2 = vcmask 1045504  }
  0x13   : > { %s2516_s10 = sshll.u32 %s4611_s19, 10  ;;  %s2385_s11 = sshll.u32 %s4611_s19, 1  ;;  %2867 = vmatprep.subr.bf16.mxu1 %v2866_v4  ;;  %v3209_v9 = vld [vmem:[%s4578_s2] ss:$0 sm:$0xff]  ;;  %v2878_v25 = vpack.c.bf16 %v2400_v19, %v2399_v18  ;;  %vm999_vm4 = vcmask 261120   ;;  %vm1032_vm5 = vcmask 523264  }
  0x14   : > { %s3194_s26 = scalar_lea.vmem %s4576_s0, %s2516_s10  ;;  %s3199_s29 = scalar_lea.vmem %s4581_s5, %s2385_s11  ;;  %2869 = vmatpush3.bf16.msra.mxu1 %v2866_v4  ;;  %vm1142_vm6 = vcmask 785408  }
  0x15   : > { %s3212_s10 = scalar_lea.vmem %s3194_s26, %s2517_s25  ;;  %s2390_s11 = sadd.s32 4294967295, %s3180_s9  ;;  %2871 = vmatprep.subr.bf16.mxu1 %v2870_v5 }
  0x16   : > { %v266_v10 = vld [vmem:[%s3212_s10] sm:$0xff]  ;;  %v267_v11 = vld [vmem:[%s3212_s10 + $0x8] sm:$0xff]  ;;  %v268_v12 = vld [vmem:[%s3212_s10 + $0x10] sm:$0xff]  ;;  %p407_p7 = scmp.gt.s32.totalorder %s2390_s11, 0  ;;  %s3099_s27 = smov 32  }
  0x17   : > { %v304_v14 = vmul.f32 %v3204_v8, %v266_v10  ;;  %v305_v15 = vmul.f32 %v3204_v8, %v267_v11  ;;  %v306_v16 = vmul.f32 %v3204_v8, %v268_v12  ;;  %s3223_s25 = scalar_select %p448_p6, 1, 0  ;;  %v269_v17 = vld [vmem:[%s3212_s10 + $0x18] sm:$0xff]  ;;  %v270_v60 = vld [vmem:[%s3212_s10 + $0x20] sm:$0xff]  ;;  %v271_v1 = vld [vmem:[%s3212_s10 + $0x28] sm:$0xff] }
  0x18   : > { %s4613_s11 = smov (!%p407_p7, %s2390_s11), 0  ;;  %v307_v20 = vmul.f32 %v3204_v8, %v269_v17  ;;  %2873 = vmatpush3.bf16.msra.mxu1 %v2870_v5  ;;  %v272_v2 = vld [vmem:[%s3212_s10 + $0x30] sm:$0xff]  ;;  %v308_v11 = vmul.f32 %v3204_v8, %v270_v60  ;;  %s3100_s28 = smov 64  }
  0x19   : > { %v342_v21 = vadd.f32 %v3209_v9, %v304_v14  ;;  %v343_v22 = vadd.f32 %v3209_v9, %v305_v15  ;;  %v344_v23 = vadd.f32 %v3209_v9, %v306_v16  ;;  %s2391_s16 = sshll.u32 %s4613_s11, 5  ;;  %2875 = vmatprep.subr.bf16.mxu1 %v2874_v13  ;;  %v450_v29 = vstv %s3223_s25  ;;  %s409_s30 = sadd.s32 8, %s3180_s9 }
  0x1a   : > { %v345_v24 = vadd.f32 %v3209_v9, %v307_v20  ;;  %s413_s17 = scalar_lea.vmem %s3194_s26, %s2391_s16  ;;  %vm3241_vm3 = vcmp.eq.s32.totalorder %v450_v29, 1  ;;  %v309_v14 = vmul.f32 %v3204_v8, %v271_v1  ;;  %v310_v15 = vmul.f32 %v3204_v8, %v272_v2  ;;  %p3678_p8 = scmp.lt.s32.totalorder %s409_s30, 31 }
  0x1b   : > { %v374_v26 = vmax.f32 %v342_v21, 0.0  ;;  %v375_v27 = vmax.f32 %v343_v22, 0.0  ;;  %v376_v28 = vmax.f32 %v344_v23, 0.0  ;;  %v414_v30 = vld [vmem:[%s413_s17] sm:$0xff]  ;;  %v415_v31 = vld [vmem:[%s413_s17 + $0x8] sm:$0xff]  ;;  %v416_v33 = vld [vmem:[%s413_s17 + $0x10] sm:$0xff] }
  0x1c   : > { %v377_v32 = vmax.f32 %v345_v24, 0.0  ;;  %v418_v37 = vmul.f32 %v3204_v8, %v414_v30  ;;  %2877 = vmatpush3.bf16.msra.mxu1 %v2874_v13  ;;  %v419_v38 = vmul.f32 %v3204_v8, %v415_v31  ;;  %v420_v41 = vmul.f32 %v3204_v8, %v416_v33  ;;  %v417_v42 = vld [vmem:[%s413_s17 + $0x18] sm:$0xff]  ;;  %s4615_s30 = smov (!%p3678_p8, %s409_s30), 31  ;;  %p456_p9 = scmp.eq.s32.totalorder %s3081_s18, 3 }
  0x1d   : > { %v512_v34 = vrot.slane %v374_v26, 7  ;;  %v513_v35 = vrot.slane %v375_v27, 7  ;;  %v515_v36 = vrot.slane %v376_v28, 7  ;;  %2879 = vmatprep.subr.bf16.mxu1 %v2878_v25  ;;  %v421_v54 = vmul.f32 %v3204_v8, %v417_v42  ;;  %s2392_s7 = sshll.u32 %s4615_s30, 5  ;;  %p249_p10 = scmp.lt.s32.totalorder %s3180_s9, 31 }
  0x1e   : > { %v517_v40 = vrot.slane %v377_v32, 7  ;;  %v422_v46 = vadd.f32 %v3209_v9, %v418_v37  ;;  %v423_v52 = vadd.f32 %v3209_v9, %v419_v38  ;;  %v424_v57 = vadd.f32 %v3209_v9, %v420_v41  ;;  %s3721_s8 = scalar_lea.vmem %s3194_s26, %s2392_s7  ;;  %p2513_p11 = scmp.ne.s32.totalorder %s3081_s18, 0 }
  0x1f   : > { %v3247_v43 = vsel %vm504_vm0, %v512_v34, %v513_v35  ;;  %v3250_v44 = vsel %vm504_vm0, %v513_v35, %v515_v36  ;;  %v3253_v45 = vsel %vm504_vm0, 0.0, %v512_v34  ;;  %v425_v5 = vadd.f32 %v3209_v9, %v421_v54  ;;  %v273_v35 = vld [vmem:[%s3212_s10 + $0x38] sm:$0xff]  ;;  %s3741_s26 = scalar_select %p456_p9, 1, 0 }
  0x20   : > { %v672_v47 = vrot.slane %v3247_v43, 1  ;;  %v674_v48 = vrot.slane %v3250_v44, 1  ;;  %v671_v49 = vrot.slane %v3253_v45, 1  ;;  %v744_v50 = vrot.slane %v3253_v45, 2  ;;  %2881 = vmatpush3.bf16.msra.mxu1 %v2878_v25  ;;  %s4617_s9 = smov (!%p249_p10, %s3180_s9), 31 }
  0x21   : > { %v745_v51 = vrot.slane %v3247_v43, 2  ;;  %v426_v53 = vmax.f32 %v422_v46, 0.0  ;;  %v427_v58 = vmax.f32 %v423_v52, 0.0  ;;  %v747_v63 = vrot.slane %v3250_v44, 2 }
  0x22   : > { %v675_v55 = vsel %vm661_vm1, %v672_v47, %v674_v48  ;;  %v673_v56 = vsel %vm661_vm1, %v671_v49, %v672_v47  ;;  %v428_v0 = vmax.f32 %v424_v57, 0.0  ;;  %v3278_v4 = vsel %vm504_vm0, %v515_v36, %v517_v40  ;;  %v274_v57 = vld [vmem:[%s3212_s10 + $0x40] sm:$0xff] }
  0x23   : > { %817 = vrot.lane.b32.xlu1 %v675_v55, %s3099_s27  ;;  %815 = vrot.lane.b32.xlu0 %v673_v56, %s3099_s27  ;;  %v452_v59 = vsel %vm3241_vm3, 0.0, %v426_v53  ;;  %v746_v61 = vsel %vm734_vm2, %v744_v50, %v745_v51  ;;  %v453_v3 = vsel %vm3241_vm3, 0.0, %v427_v58  ;;  %v748_v17 = vsel %vm734_vm2, %v745_v51, %v747_v63  ;;  %v275_v58 = vld [vmem:[%s3212_s10 + $0x48] sm:$0xff] }
  0x24   : > { %v505_v62 = vrot.slane %v452_v59, 7  ;;  %v506_v6 = vrot.slane %v453_v3, 7  ;;  %v454_v10 = vsel %vm3241_vm3, 0.0, %v428_v0  ;;  %v676_v18 = vrot.slane %v3278_v4, 1  ;;  %v276_v59 = vld [vmem:[%s3212_s10 + $0x50] sm:$0xff] }
  0x25   : > { %v508_v13 = vrot.slane %v454_v10, 7  ;;  %v429_v19 = vmax.f32 %v425_v5, 0.0  ;;  %v636_v23 = vsel %vm504_vm0, %v517_v40, 0.0  ;;  %v346_v28 = vadd.f32 %v3209_v9, %v308_v11 }
  0x26   : > { %v3282_v7 = vsel %vm504_vm0, 0.0, %v505_v62  ;;  %v3292_v16 = vsel %vm504_vm0, %v505_v62, %v506_v6  ;;  %v677_v29 = vsel %vm661_vm1, %v674_v48, %v676_v18  ;;  %v678_v30 = vrot.slane %v636_v23, 1 }
  0x27   : > { %911 = vrot.lane.b32.xlu1 %v746_v61, %s3100_s28  ;;  %v662_v12 = vrot.slane %v3282_v7, 1  ;;  %v663_v20 = vrot.slane %v3292_v16, 1  ;;  %v735_v21 = vrot.slane %v3282_v7, 2  ;;  %v736_v22 = vrot.slane %v3292_v16, 2 }
  0x28   : > { %v3303_v24 = vsel %vm504_vm0, %v506_v6, %v508_v13  ;;  %v455_v25 = vsel %vm3241_vm3, 0.0, %v429_v19  ;;  %v347_v31 = vadd.f32 %v3209_v9, %v309_v14  ;;  %v348_v32 = vadd.f32 %v3209_v9, %v310_v15 }
  0x29   : > { %v664_v26 = vsel %vm661_vm1, %v662_v12, %v663_v20  ;;  %v510_v27 = vrot.slane %v455_v25, 7  ;;  %v737_v33 = vsel %vm734_vm2, %v735_v21, %v736_v22  ;;  %v738_v34 = vrot.slane %v3303_v24, 2  ;;  %v277_v21 = vld [vmem:[%s3212_s10 + $0x58] sm:$0xff] }
  0x2a   : > { %807 = vrot.lane.b32.xlu0 %v664_v26, %s3099_s27  ;;  %v378_v37 = vmax.f32 %v346_v28, 0.0  ;;  %v679_v38 = vsel %vm661_vm1, %v676_v18, %v678_v30  ;;  %v379_v39 = vmax.f32 %v347_v31, 0.0  ;;  %v380_v40 = vmax.f32 %v348_v32, 0.0 }
  0x2b   : > { %913 = vrot.lane.b32.xlu1 %v748_v17, %s3100_s28  ;;  %v3318_v36 = vsel %vm504_vm0, %v508_v13, %v510_v27  ;;  %v311_v41 = vmul.f32 %v3204_v8, %v273_v35  ;;  %v739_v42 = vsel %vm734_vm2, %v736_v22, %v738_v34  ;;  %v665_v46 = vrot.slane %v3303_v24, 1 }
  0x2c   : > { %v667_v47 = vrot.slane %v3318_v36, 1  ;;  %v635_v48 = vsel %vm504_vm0, %v510_v27, 0.0  ;;  %v749_v50 = vrot.slane %v3278_v4, 2  ;;  %v519_v51 = vrot.slane %v378_v37, 7 }
  0x2d   : > { %v666_v49 = vsel %vm661_vm1, %v663_v20, %v665_v46  ;;  %v520_v52 = vrot.slane %v379_v39, 7  ;;  %v522_v53 = vrot.slane %v380_v40, 7  ;;  %v349_v54 = vadd.f32 %v3209_v9, %v311_v41 }
  0x2e   : > { %903 = vrot.lane.b32.xlu0 %v737_v33, %s3100_s28  ;;  %v668_v55 = vsel %vm661_vm1, %v665_v46, %v667_v47  ;;  %v669_v56 = vrot.slane %v635_v48, 1  ;;  %v750_v60 = vsel %vm734_vm2, %v747_v63, %v749_v50  ;;  %v751_v61 = vrot.slane %v636_v23, 2 }
  0x2f   : > { %819 = vrot.lane.b32.xlu1 %v677_v29, %s3099_s27  ;;  %v740_v62 = vrot.slane %v3318_v36, 2  ;;  %v3344_v0 = vsel %vm504_vm0, %v519_v51, %v520_v52  ;;  %v3347_v1 = vsel %vm504_vm0, %v520_v52, %v522_v53  ;;  %v381_v2 = vmax.f32 %v349_v54, 0.0 }
  0x30   : > { %v670_v3 = vsel %vm661_vm1, %v667_v47, %v669_v56  ;;  %v312_v5 = vmul.f32 %v3204_v8, %v274_v57  ;;  %v313_v6 = vmul.f32 %v3204_v8, %v275_v58  ;;  %v314_v63 = vmul.f32 %v3204_v8, %v276_v59  ;;  %v278_v47 = vld [vmem:[%s3212_s10 + $0x60] sm:$0xff] }
  0x31   : > { %v752_v10 = vsel %vm734_vm2, %v749_v50, %v751_v61  ;;  %v742_v11 = vrot.slane %v635_v48, 2  ;;  %v681_v12 = vrot.slane %v3344_v0, 1  ;;  %v683_v13 = vrot.slane %v3347_v1, 1  ;;  %v279_v48 = vld [vmem:[%s3212_s10 + $0x68] sm:$0xff] }
  0x32   : > { %905 = vrot.lane.b32.xlu0 %v739_v42, %s3100_s28  ;;  %v3359_v14 = vsel %vm504_vm0, 0.0, %v519_v51  ;;  %v524_v15 = vrot.slane %v381_v2, 7  ;;  %v741_v17 = vsel %vm734_vm2, %v738_v34, %v740_v62  ;;  %v350_v18 = vadd.f32 %v3209_v9, %v312_v5  ;;  %v281_v5 = vld [vmem:[%s3212_s10 + $0x78] sm:$0xff] }
  0x33   : > { %821 = vrot.lane.b32.xlu1 %v679_v38, %s3099_s27  ;;  %v351_v19 = vadd.f32 %v3209_v9, %v313_v6  ;;  %v352_v20 = vadd.f32 %v3209_v9, %v314_v63  ;;  %v743_v22 = vsel %vm734_vm2, %v740_v62, %v742_v11  ;;  %v680_v23 = vrot.slane %v3359_v14, 1 }
  0x34   : > { %v754_v25 = vrot.slane %v3344_v0, 2  ;;  %v684_v26 = vsel %vm661_vm1, %v681_v12, %v683_v13  ;;  %v756_v27 = vrot.slane %v3347_v1, 2  ;;  %v3374_v28 = vsel %vm504_vm0, %v522_v53, %v524_v15 }
  0x35   : > { %v315_v29 = vmul.f32 %v3204_v8, %v277_v21  ;;  %v637_v30 = vsel %vm504_vm0, %v524_v15, 0.0  ;;  %v382_v31 = vmax.f32 %v350_v18, 0.0  ;;  %v383_v32 = vmax.f32 %v351_v19, 0.0 }
  0x36   : > { %811 = vrot.lane.b32.xlu0 %v668_v55, %s3099_s27  ;;  %v384_v33 = vmax.f32 %v352_v20, 0.0  ;;  %v753_v34 = vrot.slane %v3359_v14, 2  ;;  %v757_v35 = vsel %vm734_vm2, %v754_v25, %v756_v27  ;;  %v685_v37 = vrot.slane %v3374_v28, 1 }
  0x37   : > { %809 = vrot.lane.b32.xlu1 %v666_v49, %s3099_s27  ;;  %v687_v38 = vrot.slane %v637_v30, 1  ;;  %v353_v39 = vadd.f32 %v3209_v9, %v315_v29  ;;  %v682_v40 = vsel %vm661_vm1, %v680_v23, %v681_v12  ;;  %v526_v41 = vrot.slane %v382_v31, 7  ;;  %v280_v49 = vld [vmem:[%s3212_s10 + $0x70] sm:$0xff] }
  0x38   : > { %v527_v42 = vrot.slane %v383_v32, 7  ;;  %v529_v46 = vrot.slane %v384_v33, 7  ;;  %v758_v50 = vrot.slane %v3374_v28, 2  ;;  %v760_v51 = vrot.slane %v637_v30, 2 }
  0x39   : > { %v755_v52 = vsel %vm734_vm2, %v753_v34, %v754_v25  ;;  %v688_v53 = vsel %vm661_vm1, %v685_v37, %v687_v38  ;;  %v385_v54 = vmax.f32 %v353_v39, 0.0  ;;  %v316_v55 = vmul.f32 %v3204_v8, %v278_v47  ;;  %v1065_v38 = vld [vmem:[%s4579_s3] sm:$0xff]  ;;  %v1066_v39 = vld [vmem:[%s4579_s3 + $0x8] sm:$0xff] }
  0x3a   : > { %813 = vrot.lane.b32.xlu0 %v670_v3, %s3099_s27  ;;  %v3395_v56 = vsel %vm504_vm0, %v526_v41, %v527_v42  ;;  %v3398_v57 = vsel %vm504_vm0, %v527_v42, %v529_v46  ;;  %v317_v58 = vmul.f32 %v3204_v8, %v279_v48  ;;  %v318_v59 = vmul.f32 %v3204_v8, %v280_v49 }
  0x3b   : > { %915 = vrot.lane.b32.xlu1 %v750_v60, %s3100_s28  ;;  %v761_v60 = vsel %vm734_vm2, %v758_v50, %v760_v51  ;;  %v690_v61 = vrot.slane %v3395_v56, 1  ;;  %v692_v62 = vrot.slane %v3398_v57, 1  ;;  %v3408_v2 = vsel %vm504_vm0, 0.0, %v526_v41  ;;  %v284_v41 = vld [vmem:[%s3212_s10 + $0x90] sm:$0xff] }
  0x3c   : > { %v531_v3 = vrot.slane %v385_v54, 7  ;;  %v686_v6 = vsel %vm661_vm1, %v683_v13, %v685_v37  ;;  %v354_v63 = vadd.f32 %v3209_v9, %v316_v55  ;;  %v356_v11 = vadd.f32 %v3209_v9, %v318_v59  ;;  %v282_v37 = vld [vmem:[%s3212_s10 + $0x80] sm:$0xff]  ;;  %v285_v59 = vld [vmem:[%s3212_s10 + $0x98] sm:$0xff] }
  0x3d   : > { %v759_v12 = vsel %vm734_vm2, %v756_v27, %v758_v50  ;;  %v689_v15 = vrot.slane %v3408_v2, 1  ;;  %v693_v13 = vsel %vm661_vm1, %v690_v61, %v692_v62  ;;  %v763_v18 = vrot.slane %v3395_v56, 2 }
  0x3e   : > { %907 = vrot.lane.b32.xlu0 %v741_v17, %s3100_s28  ;;  %v319_v17 = vmul.f32 %v3204_v8, %v281_v5  ;;  %v765_v19 = vrot.slane %v3398_v57, 2  ;;  %v3426_v20 = vsel %vm504_vm0, %v529_v46, %v531_v3  ;;  %v638_v21 = vsel %vm504_vm0, %v531_v3, 0.0 }
  0x3f   : > { %917 = vrot.lane.b32.xlu1 %v752_v10, %s3100_s28  ;;  %v355_v10 = vadd.f32 %v3209_v9, %v317_v58  ;;  %v388_v25 = vmax.f32 %v356_v11, 0.0  ;;  %v694_v29 = vrot.slane %v3426_v20, 1  ;;  %v696_v30 = vrot.slane %v638_v21, 1 }
  0x40   : > { %v766_v27 = vsel %vm734_vm2, %v763_v18, %v765_v19  ;;  %v357_v31 = vadd.f32 %v3209_v9, %v319_v17  ;;  %v691_v32 = vsel %vm661_vm1, %v689_v15, %v690_v61  ;;  %v767_v46 = vrot.slane %v3426_v20, 2 }
  0x41   : > { %v387_v23 = vmax.f32 %v355_v10, 0.0  ;;  %v769_v47 = vrot.slane %v638_v21, 2  ;;  %v697_v48 = vsel %vm661_vm1, %v694_v29, %v696_v30  ;;  %v320_v50 = vmul.f32 %v3204_v8, %v282_v37 }
  0x42   : > { %909 = vrot.lane.b32.xlu0 %v743_v22, %s3100_s28  ;;  %v386_v22 = vmax.f32 %v354_v63, 0.0  ;;  %v389_v49 = vmax.f32 %v357_v31, 0.0  ;;  %v3451_v51 = vpack.c.bf16 %v1066_v39, %v1065_v38  ;;  %v322_v55 = vmul.f32 %v3204_v8, %v284_v41  ;;  %v2402_v63 = vld [vmem:[%s4579_s3 + $0xa8] sm:$0xff] }
  0x43   : > { %825 = vrot.lane.b32.xlu1 %v684_v26, %s3099_s27  ;;  %v762_v26 = vrot.slane %v3408_v2, 2  ;;  %v534_v34 = vrot.slane %v387_v23, 7  ;;  %v770_v58 = vsel %vm734_vm2, %v767_v46, %v769_v47  ;;  %v695_v10 = vsel %vm661_vm1, %v692_v62, %v694_v29  ;;  %v2404_v29 = vld [vmem:[%s4579_s3 + $0xb8] sm:$0xff] }
  0x44   : > { %v533_v33 = vrot.slane %v386_v22, 7  ;;  %2891 = vmatprep.subr.bf16.mxu0 %v3451_v51  ;;  %v538_v5 = vrot.slane %v389_v49, 7  ;;  %v358_v11 = vadd.f32 %v3209_v9, %v320_v50  ;;  %v360_v15 = vadd.f32 %v3209_v9, %v322_v55  ;;  %v1067_v22 = vld [vmem:[%s4579_s3 + $0x10] sm:$0xff]  ;;  %v1072_v49 = vld [vmem:[%s4579_s3 + $0x38] sm:$0xff] }
  0x45   : > { %v764_v42 = vsel %vm734_vm2, %v762_v26, %v763_v18  ;;  %2893 = vmatpush3.bf16.msra.mxu0 %v3451_v51  ;;  %v768_v17 = vsel %vm734_vm2, %v765_v19, %v767_v46  ;;  %v323_v18 = vmul.f32 %v3204_v8, %v285_v59  ;;  %v1068_v26 = vld [vmem:[%s4579_s3 + $0x18] sm:$0xff]  ;;  %vm2070_vm8 = vcmask (!%p2513_p11), 254976  }
  0x46   : > { %823 = vrot.lane.b32.xlu0 %v682_v40, %s3099_s27  ;;  %v283_v40 = vld [vmem:[%s3212_s10 + $0x88] sm:$0xff]  ;;  %v3470_v3 = vsel %vm504_vm0, 0.0, %v533_v33  ;;  %v639_v30 = vsel %vm504_vm0, %v538_v5, 0.0  ;;  %v390_v31 = vmax.f32 %v358_v11, 0.0  ;;  %v3519_v39 = vpack.c.bf16 %v1068_v26, %v1067_v22 }
  0x47   : > { %921 = vrot.lane.b32.xlu1 %v757_v35, %s3100_s28  ;;  %v536_v35 = vrot.slane %v388_v25, 7  ;;  %v321_v54 = vmul.f32 %v3204_v8, %v283_v40  ;;  %v771_v38 = vrot.slane %v3470_v3, 2  ;;  %v705_v46 = vrot.slane %v639_v30, 1 }
  0x48   : > { %v361_v47 = vadd.f32 %v3209_v9, %v323_v18  ;;  %v540_v50 = vrot.slane %v390_v31, 7  ;;  %2895 = vmatprep.subr.bf16.mxu0 %v3519_v39  ;;  %v1074_v18 = vld [vmem:[%s4579_s3 + $0x48] sm:$0xff] }
  0x49   : > { %v3498_v19 = vsel %vm504_vm0, %v536_v35, %v538_v5  ;;  %v288_v5 = vld [vmem:[%s3212_s10 + $0xb0] sm:$0xff]  ;;  %2897 = vmatpush3.bf16.msra.mxu0 %v3519_v39 }
  0x4a   : > { %919 = vrot.lane.b32.xlu0 %v755_v52, %s3100_s28  ;;  %v3454_v52 = vsel %vm504_vm0, %v533_v33, %v534_v34  ;;  %v392_v33 = vmax.f32 %v360_v15, 0.0  ;;  %v393_v15 = vmax.f32 %v361_v47, 0.0 }
  0x4b   : > { %829 = vrot.lane.b32.xlu1 %v688_v53, %s3099_s27  ;;  %v3457_v53 = vsel %vm504_vm0, %v534_v34, %v536_v35  ;;  %v772_v23 = vrot.slane %v3454_v52, 2  ;;  %v1069_v34 = vld [vmem:[%s4579_s3 + $0x20] sm:$0xff]  ;;  %v1070_v35 = vld [vmem:[%s4579_s3 + $0x28] sm:$0xff] }
  0x4c   : > { %v701_v61 = vrot.slane %v3457_v53, 1  ;;  %v774_v25 = vrot.slane %v3457_v53, 2  ;;  %v543_v55 = vrot.slane %v392_v33, 7  ;;  %v3535_v59 = vpack.c.bf16 %v1070_v35, %v1069_v34  ;;  %v1075_v34 = vld [vmem:[%s4579_s3 + $0x50] sm:$0xff]  ;;  %v1076_v35 = vld [vmem:[%s4579_s3 + $0x58] sm:$0xff] }
  0x4d   : > { %v773_v11 = vsel %vm734_vm2, %v771_v38, %v772_v23  ;;  %v545_v33 = vrot.slane %v393_v15, 7 }
  0x4e   : > { %827 = vrot.lane.b32.xlu0 %v686_v6, %s3099_s27  ;;  %v2401_v6 = vld [vmem:[%s4579_s3 + $0xa0] sm:$0xff]  ;;  %v775_v41 = vsel %vm734_vm2, %v772_v23, %v774_v25  ;;  %2899 = vmatprep.subr.bf16.mxu0 %v3535_v59  ;;  %v326_v23 = vmul.f32 %v3204_v8, %v288_v5 }
  0x4f   : > { %925 = vrot.lane.b32.xlu1 %v761_v60, %s3100_s28  ;;  %v699_v60 = vrot.slane %v3454_v52, 1  ;;  %v2882_v21 = vpack.c.bf16 %v2402_v63, %v2401_v6  ;;  %v776_v6 = vrot.slane %v3498_v19, 2  ;;  %v778_v63 = vrot.slane %v639_v30, 2  ;;  %2901 = vmatpush3.bf16.msra.mxu0 %v3535_v59 }
  0x51   : > { %v702_v62 = vsel %vm661_vm1, %v699_v60, %v701_v61  ;;  %2883 = vmatprep.subr.bf16.mxu1 %v2882_v21  ;;  %v779_v26 = vsel %vm734_vm2, %v776_v6, %v778_v63  ;;  %v2470_v63 = vld [vmem:[%s4579_s3 + $0xc8] sm:$0xff] }
  0x52   : > { %923 = vrot.lane.b32.xlu0 %v759_v12, %s3100_s28  ;;  %v359_v12 = vadd.f32 %v3209_v9, %v321_v54  ;;  %2885 = vmatpush3.bf16.msra.mxu1 %v2882_v21 }
  0x53   : > { %833 = vrot.lane.b32.xlu1 %v693_v13, %s3099_s27  ;;  %v698_v13 = vrot.slane %v3470_v3, 1 }
  0x55   : > { %v700_v37 = vsel %vm661_vm1, %v698_v13, %v699_v60  ;;  %v287_v60 = vld [vmem:[%s3212_s10 + $0xa8] sm:$0xff]  ;;  %v1073_v13 = vld [vmem:[%s4579_s3 + $0x40] sm:$0xff] }
  0x56   : > { %831 = vrot.lane.b32.xlu0 %v691_v32, %s3099_s27  ;;  %v391_v32 = vmax.f32 %v359_v12, 0.0 }
  0x57   : > { %929 = vrot.lane.b32.xlu1 %v766_v27, %s3100_s28  ;;  %v2403_v27 = vld [vmem:[%s4579_s3 + $0xb0] sm:$0xff] }
  0x58   : > { %v2886_v40 = vpack.c.bf16 %v2404_v29, %v2403_v27  ;;  %v541_v54 = vrot.slane %v391_v32, 7  ;;  %v289_v27 = vld [vmem:[%s3212_s10 + $0xb8] sm:$0xff]  ;;  %v3569_v29 = vpack.c.bf16 %v1074_v18, %v1073_v13  ;;  %v3575_v32 = vsel %vm504_vm0, 0.0, %v540_v50 }
  0x59   : > { %v707_v47 = vrot.slane %v3575_v32, 1 }
  0x5a   : > { %927 = vrot.lane.b32.xlu0 %v764_v42, %s3100_s28  ;;  %v703_v42 = vrot.slane %v3498_v19, 1  ;;  %2887 = vmatprep.subr.bf16.mxu1 %v2886_v40  ;;  %v3556_v21 = vsel %vm504_vm0, %v540_v50, %v541_v54  ;;  %v3559_v22 = vsel %vm504_vm0, %v541_v54, %v543_v55  ;;  %v640_v54 = vsel %vm504_vm0, %v545_v33, 0.0 }
  0x5b   : > { %837 = vrot.lane.b32.xlu1 %v697_v48, %s3099_s27  ;;  %v1071_v48 = vld [vmem:[%s4579_s3 + $0x30] sm:$0xff]  ;;  %2889 = vmatpush3.bf16.msra.mxu1 %v2886_v40  ;;  %v708_v30 = vrot.slane %v3556_v21, 1  ;;  %v710_v31 = vrot.slane %v3559_v22, 1  ;;  %v783_v50 = vrot.slane %v3559_v22, 2 }
  0x5c   : > { %v706_v12 = vsel %vm661_vm1, %v703_v42, %v705_v46  ;;  %2938 = vmatprep.subr.bf16.mxu1 %v3451_v51  ;;  %v777_v46 = vsel %vm734_vm2, %v774_v25, %v776_v6  ;;  %v3606_v25 = vsel %vm504_vm0, %v543_v55, %v545_v33  ;;  %v2469_v6 = vld [vmem:[%s4579_s3 + $0xc0] sm:$0xff] }
  0x5d   : > { %v709_v55 = vsel %vm661_vm1, %v707_v47, %v708_v30  ;;  %v712_v15 = vrot.slane %v3606_v25, 1  ;;  %v3626_v33 = vpack.c.bf16 %v2470_v63, %v2469_v6 }
  0x5e   : > { %835 = vrot.lane.b32.xlu0 %v695_v10, %s3099_s27  ;;  %v3543_v10 = vpack.c.bf16 %v1072_v49, %v1071_v48  ;;  %v327_v48 = vmul.f32 %v3204_v8, %v289_v27  ;;  %v781_v49 = vrot.slane %v3556_v21, 2  ;;  %v291_v27 = vld [vmem:[%s3212_s10 + $0xc8] sm:$0xff] }
  0x5f   : > { %933 = vrot.lane.b32.xlu1 %v770_v58, %s3100_s28  ;;  %v286_v58 = vld [vmem:[%s3212_s10 + $0xa0] sm:$0xff]  ;;  %v713_v6 = vsel %vm661_vm1, %v710_v31, %v712_v15 }
  0x60   : > { %2903 = vmatprep.subr.bf16.mxu0 %v3543_v10  ;;  %v365_v13 = vadd.f32 %v3209_v9, %v327_v48 }
  0x61   : > { %2905 = vmatpush3.bf16.msra.mxu0 %v3543_v10 }
  0x62   : > { %931 = vrot.lane.b32.xlu0 %v768_v17, %s3100_s28  ;;  %v324_v17 = vmul.f32 %v3204_v8, %v286_v58  ;;  %2907 = vmatprep.subr.bf16.mxu0 %v3569_v29  ;;  %v397_v48 = vmax.f32 %v365_v13, 0.0 }
  0x63   : > { %841 = vrot.lane.b32.xlu1 %v702_v62, %s3099_s27  ;;  %v325_v62 = vmul.f32 %v3204_v8, %v287_v60 }
  0x64   : > { %v362_v38 = vadd.f32 %v3209_v9, %v324_v17  ;;  %v714_v17 = vrot.slane %v640_v54, 1 }
  0x65   : > { %v363_v40 = vadd.f32 %v3209_v9, %v325_v62  ;;  %2909 = vmatpush3.bf16.msra.mxu0 %v3569_v29 }
  0x66   : > { %839 = vrot.lane.b32.xlu0 %v700_v37, %s3099_s27  ;;  %v704_v37 = vsel %vm661_vm1, %v701_v61, %v703_v42  ;;  %v3597_v61 = vpack.c.bf16 %v1076_v35, %v1075_v34  ;;  %v711_v42 = vsel %vm661_vm1, %v708_v30, %v710_v31  ;;  %v394_v58 = vmax.f32 %v362_v38, 0.0  ;;  %v292_v30 = vld [vmem:[%s3212_s10 + $0xd0] sm:$0xff] }
  0x67   : > { %937 = vrot.lane.b32.xlu1 %v775_v41, %s3100_s28  ;;  %v364_v41 = vadd.f32 %v3209_v9, %v326_v23  ;;  %v395_v60 = vmax.f32 %v363_v40, 0.0  ;;  %v785_v34 = vrot.slane %v3606_v25, 2  ;;  %v787_v35 = vrot.slane %v640_v54, 2 }
  0x68   : > { %2911 = vmatprep.subr.bf16.mxu0 %v3597_v61  ;;  %v547_v18 = vrot.slane %v394_v58, 7  ;;  %v715_v38 = vsel %vm661_vm1, %v712_v15, %v714_v17 }
  0x69   : > { %v396_v5 = vmax.f32 %v364_v41, 0.0  ;;  %v548_v62 = vrot.slane %v395_v60, 7  ;;  %2913 = vmatpush3.bf16.msra.mxu0 %v3597_v61  ;;  %v329_v41 = vmul.f32 %v3204_v8, %v291_v27  ;;  %v786_v17 = vsel %vm734_vm2, %v783_v50, %v785_v34 }
  0x6a   : > { %935 = vrot.lane.b32.xlu0 %v773_v11, %s3100_s28  ;;  %v780_v11 = vrot.slane %v3575_v32, 2  ;;  %2915 = vmatprep.subr.bf16.mxu0 %v3626_v33  ;;  %v3656_v63 = vsel %vm504_vm0, 0.0, %v547_v18 }
  0x6b   : > { %845 = vrot.lane.b32.xlu1 %v706_v12, %s3099_s27  ;;  %v784_v12 = vsel %vm734_vm2, %v781_v49, %v783_v50  ;;  %v550_v23 = vrot.slane %v396_v5, 7  ;;  %v367_v5 = vadd.f32 %v3209_v9, %v329_v41  ;;  %v716_v15 = vrot.slane %v3656_v63, 1 }
  0x6d   : > { %v3642_v47 = vsel %vm504_vm0, %v548_v62, %v550_v23 }
  0x6e   : > { %843 = vrot.lane.b32.xlu0 %v704_v37, %s3099_s27  ;;  %v782_v37 = vsel %vm734_vm2, %v780_v11, %v781_v49  ;;  %v788_v49 = vsel %vm734_vm2, %v785_v34, %v787_v35  ;;  %v719_v58 = vrot.slane %v3642_v47, 1 }
  0x6f   : > { %941 = vrot.lane.b32.xlu1 %v779_v26, %s3100_s28  ;;  %v290_v26 = vld [vmem:[%s3212_s10 + $0xc0] sm:$0xff] }
  0x70   : > { %v328_v40 = vmul.f32 %v3204_v8, %v290_v26  ;;  %v399_v26 = vmax.f32 %v367_v5, 0.0  ;;  %v295_v5 = vld [vmem:[%s3212_s10 + $0xe8] sm:$0xff] }
  0x72   : > { %939 = vrot.lane.b32.xlu0 %v777_v46, %s3100_s28  ;;  %v3639_v46 = vsel %vm504_vm0, %v547_v18, %v548_v62  ;;  %v366_v60 = vadd.f32 %v3209_v9, %v328_v40  ;;  %v792_v62 = vrot.slane %v3642_v47, 2  ;;  %v555_v41 = vrot.slane %v399_v26, 7 }
  0x73   : > { %849 = vrot.lane.b32.xlu1 %v711_v42, %s3099_s27  ;;  %v330_v42 = vmul.f32 %v3204_v8, %v292_v30  ;;  %v717_v54 = vrot.slane %v3639_v46, 1  ;;  %v790_v13 = vrot.slane %v3639_v46, 2 }
  0x74   : > { %v398_v18 = vmax.f32 %v366_v60, 0.0  ;;  %v294_v60 = vld [vmem:[%s3212_s10 + $0xe0] sm:$0xff] }
  0x75   : > { %v368_v11 = vadd.f32 %v3209_v9, %v330_v42  ;;  %v720_v31 = vsel %vm661_vm1, %v717_v54, %v719_v58  ;;  %v793_v34 = vsel %vm734_vm2, %v790_v13, %v792_v62 }
  0x76   : > { %847 = vrot.lane.b32.xlu0 %v709_v55, %s3099_s27  ;;  %v552_v55 = vrot.slane %v397_v48, 7  ;;  %v554_v40 = vrot.slane %v398_v18, 7  ;;  %v718_v48 = vsel %vm661_vm1, %v716_v15, %v717_v54  ;;  %v332_v54 = vmul.f32 %v3204_v8, %v294_v60 }
  0x77   : > { %945 = vrot.lane.b32.xlu1 %v784_v12, %s3100_s28  ;;  %v293_v12 = vld [vmem:[%s3212_s10 + $0xd8] sm:$0xff]  ;;  %v400_v35 = vmax.f32 %v368_v11, 0.0 }
  0x78   : > { %v3668_v27 = vsel %vm504_vm0, %v550_v23, %v552_v55  ;;  %v641_v30 = vsel %vm504_vm0, %v552_v55, 0.0  ;;  %v331_v50 = vmul.f32 %v3204_v8, %v293_v12 }
  0x79   : > { %v721_v23 = vrot.slane %v3668_v27, 1  ;;  %v557_v42 = vrot.slane %v400_v35, 7  ;;  %v794_v11 = vrot.slane %v3668_v27, 2 }
  0x7a   : > { %943 = vrot.lane.b32.xlu0 %v782_v37, %s3100_s28  ;;  %v789_v37 = vrot.slane %v3656_v63, 2 }
  0x7b   : > { %853 = vrot.lane.b32.xlu1 %v715_v38, %s3099_s27  ;;  %v723_v38 = vrot.slane %v641_v30, 1  ;;  %v3699_v15 = vsel %vm504_vm0, %v555_v41, %v557_v42  ;;  %v795_v60 = vsel %vm734_vm2, %v792_v62, %v794_v11 }
  0x7c   : > { %v791_v55 = vsel %vm734_vm2, %v789_v37, %v790_v13  ;;  %v333_v13 = vmul.f32 %v3204_v8, %v295_v5  ;;  %v370_v37 = vadd.f32 %v3209_v9, %v332_v54 }
  0x7d   : > { %v724_v12 = vsel %vm661_vm1, %v721_v23, %v723_v38  ;;  %v722_v38 = vsel %vm661_vm1, %v719_v58, %v721_v23  ;;  %v4584_v23 = vrot.slane %v3699_v15, 2 }
  0x7e   : > { %851 = vrot.lane.b32.xlu0 %v713_v6, %s3099_s27  ;;  %v296_v6 = vld [vmem:[%s3212_s10 + $0xf0] sm:$0xff]  ;;  %v402_v62 = vmax.f32 %v370_v37, 0.0 }
  0x7f   : > { %949 = vrot.lane.b32.xlu1 %v788_v49, %s3100_s28  ;;  %v369_v49 = vadd.f32 %v3209_v9, %v331_v50  ;;  %v334_v26 = vmul.f32 %v3204_v8, %v296_v6  ;;  %v434_v37 = vld [vmem:[%s3721_s8 + $0x10] sm:$0xff] }
  0x81   : > { %v401_v18 = vmax.f32 %v369_v49, 0.0  ;;  %v297_v49 = vld [vmem:[%s3212_s10 + $0xf8] sm:$0xff] }
  0x82   : > { %947 = vrot.lane.b32.xlu0 %v786_v17, %s3100_s28  ;;  %v796_v17 = vrot.slane %v641_v30, 2  ;;  %v3705_v30 = vsel %vm504_vm0, 0.0, %v554_v40 }
  0x83   : > { %857 = vrot.lane.b32.xlu1 %v720_v31, %s3099_s27  ;;  %v3693_v31 = vsel %vm504_vm0, %v554_v40, %v555_v41  ;;  %4591 = vst [vmem:[#allocation3_spill] sm:$0xff] %v3705_v30  ;;  %v559_v41 = vrot.slane %v401_v18, 7  ;;  %v372_v40 = vadd.f32 %v3209_v9, %v334_v26  ;;  %v725_v5 = vrot.slane %v3705_v30, 1  ;;  %v432_v18 = vld [vmem:[%s3721_s8] sm:$0xff] }
  0x84   : > { %4590 = vst [vmem:[#allocation2_spill] sm:$0xff] %v3693_v31  ;;  %v797_v35 = vsel %vm734_vm2, %v794_v11, %v796_v17  ;;  %v726_v50 = vrot.slane %v3693_v31, 1  ;;  %v799_v6 = vrot.slane %v3693_v31, 2  ;;  %v798_v26 = vrot.slane %v3705_v30, 2 }
  0x85   : > { %v3731_v11 = vsel %vm504_vm0, %v557_v42, %v559_v41  ;;  %v404_v54 = vmax.f32 %v372_v40, 0.0  ;;  %v561_v40 = vrot.slane %v402_v62, 7  ;;  %v438_v30 = vmul.f32 %v3204_v8, %v434_v37 }
  0x86   : > { %855 = vrot.lane.b32.xlu0 %v718_v48, %s3099_s27  ;;  %v371_v48 = vadd.f32 %v3209_v9, %v333_v13  ;;  %4592 = vst [vmem:[#allocation4_spill] sm:$0xff] %v3731_v11  ;;  %v727_v13 = vsel %vm661_vm1, %v725_v5, %v726_v50  ;;  %v802_v42 = vsel %vm734_vm2, %v799_v6, %v4584_v23  ;;  %v458_v31 = vstv %s3741_s26 }
  0x87   : > { %953 = vrot.lane.b32.xlu1 %v793_v34, %s3100_s28  ;;  %v4582_v34 = vrot.slane %v3699_v15, 1  ;;  %v564_v5 = vrot.slane %v404_v54, 7  ;;  %v800_v23 = vsel %vm734_vm2, %v798_v26, %v799_v6  ;;  %v803_v62 = vrot.slane %v3731_v11, 2 }
  0x88   : > { %v403_v17 = vmax.f32 %v371_v48, 0.0  ;;  %vm3776_vm7 = vcmp.eq.s32.totalorder %v458_v31, 1 }
  0x89   : > { %v729_v58 = vsel %vm661_vm1, %v726_v50, %v4582_v34 }
  0x8a   : > { %951 = vrot.lane.b32.xlu0 %v791_v55, %s3100_s28  ;;  %v335_v55 = vmul.f32 %v3204_v8, %v297_v49  ;;  %v562_v49 = vrot.slane %v403_v17, 7 }
  0x8b   : > { %861 = vrot.lane.b32.xlu1 %v724_v12, %s3099_s27  ;;  %v642_v12 = vsel %vm504_vm0, %v559_v41, 0.0 }
  0x8c   : > { %v732_v41 = vrot.slane %v642_v12, 1  ;;  %v373_v48 = vadd.f32 %v3209_v9, %v335_v55  ;;  %v805_v55 = vrot.slane %v642_v12, 2  ;;  %v3765_v6 = vsel %vm504_vm0, %v562_v49, %v564_v5 }
  0x8e   : > { %859 = vrot.lane.b32.xlu0 %v722_v38, %s3099_s27  ;;  %v730_v38 = vrot.slane %v3731_v11, 1  ;;  %v405_v17 = vmax.f32 %v373_v48, 0.0  ;;  %v1082_v48 = vrot.slane %v3765_v6, 1 }
  0x8f   : > { %957 = vrot.lane.b32.xlu1 %v797_v35, %s3100_s28  ;;  %v433_v35 = vld [vmem:[%s3721_s8 + $0x8] sm:$0xff] }
  0x90   : > { %v733_v9 = vsel %vm661_vm1, %v730_v38, %v732_v41 }
  0x92   : > { %955 = vrot.lane.b32.xlu0 %v795_v60, %s3100_s28  ;;  %v437_v60 = vmul.f32 %v3204_v8, %v433_v35 }
  0x93   : > { %865 = vrot.lane.b32.xlu1 %v729_v58, %s3099_s27  ;;  %v436_v58 = vmul.f32 %v3204_v8, %v432_v18  ;;  %v3762_v18 = vsel %vm504_vm0, %v561_v40, %v562_v49  ;;  %v566_v49 = vrot.slane %v405_v17, 7  ;;  %v3058_v17 = vld [vmem:[%s4577_s1] ss:$0 sm:$0xff] }
  0x94   : > { %v1080_v41 = vrot.slane %v3762_v18, 1 }
  0x95   : > { %v818_v50 = vpop.permute.xlu1 %817  ;;  %v816_v34 = vpop.permute.xlu0 %815 }
  0x96   : > { %863 = vrot.lane.b32.xlu0 %v727_v13, %s3099_s27  ;;  %v1004_v54 = vsel %vm999_vm4, %v3253_v45, %v816_v34  ;;  %v3057_v13 = vld [vmem:[%s4578_s2] ss:$0 sm:$0xff]  ;;  %v435_v34 = vld [vmem:[%s3721_s8 + $0x18] sm:$0xff] }
  0x97   : > { %961 = vrot.lane.b32.xlu1 %v802_v42, %s3100_s28  ;;  %v440_v26 = vadd.f32 %v3057_v13, %v436_v58  ;;  %v441_v12 = vadd.f32 %v3057_v13, %v437_v60  ;;  %v442_v37 = vadd.f32 %v3057_v13, %v438_v30  ;;  %v806_v42 = vsel %vm734_vm2, %v803_v62, %v805_v55 }
  0x98   : > { %v1005_v30 = vsel %vm999_vm4, %v3247_v43, %v818_v50  ;;  %v4595_v58 = vrot.slane %v3699_v15, 1  ;;  %v439_v43 = vmul.f32 %v3058_v17, %v435_v34 }
  0x99   : > { %v912_v8 = vpop.permute.xlu1 %911  ;;  %v446_v11 = vmax.f32 %v442_v37, 0.0 }
  0x9a   : > { %v3771_v35 = vsel %vm1032_vm5, %v1004_v54, %v912_v8  ;;  %959 = vrot.lane.b32.xlu0 %v800_v23, %s3100_s28  ;;  %v731_v31 = vsel %vm661_vm1, %v4595_v58, %v730_v38  ;;  %v444_v54 = vmax.f32 %v440_v26, 0.0  ;;  %v445_v8 = vmax.f32 %v441_v12, 0.0 }
  0x9b   : > { %869 = vrot.lane.b32.xlu1 %v733_v9, %s3099_s27  ;;  %2674 = vmatprep.mubr.msk.f32.mxu1 %vm1142_vm6, %v3771_v35  ;;  %v3791_v9 = vsel %vm504_vm0, 0.0, %v561_v40  ;;  %v4596_v38 = vrot.slane %v3699_v15, 2  ;;  %v1083_v40 = vsel %vm661_vm1, %v1080_v41, %v1082_v48  ;;  %v1089_v26 = vrot.slane %v3762_v18, 2 }
  0x9c   : > { %v808_v23 = vpop.permute.xlu0 %807  ;;  %v1091_v12 = vrot.slane %v3765_v6, 2  ;;  %v1079_v34 = vrot.slane %v3791_v9, 1 }
  0x9d   : > { %v914_v60 = vpop.permute.xlu1 %913  ;;  %v804_v50 = vsel %vm734_vm2, %v4596_v38, %v803_v62  ;;  %v460_v62 = vsel %vm3776_vm7, 0.0, %v444_v54  ;;  %v1000_v58 = vsel %vm999_vm4, %v3282_v7, %v808_v23 }
  0x9e   : > { %v3794_v55 = vsel %vm1032_vm5, %v1005_v30, %v914_v60  ;;  %867 = vrot.lane.b32.xlu0 %v731_v31, %s3099_s27  ;;  %v643_v30 = vsel %vm504_vm0, %v566_v49, 0.0  ;;  %v3826_v60 = vsel %vm3776_vm7, 0.0, %v446_v11  ;;  %v1092_v7 = vsel %vm734_vm2, %v1089_v26, %v1091_v12 }
  0x9f   : > { %965 = vrot.lane.b32.xlu1 %v806_v42, %s3100_s28  ;;  %2675 = vmatmul.mubr.msk.f32.vlgmr.msra.gmra.mrb[0].mxu1 %vm1142_vm6, %v3794_v55  ;;  %v3814_v42 = vsel %vm504_vm0, %v564_v5, %v566_v49  ;;  %v443_v5 = vadd.f32 %v3057_v13, %v439_v43  ;;  %v1088_v49 = vrot.slane %v3791_v9, 2  ;;  %v1086_v23 = vrot.slane %v643_v30, 1 }
  0xa0   : > { %2944 = vmatpush3.bf16.msra.mxu1 %v3451_v51  ;;  %v904_v31 = vpop.permute.xlu0 %903  ;;  %v461_v51 = vsel %vm3776_vm7, 0.0, %v445_v8  ;;  %v1084_v54 = vrot.slane %v3814_v42, 1  ;;  %v1081_v11 = vsel %vm661_vm1, %v1079_v34, %v1080_v41  ;;  %v568_v8 = vrot.slane %v460_v62, 7  ;;  %v2472_v41 = vld [vmem:[%s4579_s3 + $0xd8] sm:$0xff] }
  0xa1   : > { %v820_v37 = vpop.permute.xlu1 %819  ;;  %2939 = vmatprep.subr.bf16.mxu1 %v3519_v39  ;;  %v1033_v17 = vsel %vm1032_vm5, %v1000_v58, %v904_v31  ;;  %v569_v43 = vrot.slane %v461_v51, 7  ;;  %v571_v38 = vrot.slane %v3826_v60, 7  ;;  %v2471_v58 = vld [vmem:[%s4579_s3 + $0xd0] sm:$0xff]  ;;  %v1095_v62 = vrot.slane %v643_v30, 2  ;;  %v2473_v30 = vld [vmem:[%s4579_s3 + $0xe0] sm:$0xff] }
  0xa2   : > { %963 = vrot.lane.b32.xlu0 %v804_v50, %s3100_s28  ;;  %2746 = vmatprep.mubr.msk.f32.mxu0 %vm1142_vm6, %v1033_v17  ;;  %v1087_v34 = vsel %vm661_vm1, %v1084_v54, %v1086_v23  ;;  %v1090_v31 = vsel %vm734_vm2, %v1088_v49, %v1089_v26 }
  0xa3   : > { %1099 = vrot.lane.b32.xlu1 %v1083_v40, %s3099_s27  ;;  %v447_v40 = vmax.f32 %v443_v5, 0.0  ;;  %v3853_v60 = vsel %vm504_vm0, %v568_v8, %v569_v43  ;;  %v3856_v5 = vsel %vm504_vm0, %v569_v43, %v571_v38  ;;  %v1006_v43 = vsel %vm999_vm4, %v3250_v44, %v820_v37  ;;  %v2475_v44 = vld [vmem:[%s4579_s3 + $0xf0] sm:$0xff] }
  0xa4   : > { %2945 = vmatpush3.bf16.msra.mxu1 %v3519_v39  ;;  %v906_v50 = vpop.permute.xlu0 %905  ;;  %v1093_v39 = vrot.slane %v3814_v42, 2  ;;  %v1704_v45 = vrot.slane %v3853_v60, 1  ;;  %v1706_v49 = vrot.slane %v3856_v5, 1  ;;  %v1713_v37 = vrot.slane %v3853_v60, 2 }
  0xa5   : > { %v822_v13 = vpop.permute.xlu1 %821  ;;  %2940 = vmatprep.subr.bf16.mxu1 %v3535_v59  ;;  %v463_v23 = vsel %vm3776_vm7, 0.0, %v447_v40 }
  0xa6   : > { %1097 = vrot.lane.b32.xlu0 %v1081_v11, %s3099_s27  ;;  %v2918_v11 = vpack.c.bf16 %v2472_v41, %v2471_v58  ;;  %v573_v58 = vrot.slane %v463_v23, 7 }
  0xa7   : > { %1111 = vrot.lane.b32.xlu1 %v1092_v7, %s3100_s28 }
  0xa8   : > { %2946 = vmatpush3.bf16.msra.mxu1 %v3535_v59  ;;  %v812_v17 = vpop.permute.xlu0 %811  ;;  %v2474_v59 = vld [vmem:[%s4579_s3 + $0xe8] sm:$0xff]  ;;  %v3913_v23 = vsel %vm504_vm0, %v571_v38, %v573_v58 }
  0xa9   : > { %v810_v51 = vpop.permute.xlu1 %809  ;;  %2941 = vmatprep.subr.bf16.mxu1 %v3543_v10  ;;  %v1708_v38 = vrot.slane %v3913_v23, 1 }
  0xaa   : > { %v1001_v7 = vsel %vm999_vm4, %v3292_v16, %v810_v51  ;;  %1109 = vrot.lane.b32.xlu0 %v1090_v31, %s3100_s28  ;;  %v1096_v16 = vsel %vm734_vm2, %v1093_v39, %v1095_v62  ;;  %v3888_v62 = vsel %vm504_vm0, 0.0, %v568_v8  ;;  %v2922_v31 = vpack.c.bf16 %v2474_v59, %v2473_v30 }
  0xab   : > { %1103 = vrot.lane.b32.xlu1 %v1087_v34, %s3099_s27  ;;  %v1034_v26 = vsel %vm1032_vm5, %v1001_v7, %v906_v50  ;;  %v1085_v50 = vsel %vm661_vm1, %v1082_v48, %v1084_v54  ;;  %v1707_v48 = vsel %vm661_vm1, %v1704_v45, %v1706_v49  ;;  %v1715_v54 = vrot.slane %v3856_v5, 2 }
  0xac   : > { %2747 = vmatmul.mubr.msk.f32.vlgmr.msra.gmra.mrb[0].mxu0 %vm1142_vm6, %v1034_v26  ;;  %2947 = vmatpush3.bf16.msra.mxu1 %v3543_v10  ;;  %v814_v41 = vpop.permute.xlu0 %813  ;;  %v2476_v10 = vld [vmem:[%s4579_s3 + $0xf8] sm:$0xff]  ;;  %v1007_v8 = vsel %vm999_vm4, %v3278_v4, %v822_v13  ;;  %v1703_v7 = vrot.slane %v3888_v62, 1 }
  0xad   : > { %v916_v40 = vpop.permute.xlu1 %915  ;;  %2917 = vmatpush3.bf16.msra.mxu0 %v3626_v33  ;;  %2942 = vmatprep.subr.bf16.mxu1 %v3569_v29  ;;  %v1094_v33 = vsel %vm734_vm2, %v1091_v12, %v1093_v39  ;;  %v644_v12 = vsel %vm504_vm0, %v573_v58, 0.0  ;;  %v1002_v39 = vsel %vm999_vm4, %v3303_v24, %v812_v17  ;;  %v2926_v59 = vpack.c.bf16 %v2476_v10, %v2475_v44  ;;  %v2478_v24 = vld [vmem:[%s4579_s3 + $0x108] sm:$0xff]  ;;  %v2479_v10 = vld [vmem:[%s4579_s3 + $0x110] sm:$0xff] }
  0xae   : > { %v3885_v34 = vsel %vm1032_vm5, %v1006_v43, %v916_v40  ;;  %2919 = vmatprep.subr.bf16.mxu0 %v2918_v11  ;;  %1101 = vrot.lane.b32.xlu0 %v1085_v50, %s3099_s27  ;;  %v1716_v13 = vsel %vm734_vm2, %v1713_v37, %v1715_v54  ;;  %v1710_v17 = vrot.slane %v644_v12, 1  ;;  %v1712_v43 = vrot.slane %v3888_v62, 2 }
  0xaf   : > { %1115 = vrot.lane.b32.xlu1 %v1096_v16, %s3100_s28  ;;  %2677 = vmatprep.mubr.msk.f32.mxu1 %vm1142_vm6, %v3885_v34  ;;  %v1705_v16 = vsel %vm661_vm1, %v1703_v7, %v1704_v45  ;;  %v1003_v50 = vsel %vm999_vm4, %v3318_v36, %v814_v41  ;;  %v2480_v45 = vld [vmem:[%s4579_s3 + $0x118] sm:$0xff]  ;;  %v1719_v41 = vrot.slane %v644_v12, 2 }
  0xb0   : > { %2948 = vmatpush3.bf16.msra.mxu1 %v3569_v29  ;;  %v908_v26 = vpop.permute.xlu0 %907  ;;  %v2477_v29 = vld [vmem:[%s4579_s3 + $0x100] sm:$0xff]  ;;  %v1711_v36 = vsel %vm661_vm1, %v1708_v38, %v1710_v17 }
  0xb1   : > { %v918_v51 = vpop.permute.xlu1 %917  ;;  %2921 = vmatpush3.bf16.msra.mxu0 %v2918_v11  ;;  %2943 = vmatprep.subr.bf16.mxu1 %v3597_v61  ;;  %v1035_v4 = vsel %vm1032_vm5, %v1002_v39, %v908_v26  ;;  %v2930_v58 = vpack.c.bf16 %v2478_v24, %v2477_v29  ;;  %v1709_v26 = vsel %vm661_vm1, %v1706_v49, %v1708_v38 }
  0xb2   : > { %v1040_v30 = vsel %vm1032_vm5, %v1007_v8, %v918_v51  ;;  %2923 = vmatprep.subr.bf16.mxu0 %v2922_v31  ;;  %1113 = vrot.lane.b32.xlu0 %v1094_v33, %s3100_s28  ;;  %v1714_v33 = vsel %vm734_vm2, %v1712_v43, %v1713_v37  ;;  %v2934_v8 = vpack.c.bf16 %v2480_v45, %v2479_v10 }
  0xb3   : > { %2678 = vmatmul.mubr.msk.f32.gmra.mrb[2].mxu1 %vm1142_vm6, %v1040_v30  ;;  %1723 = vrot.lane.b32.xlu1 %v1707_v48, %s3099_s27 }
  0xb4   : > { %2749 = vmatprep.mubr.msk.f32.mxu0 %vm1142_vm6, %v1035_v4  ;;  %2949 = vmatpush3.bf16.msra.mxu1 %v3597_v61  ;;  %v910_v40 = vpop.permute.xlu0 %909  ;;  %v1717_v61 = vrot.slane %v3913_v23, 2 }
  0xb5   : > { %v826_v11 = vpop.permute.xlu1 %825  ;;  %2925 = vmatpush3.bf16.msra.mxu0 %v2922_v31  ;;  %v1036_v44 = vsel %vm1032_vm5, %v1003_v50, %v910_v40 }
  0xb6   : > { %2927 = vmatprep.subr.bf16.mxu0 %v2926_v59  ;;  %2750 = vmatmul.mubr.msk.f32.gmra.mrb[2].mxu0 %vm1142_vm6, %v1036_v44  ;;  %v1720_v51 = vsel %vm734_vm2, %v1717_v61, %v1719_v41  ;;  %v1009_v7 = vsel %vm999_vm4, %v3344_v0, %v826_v11 }
  0xb7   : > { %1735 = vrot.lane.b32.xlu1 %v1716_v13, %s3100_s28  ;;  %1721 = vrot.lane.b32.xlu0 %v1705_v16, %s3099_s27 }
  0xb8   : > { %2752 = vmatprep.mubr.msk.f32.mxu0 %vm1142_vm6, %v3771_v35  ;;  %v824_v48 = vpop.permute.xlu0 %823 }
  0xb9   : > { %v922_v31 = vpop.permute.xlu1 %921  ;;  %2929 = vmatpush3.bf16.msra.mxu0 %v2926_v59  ;;  %v1008_v37 = vsel %vm999_vm4, %v3359_v14, %v824_v48 }
  0xba   : > { %2931 = vmatprep.subr.bf16.mxu0 %v2930_v58  ;;  %2753 = vmatmul.mubr.msk.f32.gmra.mrb[4].mxu0 %vm1142_vm6, %v3794_v55  ;;  %v1042_v12 = vsel %vm1032_vm5, %v1009_v7, %v922_v31 }
  0xbb   : > { %1727 = vrot.lane.b32.xlu1 %v1711_v36, %s3099_s27  ;;  %1733 = vrot.lane.b32.xlu0 %v1714_v33, %s3100_s28 }
  0xbc   : > { %2755 = vmatprep.mubr.msk.f32.mxu0 %vm1142_vm6, %v3885_v34  ;;  %v920_v39 = vpop.permute.xlu0 %919  ;;  %v1718_v34 = vsel %vm734_vm2, %v1715_v54, %v1717_v61 }
  0xbd   : > { %v830_v35 = vpop.permute.xlu1 %829  ;;  %2933 = vmatpush3.bf16.msra.mxu0 %v2930_v58  ;;  %v1041_v55 = vsel %vm1032_vm5, %v1008_v37, %v920_v39 }
  0xbe   : > { %2935 = vmatprep.subr.bf16.mxu0 %v2934_v8  ;;  %2680 = vmatprep.mubr.msk.f32.mxu1 %vm1142_vm6, %v1041_v55  ;;  %v1011_v49 = vsel %vm999_vm4, %v3374_v28, %v830_v35 }
  0xbf   : > { %1739 = vrot.lane.b32.xlu1 %v1720_v51, %s3100_s28  ;;  %2756 = vmatmul.mubr.msk.f32.gmra.mrb[6].mxu0 %vm1142_vm6, %v1040_v30 }
  0xc0   : > { %2681 = vmatmul.mubr.msk.f32.gmra.mrb[4].mxu1 %vm1142_vm6, %v1042_v12  ;;  %2758 = vmatprep.mubr.msk.f32.mxu0 %vm1142_vm6, %v1041_v55  ;;  %v828_v14 = vpop.permute.xlu0 %827 }
  0xc1   : > { %v926_v0 = vpop.permute.xlu1 %925  ;;  %1725 = vrot.lane.b32.xlu0 %v1709_v26, %s3099_s27  ;;  %2937 = vmatpush3.bf16.msra.mxu0 %v2934_v8  ;;  %v1010_v30 = vsel %vm999_vm4, %v3347_v1, %v828_v14  ;;  %s2382_s27 = sshll.u32 %s4617_s9, 2 }
  0xc2   : > { %v1044_v4 = vsel %vm1032_vm5, %v1011_v49, %v926_v0 }
  0xc3   : > { %2759 = vmatmul.mubr.msk.f32.gmra.mrb[8].mxu0 %vm1142_vm6, %v1042_v12 }
  0xc4   : > { %v924_v29 = vpop.permute.xlu0 %923 }
  0xc5   : > { %v834_v59 = vpop.permute.xlu1 %833  ;;  %1737 = vrot.lane.b32.xlu0 %v1718_v34, %s3100_s28  ;;  %v1043_v24 = vsel %vm1032_vm5, %v1010_v30, %v924_v29  ;;  %s2383_s28 = sshll.u32 %s4611_s19, 7 }
  0xc6   : > { %2683 = vmatprep.mubr.msk.f32.mxu1 %vm1142_vm6, %v1043_v24  ;;  %2761 = vmatprep.mubr.msk.f32.mxu0 %vm1142_vm6, %v1043_v24  ;;  %v1013_v1 = vsel %vm999_vm4, %v3395_v56, %v834_v59  ;;  %s253_s6 = sadd.s32 %s2383_s28, %s2382_s27 }
  0xc7   : > { %2684 = vmatmul.mubr.msk.f32.gmra.mrb[6].mxu1 %vm1142_vm6, %v1044_v4  ;;  %2762 = vmatmul.mubr.msk.f32.gmra.mrb[10].mxu0 %vm1142_vm6, %v1044_v4  ;;  %s2384_s7 = sshll.u32 %s253_s6, 3 }
  0xc8   : > { %v832_v54 = vpop.permute.xlu0 %831  ;;  %s4234_s10 = scalar_lea.vmem %s4580_s4, %s2384_s7 }
  0xc9   : > { %v930_v28 = vpop.permute.xlu1 %929  ;;  %v1012_v38 = vsel %vm999_vm4, %v3408_v2, %v832_v54 }
  0xca   : > { %v1046_v17 = vsel %vm1032_vm5, %v1013_v1, %v930_v28 }
  0xcc   : > { %v928_v11 = vpop.permute.xlu0 %927 }
  0xcd   : > { %v838_v13 = vpop.permute.xlu1 %837  ;;  %v1045_v16 = vsel %vm1032_vm5, %v1012_v38, %v928_v11 }
  0xce   : > { %2686 = vmatprep.mubr.msk.f32.mxu1 %vm1142_vm6, %v1045_v16  ;;  %2764 = vmatprep.mubr.msk.f32.mxu0 %vm1142_vm6, %v1045_v16  ;;  %v1015_v56 = vsel %vm999_vm4, %v3426_v20, %v838_v13 }
  0xcf   : > { %2687 = vmatmul.mubr.msk.f32.gmra.mrb[8].mxu1 %vm1142_vm6, %v1046_v17  ;;  %2765 = vmatmul.mubr.msk.f32.gmra.mrb[12].mxu0 %vm1142_vm6, %v1046_v17 }
  0xd0   : > { %v836_v50 = vpop.permute.xlu0 %835 }
  0xd1   : > { %v934_v43 = vpop.permute.xlu1 %933  ;;  %v1014_v2 = vsel %vm999_vm4, %v3398_v57, %v836_v50 }
  0xd2   : > { %v1048_v58 = vsel %vm1032_vm5, %v1015_v56, %v934_v43 }
  0xd4   : > { %v932_v44 = vpop.permute.xlu0 %931 }
  0xd5   : > { %v842_v40 = vpop.permute.xlu1 %841  ;;  %v1047_v10 = vsel %vm1032_vm5, %v1014_v2, %v932_v44  ;;  %v4598_v44 = vld [vmem:[#allocation3_spill] sm:$0xff] }
  0xd6   : > { %2689 = vmatprep.mubr.msk.f32.mxu1 %vm1142_vm6, %v1047_v10  ;;  %2767 = vmatprep.mubr.msk.f32.mxu0 %vm1142_vm6, %v1047_v10  ;;  %v1017_v57 = vsel %vm999_vm4, %v3454_v52, %v842_v40  ;;  %v4597_v40 = vld [vmem:[#allocation2_spill] sm:$0xff] }
  0xd7   : > { %2690 = vmatmul.mubr.msk.f32.gmra.mrb[10].mxu1 %vm1142_vm6, %v1048_v58  ;;  %2768 = vmatmul.mubr.msk.f32.gmra.mrb[14].mxu0 %vm1142_vm6, %v1048_v58 }
  0xd8   : > { %2818 = vmatprep.mubr.msk.f32.mxu0 %vm1142_vm6, %v1041_v55  ;;  %v840_v20 = vpop.permute.xlu0 %839 }
  0xd9   : > { %v938_v45 = vpop.permute.xlu1 %937  ;;  %v1016_v61 = vsel %vm999_vm4, %v3470_v3, %v840_v20 }
  0xda   : > { %v4020_v41 = vsel %vm1032_vm5, %v1017_v57, %v938_v45 }
  0xdb   : > { %2819 = vmatmul.mubr.msk.f32.vlgmr.msra.gmra.mrb[0].mxu0 %vm1142_vm6, %v1042_v12 }
  0xdc   : > { %2821 = vmatprep.mubr.msk.f32.mxu0 %vm1142_vm6, %v1043_v24  ;;  %v936_v31 = vpop.permute.xlu0 %935 }
  0xdd   : > { %v846_v36 = vpop.permute.xlu1 %845  ;;  %v4024_v33 = vsel %vm1032_vm5, %v1016_v61, %v936_v31  ;;  %v4599_v31 = vld [vmem:[#allocation4_spill] sm:$0xff] }
  0xde   : > { %2692 = vmatprep.mubr.msk.f32.mxu1 %vm1142_vm6, %v4024_v33  ;;  %v1019_v48 = vsel %vm999_vm4, %v3498_v19, %v846_v36 }
  0xdf   : > { %2693 = vmatmul.mubr.msk.f32.gmra.mrb[12].mxu1 %vm1142_vm6, %v4020_v41  ;;  %2822 = vmatmul.mubr.msk.f32.gmra.mrb[2].mxu0 %vm1142_vm6, %v1044_v4 }
  0xe0   : > { %2824 = vmatprep.mubr.msk.f32.mxu0 %vm1142_vm6, %v1045_v16  ;;  %v844_v3 = vpop.permute.xlu0 %843 }
  0xe1   : > { %v942_v52 = vpop.permute.xlu1 %941  ;;  %v1018_v51 = vsel %vm999_vm4, %v3457_v53, %v844_v3 }
  0xe2   : > { %v4038_v7 = vsel %vm1032_vm5, %v1019_v48, %v942_v52 }
  0xe3   : > { %2825 = vmatmul.mubr.msk.f32.gmra.mrb[4].mxu0 %vm1142_vm6, %v1046_v17 }
  0xe4   : > { %2827 = vmatprep.mubr.msk.f32.mxu0 %vm1142_vm6, %v1047_v10  ;;  %v940_v35 = vpop.permute.xlu0 %939 }
  0xe5   : > { %v850_v8 = vpop.permute.xlu1 %849  ;;  %v4042_v37 = vsel %vm1032_vm5, %v1018_v51, %v940_v35 }
  0xe6   : > { %2695 = vmatprep.mubr.msk.f32.mxu1 %vm1142_vm6, %v4042_v37  ;;  %v1021_v12 = vsel %vm999_vm4, %v3556_v21, %v850_v8 }
  0xe7   : > { %2696 = vmatmul.mubr.msk.f32.gmra.mrb[14].mxu1 %vm1142_vm6, %v4038_v7  ;;  %2828 = vmatmul.mubr.msk.f32.gmra.mrb[6].mxu0 %vm1142_vm6, %v1048_v58 }
  0xe8   : > { %2830 = vmatprep.mubr.msk.f32.mxu0 %vm1142_vm6, %v4024_v33  ;;  %v848_v53 = vpop.permute.xlu0 %847 }
  0xe9   : > { %v946_v19 = vpop.permute.xlu1 %945  ;;  %v1020_v55 = vsel %vm999_vm4, %v3575_v32, %v848_v53 }
  0xea   : > { %v4058_v26 = vsel %vm1032_vm5, %v1021_v12, %v946_v19 }
  0xeb   : > { %2831 = vmatmul.mubr.msk.f32.gmra.mrb[8].mxu0 %vm1142_vm6, %v4020_v41 }
  0xec   : > { %2833 = vmatprep.mubr.msk.f32.mxu0 %vm1142_vm6, %v4042_v37  ;;  %v944_v0 = vpop.permute.xlu0 %943 }
  0xed   : > { %v854_v39 = vpop.permute.xlu1 %853  ;;  %v4063_v14 = vsel %vm1032_vm5, %v1020_v55, %v944_v0 }
  0xee   : > { %2698 = vmatprep.mubr.msk.f32.mxu1 %vm1142_vm6, %v4063_v14  ;;  %v1023_v34 = vsel %vm999_vm4, %v3606_v25, %v854_v39 }
  0xef   : > { %2699 = vmatmul.mubr.msk.f32.gmra.mrb[16].mxu1 %vm1142_vm6, %v4058_v26  ;;  %2834 = vmatmul.mubr.msk.f32.gmra.mrb[10].mxu0 %vm1142_vm6, %v4038_v7 }
  0xf0   : > { %2836 = vmatprep.mubr.msk.f32.mxu0 %vm1142_vm6, %v4063_v14  ;;  %v852_v32 = vpop.permute.xlu0 %851 }
  0xf1   : > { %v950_v21 = vpop.permute.xlu1 %949  ;;  %v1022_v59 = vsel %vm999_vm4, %v3559_v22, %v852_v32 }
  0xf2   : > { %v4080_v30 = vsel %vm1032_vm5, %v1023_v34, %v950_v21 }
  0xf3   : > { %2837 = vmatmul.mubr.msk.f32.gmra.mrb[12].mxu0 %vm1142_vm6, %v4058_v26 }
  0xf4   : > { %v948_v4 = vpop.permute.xlu0 %947 }
  0xf5   : > { %v858_v49 = vpop.permute.xlu1 %857  ;;  %v4083_v29 = vsel %vm1032_vm5, %v1022_v59, %v948_v4 }
  0xf6   : > { %2701 = vmatprep.mubr.msk.f32.mxu1 %vm1142_vm6, %v4083_v29  ;;  %2839 = vmatprep.mubr.msk.f32.mxu0 %vm1142_vm6, %v4083_v29  ;;  %v1025_v24 = vsel %vm999_vm4, %v3639_v46, %v858_v49 }
  0xf7   : > { %2702 = vmatmul.mubr.msk.f32.gmra.mrb[18].mxu1 %vm1142_vm6, %v4080_v30  ;;  %2840 = vmatmul.mubr.msk.f32.gmra.mrb[14].mxu0 %vm1142_vm6, %v4080_v30 }
  0xf8   : > { %v856_v25 = vpop.permute.xlu0 %855 }
  0xf9   : > { %v954_v22 = vpop.permute.xlu1 %953  ;;  %v1024_v54 = vsel %vm999_vm4, %v3656_v63, %v856_v25 }
  0xfa   : > { %v4098_v1 = vsel %vm1032_vm5, %v1025_v24, %v954_v22 }
  0xfc   : > { %v952_v13 = vpop.permute.xlu0 %951 }
  0xfd   : > { %v862_v28 = vpop.permute.xlu1 %861  ;;  %v4101_v38 = vsel %vm1032_vm5, %v1024_v54, %v952_v13 }
  0xfe   : > { %2704 = vmatprep.mubr.msk.f32.mxu1 %vm1142_vm6, %v4101_v38  ;;  %2842 = vmatprep.mubr.msk.f32.mxu0 %vm1142_vm6, %v4101_v38  ;;  %v1027_v17 = vsel %vm999_vm4, %v3668_v27, %v862_v28 }
  0xff   : > { %2705 = vmatmul.mubr.msk.f32.gmra.mrb[20].mxu1 %vm1142_vm6, %v4098_v1  ;;  %2843 = vmatmul.mubr.msk.f32.gmra.mrb[16].mxu0 %vm1142_vm6, %v4098_v1 }
 0x100   : > { %v860_v63 = vpop.permute.xlu0 %859 }
 0x101   : > { %v958_v46 = vpop.permute.xlu1 %957  ;;  %v1026_v16 = vsel %vm999_vm4, %v3642_v47, %v860_v63 }
 0x102   : > { %v4116_v43 = vsel %vm1032_vm5, %v1027_v17, %v958_v46 }
 0x104   : > { %v956_v50 = vpop.permute.xlu0 %955 }
 0x105   : > { %v866_v11 = vpop.permute.xlu1 %865  ;;  %v4119_v56 = vsel %vm1032_vm5, %v1026_v16, %v956_v50 }
 0x106   : > { %2707 = vmatprep.mubr.msk.f32.mxu1 %vm1142_vm6, %v4119_v56  ;;  %2845 = vmatprep.mubr.msk.f32.mxu0 %vm1142_vm6, %v4119_v56  ;;  %v1029_v2 = vsel %vm999_vm4, %v4597_v40, %v866_v11 }
 0x107   : > { %2708 = vmatmul.mubr.msk.f32.gmra.mrb[22].mxu1 %vm1142_vm6, %v4116_v43  ;;  %2846 = vmatmul.mubr.msk.f32.gmra.mrb[18].mxu0 %vm1142_vm6, %v4116_v43 }
 0x108   : > { %v864_v27 = vpop.permute.xlu0 %863 }
 0x109   : > { %v962_v47 = vpop.permute.xlu1 %961  ;;  %v1028_v10 = vsel %vm999_vm4, %v4598_v44, %v864_v27 }
 0x10a   : > { %v4134_v45 = vsel %vm1032_vm5, %v1029_v2, %v962_v47 }
 0x10c   : > { %v960_v20 = vpop.permute.xlu0 %959 }
 0x10d   : > { %v870_v58 = vpop.permute.xlu1 %869  ;;  %v4137_v57 = vsel %vm1032_vm5, %v1028_v10, %v960_v20 }
 0x10e   : > { %2710 = vmatprep.mubr.msk.f32.mxu1 %vm1142_vm6, %v4137_v57  ;;  %2848 = vmatprep.mubr.msk.f32.mxu0 %vm1142_vm6, %v4137_v57  ;;  %v1031_v52 = vsel %vm999_vm4, %v4599_v31, %v870_v58 }
 0x10f   : > { %2711 = vmatmul.mubr.msk.f32.gmra.mrb[24].mxu1 %vm1142_vm6, %v4134_v45  ;;  %2849 = vmatmul.mubr.msk.f32.gmra.mrb[20].mxu0 %vm1142_vm6, %v4134_v45 }
 0x110   : > { %v868_v61 = vpop.permute.xlu0 %867 }
 0x111   : > { %v966_v36 = vpop.permute.xlu1 %965  ;;  %v1030_v48 = vsel %vm999_vm4, %v3699_v15, %v868_v61 }
 0x112   : > { %v4152_v8 = vsel %vm1032_vm5, %v1031_v52, %v966_v36 }
 0x114   : > { %v964_v51 = vpop.permute.xlu0 %963 }
 0x115   : > { %v1100_v3 = vpop.permute.xlu1 %1099  ;;  %v1063_v35 = vsel %vm1032_vm5, %v1030_v48, %v964_v51 }
 0x116   : > { %2713 = vmatprep.mubr.msk.f32.mxu1 %vm1142_vm6, %v1063_v35  ;;  %2851 = vmatprep.mubr.msk.f32.mxu0 %vm1142_vm6, %v1063_v35  ;;  %v1122_v15 = vsel %vm999_vm4, %v3762_v18, %v1100_v3 }
 0x117   : > { %2714 = vmatmul.mubr.msk.f32.gmra.mrb[26].mxu1 %vm1142_vm6, %v4152_v8  ;;  %2852 = vmatmul.mubr.msk.f32.gmra.mrb[22].mxu0 %vm1142_vm6, %v4152_v8 }
 0x118   : > { %v1098_v53 = vpop.permute.xlu0 %1097 }
 0x119   : > { %v1112_v19 = vpop.permute.xlu1 %1111  ;;  %v1121_v39 = vsel %vm999_vm4, %v3791_v9, %v1098_v53 }
 0x11a   : > { %v1126_v55 = vsel %vm1032_vm5, %v1122_v15, %v1112_v19 }
 0x11c   : > { %v1110_v0 = vpop.permute.xlu0 %1109 }
 0x11d   : > { %v1104_v12 = vpop.permute.xlu1 %1103  ;;  %v1125_v21 = vsel %vm1032_vm5, %v1121_v39, %v1110_v0 }
 0x11e   : > { %2716 = vmatprep.mubr.msk.f32.mxu1 %vm1142_vm6, %v1125_v21  ;;  %2854 = vmatprep.mubr.msk.f32.mxu0 %vm1142_vm6, %v1125_v21  ;;  %v1124_v18 = vsel %vm999_vm4, %v3814_v42, %v1104_v12 }
 0x11f   : > { %2717 = vmatmul.mubr.msk.f32.gmra.mrb[28].mxu1 %vm1142_vm6, %v1126_v55  ;;  %2855 = vmatmul.mubr.msk.f32.gmra.mrb[24].mxu0 %vm1142_vm6, %v1126_v55 }
 0x120   : > { %v1102_v34 = vpop.permute.xlu0 %1101 }
 0x121   : > { %v1116_v32 = vpop.permute.xlu1 %1115  ;;  %v1123_v9 = vsel %vm999_vm4, %v3765_v6, %v1102_v34 }
 0x122   : > { %v1128_v59 = vsel %vm1032_vm5, %v1124_v18, %v1116_v32 }
 0x124   : > { %v1114_v4 = vpop.permute.xlu0 %1113 }
 0x125   : > { %v1724_v49 = vpop.permute.xlu1 %1723  ;;  %v1127_v22 = vsel %vm1032_vm5, %v1123_v9, %v1114_v4 }
 0x126   : > { %2719 = vmatprep.mubr.msk.f32.mxu1 %vm1142_vm6, %v1127_v22  ;;  %2857 = vmatprep.mubr.msk.f32.mxu0 %vm1142_vm6, %v1127_v22  ;;  %v1746_v6 = vsel %vm999_vm4, %v3853_v60, %v1724_v49 }
 0x127   : > { %2720 = vmatmul.mubr.msk.f32.gmra.mrb[30].mxu1 %vm1142_vm6, %v1128_v59  ;;  %2858 = vmatmul.mubr.msk.f32.gmra.mrb[26].mxu0 %vm1142_vm6, %v1128_v59 }
 0x128   : > { %2770 = vmatprep.mubr.msk.f32.mxu1 %vm1142_vm6, %v4024_v33 }
 0x129   : > { %v1736_v25 = vpop.permute.xlu1 %1735  ;;  %v1722_v42 = vpop.permute.xlu0 %1721 }
 0x12a   : > { %v1745_v24 = vsel %vm999_vm4, %v3888_v62, %v1722_v42  ;;  %v1750_v54 = vsel %vm1032_vm5, %v1746_v6, %v1736_v25 }
 0x12b   : > { %2771 = vmatmul.mubr.msk.f32.vlgmr.msra.gmra.mrb[16].mxu1 %vm1142_vm6, %v4020_v41 }
 0x12c   : > { %2773 = vmatprep.mubr.msk.f32.mxu1 %vm1142_vm6, %v4042_v37 }
 0x12d   : > { %v1734_v28 = vpop.permute.xlu0 %1733  ;;  %v1728_v46 = vpop.permute.xlu1 %1727 }
 0x12e   : > { %v1749_v13 = vsel %vm1032_vm5, %v1745_v24, %v1734_v28  ;;  %v1748_v62 = vsel %vm999_vm4, %v3913_v23, %v1728_v46 }
 0x12f   : > { %2860 = vmatprep.mubr.msk.f32.mxu0 %vm1142_vm6, %v1749_v13  ;;  %2774 = vmatmul.mubr.msk.f32.gmra.mrb[18].mxu1 %vm1142_vm6, %v4038_v7 }
 0x130   : > { %2861 = vmatmul.mubr.msk.f32.gmra.mrb[28].mxu0 %vm1142_vm6, %v1750_v54  ;;  %2776 = vmatprep.mubr.msk.f32.mxu1 %vm1142_vm6, %v4063_v14 }
 0x131   : > { %v1740_v41 = vpop.permute.xlu1 %1739 }
 0x132   : > { %v1752_v37 = vsel %vm1032_vm5, %v1748_v62, %v1740_v41 }
 0x133   : > { %v1726_v60 = vpop.permute.xlu0 %1725  ;;  %2777 = vmatmul.mubr.msk.f32.gmra.mrb[20].mxu1 %vm1142_vm6, %v4058_v26 }
 0x134   : > { %2779 = vmatprep.mubr.msk.f32.mxu1 %vm1142_vm6, %v4083_v29  ;;  %v1747_v33 = vsel %vm999_vm4, %v3856_v5, %v1726_v60 }
 0x137   : > { %v1738_v7 = vpop.permute.xlu0 %1737  ;;  %2780 = vmatmul.mubr.msk.f32.gmra.mrb[22].mxu1 %vm1142_vm6, %v4080_v30 }
 0x138   : > { %v1751_v14 = vsel %vm1032_vm5, %v1747_v33, %v1738_v7  ;;  %2782 = vmatprep.mubr.msk.f32.mxu1 %vm1142_vm6, %v4101_v38 }
 0x139   : > { %2863 = vmatprep.mubr.msk.f32.mxu0 %vm1142_vm6, %v1751_v14 }
 0x13a   : > { %2864 = vmatmul.mubr.msk.f32.gmra.mrb[30].mxu0 %vm1142_vm6, %v1752_v37 }
 0x13b   : > { %2783 = vmatmul.mubr.msk.f32.gmra.mrb[24].mxu1 %vm1142_vm6, %v4098_v1 }
 0x13c   : > { %2785 = vmatprep.mubr.msk.f32.mxu1 %vm1142_vm6, %v4119_v56 }
 0x13f   : > { %2786 = vmatmul.mubr.msk.f32.gmra.mrb[26].mxu1 %vm1142_vm6, %v4116_v43 }
 0x140   : > { %2788 = vmatprep.mubr.msk.f32.mxu1 %vm1142_vm6, %v4137_v57 }
 0x143   : > { %2789 = vmatmul.mubr.msk.f32.gmra.mrb[28].mxu1 %vm1142_vm6, %v4134_v45 }
 0x144   : > { %2791 = vmatprep.mubr.msk.f32.mxu1 %vm1142_vm6, %v1063_v35 }
 0x147   : > { %2792 = vmatmul.mubr.msk.f32.gmra.mrb[30].mxu1 %vm1142_vm6, %v4152_v8 }
 0x172   : > { %v2676_v5 = vpop.f32.mrb[0].mxu1 }
 0x173   : > { %v1305_v23 = vpop.f32.mrb[1].mxu1 }
 0x186   : > { %v2679_v26 = vpop.f32.mrb[2].mxu1 }
 0x187   : > { %v1315_v30 = vpop.f32.mrb[3].mxu1 }
 0x193   : > { %v2682_v29 = vpop.f32.mrb[4].mxu1 }
 0x194   : > { %v1325_v1 = vpop.f32.mrb[5].mxu1 }
 0x19a   : > { %v2685_v38 = vpop.f32.mrb[6].mxu1 }
 0x19b   : > { %v1335_v63 = vpop.f32.mrb[7].mxu1 }
 0x1a2   : > { %v2688_v17 = vpop.f32.mrb[8].mxu1 }
 0x1a3   : > { %v1345_v11 = vpop.f32.mrb[9].mxu1 }
 0x1aa   : > { %v2691_v16 = vpop.f32.mrb[10].mxu1 }
 0x1ab   : > { %v1355_v43 = vpop.f32.mrb[11].mxu1 }
 0x1ae   : > { %v2820_v50 = vpop.f32.mrb[0].mxu0 }
 0x1af   : > { %v4236_v56 = vadd.f32 %v2820_v50, %v2676_v5  ;;  %v1844_v47 = vpop.f32.mrb[1].mxu0 }
 0x1b0   : > { %v4238_v27 = vadd.f32 %v1844_v47, %v1305_v23 }
 0x1b1   : > { %2036 = vst.msk [vmem:[%s4234_s10 + $0x8] sm:$0xff] %vm999_vm4, %v4236_v56 }
 0x1b2   : > { %2035 = vst.msk [vmem:[%s4234_s10] sm:$0xff] %vm999_vm4, %v4238_v27  ;;  %v2694_v40 = vpop.f32.mrb[12].mxu1  ;;  %v2823_v2 = vpop.f32.mrb[2].mxu0 }
 0x1b3   : > { %v4246_v58 = vadd.f32 %v2823_v2, %v2679_v26  ;;  %v1365_v44 = vpop.f32.mrb[13].mxu1  ;;  %v1854_v10 = vpop.f32.mrb[3].mxu0 }
 0x1b4   : > { %v4248_v45 = vadd.f32 %v1854_v10, %v1315_v30 }
 0x1b5   : > { %2038 = vst.msk [vmem:[%s4234_s10 + $0x18] sm:$0xff] %vm999_vm4, %v4246_v58 }
 0x1b6   : > { %2037 = vst.msk [vmem:[%s4234_s10 + $0x10] sm:$0xff] %vm999_vm4, %v4248_v45  ;;  %v2826_v20 = vpop.f32.mrb[4].mxu0 }
 0x1b7   : > { %v4256_v57 = vadd.f32 %v2826_v20, %v2682_v29  ;;  %v1864_v36 = vpop.f32.mrb[5].mxu0 }
 0x1b8   : > { %v4258_v61 = vadd.f32 %v1864_v36, %v1325_v1 }
 0x1b9   : > { %2040 = vst.msk [vmem:[%s4234_s10 + $0x28] sm:$0xff] %vm999_vm4, %v4256_v57 }
 0x1ba   : > { %2039 = vst.msk [vmem:[%s4234_s10 + $0x20] sm:$0xff] %vm999_vm4, %v4258_v61  ;;  %v2697_v31 = vpop.f32.mrb[14].mxu1  ;;  %v2829_v52 = vpop.f32.mrb[6].mxu0 }
 0x1bb   : > { %v4266_v3 = vadd.f32 %v2829_v52, %v2685_v38  ;;  %v1375_v48 = vpop.f32.mrb[15].mxu1  ;;  %v1874_v8 = vpop.f32.mrb[7].mxu0 }
 0x1bc   : > { %v4268_v51 = vadd.f32 %v1874_v8, %v1335_v63 }
 0x1bd   : > { %2042 = vst.msk [vmem:[%s4234_s10 + $0x38] sm:$0xff] %vm999_vm4, %v4266_v3 }
 0x1be   : > { %2041 = vst.msk [vmem:[%s4234_s10 + $0x30] sm:$0xff] %vm999_vm4, %v4268_v51  ;;  %v2832_v35 = vpop.f32.mrb[8].mxu0 }
 0x1bf   : > { %v4276_v19 = vadd.f32 %v2832_v35, %v2688_v17  ;;  %v1884_v53 = vpop.f32.mrb[9].mxu0 }
 0x1c0   : > { %v4278_v15 = vadd.f32 %v1884_v53, %v1345_v11 }
 0x1c1   : > { %2044 = vst.msk [vmem:[%s4234_s10 + $0x48] sm:$0xff] %vm999_vm4, %v4276_v19 }
 0x1c2   : > { %2043 = vst.msk [vmem:[%s4234_s10 + $0x40] sm:$0xff] %vm999_vm4, %v4278_v15  ;;  %v2835_v12 = vpop.f32.mrb[10].mxu0 }
 0x1c3   : > { %v4286_v39 = vadd.f32 %v2835_v12, %v2691_v16  ;;  %v1894_v55 = vpop.f32.mrb[11].mxu0 }
 0x1c4   : > { %v4288_v0 = vadd.f32 %v1894_v55, %v1355_v43 }
 0x1c5   : > { %2046 = vst.msk [vmem:[%s4234_s10 + $0x58] sm:$0xff] %vm999_vm4, %v4286_v39 }
 0x1c6   : > { %2045 = vst.msk [vmem:[%s4234_s10 + $0x50] sm:$0xff] %vm999_vm4, %v4288_v0  ;;  %v2838_v21 = vpop.f32.mrb[12].mxu0 }
 0x1c7   : > { %v4296_v32 = vadd.f32 %v2838_v21, %v2694_v40  ;;  %v1904_v34 = vpop.f32.mrb[13].mxu0 }
 0x1c8   : > { %v4298_v18 = vadd.f32 %v1904_v34, %v1365_v44 }
 0x1c9   : > { %2048 = vst.msk [vmem:[%s4234_s10 + $0x68] sm:$0xff] %vm999_vm4, %v4296_v32 }
 0x1ca   : > { %2047 = vst.msk [vmem:[%s4234_s10 + $0x60] sm:$0xff] %vm999_vm4, %v4298_v18  ;;  %v2841_v49 = vpop.f32.mrb[14].mxu0 }
 0x1cb   : > { %v4306_v9 = vadd.f32 %v2841_v49, %v2697_v31  ;;  %v1914_v59 = vpop.f32.mrb[15].mxu0 }
 0x1cc   : > { %v4308_v4 = vadd.f32 %v1914_v59, %v1375_v48 }
 0x1cd   : > { %2050 = vst.msk [vmem:[%s4234_s10 + $0x78] sm:$0xff] %vm999_vm4, %v4306_v9 }
 0x1ce   : > { %2049 = vst.msk [vmem:[%s4234_s10 + $0x70] sm:$0xff] %vm999_vm4, %v4308_v4 }
 0x1d2   : > { %v2844_v22 = vpop.f32.mrb[16].mxu0 }
 0x1d3   : > { %v1924_v25 = vpop.f32.mrb[17].mxu0 }
 0x1da   : > { %v2847_v42 = vpop.f32.mrb[18].mxu0 }
 0x1db   : > { %v1934_v6 = vpop.f32.mrb[19].mxu0 }
 0x1e2   : > { %v2850_v24 = vpop.f32.mrb[20].mxu0 }
 0x1e3   : > { %v1944_v28 = vpop.f32.mrb[21].mxu0 }
 0x1ea   : > { %v2853_v54 = vpop.f32.mrb[22].mxu0 }
 0x1eb   : > { %v1954_v13 = vpop.f32.mrb[23].mxu0 }
 0x1f2   : > { %v2856_v46 = vpop.f32.mrb[24].mxu0 }
 0x1f3   : > { %v1964_v60 = vpop.f32.mrb[25].mxu0 }
 0x1fa   : > { %v2859_v62 = vpop.f32.mrb[26].mxu0 }
 0x1fb   : > { %v1974_v41 = vpop.f32.mrb[27].mxu0 }
 0x1fe   : > { %v2772_v33 = vpop.f32.mrb[16].mxu1 }
 0x1ff   : > { %v4316_v7 = vadd.f32 %v2844_v22, %v2772_v33  ;;  %v1622_v37 = vpop.f32.mrb[17].mxu1  ;;  %v3101_v22 = vmov (!%p2513_p11), 0.0  }
 0x200   : > { %v4318_v14 = vadd.f32 %v1924_v25, %v1622_v37  ;;  %2071 = vst.msk [vmem:[%s3199_s29] sm:$0x3] (!%p2513_p11), %vm2070_vm8, %v3101_v22 }
 0x201   : > { %2052 = vst.msk [vmem:[%s4234_s10 + $0x88] sm:$0xff] %vm999_vm4, %v4316_v7 }
 0x202   : > { %2051 = vst.msk [vmem:[%s4234_s10 + $0x80] sm:$0xff] %vm999_vm4, %v4318_v14  ;;  %v2775_v5 = vpop.f32.mrb[18].mxu1 }
 0x203   : > { %v2862_v23 = vpop.f32.mrb[28].mxu0  ;;  %v4326_v26 = vadd.f32 %v2847_v42, %v2775_v5  ;;  %v1632_v30 = vpop.f32.mrb[19].mxu1 }
 0x204   : > { %v1984_v29 = vpop.f32.mrb[29].mxu0  ;;  %v4328_v1 = vadd.f32 %v1934_v6, %v1632_v30 }
 0x205   : > { %2054 = vst.msk [vmem:[%s4234_s10 + $0x98] sm:$0xff] %vm999_vm4, %v4326_v26 }
 0x206   : > { %2053 = vst.msk [vmem:[%s4234_s10 + $0x90] sm:$0xff] %vm999_vm4, %v4328_v1  ;;  %v2778_v38 = vpop.f32.mrb[20].mxu1 }
 0x207   : > { %v4336_v63 = vadd.f32 %v2850_v24, %v2778_v38  ;;  %v1642_v17 = vpop.f32.mrb[21].mxu1 }
 0x208   : > { %v4338_v11 = vadd.f32 %v1944_v28, %v1642_v17 }
 0x209   : > { %2056 = vst.msk [vmem:[%s4234_s10 + $0xa8] sm:$0xff] %vm999_vm4, %v4336_v63 }
 0x20a   : > { %2055 = vst.msk [vmem:[%s4234_s10 + $0xa0] sm:$0xff] %vm999_vm4, %v4338_v11  ;;  %v2781_v16 = vpop.f32.mrb[22].mxu1 }
 0x20b   : > { %v4346_v43 = vadd.f32 %v2853_v54, %v2781_v16  ;;  %v1652_v50 = vpop.f32.mrb[23].mxu1 }
 0x20c   : > { %v4348_v47 = vadd.f32 %v1954_v13, %v1652_v50 }
 0x20d   : > { %v2865_v40 = vpop.f32.mrb[30].mxu0  ;;  %2058 = vst.msk [vmem:[%s4234_s10 + $0xb8] sm:$0xff] %vm999_vm4, %v4346_v43 }
 0x20e   : > { %v1994_v2 = vpop.f32.mrb[31].mxu0  ;;  %2057 = vst.msk [vmem:[%s4234_s10 + $0xb0] sm:$0xff] %vm999_vm4, %v4348_v47  ;;  %v2784_v44 = vpop.f32.mrb[24].mxu1 }
 0x20f   : > { %v4356_v10 = vadd.f32 %v2856_v46, %v2784_v44  ;;  %v1662_v20 = vpop.f32.mrb[25].mxu1 }
 0x210   : > { %v4358_v36 = vadd.f32 %v1964_v60, %v1662_v20 }
 0x211   : > { %2060 = vst.msk [vmem:[%s4234_s10 + $0xc8] sm:$0xff] %vm999_vm4, %v4356_v10 }
 0x212   : > { %2059 = vst.msk [vmem:[%s4234_s10 + $0xc0] sm:$0xff] %vm999_vm4, %v4358_v36  ;;  %v2787_v31 = vpop.f32.mrb[26].mxu1 }
 0x213   : > { %v4366_v52 = vadd.f32 %v2859_v62, %v2787_v31  ;;  %v1672_v48 = vpop.f32.mrb[27].mxu1 }
 0x214   : > { %v4368_v8 = vadd.f32 %v1974_v41, %v1672_v48 }
 0x215   : > { %2062 = vst.msk [vmem:[%s4234_s10 + $0xd8] sm:$0xff] %vm999_vm4, %v4366_v52 }
 0x216   : > { %2061 = vst.msk [vmem:[%s4234_s10 + $0xd0] sm:$0xff] %vm999_vm4, %v4368_v8  ;;  %v2790_v35 = vpop.f32.mrb[28].mxu1 }
 0x217   : > { %v4376_v53 = vadd.f32 %v2862_v23, %v2790_v35  ;;  %v1682_v12 = vpop.f32.mrb[29].mxu1 }
 0x218   : > { %v4378_v55 = vadd.f32 %v1984_v29, %v1682_v12  ;;  %2069 = sbr.rel (%p2513_p11) target bundleno = 543 (0x21f), region = 40 }
 0x219   : > { %2064 = vst.msk [vmem:[%s4234_s10 + $0xe8] sm:$0xff] %vm999_vm4, %v4376_v53 }
 0x21a   : > { %2063 = vst.msk [vmem:[%s4234_s10 + $0xe0] sm:$0xff] %vm999_vm4, %v4378_v55  ;;  %v2793_v21 = vpop.f32.mrb[30].mxu1 }
 0x21b   : > { %v4386_v34 = vadd.f32 %v2865_v40, %v2793_v21  ;;  %v1692_v49 = vpop.f32.mrb[31].mxu1 }
 0x21c   : > { %v4388_v59 = vadd.f32 %v1994_v2, %v1692_v49 }
 0x21d   : > { %2066 = vst.msk [vmem:[%s4234_s10 + $0xf8] sm:$0xff] %vm999_vm4, %v4386_v34 }
 0x21e   : > { %2065 = vst.msk [vmem:[%s4234_s10 + $0xf0] sm:$0xff] %vm999_vm4, %v4388_v59 }
 0x21f PF: > { %v2072_v25 = vsel %vm999_vm4, %v4238_v27, 0.0  ;;  %v2073_v42 = vsel %vm999_vm4, %v4236_v56, 0.0  ;;  %v2075_v6 = vsel %vm999_vm4, %v4248_v45, 0.0  ;;  %v2077_v28 = vsel %vm999_vm4, %v4246_v58, 0.0 }
 0x220   : > { %v2074_v24 = vadd.f32 %v2073_v42, %v2072_v25  ;;  %v2079_v13 = vsel %vm999_vm4, %v4258_v61, 0.0  ;;  %v2081_v60 = vsel %vm999_vm4, %v4256_v57, 0.0  ;;  %v2083_v41 = vsel %vm999_vm4, %v4268_v51, 0.0 }
 0x221   : > { %v2085_v37 = vsel %vm999_vm4, %v4266_v3, 0.0  ;;  %v2087_v23 = vsel %vm999_vm4, %v4278_v15, 0.0  ;;  %v2089_v29 = vsel %vm999_vm4, %v4276_v19, 0.0  ;;  %v2141_v38 = vmul.f32 %v4238_v27, %v4238_v27 }
 0x222   : > { %v2076_v54 = vadd.f32 %v2075_v6, %v2074_v24  ;;  %v2142_v17 = vmul.f32 %v4236_v56, %v4236_v56  ;;  %v2143_v16 = vmul.f32 %v4248_v45, %v4248_v45  ;;  %v2091_v40 = vsel %vm999_vm4, %v4288_v0, 0.0 }
 0x223   : > { %v2144_v2 = vmul.f32 %v4246_v58, %v4246_v58  ;;  %v2093_v20 = vsel %vm999_vm4, %v4286_v39, 0.0  ;;  %v2145_v27 = vmul.f32 %v4258_v61, %v4258_v61  ;;  %v2173_v31 = vsel %vm999_vm4, %v2141_v38, 0.0 }
 0x224   : > { %v2078_v46 = vadd.f32 %v2077_v28, %v2076_v54  ;;  %v2174_v56 = vsel %vm999_vm4, %v2142_v17, 0.0  ;;  %v2176_v45 = vsel %vm999_vm4, %v2143_v16, 0.0  ;;  %v2095_v12 = vsel %vm999_vm4, %v4298_v18, 0.0 }
 0x225   : > { %v2175_v35 = vadd.f32 %v2174_v56, %v2173_v31  ;;  %v2146_v58 = vmul.f32 %v4256_v57, %v4256_v57  ;;  %v2178_v21 = vsel %vm999_vm4, %v2144_v2, 0.0  ;;  %v2097_v61 = vsel %vm999_vm4, %v4296_v32, 0.0 }
 0x226   : > { %v2080_v62 = vadd.f32 %v2079_v13, %v2078_v46  ;;  %v2147_v25 = vmul.f32 %v4268_v51, %v4268_v51  ;;  %v2180_v42 = vsel %vm999_vm4, %v2145_v27, 0.0  ;;  %v2099_v28 = vsel %vm999_vm4, %v4308_v4, 0.0 }
 0x227   : > { %v2177_v22 = vadd.f32 %v2176_v45, %v2175_v35  ;;  %v2148_v57 = vmul.f32 %v4266_v3, %v4266_v3  ;;  %v2182_v54 = vsel %vm999_vm4, %v2146_v58, 0.0  ;;  %v2149_v51 = vmul.f32 %v4278_v15, %v4278_v15 }
 0x228   : > { %v2082_v33 = vadd.f32 %v2081_v60, %v2080_v62  ;;  %v2101_v60 = vsel %vm999_vm4, %v4306_v9, 0.0  ;;  %v2184_v62 = vsel %vm999_vm4, %v2147_v25, 0.0  ;;  %v2150_v3 = vmul.f32 %v4276_v19, %v4276_v19 }
 0x229   : > { %v2179_v24 = vadd.f32 %v2178_v21, %v2177_v22  ;;  %v2151_v15 = vmul.f32 %v4288_v0, %v4288_v0  ;;  %v2188_v38 = vsel %vm999_vm4, %v2149_v51, 0.0  ;;  %v2152_v19 = vmul.f32 %v4286_v39, %v4286_v39 }
 0x22a   : > { %v2084_v5 = vadd.f32 %v2083_v41, %v2082_v33  ;;  %v2153_v0 = vmul.f32 %v4298_v18, %v4298_v18  ;;  %v2111_v45 = vsel %vm999_vm4, %v4338_v11, 0.0  ;;  %v2154_v39 = vmul.f32 %v4296_v32, %v4296_v32 }
 0x22b   : > { %v2181_v46 = vadd.f32 %v2180_v42, %v2179_v24  ;;  %v2192_v27 = vsel %vm999_vm4, %v2151_v15, 0.0  ;;  %v2113_v58 = vsel %vm999_vm4, %v4336_v63, 0.0  ;;  %v2155_v18 = vmul.f32 %v4308_v4, %v4308_v4 }
 0x22c   : > { %v2086_v30 = vadd.f32 %v2085_v37, %v2084_v5  ;;  %v2103_v37 = vsel %vm999_vm4, %v4318_v14, 0.0  ;;  %v2186_v5 = vsel %vm999_vm4, %v2148_v57, 0.0  ;;  %v2196_v21 = vsel %vm999_vm4, %v2153_v0, 0.0 }
 0x22d   : > { %v2183_v33 = vadd.f32 %v2182_v54, %v2181_v46  ;;  %v2156_v32 = vmul.f32 %v4306_v9, %v4306_v9  ;;  %v2198_v25 = vsel %vm999_vm4, %v2154_v39, 0.0  ;;  %v2117_v24 = vsel %vm999_vm4, %v4346_v43, 0.0 }
 0x22e   : > { %v2088_v50 = vadd.f32 %v2087_v23, %v2086_v30  ;;  %v2157_v4 = vmul.f32 %v4318_v14, %v4318_v14  ;;  %v2158_v9 = vmul.f32 %v4316_v7, %v4316_v7  ;;  %v2159_v14 = vmul.f32 %v4328_v1, %v4328_v1 }
 0x22f   : > { %v2185_v30 = vadd.f32 %v2184_v62, %v2183_v33  ;;  %v2202_v46 = vsel %vm999_vm4, %v2156_v32, 0.0  ;;  %v2121_v62 = vsel %vm999_vm4, %v4356_v10, 0.0  ;;  %v2165_v39 = vmul.f32 %v4358_v36, %v4358_v36 }
 0x230   : > { %v2090_v44 = vadd.f32 %v2089_v29, %v2088_v50  ;;  %v2105_v29 = vsel %vm999_vm4, %v4316_v7, 0.0  ;;  %v2107_v50 = vsel %vm999_vm4, %v4328_v1, 0.0  ;;  %v2160_v7 = vmul.f32 %v4326_v26, %v4326_v26 }
 0x231   : > { %v2187_v16 = vadd.f32 %v2186_v5, %v2185_v30  ;;  %v2206_v5 = vsel %vm999_vm4, %v2158_v9, 0.0  ;;  %v2161_v1 = vmul.f32 %v4338_v11, %v4338_v11  ;;  %v2208_v15 = vsel %vm999_vm4, %v2159_v14, 0.0 }
 0x232   : > { %v2092_v48 = vadd.f32 %v2091_v40, %v2090_v44  ;;  %v2190_v40 = vsel %vm999_vm4, %v2150_v3, 0.0  ;;  %v2123_v3 = vsel %vm999_vm4, %v4368_v8, 0.0  ;;  %v2163_v11 = vmul.f32 %v4348_v47, %v4348_v47 }
 0x233   : > { %v2189_v44 = vadd.f32 %v2188_v38, %v2187_v16  ;;  %v2127_v16 = vsel %vm999_vm4, %v4378_v55, 0.0  ;;  %vm2245_vm9 = vcmask 254976  }
 0x234   : > { %v2094_v49 = vadd.f32 %v2093_v20, %v2092_v48  ;;  %v2109_v20 = vsel %vm999_vm4, %v4326_v26, 0.0  ;;  %v2194_v48 = vsel %vm999_vm4, %v2152_v19, 0.0  ;;  %v2162_v26 = vmul.f32 %v4336_v63, %v4336_v63 }
 0x235   : > { %v2191_v56 = vadd.f32 %v2190_v40, %v2189_v44  ;;  %v2212_v44 = vsel %vm999_vm4, %v2161_v1, 0.0 }
 0x236   : > { %v2096_v6 = vadd.f32 %v2095_v12, %v2094_v49 }
 0x237   : > { %v2193_v12 = vadd.f32 %v2192_v27, %v2191_v56  ;;  %v2164_v27 = vmul.f32 %v4346_v43, %v4346_v43 }
 0x238   : > { %v2098_v13 = vadd.f32 %v2097_v61, %v2096_v6  ;;  %v2115_v61 = vsel %vm999_vm4, %v4348_v47, 0.0 }
 0x239   : > { %v2195_v22 = vadd.f32 %v2194_v48, %v2193_v12  ;;  %v2216_v48 = vsel %vm999_vm4, %v2163_v11, 0.0  ;;  %v2218_v12 = vsel %vm999_vm4, %v2164_v27, 0.0 }
 0x23a   : > { %v2100_v41 = vadd.f32 %v2099_v28, %v2098_v13  ;;  %v2200_v28 = vsel %vm999_vm4, %v2155_v18, 0.0  ;;  %v2119_v13 = vsel %vm999_vm4, %v4358_v36, 0.0  ;;  %v2133_v18 = vsel %vm999_vm4, %v4386_v34, 0.0 }
 0x23b   : > { %v2197_v6 = vadd.f32 %v2196_v21, %v2195_v22  ;;  %v2167_v21 = vmul.f32 %v4368_v8, %v4368_v8  ;;  %v2168_v36 = vmul.f32 %v4366_v52, %v4366_v52 }
 0x23c   : > { %v2102_v23 = vadd.f32 %v2101_v60, %v2100_v41  ;;  %v2204_v41 = vsel %vm999_vm4, %v2157_v4, 0.0 }
 0x23d   : > { %v2199_v54 = vadd.f32 %v2198_v25, %v2197_v6  ;;  %v2169_v25 = vmul.f32 %v4378_v55, %v4378_v55  ;;  %v2226_v8 = vsel %vm999_vm4, %v2168_v36, 0.0 }
 0x23e   : > { %v2104_v17 = vadd.f32 %v2103_v37, %v2102_v23 }
 0x23f   : > { %v2201_v51 = vadd.f32 %v2200_v28, %v2199_v54 }
 0x240   : > { %v2106_v2 = vadd.f32 %v2105_v29, %v2104_v17  ;;  %v2125_v29 = vsel %vm999_vm4, %v4366_v52, 0.0  ;;  %v2171_v52 = vmul.f32 %v4388_v59, %v4388_v59 }
 0x241   : > { %v2203_v37 = vadd.f32 %v2202_v46, %v2201_v51 }
 0x242   : > { %v2108_v31 = vadd.f32 %v2107_v50, %v2106_v2  ;;  %v2210_v50 = vsel %vm999_vm4, %v2160_v7, 0.0  ;;  %v2129_v2 = vsel %vm999_vm4, %v4376_v53, 0.0 }
 0x243   : > { %v2205_v30 = vadd.f32 %v2204_v41, %v2203_v37 }
 0x244   : > { %v2110_v35 = vadd.f32 %v2109_v20, %v2108_v31  ;;  %v2214_v31 = vsel %vm999_vm4, %v2162_v26, 0.0 }
 0x245   : > { %v2207_v17 = vadd.f32 %v2206_v5, %v2205_v30 }
 0x246   : > { %v2112_v49 = vadd.f32 %v2111_v45, %v2110_v35  ;;  %v2131_v45 = vsel %vm999_vm4, %v4388_v59, 0.0  ;;  %v2166_v35 = vmul.f32 %v4356_v10, %v4356_v10 }
 0x247   : > { %v2209_v40 = vadd.f32 %v2208_v15, %v2207_v17 }
 0x248   : > { %v2114_v42 = vadd.f32 %v2113_v58, %v2112_v49  ;;  %v2220_v49 = vsel %vm999_vm4, %v2165_v39, 0.0 }
 0x249   : > { %v2211_v0 = vadd.f32 %v2210_v50, %v2209_v40 }
 0x24a   : > { %v2116_v57 = vadd.f32 %v2115_v61, %v2114_v42  ;;  %v2222_v61 = vsel %vm999_vm4, %v2166_v35, 0.0  ;;  %v2224_v42 = vsel %vm999_vm4, %v2167_v21, 0.0 }
 0x24b   : > { %v2213_v56 = vadd.f32 %v2212_v44, %v2211_v0 }
 0x24c   : > { %v2118_v60 = vadd.f32 %v2117_v24, %v2116_v57  ;;  %v2170_v24 = vmul.f32 %v4376_v53, %v4376_v53  ;;  %v2228_v57 = vsel %vm999_vm4, %v2169_v25, 0.0  ;;  %v2232_v53 = vsel %vm999_vm4, %v2171_v52, 0.0 }
 0x24d   : > { %v2215_v47 = vadd.f32 %v2214_v31, %v2213_v56 }
 0x24e   : > { %v2120_v33 = vadd.f32 %v2119_v13, %v2118_v60  ;;  %v2172_v13 = vmul.f32 %v4386_v34, %v4386_v34  ;;  %v2230_v55 = vsel %vm999_vm4, %v2170_v24, 0.0 }
 0x24f   : > { %v2217_v43 = vadd.f32 %v2216_v48, %v2215_v47 }
 0x250   : > { %v2122_v23 = vadd.f32 %v2121_v62, %v2120_v33  ;;  %v2234_v51 = vsel %vm999_vm4, %v2172_v13, 0.0 }
 0x251   : > { %v2219_v22 = vadd.f32 %v2218_v12, %v2217_v43 }
 0x252   : > { %v2124_v38 = vadd.f32 %v2123_v3, %v2122_v23 }
 0x253   : > { %v2221_v10 = vadd.f32 %v2220_v49, %v2219_v22 }
 0x254   : > { %v2126_v19 = vadd.f32 %v2125_v29, %v2124_v38  ;;  %v2242_v29 = vld [vmem:[%s3199_s29] sm:$0x3] }
 0x255   : > { %v2223_v6 = vadd.f32 %v2222_v61, %v2221_v10 }
 0x256   : > { %v2128_v20 = vadd.f32 %v2127_v16, %v2126_v19 }
 0x257   : > { %v2225_v28 = vadd.f32 %v2224_v42, %v2223_v6 }
 0x258   : > { %v2130_v63 = vadd.f32 %v2129_v2, %v2128_v20 }
 0x259   : > { %v2227_v54 = vadd.f32 %v2226_v8, %v2225_v28 }
 0x25a   : > { %v2132_v58 = vadd.f32 %v2131_v45, %v2130_v63 }
 0x25b   : > { %v2229_v46 = vadd.f32 %v2228_v57, %v2227_v54 }
 0x25c   : > { %v2134_v32 = vadd.f32 %v2133_v18, %v2132_v58 }
 0x25d   : > { %v2231_v60 = vadd.f32 %v2230_v55, %v2229_v46 }
 0x25e   : > { %v2135_v4 = vrot.slane %v2134_v32, 4 }
 0x25f   : > { %v2233_v14 = vadd.f32 %v2232_v53, %v2231_v60 }
 0x260   : > { %v2136_v9 = vadd.f32 %v2135_v4, %v2134_v32 }
 0x261   : > { %v2235_v59 = vadd.f32 %v2234_v51, %v2233_v14 }
 0x262   : > { %v2137_v62 = vrot.slane %v2136_v9, 2 }
 0x263   : > { %v2236_v33 = vrot.slane %v2235_v59, 4 }
 0x264   : > { %v2138_v41 = vadd.f32 %v2137_v62, %v2136_v9 }
 0x265   : > { %v2237_v37 = vadd.f32 %v2236_v33, %v2235_v59 }
 0x266   : > { %v2139_v3 = vrot.slane %v2138_v41, 1 }
 0x267   : > { %v2238_v7 = vrot.slane %v2237_v37, 2 }
 0x268   : > { %v2140_v5 = vadd.f32 %v2139_v3, %v2138_v41 }
 0x269   : > { %v2239_v34 = vadd.f32 %v2238_v7, %v2237_v37 }
 0x26b   : > { %v2240_v23 = vrot.slane %v2239_v34, 1 }
 0x26d   : > { %v2241_v30 = vadd.f32 %v2240_v23, %v2239_v34 }
 0x26f   : > { %v2243_v1 = vsel %vm504_vm0, %v2140_v5, %v2241_v30 }
 0x270   : > { %v2244_v15 = vadd.f32 %v2243_v1, %v2242_v29 }
 0x272   : > { %2246 = vst.msk [vmem:[%s3199_s29] sm:$0x3] %vm2245_vm9, %v2244_v15 }
 0x273 PF: > { %s16_s22 = sadd.s32 1, %s3097_s22   ;;  %s4600_s18 = smov %s3089_s20 }
 0x274   : > { %p13_p12 = scmp.ge.s32.totalorder %s16_s22, 10   ;;  %s4601_s19 = smov %s3093_s21 }
 0x275   : > { %s4602_s20 = smov %s4605_s23  ;;  %s4603_s21 = smov %s4609_s24 }
 0x276   :  { %15 = sbr.rel (!%p13_p12) target bundleno = 3 (0x3), region = 87 }

// kernel: tiny_ssd_forward.8
= control target key start
LH: loop header
LB: loop body
LE: loop exit
PB: predicated region body
PF: predicated region fallthrough
CT: control target
= control target key end

     0   :  { %s2961_s18 = smov 0   ;;  %s2963_s19 = smov 0   ;;  %s4049_s0 = inlined_call_operand.vmem [shape: f32[2,16,16,32], index: 0, kind: input, shape index: {}]   ;;  %s4050_s1 = inlined_call_operand.vmem [shape: f32[1,1,32], index: 1, kind: input, shape index: {}]   ;;  %s4051_s2 = inlined_call_operand.vmem [shape: f32[1,1,32], index: 2, kind: input, shape index: {}]   ;;  %s4052_s3 = inlined_call_operand.vmem [shape: f32[3,96,64], index: 3, kind: input, shape index: {}]   ;;  %s4053_s4 = inlined_call_operand.vmem [shape: f32[2,16,16,64], index: 4, kind: output, shape index: {0}]   ;;  %s4054_s5 = inlined_call_operand.vmem [shape: f32[2,2,64], index: 5, kind: output, shape index: {1}]  }
   0x1   :  { %s2965_s20 = smov 0  }
   0x2 LB: > { %s28_s21 = sadd.s32 1, %s2922_s19  ;;  %p2239_p0 = scmp.ge.s32.totalorder %s2926_s20, 1  ;;  %s2926_s20 = sphi %s2965_s20, %s16_s20   ;;  %s2922_s19 = sphi %s2963_s19, %s4056_s19   ;;  %s2918_s18 = sphi %s2961_s18, %s4055_s18  }
   0x3   : > { %p30_p1 = scmp.ge.s32.totalorder %s28_s21, 2  ;;  %p204_p2 = scmp.lt.s32.totalorder %s2926_s20, 3 }
   0x5   : > { %s4058_s21 = smov (%p30_p1, %s28_s21), 0  ;;  %p205_p3 = pnand %p2239_p0, %p204_p2 }
   0x6   : > { %vm439_vm0 = vcmask (!%p205_p3), 1040384   ;;  %p241_p4 = scmp.lt.s32.totalorder (!%p205_p3), %s2918_s18, 1  ;;  %v2928_v0 = vmov (!%p205_p3), 0.0   ;;  %vm606_vm1 = vcmask (!%p205_p3), 1046528   ;;  %vm1938_vm2 = vcmask (!%p205_p3), 517120   ;;  %v1026_v3 = vld [vmem:[%s4052_s3] sm:$0xff] (!%p205_p3) }
   0x7   : > { %208 = sbr.rel (%p205_p3) target bundleno = 541 (0x21d), region = 36  ;;  %v2979_v1 = vrot.slane (!%p205_p3), %v2928_v0, 7  ;;  %vm687_vm3 = vcmask (!%p205_p3), 1045504   ;;  %v2986_v2 = vld [vmem:[%s4050_s1] ss:$0 sm:$0xff] (!%p205_p3)  ;;  %v1027_v4 = vld [vmem:[%s4052_s3 + $0x8] sm:$0xff] (!%p205_p3) }
   0x8   : > { %v1028_v5 = vld [vmem:[%s4052_s3 + $0x10] sm:$0xff] (!%p205_p3)  ;;  %v1029_v10 = vld [vmem:[%s4052_s3 + $0x18] sm:$0xff] (!%p205_p3)  ;;  %v3022_v15 = vld [vmem:[%s4051_s2] ss:$0 sm:$0xff] (!%p205_p3)  ;;  %v3024_v16 = vpack.c.bf16 (!%p205_p3), %v1027_v4, %v1026_v3  ;;  %s2929_s17 = smov (!%p205_p3), 32   ;;  %s2930_s22 = smov (!%p205_p3), 64  }
   0x9   : > { %v2999_v6 = vsel (!%p205_p3), %vm439_vm0, 0.0, %v2979_v1  ;;  %v557_v7 = vsel (!%p205_p3), %vm439_vm0, %v2979_v1, 0.0  ;;  %v608_v8 = vrot.slane (!%p205_p3), %v2979_v1, 1  ;;  %v689_v9 = vrot.slane (!%p205_p3), %v2979_v1, 2 }
   0xa   : > { %v607_v11 = vrot.slane (!%p205_p3), %v2999_v6, 1  ;;  %v610_v12 = vrot.slane (!%p205_p3), %v557_v7, 1  ;;  %v688_v13 = vrot.slane (!%p205_p3), %v2999_v6, 2  ;;  %v691_v14 = vrot.slane (!%p205_p3), %v557_v7, 2  ;;  %2744 = vmatprep.subr.bf16.mxu0 (!%p205_p3), %v3024_v16 }
   0xb   : > { %v3026_v17 = vpack.c.bf16 (!%p205_p3), %v1029_v10, %v1028_v5  ;;  %2746 = vmatpush3.bf16.msra.mxu0 (!%p205_p3), %v3024_v16  ;;  %vm960_vm4 = vcmask (!%p205_p3), 261120   ;;  %vm993_vm5 = vcmask (!%p205_p3), 523264   ;;  %vm1079_vm6 = vcmask (!%p205_p3), 785408  }
   0xc   : > { %v609_v18 = vsel (!%p205_p3), %vm606_vm1, %v607_v11, %v608_v8  ;;  %v611_v19 = vsel (!%p205_p3), %vm606_vm1, %v608_v8, %v610_v12  ;;  %v690_v20 = vsel (!%p205_p3), %vm687_vm3, %v688_v13, %v689_v9  ;;  %v692_v21 = vsel (!%p205_p3), %vm687_vm3, %v689_v9, %v691_v14 }
   0xd   : > { %v2894_v25 = vpack.i.bf16 (!%p205_p3), %v611_v19, %v609_v18  ;;  %v2899_v26 = vpack.i.bf16 (!%p205_p3), %v692_v21, %v690_v20  ;;  %2748 = vmatprep.subr.bf16.mxu0 (!%p205_p3), %v3026_v17 }
   0xe   : > { %s4060_s18 = smov (!%p241_p4, %s2918_s18), 1 }
   0xf   : > { %s2369_s7 = sshll.u32 %s4060_s18, 8  ;;  %s2244_s8 = sshll.u32 %s4060_s18, 1  ;;  %2895 = vrot.lane.b32.xlu0 %v2894_v25, %s2929_s17  ;;  %2900 = vrot.lane.b32.xlu1 %v2899_v26, %s2930_s22 }
  0x10   : > { %s3017_s11 = scalar_lea.vmem %s4049_s0, %s2369_s7  ;;  %s3033_s16 = scalar_lea.vmem %s4054_s5, %s2244_s8  ;;  %2750 = vmatpush3.bf16.msra.mxu0 %v3026_v17 }
  0x11   : > { %v266_v22 = vld [vmem:[%s3017_s11] sm:$0xff]  ;;  %v267_v23 = vld [vmem:[%s3017_s11 + $0x8] sm:$0xff]  ;;  %v268_v24 = vld [vmem:[%s3017_s11 + $0x10] sm:$0xff]  ;;  %1939 = vst.msk [vmem:[%s3033_s16] sm:$0x3] %vm1938_vm2, %v2928_v0  ;;  %s3870_s14 = scalar_lea.vmem %s4053_s4, %s2369_s7 }
  0x12   : > { %v304_v27 = vmul.f32 %v2986_v2, %v266_v22  ;;  %v305_v28 = vmul.f32 %v2986_v2, %v267_v23  ;;  %v269_v29 = vld [vmem:[%s3017_s11 + $0x18] sm:$0xff]  ;;  %v270_v30 = vld [vmem:[%s3017_s11 + $0x20] sm:$0xff]  ;;  %v271_v31 = vld [vmem:[%s3017_s11 + $0x28] sm:$0xff]  ;;  %v306_v32 = vmul.f32 %v2986_v2, %v268_v24 }
  0x13   : > { %v307_v33 = vmul.f32 %v2986_v2, %v269_v29  ;;  %v308_v34 = vmul.f32 %v2986_v2, %v270_v30  ;;  %v309_v35 = vmul.f32 %v2986_v2, %v271_v31  ;;  %v272_v41 = vld [vmem:[%s3017_s11 + $0x30] sm:$0xff]  ;;  %v273_v45 = vld [vmem:[%s3017_s11 + $0x38] sm:$0xff]  ;;  %v274_v21 = vld [vmem:[%s3017_s11 + $0x40] sm:$0xff] }
  0x14   : > { %v342_v36 = vadd.f32 %v3022_v15, %v304_v27  ;;  %v343_v37 = vadd.f32 %v3022_v15, %v305_v28  ;;  %v344_v38 = vadd.f32 %v3022_v15, %v306_v32  ;;  %v310_v50 = vmul.f32 %v2986_v2, %v272_v41  ;;  %v275_v32 = vld [vmem:[%s3017_s11 + $0x48] sm:$0xff]  ;;  %v276_v41 = vld [vmem:[%s3017_s11 + $0x50] sm:$0xff] }
  0x15   : > { %v345_v39 = vadd.f32 %v3022_v15, %v307_v33  ;;  %v346_v40 = vadd.f32 %v3022_v15, %v308_v34  ;;  %v347_v44 = vadd.f32 %v3022_v15, %v309_v35  ;;  %v311_v54 = vmul.f32 %v2986_v2, %v273_v45 }
  0x16   : > { %v374_v42 = vmax.f32 %v342_v36, 0.0  ;;  %v375_v43 = vmax.f32 %v343_v37, 0.0  ;;  %v376_v46 = vmax.f32 %v344_v38, 0.0  ;;  %v348_v10 = vadd.f32 %v3022_v15, %v310_v50 }
  0x17   : > { %v377_v47 = vmax.f32 %v345_v39, 0.0  ;;  %v378_v53 = vmax.f32 %v346_v40, 0.0  ;;  %v379_v58 = vmax.f32 %v347_v44, 0.0  ;;  %v349_v11 = vadd.f32 %v3022_v15, %v311_v54 }
  0x18   : > { %v442_v48 = vrot.slane %v374_v42, 7  ;;  %v443_v49 = vrot.slane %v375_v43, 7  ;;  %v445_v51 = vrot.slane %v376_v46, 7  ;;  %v380_v25 = vmax.f32 %v348_v10, 0.0  ;;  %v277_v42 = vld [vmem:[%s3017_s11 + $0x58] sm:$0xff] }
  0x19   : > { %v446_v52 = vrot.slane %v377_v47, 7  ;;  %v448_v19 = vrot.slane %v378_v53, 7  ;;  %v449_v20 = vrot.slane %v379_v58, 7  ;;  %v381_v28 = vmax.f32 %v349_v11, 0.0  ;;  %v279_v11 = vld [vmem:[%s3017_s11 + $0x68] sm:$0xff] }
  0x1a   : > { %v3068_v55 = vsel %vm439_vm0, %v442_v48, %v443_v49  ;;  %v558_v56 = vsel %vm439_vm0, %v443_v49, 0.0  ;;  %v3072_v57 = vsel %vm439_vm0, 0.0, %v442_v48  ;;  %v3088_v9 = vsel %vm439_vm0, 0.0, %v445_v51 }
  0x1b   : > { %v613_v59 = vrot.slane %v3068_v55, 1  ;;  %v615_v60 = vrot.slane %v558_v56, 1  ;;  %v612_v61 = vrot.slane %v3072_v57, 1  ;;  %v694_v62 = vrot.slane %v3068_v55, 2 }
  0x1c   : > { %v696_v63 = vrot.slane %v558_v56, 2  ;;  %v693_v0 = vrot.slane %v3072_v57, 2  ;;  %v3079_v3 = vsel %vm439_vm0, %v445_v51, %v446_v52  ;;  %v559_v4 = vsel %vm439_vm0, %v446_v52, 0.0 }
  0x1d   : > { %v616_v5 = vsel %vm606_vm1, %v613_v59, %v615_v60  ;;  %v614_v7 = vsel %vm606_vm1, %v612_v61, %v613_v59  ;;  %v618_v8 = vrot.slane %v3079_v3, 1  ;;  %v620_v14 = vrot.slane %v559_v4, 1 }
  0x1e   : > { %774 = vrot.lane.b32.xlu1 %v616_v5, %s2929_s17  ;;  %772 = vrot.lane.b32.xlu0 %v614_v7, %s2929_s17  ;;  %v697_v12 = vsel %vm687_vm3, %v694_v62, %v696_v63  ;;  %v695_v13 = vsel %vm687_vm3, %v693_v0, %v694_v62  ;;  %v617_v18 = vrot.slane %v3088_v9, 1  ;;  %v699_v22 = vrot.slane %v3079_v3, 2  ;;  %v278_v63 = vld [vmem:[%s3017_s11 + $0x60] sm:$0xff] }
  0x1f   : > { %v701_v23 = vrot.slane %v559_v4, 2  ;;  %v698_v24 = vrot.slane %v3088_v9, 2  ;;  %v621_v26 = vsel %vm606_vm1, %v618_v8, %v620_v14  ;;  %v3103_v29 = vsel %vm439_vm0, %v448_v19, %v449_v20 }
  0x20   : > { %v619_v27 = vsel %vm606_vm1, %v617_v18, %v618_v8  ;;  %v560_v30 = vsel %vm439_vm0, %v449_v20, 0.0  ;;  %v3107_v31 = vsel %vm439_vm0, 0.0, %v448_v19  ;;  %v312_v33 = vmul.f32 %v2986_v2, %v274_v21 }
  0x21   : > { %v702_v34 = vsel %vm687_vm3, %v699_v22, %v701_v23  ;;  %v700_v35 = vsel %vm687_vm3, %v698_v24, %v699_v22  ;;  %v451_v36 = vrot.slane %v380_v25, 7  ;;  %v623_v37 = vrot.slane %v3103_v29, 1 }
  0x22   : > { %870 = vrot.lane.b32.xlu1 %v697_v12, %s2930_s22  ;;  %868 = vrot.lane.b32.xlu0 %v695_v13, %s2930_s22  ;;  %v625_v38 = vrot.slane %v560_v30, 1  ;;  %v622_v39 = vrot.slane %v3107_v31, 1  ;;  %v313_v40 = vmul.f32 %v2986_v2, %v275_v32  ;;  %v452_v43 = vrot.slane %v381_v28, 7 }
  0x23   : > { %v350_v44 = vadd.f32 %v3022_v15, %v312_v33  ;;  %v704_v46 = vrot.slane %v3103_v29, 2  ;;  %v706_v47 = vrot.slane %v560_v30, 2  ;;  %v314_v48 = vmul.f32 %v2986_v2, %v276_v41 }
  0x24   : > { %v351_v45 = vadd.f32 %v3022_v15, %v313_v40  ;;  %v315_v49 = vmul.f32 %v2986_v2, %v277_v42  ;;  %v626_v50 = vsel %vm606_vm1, %v623_v37, %v625_v38  ;;  %v624_v51 = vsel %vm606_vm1, %v622_v39, %v623_v37 }
  0x25   : > { %v703_v52 = vrot.slane %v3107_v31, 2  ;;  %v3131_v53 = vsel %vm439_vm0, 0.0, %v451_v36  ;;  %v3134_v54 = vsel %vm439_vm0, %v451_v36, %v452_v43  ;;  %v561_v56 = vsel %vm439_vm0, %v452_v43, 0.0 }
  0x26   : > { %778 = vrot.lane.b32.xlu1 %v621_v26, %s2929_s17  ;;  %776 = vrot.lane.b32.xlu0 %v619_v27, %s2929_s17  ;;  %v382_v58 = vmax.f32 %v350_v44, 0.0  ;;  %v383_v59 = vmax.f32 %v351_v45, 0.0  ;;  %v707_v60 = vsel %vm687_vm3, %v704_v46, %v706_v47  ;;  %v352_v61 = vadd.f32 %v3022_v15, %v314_v48 }
  0x27   : > { %v353_v62 = vadd.f32 %v3022_v15, %v315_v49  ;;  %v705_v0 = vsel %vm687_vm3, %v703_v52, %v704_v46  ;;  %v628_v4 = vrot.slane %v3134_v54, 1  ;;  %v630_v5 = vrot.slane %v561_v56, 1 }
  0x28   : > { %v627_v7 = vrot.slane %v3131_v53, 1  ;;  %v454_v8 = vrot.slane %v382_v58, 7  ;;  %v455_v10 = vrot.slane %v383_v59, 7  ;;  %v708_v12 = vrot.slane %v3131_v53, 2 }
  0x29   : > { %v316_v13 = vmul.f32 %v2986_v2, %v278_v63  ;;  %v709_v14 = vrot.slane %v3134_v54, 2  ;;  %v711_v18 = vrot.slane %v561_v56, 2  ;;  %v384_v19 = vmax.f32 %v352_v61, 0.0 }
  0x2a   : > { %874 = vrot.lane.b32.xlu1 %v702_v34, %s2930_s22  ;;  %872 = vrot.lane.b32.xlu0 %v700_v35, %s2930_s22  ;;  %v385_v20 = vmax.f32 %v353_v62, 0.0  ;;  %v631_v21 = vsel %vm606_vm1, %v628_v4, %v630_v5  ;;  %v629_v22 = vsel %vm606_vm1, %v627_v7, %v628_v4  ;;  %v317_v23 = vmul.f32 %v2986_v2, %v279_v11  ;;  %v280_v34 = vld [vmem:[%s3017_s11 + $0x70] sm:$0xff]  ;;  %v281_v35 = vld [vmem:[%s3017_s11 + $0x78] sm:$0xff] }
  0x2b   : > { %v3156_v24 = vsel %vm439_vm0, %v454_v8, %v455_v10  ;;  %v562_v25 = vsel %vm439_vm0, %v455_v10, 0.0  ;;  %v3160_v26 = vsel %vm439_vm0, 0.0, %v454_v8  ;;  %v354_v27 = vadd.f32 %v3022_v15, %v316_v13  ;;  %v282_v4 = vld [vmem:[%s3017_s11 + $0x80] sm:$0xff]  ;;  %v283_v8 = vld [vmem:[%s3017_s11 + $0x88] sm:$0xff] }
  0x2c   : > { %v712_v28 = vsel %vm687_vm3, %v709_v14, %v711_v18  ;;  %v710_v30 = vsel %vm687_vm3, %v708_v12, %v709_v14  ;;  %v457_v32 = vrot.slane %v384_v19, 7  ;;  %v458_v33 = vrot.slane %v385_v20, 7 }
  0x2d   : > { %v633_v36 = vrot.slane %v3156_v24, 1  ;;  %v635_v37 = vrot.slane %v562_v25, 1  ;;  %v632_v38 = vrot.slane %v3160_v26, 1  ;;  %v355_v39 = vadd.f32 %v3022_v15, %v317_v23 }
  0x2e   : > { %782 = vrot.lane.b32.xlu1 %v626_v50, %s2929_s17  ;;  %780 = vrot.lane.b32.xlu0 %v624_v51, %s2929_s17  ;;  %v713_v40 = vrot.slane %v3160_v26, 2  ;;  %v386_v41 = vmax.f32 %v354_v27, 0.0  ;;  %v318_v42 = vmul.f32 %v2986_v2, %v280_v34  ;;  %v319_v43 = vmul.f32 %v2986_v2, %v281_v35 }
  0x2f   : > { %v714_v44 = vrot.slane %v3156_v24, 2  ;;  %v716_v45 = vrot.slane %v562_v25, 2  ;;  %v3179_v46 = vsel %vm439_vm0, %v457_v32, %v458_v33  ;;  %v563_v47 = vsel %vm439_vm0, %v458_v33, 0.0 }
  0x30   : > { %v636_v48 = vsel %vm606_vm1, %v633_v36, %v635_v37  ;;  %v634_v49 = vsel %vm606_vm1, %v632_v38, %v633_v36  ;;  %v3185_v50 = vsel %vm439_vm0, 0.0, %v457_v32  ;;  %v387_v51 = vmax.f32 %v355_v39, 0.0  ;;  %v284_v36 = vld [vmem:[%s3017_s11 + $0x90] sm:$0xff]  ;;  %v285_v37 = vld [vmem:[%s3017_s11 + $0x98] sm:$0xff] }
  0x31   : > { %v638_v52 = vrot.slane %v3179_v46, 1  ;;  %v640_v56 = vrot.slane %v563_v47, 1  ;;  %v717_v58 = vsel %vm687_vm3, %v714_v44, %v716_v45  ;;  %v637_v59 = vrot.slane %v3185_v50, 1 }
  0x32   : > { %878 = vrot.lane.b32.xlu1 %v707_v60, %s2930_s22  ;;  %876 = vrot.lane.b32.xlu0 %v705_v0, %s2930_s22  ;;  %v356_v60 = vadd.f32 %v3022_v15, %v318_v42  ;;  %v715_v61 = vsel %vm687_vm3, %v713_v40, %v714_v44  ;;  %v460_v62 = vrot.slane %v386_v41, 7  ;;  %v461_v63 = vrot.slane %v387_v51, 7 }
  0x33   : > { %v357_v0 = vadd.f32 %v3022_v15, %v319_v43  ;;  %v641_v5 = vsel %vm606_vm1, %v638_v52, %v640_v56  ;;  %v719_v7 = vrot.slane %v3179_v46, 2  ;;  %v639_v10 = vsel %vm606_vm1, %v637_v59, %v638_v52  ;;  %v1030_v59 = vld [vmem:[%s4052_s3 + $0x20] sm:$0xff] }
  0x34   : > { %v721_v11 = vrot.slane %v563_v47, 2  ;;  %v718_v12 = vrot.slane %v3185_v50, 2  ;;  %v388_v13 = vmax.f32 %v356_v60, 0.0  ;;  %v3204_v14 = vsel %vm439_vm0, %v460_v62, %v461_v63  ;;  %v2247_v47 = vld [vmem:[%s4052_s3 + $0x60] sm:$0xff]  ;;  %v1031_v60 = vld [vmem:[%s4052_s3 + $0x28] sm:$0xff] }
  0x35   : > { %v564_v18 = vsel %vm439_vm0, %v461_v63, 0.0  ;;  %v389_v19 = vmax.f32 %v357_v0, 0.0  ;;  %v320_v20 = vmul.f32 %v2986_v2, %v282_v4  ;;  %v643_v27 = vrot.slane %v3204_v14, 1  ;;  %v2250_v63 = vld [vmem:[%s4052_s3 + $0x78] sm:$0xff] }
  0x36   : > { %786 = vrot.lane.b32.xlu1 %v631_v21, %s2929_s17  ;;  %784 = vrot.lane.b32.xlu0 %v629_v22, %s2929_s17  ;;  %v3209_v21 = vsel %vm439_vm0, 0.0, %v460_v62  ;;  %v321_v22 = vmul.f32 %v2986_v2, %v283_v8  ;;  %v722_v23 = vsel %vm687_vm3, %v719_v7, %v721_v11  ;;  %v720_v25 = vsel %vm687_vm3, %v718_v12, %v719_v7  ;;  %v2249_v62 = vld [vmem:[%s4052_s3 + $0x70] sm:$0xff]  ;;  %v1033_v8 = vld [vmem:[%s4052_s3 + $0x38] sm:$0xff] }
  0x37   : > { %v463_v32 = vrot.slane %v388_v13, 7  ;;  %v464_v33 = vrot.slane %v389_v19, 7  ;;  %v358_v34 = vadd.f32 %v3022_v15, %v320_v20  ;;  %v724_v39 = vrot.slane %v3204_v14, 2  ;;  %v1032_v7 = vld [vmem:[%s4052_s3 + $0x30] sm:$0xff] }
  0x38   : > { %v359_v35 = vadd.f32 %v3022_v15, %v321_v22  ;;  %v726_v40 = vrot.slane %v564_v18, 2  ;;  %v723_v41 = vrot.slane %v3209_v21, 2  ;;  %v322_v52 = vmul.f32 %v2986_v2, %v284_v36 }
  0x39   : > { %v3229_v43 = vsel %vm439_vm0, %v463_v32, %v464_v33  ;;  %v3232_v44 = vsel %vm439_vm0, %v464_v33, 0.0  ;;  %v390_v45 = vmax.f32 %v358_v34, 0.0  ;;  %v323_v56 = vmul.f32 %v2986_v2, %v285_v37  ;;  %v2251_v33 = vld [vmem:[%s4052_s3 + $0x80] sm:$0xff] }
  0x3a   : > { %882 = vrot.lane.b32.xlu1 %v712_v28, %s2930_s22  ;;  %880 = vrot.lane.b32.xlu0 %v710_v30, %s2930_s22  ;;  %v645_v28 = vrot.slane %v564_v18, 1  ;;  %v642_v30 = vrot.slane %v3209_v21, 1  ;;  %v391_v51 = vmax.f32 %v359_v35, 0.0  ;;  %v727_v0 = vsel %vm687_vm3, %v724_v39, %v726_v40  ;;  %v1035_v40 = vld [vmem:[%s4052_s3 + $0x48] sm:$0xff] }
  0x3b   : > { %v725_v4 = vsel %vm687_vm3, %v723_v41, %v724_v39  ;;  %v466_v12 = vrot.slane %v390_v45, 7  ;;  %v360_v19 = vadd.f32 %v3022_v15, %v322_v52  ;;  %v361_v20 = vadd.f32 %v3022_v15, %v323_v56  ;;  %v1034_v39 = vld [vmem:[%s4052_s3 + $0x40] sm:$0xff]  ;;  %v2254_v52 = vld [vmem:[%s4052_s3 + $0x98] sm:$0xff] }
  0x3c   : > { %v646_v38 = vsel %vm606_vm1, %v643_v27, %v645_v28  ;;  %v644_v42 = vsel %vm606_vm1, %v642_v30, %v643_v27  ;;  %v467_v18 = vrot.slane %v391_v51, 7  ;;  %v3274_v22 = vpack.c.bf16 %v1031_v60, %v1030_v59  ;;  %v2253_v51 = vld [vmem:[%s4052_s3 + $0x90] sm:$0xff] }
  0x3d   : > { %v2723_v27 = vpack.c.bf16 %v2250_v63, %v2249_v62  ;;  %v3278_v28 = vpack.c.bf16 %v1033_v8, %v1032_v7  ;;  %v729_v30 = vrot.slane %v3229_v43, 2  ;;  %v3291_v37 = vsel %vm439_vm0, 0.0, %v466_v12  ;;  %v1037_v7 = vld [vmem:[%s4052_s3 + $0x58] sm:$0xff] }
  0x3e   : > { %790 = vrot.lane.b32.xlu1 %v636_v48, %s2929_s17  ;;  %788 = vrot.lane.b32.xlu0 %v634_v49, %s2929_s17  ;;  %v2248_v48 = vld [vmem:[%s4052_s3 + $0x68] sm:$0xff]  ;;  %v3241_v49 = vsel %vm439_vm0, 0.0, %v463_v32  ;;  %v731_v32 = vrot.slane %v3232_v44, 2  ;;  %v3304_v41 = vsel %vm439_vm0, %v466_v12, %v467_v18  ;;  %v393_v45 = vmax.f32 %v361_v20, 0.0 }
  0x3f   : > { %v647_v11 = vrot.slane %v3241_v49, 1  ;;  %v2719_v13 = vpack.c.bf16 %v2248_v48, %v2247_v47  ;;  %v728_v36 = vrot.slane %v3241_v49, 2  ;;  %2752 = vmatprep.subr.bf16.mxu0 %v3274_v22  ;;  %v3321_v60 = vpack.c.bf16 %v1035_v40, %v1034_v39 }
  0x40   : > { %2754 = vmatpush3.bf16.msra.mxu0 %v3274_v22  ;;  %v732_v56 = vsel %vm687_vm3, %v729_v30, %v731_v32  ;;  %v653_v62 = vrot.slane %v3304_v41, 1 }
  0x41   : > { %2720 = vmatprep.subr.bf16.mxu1 %v2719_v13  ;;  %2756 = vmatprep.subr.bf16.mxu0 %v3278_v28 }
  0x42   : > { %886 = vrot.lane.b32.xlu1 %v717_v58, %s2930_s22  ;;  %884 = vrot.lane.b32.xlu0 %v715_v61, %s2930_s22  ;;  %v286_v58 = vld [vmem:[%s3017_s11 + $0xa0] sm:$0xff]  ;;  %v287_v61 = vld [vmem:[%s3017_s11 + $0xa8] sm:$0xff] }
  0x43   : > { %2722 = vmatpush3.bf16.msra.mxu1 %v2719_v13 }
  0x44   : > { %2724 = vmatprep.subr.bf16.mxu1 %v2723_v27  ;;  %2758 = vmatpush3.bf16.msra.mxu0 %v3278_v28 }
  0x45   : > { %2760 = vmatprep.subr.bf16.mxu0 %v3321_v60 }
  0x46   : > { %794 = vrot.lane.b32.xlu1 %v641_v5, %s2929_s17  ;;  %792 = vrot.lane.b32.xlu0 %v639_v10, %s2929_s17  ;;  %v648_v5 = vrot.slane %v3229_v43, 1  ;;  %v650_v10 = vrot.slane %v3232_v44, 1  ;;  %v392_v44 = vmax.f32 %v360_v19, 0.0  ;;  %v734_v19 = vrot.slane %v3304_v41, 2 }
  0x47   : > { %2726 = vmatpush3.bf16.msra.mxu1 %v2723_v27  ;;  %v2255_v27 = vld [vmem:[%s4052_s3 + $0xa0] sm:$0xff] }
  0x48   : > { %v651_v34 = vsel %vm606_vm1, %v648_v5, %v650_v10  ;;  %v649_v35 = vsel %vm606_vm1, %v647_v11, %v648_v5  ;;  %v1036_v5 = vld [vmem:[%s4052_s3 + $0x50] sm:$0xff]  ;;  %v469_v8 = vrot.slane %v392_v44, 7  ;;  %v470_v10 = vrot.slane %v393_v45, 7  ;;  %2762 = vmatpush3.bf16.msra.mxu0 %v3321_v60 }
  0x49   : > { %v2731_v11 = vpack.c.bf16 %v2254_v52, %v2253_v51  ;;  %v2257_v45 = vld [vmem:[%s4052_s3 + $0xb0] sm:$0xff]  ;;  %v290_v52 = vld [vmem:[%s3017_s11 + $0xc0] sm:$0xff] }
  0x4a   : > { %890 = vrot.lane.b32.xlu1 %v722_v23, %s2930_s22  ;;  %888 = vrot.lane.b32.xlu0 %v720_v25, %s2930_s22  ;;  %v324_v23 = vmul.f32 %v2986_v2, %v286_v58  ;;  %v325_v25 = vmul.f32 %v2986_v2, %v287_v61  ;;  %v288_v58 = vld [vmem:[%s3017_s11 + $0xb0] sm:$0xff]  ;;  %v730_v61 = vsel %vm687_vm3, %v728_v36, %v729_v30  ;;  %v2256_v30 = vld [vmem:[%s4052_s3 + $0xa8] sm:$0xff]  ;;  %v567_v36 = vsel %vm439_vm0, %v470_v10, 0.0 }
  0x4b   : > { %v2735_v44 = vpack.c.bf16 %v2256_v30, %v2255_v27 }
  0x4c   : > { %v362_v47 = vadd.f32 %v3022_v15, %v324_v23  ;;  %v363_v48 = vadd.f32 %v3022_v15, %v325_v25  ;;  %v3340_v25 = vpack.c.bf16 %v1037_v7, %v1036_v5 }
  0x4e   : > { %798 = vrot.lane.b32.xlu1 %v646_v38, %s2929_s17  ;;  %796 = vrot.lane.b32.xlu0 %v644_v42, %s2929_s17  ;;  %v2252_v38 = vld [vmem:[%s4052_s3 + $0x88] sm:$0xff]  ;;  %v566_v42 = vsel %vm439_vm0, %v467_v18, 0.0  ;;  %v394_v12 = vmax.f32 %v362_v47, 0.0  ;;  %v395_v13 = vmax.f32 %v363_v48, 0.0  ;;  %v326_v18 = vmul.f32 %v2986_v2, %v288_v58  ;;  %v2258_v47 = vld [vmem:[%s4052_s3 + $0xb8] sm:$0xff] }
  0x4f   : > { %v2727_v59 = vpack.c.bf16 %v2252_v38, %v2251_v33  ;;  %v655_v63 = vrot.slane %v566_v42, 1  ;;  %v736_v20 = vrot.slane %v566_v42, 2  ;;  %v3356_v38 = vsel %vm439_vm0, 0.0, %v469_v8  ;;  %2764 = vmatprep.subr.bf16.mxu0 %v3340_v25 }
  0x50   : > { %v472_v39 = vrot.slane %v394_v12, 7  ;;  %v473_v40 = vrot.slane %v395_v13, 7  ;;  %v364_v42 = vadd.f32 %v3022_v15, %v326_v18  ;;  %2766 = vmatpush3.bf16.msra.mxu0 %v3340_v25  ;;  %v328_v12 = vmul.f32 %v2986_v2, %v290_v52 }
  0x51   : > { %2728 = vmatprep.subr.bf16.mxu1 %v2727_v59  ;;  %v656_v32 = vsel %vm606_vm1, %v653_v62, %v655_v63  ;;  %v737_v48 = vsel %vm687_vm3, %v734_v19, %v736_v20  ;;  %v2323_v63 = vld [vmem:[%s4052_s3 + $0xc0] sm:$0xff]  ;;  %v738_v27 = vrot.slane %v3356_v38, 2 }
  0x52   : > { %894 = vrot.lane.b32.xlu1 %v727_v0, %s2930_s22  ;;  %892 = vrot.lane.b32.xlu0 %v725_v4, %s2930_s22  ;;  %v652_v0 = vrot.slane %v3291_v37, 1  ;;  %v289_v4 = vld [vmem:[%s3017_s11 + $0xb8] sm:$0xff]  ;;  %v3385_v7 = vsel %vm439_vm0, %v472_v39, %v473_v40  ;;  %v3398_v30 = vsel %vm439_vm0, 0.0, %v472_v39 }
  0x53   : > { %v327_v23 = vmul.f32 %v2986_v2, %v289_v4  ;;  %2730 = vmatpush3.bf16.msra.mxu1 %v2727_v59  ;;  %v660_v59 = vrot.slane %v567_v36, 1  ;;  %v2739_v4 = vpack.c.bf16 %v2258_v47, %v2257_v45  ;;  %v662_v45 = vrot.slane %v3398_v30, 1  ;;  %v292_v47 = vld [vmem:[%s3017_s11 + $0xd0] sm:$0xff] }
  0x54   : > { %v654_v33 = vsel %vm606_vm1, %v652_v0, %v653_v62  ;;  %2732 = vmatprep.subr.bf16.mxu1 %v2731_v11  ;;  %v291_v62 = vld [vmem:[%s3017_s11 + $0xc8] sm:$0xff]  ;;  %v744_v52 = vrot.slane %v3385_v7, 2 }
  0x55   : > { %v365_v51 = vadd.f32 %v3022_v15, %v327_v23  ;;  %v2324_v0 = vld [vmem:[%s4052_s3 + $0xc8] sm:$0xff]  ;;  %v329_v13 = vmul.f32 %v2986_v2, %v291_v62  ;;  %v741_v23 = vrot.slane %v567_v36, 2 }
  0x56   : > { %802 = vrot.lane.b32.xlu1 %v651_v34, %s2929_s17  ;;  %800 = vrot.lane.b32.xlu0 %v649_v35, %s2929_s17  ;;  %v733_v34 = vrot.slane %v3291_v37, 2  ;;  %v3352_v35 = vsel %vm439_vm0, %v469_v8, %v470_v10  ;;  %v568_v8 = vsel %vm439_vm0, %v473_v40, 0.0  ;;  %v396_v10 = vmax.f32 %v364_v42, 0.0 }
  0x57   : > { %v658_v58 = vrot.slane %v3352_v35, 1  ;;  %2734 = vmatpush3.bf16.msra.mxu1 %v2731_v11  ;;  %v739_v5 = vrot.slane %v3352_v35, 2  ;;  %v397_v11 = vmax.f32 %v365_v51, 0.0  ;;  %v3392_v18 = vpack.c.bf16 %v2324_v0, %v2323_v63 }
  0x58   : > { %2736 = vmatprep.subr.bf16.mxu1 %v2735_v44  ;;  %v366_v40 = vadd.f32 %v3022_v15, %v328_v12  ;;  %v367_v42 = vadd.f32 %v3022_v15, %v329_v13 }
  0x59   : > { %2768 = vmatprep.subr.bf16.mxu0 %v3392_v18  ;;  %v476_v36 = vrot.slane %v397_v11, 7  ;;  %v742_v39 = vsel %vm687_vm3, %v739_v5, %v741_v23 }
  0x5a   : > { %898 = vrot.lane.b32.xlu1 %v732_v56, %s2930_s22  ;;  %896 = vrot.lane.b32.xlu0 %v730_v61, %s2930_s22  ;;  %v735_v56 = vsel %vm687_vm3, %v733_v34, %v734_v19  ;;  %v657_v61 = vrot.slane %v3356_v38, 1  ;;  %v661_v19 = vsel %vm606_vm1, %v658_v58, %v660_v59  ;;  %v475_v34 = vrot.slane %v396_v10, 7 }
  0x5b   : > { %2738 = vmatpush3.bf16.msra.mxu1 %v2735_v44  ;;  %v740_v44 = vsel %vm687_vm3, %v738_v27, %v739_v5  ;;  %v398_v62 = vmax.f32 %v366_v40, 0.0  ;;  %v399_v63 = vmax.f32 %v367_v42, 0.0  ;;  %v330_v5 = vmul.f32 %v2986_v2, %v292_v47 }
  0x5c   : > { %v659_v20 = vsel %vm606_vm1, %v657_v61, %v658_v58  ;;  %2740 = vmatprep.subr.bf16.mxu1 %v2739_v4  ;;  %v743_v58 = vrot.slane %v3398_v30, 2  ;;  %v3418_v59 = vsel %vm439_vm0, %v475_v34, %v476_v36  ;;  %v569_v61 = vsel %vm439_vm0, %v476_v36, 0.0 }
  0x5d   : > { %v668_v10 = vrot.slane %v3418_v59, 1  ;;  %v670_v11 = vrot.slane %v569_v61, 1  ;;  %v478_v13 = vrot.slane %v398_v62, 7  ;;  %v368_v27 = vadd.f32 %v3022_v15, %v330_v5 }
  0x5e   : > { %806 = vrot.lane.b32.xlu1 %v656_v32, %s2929_s17  ;;  %804 = vrot.lane.b32.xlu0 %v654_v33, %s2929_s17  ;;  %v663_v32 = vrot.slane %v3385_v7, 1  ;;  %v665_v33 = vrot.slane %v568_v8, 1  ;;  %v745_v23 = vsel %vm687_vm3, %v743_v58, %v744_v52  ;;  %v749_v40 = vrot.slane %v3418_v59, 2 }
  0x5f   : > { %2742 = vmatpush3.bf16.msra.mxu1 %v2739_v4  ;;  %v3423_v4 = vsel %vm439_vm0, 0.0, %v475_v34  ;;  %v295_v34 = vld [vmem:[%s3017_s11 + $0xe8] sm:$0xff]  ;;  %v671_v36 = vsel %vm606_vm1, %v668_v10, %v670_v11  ;;  %v751_v42 = vrot.slane %v569_v61, 2 }
  0x60   : > { %2791 = vmatprep.subr.bf16.mxu1 %v3024_v16  ;;  %v666_v51 = vsel %vm606_vm1, %v663_v32, %v665_v33  ;;  %v664_v0 = vsel %vm606_vm1, %v662_v45, %v663_v32  ;;  %v667_v12 = vrot.slane %v3423_v4, 1  ;;  %v294_v33 = vld [vmem:[%s3017_s11 + $0xe0] sm:$0xff]  ;;  %v333_v58 = vmul.f32 %v2986_v2, %v295_v34 }
  0x61   : > { %v752_v61 = vsel %vm687_vm3, %v749_v40, %v751_v42 }
  0x62   : > { %902 = vrot.lane.b32.xlu1 %v737_v48, %s2930_s22  ;;  %900 = vrot.lane.b32.xlu0 %v735_v56, %s2930_s22  ;;  %v293_v48 = vld [vmem:[%s3017_s11 + $0xd8] sm:$0xff]  ;;  %v746_v56 = vrot.slane %v568_v8, 2 }
  0x63   : > { %v331_v8 = vmul.f32 %v2986_v2, %v293_v48  ;;  %v3448_v48 = vsel %vm439_vm0, 0.0, %v478_v13 }
  0x64   : > { %v672_v5 = vrot.slane %v3448_v48, 1 }
  0x65   : > { %v369_v32 = vadd.f32 %v3022_v15, %v331_v8 }
  0x66   : > { %810 = vrot.lane.b32.xlu1 %v661_v19, %s2929_s17  ;;  %808 = vrot.lane.b32.xlu0 %v659_v20, %s2929_s17  ;;  %v479_v19 = vrot.slane %v399_v63, 7  ;;  %v747_v20 = vsel %vm687_vm3, %v744_v52, %v746_v56  ;;  %v332_v56 = vmul.f32 %v2986_v2, %v294_v33  ;;  %v753_v33 = vrot.slane %v3448_v48, 2 }
  0x67   : > { %v401_v52 = vmax.f32 %v369_v32, 0.0 }
  0x68   : > { %v3444_v45 = vsel %vm439_vm0, %v478_v13, %v479_v19  ;;  %v570_v47 = vsel %vm439_vm0, %v479_v19, 0.0  ;;  %v370_v11 = vadd.f32 %v3022_v15, %v332_v56  ;;  %v296_v13 = vld [vmem:[%s3017_s11 + $0xf0] sm:$0xff] }
  0x69   : > { %v673_v63 = vrot.slane %v3444_v45, 1  ;;  %v754_v19 = vrot.slane %v3444_v45, 2  ;;  %v334_v34 = vmul.f32 %v2986_v2, %v296_v13 }
  0x6a   : > { %906 = vrot.lane.b32.xlu1 %v742_v39, %s2930_s22  ;;  %904 = vrot.lane.b32.xlu0 %v740_v44, %s2930_s22  ;;  %v748_v39 = vrot.slane %v3423_v4, 2  ;;  %v669_v44 = vsel %vm606_vm1, %v667_v12, %v668_v10  ;;  %v482_v10 = vrot.slane %v401_v52, 7  ;;  %v371_v12 = vadd.f32 %v3022_v15, %v333_v58 }
  0x6b   : > { %v674_v32 = vsel %vm606_vm1, %v672_v5, %v673_v63  ;;  %v402_v42 = vmax.f32 %v370_v11, 0.0  ;;  %v372_v58 = vadd.f32 %v3022_v15, %v334_v34 }
  0x6c   : > { %v750_v62 = vsel %vm687_vm3, %v748_v39, %v749_v40  ;;  %v571_v40 = vsel %vm439_vm0, %v482_v10, 0.0  ;;  %v403_v39 = vmax.f32 %v371_v12, 0.0 }
  0x6d   : > { %v680_v56 = vrot.slane %v571_v40, 1  ;;  %v404_v12 = vmax.f32 %v372_v58, 0.0 }
  0x6e   : > { %814 = vrot.lane.b32.xlu1 %v666_v51, %s2929_s17  ;;  %812 = vrot.lane.b32.xlu0 %v664_v0, %s2929_s17  ;;  %v400_v51 = vmax.f32 %v368_v27, 0.0  ;;  %v675_v0 = vrot.slane %v570_v47, 1 }
  0x70   : > { %v481_v8 = vrot.slane %v400_v51, 7  ;;  %v676_v27 = vsel %vm606_vm1, %v673_v63, %v675_v0  ;;  %v484_v63 = vrot.slane %v402_v42, 7  ;;  %v485_v0 = vrot.slane %v403_v39, 7 }
  0x72   : > { %910 = vrot.lane.b32.xlu1 %v747_v20, %s2930_s22  ;;  %908 = vrot.lane.b32.xlu0 %v745_v23, %s2930_s22  ;;  %v756_v20 = vrot.slane %v570_v47, 2  ;;  %v297_v23 = vld [vmem:[%s3017_s11 + $0xf8] sm:$0xff] }
  0x73   : > { %v335_v47 = vmul.f32 %v2986_v2, %v297_v23 }
  0x74   : > { %v757_v51 = vsel %vm687_vm3, %v754_v19, %v756_v20  ;;  %v572_v20 = vsel %vm439_vm0, %v485_v0, 0.0 }
  0x75   : > { %v373_v5 = vadd.f32 %v3022_v15, %v335_v47  ;;  %v3496_v15 = vsel %vm439_vm0, 0.0, %v484_v63  ;;  %v685_v42 = vrot.slane %v572_v20, 1  ;;  %v487_v47 = vrot.slane %v404_v12, 7 }
  0x76   : > { %818 = vrot.lane.b32.xlu1 %v671_v36, %s2929_s17  ;;  %816 = vrot.lane.b32.xlu0 %v669_v44, %s2929_s17  ;;  %v3470_v36 = vsel %vm439_vm0, %v481_v8, %v482_v10  ;;  %v3474_v44 = vsel %vm439_vm0, 0.0, %v481_v8  ;;  %v761_v8 = vrot.slane %v571_v40, 2  ;;  %v682_v39 = vrot.slane %v3496_v15, 1 }
  0x77   : > { %v678_v52 = vrot.slane %v3470_v36, 1  ;;  %v759_v2 = vrot.slane %v3470_v36, 2  ;;  %v758_v10 = vrot.slane %v3474_v44, 2  ;;  %v405_v23 = vmax.f32 %v373_v5, 0.0 }
  0x78   : > { %v766_v12 = vrot.slane %v572_v20, 2  ;;  %v2328_v20 = vld [vmem:[%s4052_s3 + $0xe8] sm:$0xff] }
  0x79   : > { %v681_v11 = vsel %vm606_vm1, %v678_v52, %v680_v56 }
  0x7a   : > { %914 = vrot.lane.b32.xlu1 %v752_v61, %s2930_s22  ;;  %912 = vrot.lane.b32.xlu0 %v750_v62, %s2930_s22  ;;  %v755_v61 = vsel %vm687_vm3, %v753_v33, %v754_v19  ;;  %v677_v62 = vrot.slane %v3474_v44, 1  ;;  %v3492_v19 = vsel %vm439_vm0, %v484_v63, %v485_v0  ;;  %v488_v63 = vrot.slane %v405_v23, 7 }
  0x7b   : > { %v683_v40 = vrot.slane %v3492_v19, 1  ;;  %v3529_v23 = vsel %vm439_vm0, 0.0, %v487_v47 }
  0x7c   : > { %v679_v13 = vsel %vm606_vm1, %v677_v62, %v678_v52  ;;  %v2326_v52 = vld [vmem:[%s4052_s3 + $0xd8] sm:$0xff] }
  0x7e   : > { %822 = vrot.lane.b32.xlu1 %v676_v27, %s2929_s17  ;;  %820 = vrot.lane.b32.xlu0 %v674_v32, %s2929_s17  ;;  %v762_v27 = vsel %vm687_vm3, %v759_v2, %v761_v8  ;;  %v760_v32 = vsel %vm687_vm3, %v758_v10, %v759_v2 }
  0x81   : > { %v2896_v33 = vpop.permute.xlu0 %2895  ;;  %v2901_v34 = vpop.permute.xlu1 %2900 }
  0x82   : > { %918 = vrot.lane.b32.xlu1 %v757_v51, %s2930_s22  ;;  %916 = vrot.lane.b32.xlu0 %v755_v61, %s2930_s22  ;;  %v2325_v51 = vld [vmem:[%s4052_s3 + $0xd0] sm:$0xff]  ;;  %v2898_v56 = vunpack.i.h.bf16 %v2896_v33  ;;  %v2897_v58 = vunpack.i.l.bf16 %v2896_v33  ;;  %v2903_v61 = vunpack.i.h.bf16 %v2901_v34  ;;  %v2902_v62 = vunpack.i.l.bf16 %v2901_v34 }
  0x83   : > { %v2771_v2 = vpack.c.bf16 %v2326_v52, %v2325_v51  ;;  %v573_v33 = vsel %vm439_vm0, %v488_v63, 0.0  ;;  %v1040_v34 = vrot.slane %v3529_v23, 1 }
  0x84   : > { %v961_v0 = vsel %vm960_vm4, %v2999_v6, %v2897_v58  ;;  %v962_v5 = vsel %vm960_vm4, %v2979_v1, %v2898_v56  ;;  %v684_v6 = vsel %vm606_vm1, %v682_v39, %v683_v40  ;;  %v763_v1 = vrot.slane %v3496_v15, 2  ;;  %v2329_v58 = vld [vmem:[%s4052_s3 + $0xf0] sm:$0xff] }
  0x85   : > { %v3517_v8 = vsel %vm993_vm5, %v961_v0, %v2902_v62  ;;  %v3520_v10 = vsel %vm993_vm5, %v962_v5, %v2903_v61  ;;  %v1043_v52 = vrot.slane %v573_v33, 1  ;;  %v2330_v61 = vld [vmem:[%s4052_s3 + $0xf8] sm:$0xff]  ;;  %v1048_v5 = vrot.slane %v573_v33, 2  ;;  %v2332_v33 = vld [vmem:[%s4052_s3 + $0x108] sm:$0xff] }
  0x86   : > { %826 = vrot.lane.b32.xlu1 %v681_v11, %s2929_s17  ;;  %824 = vrot.lane.b32.xlu0 %v679_v13, %s2929_s17  ;;  %v764_v11 = vrot.slane %v3492_v19, 2  ;;  %v686_v13 = vsel %vm606_vm1, %v683_v40, %v685_v42 }
  0x87   : > { %2599 = vmatprep.mubr.msk.f32.mxu0 %vm1079_vm6, %v3517_v8 }
  0x88   : > { %2600 = vmatmul.mubr.msk.f32.vlgmr.msra.gmra.mrb[0].mxu0 %vm1079_vm6, %v3520_v10  ;;  %v767_v42 = vsel %vm687_vm3, %v764_v11, %v766_v12  ;;  %v765_v39 = vsel %vm687_vm3, %v763_v1, %v764_v11 }
  0x89   : > { %2770 = vmatpush3.bf16.msra.mxu0 %v3392_v18  ;;  %v1045_v18 = vrot.slane %v3529_v23, 2 }
  0x8a   : > { %922 = vrot.lane.b32.xlu1 %v762_v27, %s2930_s22  ;;  %920 = vrot.lane.b32.xlu0 %v760_v32, %s2930_s22  ;;  %v2327_v27 = vld [vmem:[%s4052_s3 + $0xe0] sm:$0xff]  ;;  %v3540_v32 = vsel %vm439_vm0, %v487_v47, %v488_v63 }
  0x8b   : > { %v2775_v40 = vpack.c.bf16 %v2328_v20, %v2327_v27  ;;  %v1041_v51 = vrot.slane %v3540_v32, 1  ;;  %2772 = vmatprep.subr.bf16.mxu0 %v2771_v2  ;;  %v1046_v0 = vrot.slane %v3540_v32, 2  ;;  %v2779_v27 = vpack.c.bf16 %v2330_v61, %v2329_v58  ;;  %v2331_v20 = vld [vmem:[%s4052_s3 + $0x100] sm:$0xff] }
  0x8d   : > { %2774 = vmatpush3.bf16.msra.mxu0 %v2771_v2  ;;  %v1044_v62 = vsel %vm606_vm1, %v1041_v51, %v1043_v52  ;;  %v1042_v63 = vsel %vm606_vm1, %v1040_v34, %v1041_v51  ;;  %v2334_v51 = vld [vmem:[%s4052_s3 + $0x118] sm:$0xff] }
  0x8e   : > { %830 = vrot.lane.b32.xlu1 %v686_v13, %s2929_s17  ;;  %828 = vrot.lane.b32.xlu0 %v684_v6, %s2929_s17 }
  0x8f   : > { %2776 = vmatprep.subr.bf16.mxu0 %v2775_v40 }
  0x90   : > { %v775_v47 = vpop.permute.xlu1 %774  ;;  %v773_v56 = vpop.permute.xlu0 %772 }
  0x91   : > { %v964_v2 = vsel %vm960_vm4, %v3068_v55, %v775_v47  ;;  %v963_v11 = vsel %vm960_vm4, %v3072_v57, %v773_v56  ;;  %2778 = vmatpush3.bf16.msra.mxu0 %v2775_v40  ;;  %v1049_v55 = vsel %vm687_vm3, %v1046_v0, %v1048_v5  ;;  %v1047_v57 = vsel %vm687_vm3, %v1045_v18, %v1046_v0 }
  0x92   : > { %926 = vrot.lane.b32.xlu1 %v767_v42, %s2930_s22  ;;  %924 = vrot.lane.b32.xlu0 %v765_v39, %s2930_s22  ;;  %v2783_v42 = vpack.c.bf16 %v2332_v33, %v2331_v20  ;;  %v2333_v39 = vld [vmem:[%s4052_s3 + $0x110] sm:$0xff] }
  0x93   : > { %2780 = vmatprep.subr.bf16.mxu0 %v2779_v27  ;;  %v2787_v61 = vpack.c.bf16 %v2334_v51, %v2333_v39 }
  0x94   : > { %v871_v12 = vpop.permute.xlu1 %870  ;;  %v869_v13 = vpop.permute.xlu0 %868 }
  0x95   : > { %v997_v6 = vsel %vm993_vm5, %v964_v2, %v871_v12  ;;  %v996_v1 = vsel %vm993_vm5, %v963_v11, %v869_v13  ;;  %2782 = vmatpush3.bf16.msra.mxu0 %v2779_v27 }
  0x96   : > { %1052 = vrot.lane.b32.xlu1 %v1044_v62, %s2929_s17  ;;  %1050 = vrot.lane.b32.xlu0 %v1042_v63, %s2929_s17 }
  0x97   : > { %2527 = vmatprep.mubr.msk.f32.mxu1 %vm1079_vm6, %v996_v1  ;;  %2602 = vmatprep.mubr.msk.f32.mxu0 %vm1079_vm6, %v996_v1 }
  0x98   : > { %2528 = vmatmul.mubr.msk.f32.vlgmr.msra.gmra.mrb[0].mxu1 %vm1079_vm6, %v997_v6  ;;  %2603 = vmatmul.mubr.msk.f32.gmra.mrb[2].mxu0 %vm1079_vm6, %v997_v6  ;;  %v779_v34 = vpop.permute.xlu1 %778  ;;  %v777_v40 = vpop.permute.xlu0 %776 }
  0x99   : > { %2797 = vmatpush3.bf16.msra.mxu1 %v3024_v16  ;;  %v966_v52 = vsel %vm960_vm4, %v3079_v3, %v779_v34  ;;  %v965_v16 = vsel %vm960_vm4, %v3088_v9, %v777_v40  ;;  %2784 = vmatprep.subr.bf16.mxu0 %v2783_v42 }
  0x9a   : > { %1058 = vrot.lane.b32.xlu1 %v1049_v55, %s2930_s22  ;;  %1056 = vrot.lane.b32.xlu0 %v1047_v57, %s2930_s22 }
  0x9b   : > { %2792 = vmatprep.subr.bf16.mxu1 %v3026_v17  ;;  %2786 = vmatpush3.bf16.msra.mxu0 %v2783_v42 }
  0x9c   : > { %v875_v47 = vpop.permute.xlu1 %874  ;;  %v873_v56 = vpop.permute.xlu0 %872  ;;  %2788 = vmatprep.subr.bf16.mxu0 %v2787_v61 }
  0x9d   : > { %v3597_v18 = vsel %vm993_vm5, %v966_v52, %v875_v47  ;;  %v3600_v58 = vsel %vm993_vm5, %v965_v16, %v873_v56  ;;  %2798 = vmatpush3.bf16.msra.mxu1 %v3026_v17 }
  0x9e   : > { %2530 = vmatprep.mubr.msk.f32.mxu1 %vm1079_vm6, %v3600_v58  ;;  %2605 = vmatprep.mubr.msk.f32.mxu0 %vm1079_vm6, %v3600_v58 }
  0x9f   : > { %2531 = vmatmul.mubr.msk.f32.gmra.mrb[2].mxu1 %vm1079_vm6, %v3597_v18  ;;  %2606 = vmatmul.mubr.msk.f32.gmra.mrb[4].mxu0 %vm1079_vm6, %v3597_v18 }
  0xa0   : > { %v783_v3 = vpop.permute.xlu1 %782  ;;  %v781_v9 = vpop.permute.xlu0 %780  ;;  %2793 = vmatprep.subr.bf16.mxu1 %v3274_v22  ;;  %2790 = vmatpush3.bf16.msra.mxu0 %v2787_v61 }
  0xa1   : > { %2799 = vmatpush3.bf16.msra.mxu1 %v3274_v22  ;;  %v968_v17 = vsel %vm960_vm4, %v3103_v29, %v783_v3  ;;  %v967_v62 = vsel %vm960_vm4, %v3107_v31, %v781_v9 }
  0xa2   : > { %2794 = vmatprep.subr.bf16.mxu1 %v3278_v28 }
  0xa4   : > { %v879_v63 = vpop.permute.xlu1 %878  ;;  %v877_v0 = vpop.permute.xlu0 %876 }
  0xa5   : > { %v3619_v5 = vsel %vm993_vm5, %v968_v17, %v879_v63  ;;  %v3622_v2 = vsel %vm993_vm5, %v967_v62, %v877_v0  ;;  %2800 = vmatpush3.bf16.msra.mxu1 %v3278_v28 }
  0xa6   : > { %2533 = vmatprep.mubr.msk.f32.mxu1 %vm1079_vm6, %v3622_v2  ;;  %2608 = vmatprep.mubr.msk.f32.mxu0 %vm1079_vm6, %v3622_v2 }
  0xa7   : > { %2534 = vmatmul.mubr.msk.f32.gmra.mrb[4].mxu1 %vm1079_vm6, %v3619_v5  ;;  %2609 = vmatmul.mubr.msk.f32.gmra.mrb[6].mxu0 %vm1079_vm6, %v3619_v5 }
  0xa8   : > { %v787_v29 = vpop.permute.xlu1 %786  ;;  %v785_v31 = vpop.permute.xlu0 %784  ;;  %2795 = vmatprep.subr.bf16.mxu1 %v3321_v60 }
  0xa9   : > { %2801 = vmatpush3.bf16.msra.mxu1 %v3321_v60  ;;  %v970_v22 = vsel %vm960_vm4, %v3134_v54, %v787_v29  ;;  %v969_v28 = vsel %vm960_vm4, %v3131_v53, %v785_v31 }
  0xaa   : > { %2796 = vmatprep.subr.bf16.mxu1 %v3340_v25 }
  0xac   : > { %v883_v11 = vpop.permute.xlu1 %882  ;;  %v881_v12 = vpop.permute.xlu0 %880 }
  0xad   : > { %v1003_v13 = vsel %vm993_vm5, %v970_v22, %v883_v11  ;;  %v1002_v6 = vsel %vm993_vm5, %v969_v28, %v881_v12  ;;  %2802 = vmatpush3.bf16.msra.mxu1 %v3340_v25 }
  0xae   : > { %2536 = vmatprep.mubr.msk.f32.mxu1 %vm1079_vm6, %v1002_v6  ;;  %2611 = vmatprep.mubr.msk.f32.mxu0 %vm1079_vm6, %v1002_v6 }
  0xaf   : > { %2537 = vmatmul.mubr.msk.f32.gmra.mrb[6].mxu1 %vm1079_vm6, %v1003_v13  ;;  %2612 = vmatmul.mubr.msk.f32.gmra.mrb[8].mxu0 %vm1079_vm6, %v1003_v13 }
  0xb0   : > { %v791_v54 = vpop.permute.xlu1 %790  ;;  %v789_v60 = vpop.permute.xlu0 %788 }
  0xb1   : > { %v972_v53 = vsel %vm960_vm4, %v3156_v24, %v791_v54  ;;  %v971_v1 = vsel %vm960_vm4, %v3160_v26, %v789_v60 }
  0xb4   : > { %v887_v27 = vpop.permute.xlu1 %886  ;;  %v885_v20 = vpop.permute.xlu0 %884 }
  0xb5   : > { %v1005_v25 = vsel %vm993_vm5, %v972_v53, %v887_v27  ;;  %v1004_v33 = vsel %vm993_vm5, %v971_v1, %v885_v20 }
  0xb6   : > { %2539 = vmatprep.mubr.msk.f32.mxu1 %vm1079_vm6, %v1004_v33  ;;  %2614 = vmatprep.mubr.msk.f32.mxu0 %vm1079_vm6, %v1004_v33 }
  0xb7   : > { %2540 = vmatmul.mubr.msk.f32.gmra.mrb[8].mxu1 %vm1079_vm6, %v1005_v25  ;;  %2615 = vmatmul.mubr.msk.f32.gmra.mrb[10].mxu0 %vm1079_vm6, %v1005_v25 }
  0xb8   : > { %v795_v55 = vpop.permute.xlu1 %794  ;;  %v793_v57 = vpop.permute.xlu0 %792 }
  0xb9   : > { %v974_v24 = vsel %vm960_vm4, %v3179_v46, %v795_v55  ;;  %v973_v26 = vsel %vm960_vm4, %v3185_v50, %v793_v57 }
  0xbc   : > { %v891_v34 = vpop.permute.xlu1 %890  ;;  %v889_v40 = vpop.permute.xlu0 %888 }
  0xbd   : > { %v1007_v42 = vsel %vm993_vm5, %v974_v24, %v891_v34  ;;  %v1006_v39 = vsel %vm993_vm5, %v973_v26, %v889_v40 }
  0xbe   : > { %2542 = vmatprep.mubr.msk.f32.mxu1 %vm1079_vm6, %v1006_v39  ;;  %2617 = vmatprep.mubr.msk.f32.mxu0 %vm1079_vm6, %v1006_v39 }
  0xbf   : > { %2543 = vmatmul.mubr.msk.f32.gmra.mrb[10].mxu1 %vm1079_vm6, %v1007_v42  ;;  %2618 = vmatmul.mubr.msk.f32.gmra.mrb[12].mxu0 %vm1079_vm6, %v1007_v42 }
  0xc0   : > { %v799_v51 = vpop.permute.xlu1 %798  ;;  %v797_v52 = vpop.permute.xlu0 %796 }
  0xc1   : > { %v976_v46 = vsel %vm960_vm4, %v3204_v14, %v799_v51  ;;  %v975_v50 = vsel %vm960_vm4, %v3209_v21, %v797_v52 }
  0xc4   : > { %v895_v16 = vpop.permute.xlu1 %894  ;;  %v893_v47 = vpop.permute.xlu0 %892 }
  0xc5   : > { %v1009_v56 = vsel %vm993_vm5, %v976_v46, %v895_v16  ;;  %v1008_v61 = vsel %vm993_vm5, %v975_v50, %v893_v47 }
  0xc6   : > { %2545 = vmatprep.mubr.msk.f32.mxu1 %vm1079_vm6, %v1008_v61  ;;  %2620 = vmatprep.mubr.msk.f32.mxu0 %vm1079_vm6, %v1008_v61 }
  0xc7   : > { %2546 = vmatmul.mubr.msk.f32.gmra.mrb[12].mxu1 %vm1079_vm6, %v1009_v56  ;;  %2621 = vmatmul.mubr.msk.f32.gmra.mrb[14].mxu0 %vm1079_vm6, %v1009_v56 }
  0xc8   : > { %v803_v3 = vpop.permute.xlu1 %802  ;;  %2671 = vmatprep.mubr.msk.f32.mxu0 %vm1079_vm6, %v3600_v58  ;;  %v801_v14 = vpop.permute.xlu0 %800 }
  0xc9   : > { %v978_v21 = vsel %vm960_vm4, %v3229_v43, %v803_v3  ;;  %v977_v9 = vsel %vm960_vm4, %v3241_v49, %v801_v14 }
  0xcb   : > { %2672 = vmatmul.mubr.msk.f32.vlgmr.msra.gmra.mrb[0].mxu0 %vm1079_vm6, %v3597_v18 }
  0xcc   : > { %v899_v17 = vpop.permute.xlu1 %898  ;;  %2674 = vmatprep.mubr.msk.f32.mxu0 %vm1079_vm6, %v3622_v2  ;;  %v897_v62 = vpop.permute.xlu0 %896 }
  0xcd   : > { %v3688_v63 = vsel %vm993_vm5, %v978_v21, %v899_v17  ;;  %v3691_v58 = vsel %vm993_vm5, %v977_v9, %v897_v62 }
  0xce   : > { %2548 = vmatprep.mubr.msk.f32.mxu1 %vm1079_vm6, %v3691_v58 }
  0xcf   : > { %2549 = vmatmul.mubr.msk.f32.gmra.mrb[14].mxu1 %vm1079_vm6, %v3688_v63  ;;  %2675 = vmatmul.mubr.msk.f32.gmra.mrb[2].mxu0 %vm1079_vm6, %v3619_v5 }
  0xd0   : > { %v807_v43 = vpop.permute.xlu1 %806  ;;  %2677 = vmatprep.mubr.msk.f32.mxu0 %vm1079_vm6, %v1002_v6  ;;  %v805_v49 = vpop.permute.xlu0 %804 }
  0xd1   : > { %v980_v18 = vsel %vm960_vm4, %v3304_v41, %v807_v43  ;;  %v979_v0 = vsel %vm960_vm4, %v3291_v37, %v805_v49 }
  0xd3   : > { %2678 = vmatmul.mubr.msk.f32.gmra.mrb[4].mxu0 %vm1079_vm6, %v1003_v13 }
  0xd4   : > { %v903_v2 = vpop.permute.xlu1 %902  ;;  %2680 = vmatprep.mubr.msk.f32.mxu0 %vm1079_vm6, %v1004_v33  ;;  %v901_v29 = vpop.permute.xlu0 %900 }
  0xd5   : > { %v3707_v31 = vsel %vm993_vm5, %v980_v18, %v903_v2  ;;  %v3710_v5 = vsel %vm993_vm5, %v979_v0, %v901_v29 }
  0xd6   : > { %2551 = vmatprep.mubr.msk.f32.mxu1 %vm1079_vm6, %v3710_v5 }
  0xd7   : > { %2552 = vmatmul.mubr.msk.f32.gmra.mrb[16].mxu1 %vm1079_vm6, %v3707_v31  ;;  %2681 = vmatmul.mubr.msk.f32.gmra.mrb[6].mxu0 %vm1079_vm6, %v1005_v25 }
  0xd8   : > { %v811_v41 = vpop.permute.xlu1 %810  ;;  %2683 = vmatprep.mubr.msk.f32.mxu0 %vm1079_vm6, %v1006_v39  ;;  %v809_v37 = vpop.permute.xlu0 %808 }
  0xd9   : > { %v982_v22 = vsel %vm960_vm4, %v3352_v35, %v811_v41  ;;  %v981_v28 = vsel %vm960_vm4, %v3356_v38, %v809_v37 }
  0xdb   : > { %2684 = vmatmul.mubr.msk.f32.gmra.mrb[8].mxu0 %vm1079_vm6, %v1007_v42 }
  0xdc   : > { %v907_v11 = vpop.permute.xlu1 %906  ;;  %2686 = vmatprep.mubr.msk.f32.mxu0 %vm1079_vm6, %v1008_v61  ;;  %v905_v12 = vpop.permute.xlu0 %904 }
  0xdd   : > { %v3725_v13 = vsel %vm993_vm5, %v982_v22, %v907_v11  ;;  %v3728_v6 = vsel %vm993_vm5, %v981_v28, %v905_v12 }
  0xde   : > { %2554 = vmatprep.mubr.msk.f32.mxu1 %vm1079_vm6, %v3728_v6 }
  0xdf   : > { %2555 = vmatmul.mubr.msk.f32.gmra.mrb[18].mxu1 %vm1079_vm6, %v3725_v13  ;;  %2687 = vmatmul.mubr.msk.f32.gmra.mrb[10].mxu0 %vm1079_vm6, %v1009_v56 }
  0xe0   : > { %v815_v35 = vpop.permute.xlu1 %814  ;;  %2689 = vmatprep.mubr.msk.f32.mxu0 %vm1079_vm6, %v3691_v58  ;;  %v813_v38 = vpop.permute.xlu0 %812 }
  0xe1   : > { %v984_v54 = vsel %vm960_vm4, %v3385_v7, %v815_v35  ;;  %v983_v60 = vsel %vm960_vm4, %v3398_v30, %v813_v38 }
  0xe3   : > { %2690 = vmatmul.mubr.msk.f32.gmra.mrb[12].mxu0 %vm1079_vm6, %v3688_v63 }
  0xe4   : > { %v911_v53 = vpop.permute.xlu1 %910  ;;  %2692 = vmatprep.mubr.msk.f32.mxu0 %vm1079_vm6, %v3710_v5  ;;  %v909_v1 = vpop.permute.xlu0 %908 }
  0xe5   : > { %v3746_v27 = vsel %vm993_vm5, %v984_v54, %v911_v53  ;;  %v3749_v20 = vsel %vm993_vm5, %v983_v60, %v909_v1 }
  0xe6   : > { %2557 = vmatprep.mubr.msk.f32.mxu1 %vm1079_vm6, %v3749_v20 }
  0xe7   : > { %2558 = vmatmul.mubr.msk.f32.gmra.mrb[20].mxu1 %vm1079_vm6, %v3746_v27  ;;  %2693 = vmatmul.mubr.msk.f32.gmra.mrb[14].mxu0 %vm1079_vm6, %v3707_v31 }
  0xe8   : > { %v819_v7 = vpop.permute.xlu1 %818  ;;  %2695 = vmatprep.mubr.msk.f32.mxu0 %vm1079_vm6, %v3728_v6  ;;  %v817_v30 = vpop.permute.xlu0 %816 }
  0xe9   : > { %v986_v25 = vsel %vm960_vm4, %v3418_v59, %v819_v7  ;;  %v985_v33 = vsel %vm960_vm4, %v3423_v4, %v817_v30 }
  0xeb   : > { %2696 = vmatmul.mubr.msk.f32.gmra.mrb[16].mxu0 %vm1079_vm6, %v3725_v13 }
  0xec   : > { %v915_v55 = vpop.permute.xlu1 %914  ;;  %2698 = vmatprep.mubr.msk.f32.mxu0 %vm1079_vm6, %v3749_v20  ;;  %v913_v57 = vpop.permute.xlu0 %912 }
  0xed   : > { %v3768_v24 = vsel %vm993_vm5, %v986_v25, %v915_v55  ;;  %v3771_v26 = vsel %vm993_vm5, %v985_v33, %v913_v57 }
  0xee   : > { %2560 = vmatprep.mubr.msk.f32.mxu1 %vm1079_vm6, %v3771_v26 }
  0xef   : > { %2561 = vmatmul.mubr.msk.f32.gmra.mrb[22].mxu1 %vm1079_vm6, %v3768_v24  ;;  %2699 = vmatmul.mubr.msk.f32.gmra.mrb[18].mxu0 %vm1079_vm6, %v3746_v27 }
  0xf0   : > { %v823_v59 = vpop.permute.xlu1 %822  ;;  %2701 = vmatprep.mubr.msk.f32.mxu0 %vm1079_vm6, %v3771_v26  ;;  %v821_v4 = vpop.permute.xlu0 %820 }
  0xf1   : > { %v988_v34 = vsel %vm960_vm4, %v3444_v45, %v823_v59  ;;  %v987_v40 = vsel %vm960_vm4, %v3448_v48, %v821_v4 }
  0xf3   : > { %2702 = vmatmul.mubr.msk.f32.gmra.mrb[20].mxu0 %vm1079_vm6, %v3768_v24 }
  0xf4   : > { %v919_v42 = vpop.permute.xlu1 %918  ;;  %v917_v39 = vpop.permute.xlu0 %916 }
  0xf5   : > { %v1021_v51 = vsel %vm993_vm5, %v988_v34, %v919_v42  ;;  %v1020_v52 = vsel %vm993_vm5, %v987_v40, %v917_v39 }
  0xf6   : > { %2563 = vmatprep.mubr.msk.f32.mxu1 %vm1079_vm6, %v1020_v52  ;;  %2704 = vmatprep.mubr.msk.f32.mxu0 %vm1079_vm6, %v1020_v52 }
  0xf7   : > { %2564 = vmatmul.mubr.msk.f32.gmra.mrb[24].mxu1 %vm1079_vm6, %v1021_v51  ;;  %2705 = vmatmul.mubr.msk.f32.gmra.mrb[22].mxu0 %vm1079_vm6, %v1021_v51 }
  0xf8   : > { %v827_v46 = vpop.permute.xlu1 %826  ;;  %v825_v50 = vpop.permute.xlu0 %824 }
  0xf9   : > { %v990_v45 = vsel %vm960_vm4, %v3470_v36, %v827_v46  ;;  %v989_v48 = vsel %vm960_vm4, %v3474_v44, %v825_v50 }
  0xfc   : > { %v923_v16 = vpop.permute.xlu1 %922  ;;  %v921_v47 = vpop.permute.xlu0 %920 }
  0xfd   : > { %v1023_v56 = vsel %vm993_vm5, %v990_v45, %v923_v16  ;;  %v1022_v61 = vsel %vm993_vm5, %v989_v48, %v921_v47 }
  0xfe   : > { %2566 = vmatprep.mubr.msk.f32.mxu1 %vm1079_vm6, %v1022_v61  ;;  %2707 = vmatprep.mubr.msk.f32.mxu0 %vm1079_vm6, %v1022_v61 }
  0xff   : > { %2567 = vmatmul.mubr.msk.f32.gmra.mrb[26].mxu1 %vm1079_vm6, %v1023_v56  ;;  %2708 = vmatmul.mubr.msk.f32.gmra.mrb[24].mxu0 %vm1079_vm6, %v1023_v56 }
 0x100   : > { %v831_v3 = vpop.permute.xlu1 %830  ;;  %v829_v14 = vpop.permute.xlu0 %828 }
 0x101   : > { %v992_v36 = vsel %vm960_vm4, %v3492_v19, %v831_v3  ;;  %v991_v44 = vsel %vm960_vm4, %v3496_v15, %v829_v14 }
 0x104   : > { %v927_v21 = vpop.permute.xlu1 %926  ;;  %v925_v9 = vpop.permute.xlu0 %924 }
 0x105   : > { %v1025_v17 = vsel %vm993_vm5, %v992_v36, %v927_v21  ;;  %v1024_v62 = vsel %vm993_vm5, %v991_v44, %v925_v9 }
 0x106   : > { %2569 = vmatprep.mubr.msk.f32.mxu1 %vm1079_vm6, %v1024_v62  ;;  %2710 = vmatprep.mubr.msk.f32.mxu0 %vm1079_vm6, %v1024_v62 }
 0x107   : > { %2570 = vmatmul.mubr.msk.f32.gmra.mrb[28].mxu1 %vm1079_vm6, %v1025_v17  ;;  %2711 = vmatmul.mubr.msk.f32.gmra.mrb[26].mxu0 %vm1079_vm6, %v1025_v17 }
 0x108   : > { %v1053_v43 = vpop.permute.xlu1 %1052  ;;  %v1051_v49 = vpop.permute.xlu0 %1050 }
 0x109   : > { %v1063_v19 = vsel %vm960_vm4, %v3540_v32, %v1053_v43  ;;  %v1062_v15 = vsel %vm960_vm4, %v3529_v23, %v1051_v49 }
 0x10c   : > { %v1059_v18 = vpop.permute.xlu1 %1058  ;;  %v1057_v0 = vpop.permute.xlu0 %1056 }
 0x10d   : > { %v1065_v2 = vsel %vm993_vm5, %v1063_v19, %v1059_v18  ;;  %v1064_v29 = vsel %vm993_vm5, %v1062_v15, %v1057_v0 }
 0x10e   : > { %2572 = vmatprep.mubr.msk.f32.mxu1 %vm1079_vm6, %v1064_v29  ;;  %2713 = vmatprep.mubr.msk.f32.mxu0 %vm1079_vm6, %v1064_v29 }
 0x10f   : > { %2573 = vmatmul.mubr.msk.f32.gmra.mrb[30].mxu1 %vm1079_vm6, %v1065_v2  ;;  %2714 = vmatmul.mubr.msk.f32.gmra.mrb[28].mxu0 %vm1079_vm6, %v1065_v2 }
 0x110   : > { %2623 = vmatprep.mubr.msk.f32.mxu1 %vm1079_vm6, %v3691_v58  ;;  %2716 = vmatprep.mubr.msk.f32.mxu0 %vm1079_vm6, %v3517_v8 }
 0x113   : > { %2624 = vmatmul.mubr.msk.f32.vlgmr.msra.gmra.mrb[16].mxu1 %vm1079_vm6, %v3688_v63  ;;  %2717 = vmatmul.mubr.msk.f32.gmra.mrb[30].mxu0 %vm1079_vm6, %v3520_v10 }
 0x114   : > { %2626 = vmatprep.mubr.msk.f32.mxu1 %vm1079_vm6, %v3710_v5 }
 0x117   : > { %2627 = vmatmul.mubr.msk.f32.gmra.mrb[18].mxu1 %vm1079_vm6, %v3707_v31 }
 0x118   : > { %2629 = vmatprep.mubr.msk.f32.mxu1 %vm1079_vm6, %v3728_v6 }
 0x11b   : > { %2630 = vmatmul.mubr.msk.f32.gmra.mrb[20].mxu1 %vm1079_vm6, %v3725_v13 }
 0x11c   : > { %2632 = vmatprep.mubr.msk.f32.mxu1 %vm1079_vm6, %v3749_v20 }
 0x11f   : > { %2633 = vmatmul.mubr.msk.f32.gmra.mrb[22].mxu1 %vm1079_vm6, %v3746_v27 }
 0x120   : > { %2635 = vmatprep.mubr.msk.f32.mxu1 %vm1079_vm6, %v3771_v26 }
 0x123   : > { %2636 = vmatmul.mubr.msk.f32.gmra.mrb[24].mxu1 %vm1079_vm6, %v3768_v24 }
 0x124   : > { %2638 = vmatprep.mubr.msk.f32.mxu1 %vm1079_vm6, %v1020_v52 }
 0x127   : > { %2639 = vmatmul.mubr.msk.f32.gmra.mrb[26].mxu1 %vm1079_vm6, %v1021_v51 }
 0x128   : > { %2641 = vmatprep.mubr.msk.f32.mxu1 %vm1079_vm6, %v1022_v61 }
 0x12b   : > { %2642 = vmatmul.mubr.msk.f32.gmra.mrb[28].mxu1 %vm1079_vm6, %v1023_v56 }
 0x12c   : > { %2644 = vmatprep.mubr.msk.f32.mxu1 %vm1079_vm6, %v1024_v62 }
 0x12f   : > { %2645 = vmatmul.mubr.msk.f32.gmra.mrb[30].mxu1 %vm1079_vm6, %v1025_v17 }
 0x16b   : > { %v2529_v8 = vpop.f32.mrb[0].mxu1 }
 0x16c   : > { %v1242_v10 = vpop.f32.mrb[1].mxu1 }
 0x172   : > { %v2532_v23 = vpop.f32.mrb[2].mxu1 }
 0x173   : > { %v1252_v32 = vpop.f32.mrb[3].mxu1 }
 0x17a   : > { %v2535_v63 = vpop.f32.mrb[4].mxu1 }
 0x17b   : > { %v1262_v58 = vpop.f32.mrb[5].mxu1 }
 0x182   : > { %v2538_v31 = vpop.f32.mrb[6].mxu1 }
 0x183   : > { %v1272_v5 = vpop.f32.mrb[7].mxu1 }
 0x18a   : > { %v3853_v41 = vpop.f32.mrb[8].mxu1 }
 0x18b   : > { %v3855_v37 = vpop.f32.mrb[9].mxu1 }
 0x192   : > { %v3857_v22 = vpop.f32.mrb[10].mxu1 }
 0x193   : > { %v3859_v28 = vpop.f32.mrb[11].mxu1 }
 0x19a   : > { %v3861_v11 = vpop.f32.mrb[12].mxu1 }
 0x19b   : > { %v3863_v12 = vpop.f32.mrb[13].mxu1 }
 0x19e   : > { %v2673_v13 = vpop.f32.mrb[0].mxu0 }
 0x19f   : > { %v2803_v6 = vadd.f32 %v2673_v13, %v2529_v8  ;;  %v1711_v35 = vpop.f32.mrb[1].mxu0 }
 0x1a0   : > { %v2804_v38 = vadd.f32 %v1711_v35, %v1242_v10 }
 0x1a1   : > { %1903 = vst.msk [vmem:[%s3870_s14 + $0x8] sm:$0xff] %vm993_vm5, %v2803_v6  ;;  %v1941_v54 = vsel %vm993_vm5, %v2803_v6, 0.0  ;;  %v2010_v60 = vmul.f32 %v2803_v6, %v2803_v6 }
 0x1a2   : > { %1902 = vst.msk [vmem:[%s3870_s14] sm:$0xff] %vm993_vm5, %v2804_v38  ;;  %v1940_v53 = vsel %vm993_vm5, %v2804_v38, 0.0  ;;  %v2009_v1 = vmul.f32 %v2804_v38, %v2804_v38  ;;  %v3878_v27 = vpop.f32.mrb[14].mxu1  ;;  %v2676_v20 = vpop.f32.mrb[2].mxu0 }
 0x1a3   : > { %v2042_v7 = vsel %vm993_vm5, %v2010_v60, 0.0  ;;  %v1942_v30 = vadd.f32 %v1941_v54, %v1940_v53  ;;  %v2805_v25 = vadd.f32 %v2676_v20, %v2532_v23  ;;  %v3881_v33 = vpop.f32.mrb[15].mxu1  ;;  %v1721_v55 = vpop.f32.mrb[3].mxu0 }
 0x1a4   : > { %v2041_v57 = vsel %vm993_vm5, %v2009_v1, 0.0  ;;  %v2806_v24 = vadd.f32 %v1721_v55, %v1252_v32 }
 0x1a5   : > { %v2043_v26 = vadd.f32 %v2042_v7, %v2041_v57  ;;  %1905 = vst.msk [vmem:[%s3870_s14 + $0x18] sm:$0xff] %vm993_vm5, %v2805_v25  ;;  %v2012_v59 = vmul.f32 %v2805_v25, %v2805_v25  ;;  %v1945_v52 = vsel %vm993_vm5, %v2805_v25, 0.0 }
 0x1a6   : > { %1904 = vst.msk [vmem:[%s3870_s14 + $0x10] sm:$0xff] %vm993_vm5, %v2806_v24  ;;  %v1943_v4 = vsel %vm993_vm5, %v2806_v24, 0.0  ;;  %v2011_v34 = vmul.f32 %v2806_v24, %v2806_v24  ;;  %v2679_v40 = vpop.f32.mrb[4].mxu0 }
 0x1a7   : > { %v1944_v42 = vadd.f32 %v1943_v4, %v1942_v30  ;;  %v2807_v39 = vadd.f32 %v2679_v40, %v2535_v63  ;;  %v1731_v51 = vpop.f32.mrb[5].mxu0  ;;  %v2046_v16 = vsel %vm993_vm5, %v2012_v59, 0.0 }
 0x1a8   : > { %v2044_v46 = vsel %vm993_vm5, %v2011_v34, 0.0  ;;  %v2808_v50 = vadd.f32 %v1731_v51, %v1262_v58 }
 0x1a9   : > { %v2045_v45 = vadd.f32 %v2044_v46, %v2043_v26  ;;  %1907 = vst.msk [vmem:[%s3870_s14 + $0x28] sm:$0xff] %vm993_vm5, %v2807_v39  ;;  %v1946_v48 = vadd.f32 %v1945_v52, %v1944_v42  ;;  %v2014_v47 = vmul.f32 %v2807_v39, %v2807_v39  ;;  %v1949_v9 = vsel %vm993_vm5, %v2807_v39, 0.0 }
 0x1aa   : > { %1906 = vst.msk [vmem:[%s3870_s14 + $0x20] sm:$0xff] %vm993_vm5, %v2808_v50  ;;  %v1947_v56 = vsel %vm993_vm5, %v2808_v50, 0.0  ;;  %v2013_v61 = vmul.f32 %v2808_v50, %v2808_v50  ;;  %v2682_v3 = vpop.f32.mrb[6].mxu0 }
 0x1ab   : > { %v1948_v14 = vadd.f32 %v1947_v56, %v1946_v48  ;;  %v2047_v36 = vadd.f32 %v2046_v16, %v2045_v45  ;;  %v2809_v44 = vadd.f32 %v2682_v3, %v2538_v31  ;;  %v1741_v21 = vpop.f32.mrb[7].mxu0  ;;  %v2050_v19 = vsel %vm993_vm5, %v2014_v47, 0.0 }
 0x1ac   : > { %v2048_v17 = vsel %vm993_vm5, %v2013_v61, 0.0  ;;  %v2810_v62 = vadd.f32 %v1741_v21, %v1272_v5 }
 0x1ad   : > { %v2049_v43 = vadd.f32 %v2048_v17, %v2047_v36  ;;  %1909 = vst.msk [vmem:[%s3870_s14 + $0x38] sm:$0xff] %vm993_vm5, %v2809_v44  ;;  %v1950_v49 = vadd.f32 %v1949_v9, %v1948_v14  ;;  %v2016_v15 = vmul.f32 %v2809_v44, %v2809_v44  ;;  %v1953_v32 = vsel %vm993_vm5, %v2809_v44, 0.0 }
 0x1ae   : > { %1908 = vst.msk [vmem:[%s3870_s14 + $0x30] sm:$0xff] %vm993_vm5, %v2810_v62  ;;  %v1951_v18 = vsel %vm993_vm5, %v2810_v62, 0.0  ;;  %v2015_v0 = vmul.f32 %v2810_v62, %v2810_v62  ;;  %v2685_v2 = vpop.f32.mrb[8].mxu0 }
 0x1af   : > { %v1952_v29 = vadd.f32 %v1951_v18, %v1950_v49  ;;  %v2051_v8 = vadd.f32 %v2050_v19, %v2049_v43  ;;  %v2811_v10 = vadd.f32 %v2685_v2, %v3853_v41  ;;  %v1751_v23 = vpop.f32.mrb[9].mxu0  ;;  %v2054_v13 = vsel %vm993_vm5, %v2016_v15, 0.0 }
 0x1b0   : > { %v2052_v63 = vsel %vm993_vm5, %v2015_v0, 0.0  ;;  %v2812_v58 = vadd.f32 %v1751_v23, %v3855_v37 }
 0x1b1   : > { %v2053_v31 = vadd.f32 %v2052_v63, %v2051_v8  ;;  %1911 = vst.msk [vmem:[%s3870_s14 + $0x48] sm:$0xff] %vm993_vm5, %v2811_v10  ;;  %v1954_v5 = vadd.f32 %v1953_v32, %v1952_v29  ;;  %v2018_v6 = vmul.f32 %v2811_v10, %v2811_v10  ;;  %v1957_v1 = vsel %vm993_vm5, %v2811_v10, 0.0 }
 0x1b2   : > { %1910 = vst.msk [vmem:[%s3870_s14 + $0x40] sm:$0xff] %vm993_vm5, %v2812_v58  ;;  %v1955_v41 = vsel %vm993_vm5, %v2812_v58, 0.0  ;;  %v2017_v35 = vmul.f32 %v2812_v58, %v2812_v58  ;;  %v2688_v38 = vpop.f32.mrb[10].mxu0 }
 0x1b3   : > { %v1956_v54 = vadd.f32 %v1955_v41, %v1954_v5  ;;  %v2055_v60 = vadd.f32 %v2054_v13, %v2053_v31  ;;  %v2813_v53 = vadd.f32 %v2688_v38, %v3857_v22  ;;  %v1761_v37 = vpop.f32.mrb[11].mxu0  ;;  %v2058_v55 = vsel %vm993_vm5, %v2018_v6, 0.0 }
 0x1b4   : > { %v2056_v20 = vsel %vm993_vm5, %v2017_v35, 0.0  ;;  %v2814_v7 = vadd.f32 %v1761_v37, %v3859_v28 }
 0x1b5   : > { %v2057_v30 = vadd.f32 %v2056_v20, %v2055_v60  ;;  %1913 = vst.msk [vmem:[%s3870_s14 + $0x58] sm:$0xff] %vm993_vm5, %v2813_v53  ;;  %v1958_v25 = vadd.f32 %v1957_v1, %v1956_v54  ;;  %v2020_v57 = vmul.f32 %v2813_v53, %v2813_v53  ;;  %v1961_v40 = vsel %vm993_vm5, %v2813_v53, 0.0 }
 0x1b6   : > { %1912 = vst.msk [vmem:[%s3870_s14 + $0x50] sm:$0xff] %vm993_vm5, %v2814_v7  ;;  %v1959_v22 = vsel %vm993_vm5, %v2814_v7, 0.0  ;;  %v2019_v24 = vmul.f32 %v2814_v7, %v2814_v7  ;;  %v2691_v26 = vpop.f32.mrb[12].mxu0 }
 0x1b7   : > { %v1960_v59 = vadd.f32 %v1959_v22, %v1958_v25  ;;  %v2059_v4 = vadd.f32 %v2058_v55, %v2057_v30  ;;  %v2815_v34 = vadd.f32 %v2691_v26, %v3861_v11  ;;  %v1771_v28 = vpop.f32.mrb[13].mxu0  ;;  %v2062_v46 = vsel %vm993_vm5, %v2020_v57, 0.0 }
 0x1b8   : > { %v2060_v42 = vsel %vm993_vm5, %v2019_v24, 0.0  ;;  %v2816_v39 = vadd.f32 %v1771_v28, %v3863_v12 }
 0x1b9   : > { %v2061_v51 = vadd.f32 %v2060_v42, %v2059_v4  ;;  %1915 = vst.msk [vmem:[%s3870_s14 + $0x68] sm:$0xff] %vm993_vm5, %v2815_v34  ;;  %v1962_v52 = vadd.f32 %v1961_v40, %v1960_v59  ;;  %v2022_v50 = vmul.f32 %v2815_v34, %v2815_v34  ;;  %v1965_v61 = vsel %vm993_vm5, %v2815_v34, 0.0 }
 0x1ba   : > { %1914 = vst.msk [vmem:[%s3870_s14 + $0x60] sm:$0xff] %vm993_vm5, %v2816_v39  ;;  %v1963_v11 = vsel %vm993_vm5, %v2816_v39, 0.0  ;;  %v2021_v45 = vmul.f32 %v2816_v39, %v2816_v39  ;;  %v2694_v48 = vpop.f32.mrb[14].mxu0 }
 0x1bb   : > { %v1964_v16 = vadd.f32 %v1963_v11, %v1962_v52  ;;  %v2063_v47 = vadd.f32 %v2062_v46, %v2061_v51  ;;  %v2817_v56 = vadd.f32 %v2694_v48, %v3878_v27  ;;  %v1781_v12 = vpop.f32.mrb[15].mxu0  ;;  %v2066_v21 = vsel %vm993_vm5, %v2022_v50, 0.0 }
 0x1bc   : > { %v2064_v3 = vsel %vm993_vm5, %v2021_v45, 0.0  ;;  %v2818_v14 = vadd.f32 %v1781_v12, %v3881_v33 }
 0x1bd   : > { %v2065_v36 = vadd.f32 %v2064_v3, %v2063_v47  ;;  %1917 = vst.msk [vmem:[%s3870_s14 + $0x78] sm:$0xff] %vm993_vm5, %v2817_v56  ;;  %v1966_v44 = vadd.f32 %v1965_v61, %v1964_v16  ;;  %v2024_v9 = vmul.f32 %v2817_v56, %v2817_v56  ;;  %v1969_v15 = vsel %vm993_vm5, %v2817_v56, 0.0 }
 0x1be   : > { %1916 = vst.msk [vmem:[%s3870_s14 + $0x70] sm:$0xff] %vm993_vm5, %v2818_v14  ;;  %v1967_v17 = vsel %vm993_vm5, %v2818_v14, 0.0  ;;  %v2023_v62 = vmul.f32 %v2818_v14, %v2818_v14  ;;  %v2697_v27 = vpop.f32.mrb[16].mxu0 }
 0x1bf   : > { %v1968_v43 = vadd.f32 %v1967_v17, %v1966_v44  ;;  %v2067_v49 = vadd.f32 %v2066_v21, %v2065_v36  ;;  %v1791_v19 = vpop.f32.mrb[17].mxu0  ;;  %v2070_v2 = vsel %vm993_vm5, %v2024_v9, 0.0 }
 0x1c0   : > { %v2068_v33 = vsel %vm993_vm5, %v2023_v62, 0.0 }
 0x1c1   : > { %v2069_v18 = vadd.f32 %v2068_v33, %v2067_v49  ;;  %v1970_v0 = vadd.f32 %v1969_v15, %v1968_v43 }
 0x1c2   : > { %v2700_v29 = vpop.f32.mrb[18].mxu0 }
 0x1c3   : > { %v1801_v8 = vpop.f32.mrb[19].mxu0  ;;  %v2071_v10 = vadd.f32 %v2070_v2, %v2069_v18 }
 0x1c6   : > { %v2703_v23 = vpop.f32.mrb[20].mxu0 }
 0x1c7   : > { %v1811_v32 = vpop.f32.mrb[21].mxu0 }
 0x1ca   : > { %v2706_v63 = vpop.f32.mrb[22].mxu0 }
 0x1cb   : > { %v1821_v58 = vpop.f32.mrb[23].mxu0 }
 0x1d2   : > { %v3948_v31 = vpop.f32.mrb[24].mxu0 }
 0x1d3   : > { %v3950_v5 = vpop.f32.mrb[25].mxu0 }
 0x1da   : > { %v3952_v13 = vpop.f32.mrb[26].mxu0 }
 0x1db   : > { %v3954_v6 = vpop.f32.mrb[27].mxu0 }
 0x1e2   : > { %v3956_v41 = vpop.f32.mrb[28].mxu0 }
 0x1e3   : > { %v3958_v35 = vpop.f32.mrb[29].mxu0 }
 0x1e6   : > { %v2625_v38 = vpop.f32.mrb[16].mxu1  ;;  %v3960_v54 = vpop.f32.mrb[30].mxu0 }
 0x1e7   : > { %v2819_v60 = vadd.f32 %v2697_v27, %v2625_v38  ;;  %v1553_v53 = vpop.f32.mrb[17].mxu1  ;;  %v3962_v37 = vpop.f32.mrb[31].mxu0 }
 0x1e8   : > { %v2820_v1 = vadd.f32 %v1791_v19, %v1553_v53 }
 0x1e9   : > { %1919 = vst.msk [vmem:[%s3870_s14 + $0x88] sm:$0xff] %vm993_vm5, %v2819_v60  ;;  %v2026_v20 = vmul.f32 %v2819_v60, %v2819_v60  ;;  %v1973_v24 = vsel %vm993_vm5, %v2819_v60, 0.0 }
 0x1ea   : > { %1918 = vst.msk [vmem:[%s3870_s14 + $0x80] sm:$0xff] %vm993_vm5, %v2820_v1  ;;  %v1971_v7 = vsel %vm993_vm5, %v2820_v1, 0.0  ;;  %v2025_v30 = vmul.f32 %v2820_v1, %v2820_v1  ;;  %v2628_v25 = vpop.f32.mrb[18].mxu1 }
 0x1eb   : > { %v1972_v55 = vadd.f32 %v1971_v7, %v1970_v0  ;;  %v2821_v57 = vadd.f32 %v2700_v29, %v2628_v25  ;;  %v1563_v22 = vpop.f32.mrb[19].mxu1  ;;  %v2074_v28 = vsel %vm993_vm5, %v2026_v20, 0.0 }
 0x1ec   : > { %v2072_v26 = vsel %vm993_vm5, %v2025_v30, 0.0  ;;  %v2822_v59 = vadd.f32 %v1801_v8, %v1563_v22 }
 0x1ed   : > { %v2073_v4 = vadd.f32 %v2072_v26, %v2071_v10  ;;  %1921 = vst.msk [vmem:[%s3870_s14 + $0x98] sm:$0xff] %vm993_vm5, %v2821_v57  ;;  %v1974_v34 = vadd.f32 %v1973_v24, %v1972_v55  ;;  %v2028_v40 = vmul.f32 %v2821_v57, %v2821_v57  ;;  %v1977_v45 = vsel %vm993_vm5, %v2821_v57, 0.0 }
 0x1ee   : > { %1920 = vst.msk [vmem:[%s3870_s14 + $0x90] sm:$0xff] %vm993_vm5, %v2822_v59  ;;  %v1975_v42 = vsel %vm993_vm5, %v2822_v59, 0.0  ;;  %v2027_v39 = vmul.f32 %v2822_v59, %v2822_v59  ;;  %v2631_v51 = vpop.f32.mrb[20].mxu1 }
 0x1ef   : > { %v1976_v52 = vadd.f32 %v1975_v42, %v1974_v34  ;;  %v2075_v46 = vadd.f32 %v2074_v28, %v2073_v4  ;;  %v2823_v50 = vadd.f32 %v2703_v23, %v2631_v51  ;;  %v1573_v11 = vpop.f32.mrb[21].mxu1  ;;  %v2078_v12 = vsel %vm993_vm5, %v2028_v40, 0.0 }
 0x1f0   : > { %v2076_v48 = vsel %vm993_vm5, %v2027_v39, 0.0  ;;  %v2824_v16 = vadd.f32 %v1811_v32, %v1573_v11 }
 0x1f1   : > { %v2077_v47 = vadd.f32 %v2076_v48, %v2075_v46  ;;  %1923 = vst.msk [vmem:[%s3870_s14 + $0xa8] sm:$0xff] %vm993_vm5, %v2823_v50  ;;  %v1978_v56 = vadd.f32 %v1977_v45, %v1976_v52  ;;  %v2030_v61 = vmul.f32 %v2823_v50, %v2823_v50  ;;  %v1981_v62 = vsel %vm993_vm5, %v2823_v50, 0.0 }
 0x1f2   : > { %1922 = vst.msk [vmem:[%s3870_s14 + $0xa0] sm:$0xff] %vm993_vm5, %v2824_v16  ;;  %v1979_v3 = vsel %vm993_vm5, %v2824_v16, 0.0  ;;  %v2029_v14 = vmul.f32 %v2824_v16, %v2824_v16  ;;  %v2634_v36 = vpop.f32.mrb[22].mxu1 }
 0x1f3   : > { %v1980_v44 = vadd.f32 %v1979_v3, %v1978_v56  ;;  %v2079_v21 = vadd.f32 %v2078_v12, %v2077_v47  ;;  %v2825_v9 = vadd.f32 %v2706_v63, %v2634_v36  ;;  %v1583_v17 = vpop.f32.mrb[23].mxu1  ;;  %v2082_v15 = vsel %vm993_vm5, %v2030_v61, 0.0 }
 0x1f4   : > { %v2080_v27 = vsel %vm993_vm5, %v2029_v14, 0.0  ;;  %v2826_v43 = vadd.f32 %v1821_v58, %v1583_v17 }
 0x1f5   : > { %v2081_v49 = vadd.f32 %v2080_v27, %v2079_v21  ;;  %1925 = vst.msk [vmem:[%s3870_s14 + $0xb8] sm:$0xff] %vm993_vm5, %v2825_v9  ;;  %v1982_v19 = vadd.f32 %v1981_v62, %v1980_v44  ;;  %v2032_v33 = vmul.f32 %v2825_v9, %v2825_v9  ;;  %v1985_v32 = vsel %vm993_vm5, %v2825_v9, 0.0 }
 0x1f6   : > { %1924 = vst.msk [vmem:[%s3870_s14 + $0xb0] sm:$0xff] %vm993_vm5, %v2826_v43  ;;  %v1983_v18 = vsel %vm993_vm5, %v2826_v43, 0.0  ;;  %v2031_v0 = vmul.f32 %v2826_v43, %v2826_v43  ;;  %v2637_v2 = vpop.f32.mrb[24].mxu1 }
 0x1f7   : > { %v1984_v29 = vadd.f32 %v1983_v18, %v1982_v19  ;;  %v2083_v8 = vadd.f32 %v2082_v15, %v2081_v49  ;;  %v2827_v10 = vadd.f32 %v3948_v31, %v2637_v2  ;;  %v1593_v23 = vpop.f32.mrb[25].mxu1  ;;  %v2086_v53 = vsel %vm993_vm5, %v2032_v33, 0.0 }
 0x1f8   : > { %v2084_v63 = vsel %vm993_vm5, %v2031_v0, 0.0  ;;  %v2828_v58 = vadd.f32 %v3950_v5, %v1593_v23 }
 0x1f9   : > { %v2085_v38 = vadd.f32 %v2084_v63, %v2083_v8  ;;  %1927 = vst.msk [vmem:[%s3870_s14 + $0xc8] sm:$0xff] %vm993_vm5, %v2827_v10  ;;  %v1986_v60 = vadd.f32 %v1985_v32, %v1984_v29  ;;  %v2034_v1 = vmul.f32 %v2827_v10, %v2827_v10  ;;  %v1989_v57 = vsel %vm993_vm5, %v2827_v10, 0.0 }
 0x1fa   : > { %1926 = vst.msk [vmem:[%s3870_s14 + $0xc0] sm:$0xff] %vm993_vm5, %v2828_v58  ;;  %v1987_v31 = vsel %vm993_vm5, %v2828_v58, 0.0  ;;  %v2033_v20 = vmul.f32 %v2828_v58, %v2828_v58  ;;  %v2640_v7 = vpop.f32.mrb[26].mxu1 }
 0x1fb   : > { %v1988_v30 = vadd.f32 %v1987_v31, %v1986_v60  ;;  %v2087_v25 = vadd.f32 %v2086_v53, %v2085_v38  ;;  %v2829_v55 = vadd.f32 %v3952_v13, %v2640_v7  ;;  %v1603_v5 = vpop.f32.mrb[27].mxu1  ;;  %v2090_v4 = vsel %vm993_vm5, %v2034_v1, 0.0  ;;  %v2110_v31 = vld [vmem:[%s3033_s16] sm:$0x3] }
 0x1fc   : > { %v2088_v22 = vsel %vm993_vm5, %v2033_v20, 0.0  ;;  %v2830_v24 = vadd.f32 %v3954_v6, %v1603_v5 }
 0x1fd   : > { %v2089_v26 = vadd.f32 %v2088_v22, %v2087_v25  ;;  %1929 = vst.msk [vmem:[%s3870_s14 + $0xd8] sm:$0xff] %vm993_vm5, %v2829_v55  ;;  %v1990_v59 = vadd.f32 %v1989_v57, %v1988_v30  ;;  %v2036_v34 = vmul.f32 %v2829_v55, %v2829_v55  ;;  %v1993_v52 = vsel %vm993_vm5, %v2829_v55, 0.0 }
 0x1fe   : > { %1928 = vst.msk [vmem:[%s3870_s14 + $0xd0] sm:$0xff] %vm993_vm5, %v2830_v24  ;;  %v1991_v13 = vsel %vm993_vm5, %v2830_v24, 0.0  ;;  %v2035_v28 = vmul.f32 %v2830_v24, %v2830_v24  ;;  %v2643_v40 = vpop.f32.mrb[28].mxu1 }
 0x1ff   : > { %v1992_v42 = vadd.f32 %v1991_v13, %v1990_v59  ;;  %v2091_v39 = vadd.f32 %v2090_v4, %v2089_v26  ;;  %v2831_v51 = vadd.f32 %v3956_v41, %v2643_v40  ;;  %v1613_v6 = vpop.f32.mrb[29].mxu1  ;;  %v2094_v48 = vsel %vm993_vm5, %v2036_v34, 0.0 }
 0x200   : > { %v2092_v46 = vsel %vm993_vm5, %v2035_v28, 0.0  ;;  %v2832_v50 = vadd.f32 %v3958_v35, %v1613_v6 }
 0x201   : > { %v2093_v11 = vadd.f32 %v2092_v46, %v2091_v39  ;;  %1931 = vst.msk [vmem:[%s3870_s14 + $0xe8] sm:$0xff] %vm993_vm5, %v2831_v51  ;;  %v1994_v45 = vadd.f32 %v1993_v52, %v1992_v42  ;;  %v2038_v16 = vmul.f32 %v2831_v51, %v2831_v51  ;;  %v1997_v14 = vsel %vm993_vm5, %v2831_v51, 0.0 }
 0x202   : > { %1930 = vst.msk [vmem:[%s3870_s14 + $0xe0] sm:$0xff] %vm993_vm5, %v2832_v50  ;;  %v1995_v41 = vsel %vm993_vm5, %v2832_v50, 0.0  ;;  %v2037_v47 = vmul.f32 %v2832_v50, %v2832_v50  ;;  %v2646_v56 = vpop.f32.mrb[30].mxu1 }
 0x203   : > { %v1996_v12 = vadd.f32 %v1995_v41, %v1994_v45  ;;  %v2095_v61 = vadd.f32 %v2094_v48, %v2093_v11  ;;  %v2833_v3 = vadd.f32 %v3960_v54, %v2646_v56  ;;  %v1623_v35 = vpop.f32.mrb[31].mxu1  ;;  %v2098_v17 = vsel %vm993_vm5, %v2038_v16, 0.0 }
 0x204   : > { %v2096_v36 = vsel %vm993_vm5, %v2037_v47, 0.0  ;;  %v2834_v44 = vadd.f32 %v3962_v37, %v1623_v35 }
 0x205   : > { %v2097_v21 = vadd.f32 %v2096_v36, %v2095_v61  ;;  %1933 = vst.msk [vmem:[%s3870_s14 + $0xf8] sm:$0xff] %vm993_vm5, %v2833_v3  ;;  %v1998_v9 = vadd.f32 %v1997_v14, %v1996_v12  ;;  %v2040_v62 = vmul.f32 %v2833_v3, %v2833_v3  ;;  %v2001_v19 = vsel %vm993_vm5, %v2833_v3, 0.0 }
 0x206   : > { %1932 = vst.msk [vmem:[%s3870_s14 + $0xf0] sm:$0xff] %vm993_vm5, %v2834_v44  ;;  %v1999_v27 = vsel %vm993_vm5, %v2834_v44, 0.0  ;;  %v2039_v43 = vmul.f32 %v2834_v44, %v2834_v44 }
 0x207   : > { %v2000_v54 = vadd.f32 %v1999_v27, %v1998_v9  ;;  %v2099_v49 = vadd.f32 %v2098_v17, %v2097_v21  ;;  %v2102_v18 = vsel %vm993_vm5, %v2040_v62, 0.0 }
 0x208   : > { %v2100_v15 = vsel %vm993_vm5, %v2039_v43, 0.0 }
 0x209   : > { %v2002_v33 = vadd.f32 %v2001_v19, %v2000_v54  ;;  %v2101_v37 = vadd.f32 %v2100_v15, %v2099_v49 }
 0x20b   : > { %v2003_v0 = vrot.slane %v2002_v33, 4  ;;  %v2103_v2 = vadd.f32 %v2102_v18, %v2101_v37 }
 0x20d   : > { %v2004_v29 = vadd.f32 %v2003_v0, %v2002_v33  ;;  %v2104_v8 = vrot.slane %v2103_v2, 4 }
 0x20f   : > { %v2005_v10 = vrot.slane %v2004_v29, 2  ;;  %v2105_v23 = vadd.f32 %v2104_v8, %v2103_v2 }
 0x211   : > { %v2006_v32 = vadd.f32 %v2005_v10, %v2004_v29  ;;  %v2106_v63 = vrot.slane %v2105_v23, 2 }
 0x213   : > { %v2007_v58 = vrot.slane %v2006_v32, 1  ;;  %v2107_v38 = vadd.f32 %v2106_v63, %v2105_v23 }
 0x215   : > { %v2108_v60 = vrot.slane %v2107_v38, 1  ;;  %v2008_v53 = vadd.f32 %v2007_v58, %v2006_v32 }
 0x217   : > { %v2109_v1 = vadd.f32 %v2108_v60, %v2107_v38 }
 0x219   : > { %v2111_v20 = vsel %vm439_vm0, %v2008_v53, %v2109_v1 }
 0x21a   : > { %v2112_v7 = vadd.f32 %v2111_v20, %v2110_v31 }
 0x21c   : > { %2114 = vst.msk [vmem:[%s3033_s16] sm:$0x3] %vm1938_vm2, %v2112_v7 }
 0x21d PF: > { %s16_s20 = sadd.s32 1, %s2926_s20   ;;  %s4055_s18 = smov %s2922_s19 }
 0x21e   : > { %p13_p5 = scmp.ge.s32.totalorder %s16_s20, 4   ;;  %s4056_s19 = smov %s4058_s21 }
 0x220   :  { %15 = sbr.rel (!%p13_p5) target bundleno = 2 (0x2), region = 85 }

// kernel: tiny_ssd_forward.9
= control target key start
LH: loop header
LB: loop body
LE: loop exit
PB: predicated region body
PF: predicated region fallthrough
CT: control target
= control target key end

     0   :  { %s1910_s18 = smov 0   ;;  %s1912_s19 = smov 0   ;;  %s3005_s0 = inlined_call_operand.vmem [shape: f32[2,16,16,64], index: 0, kind: input, shape index: {}]   ;;  %s3006_s1 = inlined_call_operand.vmem [shape: f32[1,1,64], index: 1, kind: input, shape index: {}]   ;;  %s3007_s2 = inlined_call_operand.vmem [shape: f32[1,1,64], index: 2, kind: input, shape index: {}]   ;;  %s3008_s3 = inlined_call_operand.vmem [shape: f32[3,192,64], index: 3, kind: input, shape index: {}]   ;;  %s3009_s4 = inlined_call_operand.vmem [shape: f32[2,16,16,64], index: 4, kind: output, shape index: {0}]   ;;  %s3010_s5 = inlined_call_operand.vmem [shape: f32[2,2,64], index: 5, kind: output, shape index: {1}]  }
   0x1   :  { %s1914_s20 = smov 0   ;;  %s1916_s21 = smov 0  }
   0x2   :  { %s1918_s22 = smov 0  }
   0x3 LB: > { %s25_s23 = sadd.s32 1, %s1867_s20  ;;  %s28_s24 = sadd.s32 1, %s1871_s21  ;;  %s1875_s22 = sphi %s1918_s22, %s16_s22   ;;  %s1871_s21 = sphi %s1916_s21, %s3020_s21   ;;  %s1867_s20 = sphi %s1914_s20, %s3019_s20   ;;  %s1863_s19 = sphi %s1912_s19, %s3018_s19   ;;  %s1859_s18 = sphi %s1910_s18, %s3017_s18  }
   0x4   : > { %p26_p0 = scmp.ge.s32.totalorder %s25_s23, 2  ;;  %p1496_p1 = scmp.ge.s32.totalorder %s1875_s22, 1 }
   0x5   : > { %p204_p2 = scmp.lt.s32.totalorder %s1875_s22, 5 }
   0x6   : > { %s3022_s23 = smov (%p26_p0, %s25_s23), 0  ;;  %s3024_s24 = smov (!%p26_p0, %s28_s24), %s1871_s21 }
   0x7   : > { %p205_p3 = pnand %p1496_p1, %p204_p2  ;;  %p30_p4 = scmp.ge.s32.totalorder %s3024_s24, 2 }
   0x8   : > { %p241_p5 = scmp.lt.s32.totalorder (!%p205_p3), %s1863_s19, 1  ;;  %s1943_s25 = sshll.u32 (!%p205_p3), %s1859_s18, 3  ;;  %v1511_v0 = vld [vmem:[%s3008_s3 + $0xc0] sm:$0xff] (!%p205_p3)  ;;  %v1877_v1 = vmov (!%p205_p3), 0.0|0.0   ;;  %v1512_v2 = vld [vmem:[%s3008_s3 + $0xc8] sm:$0xff] (!%p205_p3)  ;;  %v1513_v7 = vld [vmem:[%s3008_s3 + $0xd0] sm:$0xff] (!%p205_p3) }
   0x9   : > { %s3026_s24 = smov (%p30_p4, %s3024_s24), 0  ;;  %208 = sbr.rel (%p205_p3) target bundleno = 520 (0x208), region = 36 }
   0xa   : > { %p249_p6 = scmp.lt.s32.totalorder (!%p205_p3), %s1943_s25, 15  ;;  %s1611_s26 = sshll.u32 (!%p205_p3), %s1859_s18, 7  ;;  %1612 = vmatprep.subr.bf16.mxu1 (!%p205_p3), %v1877_v1  ;;  %1648 = vmatprep.subr.bf16.mxu0 (!%p205_p3), %v1877_v1  ;;  %v644_v3 = vld [vmem:[%s3008_s3] sm:$0xff] (!%p205_p3)  ;;  %v645_v4 = vld [vmem:[%s3008_s3 + $0x8] sm:$0xff] (!%p205_p3)  ;;  %v1613_v5 = vpack.c.bf16 (!%p205_p3), %v1512_v2, %v1511_v0  ;;  %v1514_v8 = vld [vmem:[%s3008_s3 + $0xd8] sm:$0xff] (!%p205_p3)  ;;  %vm400_vm0 = vcmask (!%p205_p3), 1040384  }
   0xb   : > { %v1649_v6 = vpack.c.bf16 (!%p205_p3), %v645_v4, %v644_v3  ;;  %v646_v9 = vld [vmem:[%s3008_s3 + $0x10] sm:$0xff] (!%p205_p3)  ;;  %v647_v10 = vld [vmem:[%s3008_s3 + $0x18] sm:$0xff] (!%p205_p3)  ;;  %v1981_v11 = vld [vmem:[%s3008_s3 + $0xe0] sm:$0xff] (!%p205_p3)  ;;  %v1616_v14 = vpack.c.bf16 (!%p205_p3), %v1514_v8, %v1513_v7  ;;  %s1508_s28 = sadd.s32 (!%p205_p3), 4294967295, %s1943_s25  ;;  %p368_p7 = scmp.eq.s32.totalorder (!%p205_p3), %s1859_s18, 0  ;;  %vm497_vm1 = vcmask (!%p205_p3), 1046528  }
   0xc   : > { %v1986_v12 = vld [vmem:[%s3008_s3 + $0xe8] sm:$0xff] (!%p205_p3)  ;;  %v1996_v13 = vld [vmem:[%s3006_s1] ss:$0 sm:$0xff] (!%p205_p3)  ;;  %1614 = vmatpush1.bf16.msra.mxu1 (!%p205_p3), %v1613_v5  ;;  %v1652_v15 = vpack.c.bf16 (!%p205_p3), %v647_v10, %v646_v9  ;;  %v2007_v18 = vld [vmem:[%s3008_s3 + $0xf0] sm:$0xff] (!%p205_p3)  ;;  %p2089_p8 = scmp.gt.s32.totalorder (!%p205_p3), %s1508_s28, 0  ;;  %s1878_s8 = smov (!%p205_p3), 64  }
   0xd   : > { %1650 = vmatpush1.bf16.msra.mxu0 (!%p205_p3), %v1649_v6  ;;  %v648_v16 = vld [vmem:[%s3008_s3 + $0x20] sm:$0xff] (!%p205_p3)  ;;  %v649_v17 = vld [vmem:[%s3008_s3 + $0x28] sm:$0xff] (!%p205_p3)  ;;  %1615 = vmatprep.subr.bf16.mxu1 (!%p205_p3), %v1877_v1  ;;  %v2017_v19 = vld [vmem:[%s3008_s3 + $0xf8] sm:$0xff] (!%p205_p3)  ;;  %v1619_v26 = vpack.c.bf16 (!%p205_p3), %v1986_v12, %v1981_v11  ;;  %s345_s9 = sadd.s32 (!%p205_p3), 8, %s1943_s25  ;;  %p374_p10 = scmp.eq.s32.totalorder (!%p205_p3), %s1859_s18, 1  ;;  %vm538_vm4 = vcmask (!%p205_p3), 1045504  }
   0xe   : > { %1651 = vmatprep.subr.bf16.mxu0 (!%p205_p3), %v1877_v1  ;;  %v2022_v20 = vld [vmem:[%s3008_s3 + $0x30] sm:$0xff] (!%p205_p3)  ;;  %v2027_v21 = vld [vmem:[%s3008_s3 + $0x38] sm:$0xff] (!%p205_p3)  ;;  %v2037_v22 = vld [vmem:[%s3007_s2] ss:$0 sm:$0xff] (!%p205_p3)  ;;  %v1655_v27 = vpack.c.bf16 (!%p205_p3), %v649_v17, %v648_v16  ;;  %v1622_v34 = vpack.c.bf16 (!%p205_p3), %v2017_v19, %v2007_v18  ;;  %p2211_p9 = scmp.lt.s32.totalorder (!%p205_p3), %s345_s9, 15  ;;  %vm627_vm5 = vcmask (!%p205_p3), 523264  }
   0xf   : > { %v2042_v23 = vld [vmem:[%s3008_s3 + $0x100] sm:$0xff] (!%p205_p3)  ;;  %v2047_v24 = vld [vmem:[%s3008_s3 + $0x108] sm:$0xff] (!%p205_p3)  ;;  %v2069_v29 = vld [vmem:[%s3008_s3 + $0x110] sm:$0xff] (!%p205_p3)  ;;  %v1658_v35 = vpack.c.bf16 (!%p205_p3), %v2027_v21, %v2022_v20  ;;  %p1607_p11 = scmp.ne.s32.totalorder (!%p205_p3), %s1859_s18, 0 }
  0x10   : > { %s3028_s19 = smov (!%p241_p5, %s1863_s19), 1  ;;  %v2052_v25 = vld [vmem:[%s3008_s3 + $0x40] sm:$0xff]  ;;  %v2064_v28 = vld [vmem:[%s3008_s3 + $0x48] sm:$0xff]  ;;  %v2074_v30 = vld [vmem:[%s3008_s3 + $0x118] sm:$0xff]  ;;  %1617 = vmatpush1.bf16.msra.mxu1 %v1616_v14  ;;  %v1625_v36 = vpack.c.bf16 %v2047_v24, %v2042_v23  ;;  %s3030_s28 = smov (!%p2089_p8, %s1508_s28), 0 }
  0x11   : > { %s250_s10 = scalar_select %p249_p6, %s1943_s25, 15  ;;  %1653 = vmatpush1.bf16.msra.mxu0 %v1652_v15  ;;  %1618 = vmatprep.subr.bf16.mxu1 %v1877_v1  ;;  %v1661_v47 = vpack.c.bf16 %v2064_v28, %v2052_v25  ;;  %v1628_v51 = vpack.c.bf16 %v2074_v30, %v2069_v29 }
  0x12   : > { %s1610_s17 = sshll.u32 %s3028_s19, 8  ;;  %s1501_s27 = sshll.u32 %s3028_s19, 5  ;;  %1654 = vmatprep.subr.bf16.mxu0 %v1877_v1  ;;  %vm1268_vm6 = vcmask (!%p1607_p11), 517120  }
  0x13   : > { %s1991_s12 = scalar_lea.vmem %s3005_s0, %s1610_s17  ;;  %s1500_s13 = sshll.u32 %s250_s10, 1 }
  0x14   : > { %s2009_s6 = sadd.s32 %s1501_s27, %s1500_s13  ;;  %s1503_s7 = sshll.u32 %s3028_s19, 1  ;;  %1620 = vmatpush1.bf16.msra.mxu1 %v1619_v26 }
  0x15   : > { %s2032_s13 = scalar_lea.vmem %s3010_s5, %s1503_s7  ;;  %s2057_s7 = scalar_lea.vmem %s1991_s12, %s1611_s26  ;;  %1656 = vmatpush1.bf16.msra.mxu0 %v1655_v27  ;;  %1621 = vmatprep.subr.bf16.mxu1 %v1877_v1 }
  0x16   : > { %v266_v31 = vld [vmem:[%s2057_s7] sm:$0xff]  ;;  %v267_v32 = vld [vmem:[%s2057_s7 + $0x8] sm:$0xff]  ;;  %v268_v33 = vld [vmem:[%s2057_s7 + $0x10] sm:$0xff]  ;;  %s369_s30 = scalar_select %p368_p7, 1, 0  ;;  %1657 = vmatprep.subr.bf16.mxu0 %v1877_v1 }
  0x17   : > { %v288_v37 = vmul.f32 %v1996_v13, %v266_v31  ;;  %v289_v38 = vmul.f32 %v1996_v13, %v267_v32  ;;  %v269_v39 = vld [vmem:[%s2057_s7 + $0x18] sm:$0xff]  ;;  %v290_v40 = vmul.f32 %v1996_v13, %v268_v33  ;;  %v270_v41 = vld [vmem:[%s2057_s7 + $0x20] sm:$0xff]  ;;  %v271_v42 = vld [vmem:[%s2057_s7 + $0x28] sm:$0xff]  ;;  %s1509_s10 = sshll.u32 %s3030_s28, 4  ;;  %s3032_s9 = smov (!%p2211_p9, %s345_s9), 15 }
  0x18   : > { %v291_v43 = vmul.f32 %v1996_v13, %v269_v39  ;;  %v292_v44 = vmul.f32 %v1996_v13, %v270_v41  ;;  %v293_v45 = vmul.f32 %v1996_v13, %v271_v42  ;;  %v272_v46 = vld [vmem:[%s2057_s7 + $0x30] sm:$0xff]  ;;  %v370_v52 = vstv %s369_s30  ;;  %v273_v56 = vld [vmem:[%s2057_s7 + $0x38] sm:$0xff]  ;;  %s349_s17 = scalar_lea.vmem %s1991_s12, %s1509_s10  ;;  %1623 = vmatpush1.bf16.msra.mxu1 %v1622_v34  ;;  %s1510_s25 = sshll.u32 %s3032_s9, 4 }
  0x19   : > { %v310_v48 = vadd.f32 %v2037_v22, %v288_v37  ;;  %v311_v49 = vadd.f32 %v2037_v22, %v289_v38  ;;  %v312_v50 = vadd.f32 %v2037_v22, %v290_v40  ;;  %v294_v60 = vmul.f32 %v1996_v13, %v272_v46  ;;  %v350_v2 = vld [vmem:[%s349_s17] sm:$0xff]  ;;  %v351_v3 = vld [vmem:[%s349_s17 + $0x8] sm:$0xff]  ;;  %1659 = vmatpush1.bf16.msra.mxu0 %v1658_v35  ;;  %v277_v61 = vld [vmem:[%s2057_s7 + $0x58] sm:$0xff]  ;;  %s1502_s16 = sshll.u32 %s2009_s6, 3 }
  0x1a   : > { %v313_v53 = vadd.f32 %v2037_v22, %v291_v43  ;;  %v314_v54 = vadd.f32 %v2037_v22, %v292_v44  ;;  %v315_v55 = vadd.f32 %v2037_v22, %v293_v45  ;;  %vm2122_vm2 = vcmp.eq.s32.totalorder %v370_v52, 1  ;;  %1624 = vmatprep.subr.bf16.mxu1 %v1877_v1  ;;  %1660 = vmatprep.subr.bf16.mxu0 %v1877_v1 }
  0x1b   : > { %v326_v57 = vmax.f32 %v310_v48, 0.0  ;;  %v327_v58 = vmax.f32 %v311_v49, 0.0  ;;  %v328_v59 = vmax.f32 %v312_v50, 0.0  ;;  %v295_v7 = vmul.f32 %v1996_v13, %v273_v56  ;;  %v274_v48 = vld [vmem:[%s2057_s7 + $0x40] sm:$0xff] }
  0x1c   : > { %v329_v62 = vmax.f32 %v313_v53, 0.0  ;;  %v330_v63 = vmax.f32 %v314_v54, 0.0  ;;  %v331_v0 = vmax.f32 %v315_v55, 0.0  ;;  %v352_v8 = vmul.f32 %v1996_v13, %v350_v2  ;;  %1626 = vmatpush1.bf16.msra.mxu1 %v1625_v36  ;;  %v275_v54 = vld [vmem:[%s2057_s7 + $0x48] sm:$0xff]  ;;  %v276_v55 = vld [vmem:[%s2057_s7 + $0x50] sm:$0xff] }
  0x1d   : > { %v404_v4 = vrot.slane %v326_v57, 7  ;;  %v405_v5 = vrot.slane %v327_v58, 7  ;;  %v407_v6 = vrot.slane %v328_v59, 7  ;;  %v353_v9 = vmul.f32 %v1996_v13, %v351_v3  ;;  %1662 = vmatpush1.bf16.msra.mxu0 %v1661_v47  ;;  %1627 = vmatprep.subr.bf16.mxu1 %v1877_v1  ;;  %v278_v3 = vld [vmem:[%s2057_s7 + $0x60] sm:$0xff] }
  0x1e   : > { %v408_v10 = vrot.slane %v329_v62, 7  ;;  %v410_v11 = vrot.slane %v330_v63, 7  ;;  %v354_v17 = vadd.f32 %v2037_v22, %v352_v8  ;;  %v316_v27 = vadd.f32 %v2037_v22, %v294_v60  ;;  %1663 = vmatprep.subr.bf16.mxu0 %v1877_v1 }
  0x1f   : > { %v2130_v12 = vsel %vm400_vm0, %v404_v4, %v405_v5  ;;  %v2133_v14 = vsel %vm400_vm0, 0.0, %v404_v4  ;;  %v2136_v15 = vsel %vm400_vm0, %v405_v5, 0.0  ;;  %v2139_v16 = vsel %vm400_vm0, 0.0, %v407_v6 }
  0x20   : > { %v355_v18 = vadd.f32 %v2037_v22, %v353_v9  ;;  %v503_v19 = vrot.slane %v2133_v14, 1  ;;  %v504_v20 = vrot.slane %v2130_v12, 1  ;;  %v2148_v21 = vsel %vm400_vm0, %v407_v6, %v408_v10  ;;  %1629 = vmatpush1.bf16.msra.mxu1 %v1628_v51 }
  0x21   : > { %v508_v25 = vrot.slane %v2139_v16, 1  ;;  %v2152_v26 = vsel %vm400_vm0, %v408_v10, 0.0  ;;  %v356_v28 = vmax.f32 %v354_v17, 0.0  ;;  %v506_v32 = vrot.slane %v2136_v15, 1  ;;  %1630 = vmatprep.subr.bf16.mxu1 %v1877_v1  ;;  %v279_v17 = vld [vmem:[%s2057_s7 + $0x68] sm:$0xff] }
  0x22   : > { %v357_v31 = vmax.f32 %v355_v18, 0.0  ;;  %v509_v33 = vrot.slane %v2148_v21, 1  ;;  %v505_v34 = vsel %vm497_vm1, %v503_v19, %v504_v20  ;;  %v511_v35 = vrot.slane %v2152_v26, 1 }
  0x23   : > { %v411_v37 = vrot.slane %v331_v0, 7  ;;  %v2163_v38 = vsel %vm400_vm0, 0.0, %v410_v11  ;;  %v372_v39 = vsel %vm2122_vm2, 0.0, %v356_v28  ;;  %v317_v46 = vadd.f32 %v2037_v22, %v295_v7 }
  0x24   : > { %v373_v23 = vsel %vm2122_vm2, 0.0, %v357_v31  ;;  %v510_v24 = vsel %vm497_vm1, %v508_v25, %v509_v33  ;;  %v513_v36 = vrot.slane %v2163_v38, 1  ;;  %v401_v40 = vrot.slane %v372_v39, 7  ;;  %v280_v39 = vld [vmem:[%s2057_s7 + $0x70] sm:$0xff] }
  0x25   : > { %v402_v41 = vrot.slane %v373_v23, 7  ;;  %587 = vrot.lane.b32.xlu1 %v510_v24, %s1878_s8  ;;  %v512_v42 = vsel %vm497_vm1, %v509_v33, %v511_v35  ;;  %v2176_v43 = vsel %vm400_vm0, %v410_v11, %v411_v37  ;;  %v2180_v45 = vsel %vm400_vm0, %v411_v37, 0.0 }
  0x26   : > { %v514_v44 = vrot.slane %v2176_v43, 1  ;;  %v332_v47 = vmax.f32 %v316_v27, 0.0  ;;  %v2192_v50 = vsel %vm400_vm0, 0.0, %v401_v40  ;;  %v516_v53 = vrot.slane %v2180_v45, 1 }
  0x27   : > { %v2189_v49 = vsel %vm400_vm0, %v401_v40, %v402_v41  ;;  %v2195_v52 = vsel %vm400_vm0, %v402_v41, 0.0  ;;  %v498_v29 = vrot.slane %v2192_v50, 1  ;;  %v507_v56 = vsel %vm497_vm1, %v504_v20, %v506_v32 }
  0x28   : > { %v499_v30 = vrot.slane %v2189_v49, 1  ;;  %v501_v51 = vrot.slane %v2195_v52, 1  ;;  %v517_v57 = vsel %vm497_vm1, %v514_v44, %v516_v53  ;;  %v333_v58 = vmax.f32 %v317_v46, 0.0 }
  0x29   : > { %589 = vrot.lane.b32.xlu1 %v512_v42, %s1878_s8  ;;  %v413_v59 = vrot.slane %v332_v47, 7  ;;  %v296_v60 = vmul.f32 %v1996_v13, %v274_v48  ;;  %v297_v0 = vmul.f32 %v1996_v13, %v275_v54  ;;  %v298_v2 = vmul.f32 %v1996_v13, %v276_v55  ;;  %v281_v47 = vld [vmem:[%s2057_s7 + $0x78] sm:$0xff]  ;;  %s359_s7 = scalar_lea.vmem %s1991_s12, %s1510_s25 }
  0x2a   : > { %v500_v62 = vsel %vm497_vm1, %v498_v29, %v499_v30  ;;  %v502_v63 = vsel %vm497_vm1, %v499_v30, %v501_v51  ;;  %v515_v6 = vsel %vm497_vm1, %v513_v36, %v514_v44  ;;  %v414_v7 = vrot.slane %v333_v58, 7  ;;  %s2296_s12 = scalar_select %p374_p10, 1, 0 }
  0x2b   : > { %v1827_v4 = vpack.i.bf16 %v505_v34, %v500_v62  ;;  %v1832_v5 = vpack.i.bf16 %v507_v56, %v502_v63  ;;  %v2222_v8 = vsel %vm400_vm0, 0.0, %v413_v59  ;;  %v318_v9 = vadd.f32 %v2037_v22, %v296_v60 }
  0x2c   : > { %v319_v10 = vadd.f32 %v2037_v22, %v297_v0  ;;  %v299_v11 = vmul.f32 %v1996_v13, %v277_v61  ;;  %v2231_v18 = vsel %vm400_vm0, %v413_v59, %v414_v7  ;;  %v2234_v19 = vsel %vm400_vm0, %v414_v7, 0.0  ;;  %v654_v0 = vld [vmem:[%s3008_s3 + $0x50] sm:$0xff] }
  0x2d   : > { %1828 = vrot.lane.b32.xlu0 %v1827_v4, %s1878_s8  ;;  %593 = vrot.lane.b32.xlu1 %v517_v57, %s1878_s8  ;;  %v320_v20 = vadd.f32 %v2037_v22, %v298_v2  ;;  %v300_v25 = vmul.f32 %v1996_v13, %v278_v3  ;;  %v519_v27 = vrot.slane %v2231_v18, 1  ;;  %v521_v28 = vrot.slane %v2234_v19, 1  ;;  %v655_v2 = vld [vmem:[%s3008_s3 + $0x58] sm:$0xff] }
  0x2e   : > { %v334_v31 = vmax.f32 %v318_v9, 0.0  ;;  %v335_v32 = vmax.f32 %v319_v10, 0.0  ;;  %v321_v33 = vadd.f32 %v2037_v22, %v299_v11  ;;  %v301_v35 = vmul.f32 %v1996_v13, %v279_v17  ;;  %v360_v17 = vld [vmem:[%s359_s7] sm:$0xff] }
  0x2f   : > { %v336_v34 = vmax.f32 %v320_v20, 0.0  ;;  %v322_v37 = vadd.f32 %v2037_v22, %v300_v25  ;;  %v518_v23 = vrot.slane %v2222_v8, 1  ;;  %v522_v24 = vsel %vm497_vm1, %v519_v27, %v521_v28  ;;  %v361_v20 = vld [vmem:[%s359_s7 + $0x8] sm:$0xff] }
  0x30   : > { %v416_v36 = vrot.slane %v334_v31, 7  ;;  %v417_v40 = vrot.slane %v335_v32, 7  ;;  %v337_v41 = vmax.f32 %v321_v33, 0.0  ;;  %v323_v44 = vadd.f32 %v2037_v22, %v301_v35 }
  0x31   : > { %1833 = vrot.lane.b32.xlu0 %v1832_v5, %s1878_s8  ;;  %597 = vrot.lane.b32.xlu1 %v522_v24, %s1878_s8  ;;  %v419_v42 = vrot.slane %v336_v34, 7  ;;  %v338_v46 = vmax.f32 %v322_v37, 0.0  ;;  %v302_v55 = vmul.f32 %v1996_v13, %v280_v39  ;;  %v303_v60 = vmul.f32 %v1996_v13, %v281_v47  ;;  %v1523_v37 = vld [vmem:[%s3008_s3 + $0x120] sm:$0xff]  ;;  %v1524_v39 = vld [vmem:[%s3008_s3 + $0x128] sm:$0xff] }
  0x32   : > { %v2258_v48 = vsel %vm400_vm0, %v416_v36, %v417_v40  ;;  %v2261_v53 = vsel %vm400_vm0, 0.0, %v416_v36  ;;  %v2264_v54 = vsel %vm400_vm0, %v417_v40, 0.0  ;;  %v420_v56 = vrot.slane %v337_v41, 7  ;;  %v656_v41 = vld [vmem:[%s3008_s3 + $0x60] sm:$0xff] }
  0x33   : > { %v523_v29 = vrot.slane %v2261_v53, 1  ;;  %v524_v30 = vrot.slane %v2258_v48, 1  ;;  %v526_v51 = vrot.slane %v2264_v54, 1  ;;  %v2272_v57 = vsel %vm400_vm0, 0.0, %v419_v42 }
  0x34   : > { %v339_v58 = vmax.f32 %v323_v44, 0.0  ;;  %v422_v59 = vrot.slane %v338_v46, 7  ;;  %v520_v61 = vsel %vm497_vm1, %v518_v23, %v519_v27  ;;  %v2280_v63 = vsel %vm400_vm0, %v419_v42, %v420_v56  ;;  %v657_v42 = vld [vmem:[%s3008_s3 + $0x68] sm:$0xff] }
  0x35   : > { %591 = vrot.lane.b32.xlu0 %v515_v6, %s1878_s8  ;;  %v527_v62 = vsel %vm497_vm1, %v524_v30, %v526_v51  ;;  %v525_v3 = vsel %vm497_vm1, %v523_v29, %v524_v30  ;;  %v528_v4 = vrot.slane %v2272_v57, 1  ;;  %v2292_v5 = vsel %vm400_vm0, %v420_v56, 0.0 }
  0x36   : > { %601 = vrot.lane.b32.xlu1 %v527_v62, %s1878_s8  ;;  %v423_v6 = vrot.slane %v339_v58, 7  ;;  %v529_v7 = vrot.slane %v2280_v63, 1  ;;  %v531_v9 = vrot.slane %v2292_v5, 1  ;;  %v324_v10 = vadd.f32 %v2037_v22, %v302_v55  ;;  %v1526_v55 = vld [vmem:[%s3008_s3 + $0x138] sm:$0xff]  ;;  %v658_v58 = vld [vmem:[%s3008_s3 + $0x70] sm:$0xff] }
  0x37   : > { %v325_v11 = vadd.f32 %v2037_v22, %v303_v60  ;;  %v2306_v27 = vsel %vm400_vm0, 0.0, %v422_v59  ;;  %v1664_v31 = vpack.c.bf16 %v655_v2, %v654_v0  ;;  %v362_v24 = vmul.f32 %v1996_v13, %v360_v17  ;;  %v1528_v17 = vld [vmem:[%s3008_s3 + $0x148] sm:$0xff] }
  0x38   : > { %v2303_v25 = vsel %vm400_vm0, %v422_v59, %v423_v6  ;;  %v2309_v28 = vsel %vm400_vm0, %v423_v6, 0.0  ;;  %v532_v32 = vsel %vm497_vm1, %v529_v7, %v531_v9  ;;  %v340_v35 = vmax.f32 %v324_v10, 0.0  ;;  %v659_v59 = vld [vmem:[%s3008_s3 + $0x78] sm:$0xff] }
  0x39   : > { %595 = vrot.lane.b32.xlu0 %v520_v61, %s1878_s8  ;;  %v534_v33 = vrot.slane %v2303_v25, 1  ;;  %v536_v34 = vrot.slane %v2309_v28, 1  ;;  %v341_v23 = vmax.f32 %v325_v11, 0.0  ;;  %1665 = vmatpush1.bf16.msra.mxu0 %v1664_v31  ;;  %v363_v36 = vmul.f32 %v1996_v13, %v361_v20  ;;  %v1525_v13 = vld [vmem:[%s3008_s3 + $0x130] sm:$0xff]  ;;  %v660_v20 = vld [vmem:[%s3008_s3 + $0x80] sm:$0xff]  ;;  %v661_v31 = vld [vmem:[%s3008_s3 + $0x88] sm:$0xff] }
  0x3a   : > { %605 = vrot.lane.b32.xlu1 %v532_v32, %s1878_s8  ;;  %v376_v40 = vstv %s2296_s12  ;;  %v533_v44 = vrot.slane %v2306_v27, 1  ;;  %v425_v47 = vrot.slane %v340_v35, 7  ;;  %1666 = vmatprep.subr.bf16.mxu0 %v1877_v1  ;;  %v364_v30 = vadd.f32 %v2037_v22, %v362_v24  ;;  %v1529_v35 = vld [vmem:[%s3008_s3 + $0x150] sm:$0xff] }
  0x3b   : > { %v537_v46 = vsel %vm497_vm1, %v534_v33, %v536_v34  ;;  %v426_v29 = vrot.slane %v341_v23, 7  ;;  %v365_v51 = vadd.f32 %v2037_v22, %v363_v36  ;;  %v1631_v56 = vpack.c.bf16 %v1524_v39, %v1523_v37  ;;  %v1530_v37 = vld [vmem:[%s3008_s3 + $0x158] sm:$0xff] }
  0x3c   : > { %v530_v60 = vsel %vm497_vm1, %v528_v4, %v529_v7  ;;  %v2351_v61 = vsel %vm400_vm0, 0.0, %v425_v47  ;;  %vm2353_vm3 = vcmp.eq.s32.totalorder %v376_v40, 1  ;;  %v1667_v22 = vpack.c.bf16 %v657_v42, %v656_v41  ;;  %v1527_v4 = vld [vmem:[%s3008_s3 + $0x140] sm:$0xff] }
  0x3d   : > { %599 = vrot.lane.b32.xlu0 %v525_v3, %s1878_s8  ;;  %v2359_v0 = vsel %vm400_vm0, %v425_v47, %v426_v29  ;;  %v2362_v2 = vsel %vm400_vm0, %v426_v29, 0.0  ;;  %v366_v6 = vmax.f32 %v364_v30, 0.0  ;;  %1632 = vmatpush1.bf16.msra.mxu1 %v1631_v56  ;;  %v1634_v3 = vpack.c.bf16 %v1526_v55, %v1525_v13  ;;  %v662_v29 = vld [vmem:[%s3008_s3 + $0x90] sm:$0xff]  ;;  %v663_v30 = vld [vmem:[%s3008_s3 + $0x98] sm:$0xff] }
  0x3e   : > { %609 = vrot.lane.b32.xlu1 %v537_v46, %s1878_s8  ;;  %v671_v7 = vrot.slane %v2359_v0, 1  ;;  %v673_v9 = vrot.slane %v2362_v2, 1  ;;  %v367_v10 = vmax.f32 %v365_v51, 0.0  ;;  %1668 = vmatpush1.bf16.msra.mxu0 %v1667_v22  ;;  %v1670_v11 = vpack.c.bf16 %v659_v59, %v658_v58 }
  0x3f   : > { %1633 = vmatprep.subr.bf16.mxu1 %v1877_v1  ;;  %v670_v32 = vrot.slane %v2351_v61, 1  ;;  %v378_v34 = vsel %vm2353_vm3, 0.0, %v366_v6  ;;  %1669 = vmatprep.subr.bf16.mxu0 %v1877_v1  ;;  %v535_v36 = vsel %vm497_vm1, %v533_v44, %v534_v33  ;;  %v1637_v41 = vpack.c.bf16 %v1528_v17, %v1527_v4 }
  0x40   : > { %v674_v39 = vsel %vm497_vm1, %v671_v7, %v673_v9  ;;  %v379_v23 = vsel %vm2353_vm3, 0.0, %v367_v10  ;;  %v428_v24 = vrot.slane %v378_v34, 7  ;;  %v1673_v42 = vpack.c.bf16 %v661_v31, %v660_v20  ;;  %v1532_v9 = vld [vmem:[%s3008_s3 + $0x168] sm:$0xff] }
  0x41   : > { %603 = vrot.lane.b32.xlu0 %v530_v60, %s1878_s8  ;;  %v429_v40 = vrot.slane %v379_v23, 7  ;;  %1635 = vmatpush1.bf16.msra.mxu1 %v1634_v3  ;;  %v1640_v47 = vpack.c.bf16 %v1530_v37, %v1529_v35  ;;  %v544_v13 = vrot.slane %v2133_v14, 2  ;;  %v672_v55 = vsel %vm497_vm1, %v670_v32, %v671_v7  ;;  %v1531_v7 = vld [vmem:[%s3008_s3 + $0x160] sm:$0xff] }
  0x42   : > { %682 = vrot.lane.b32.xlu1 %v674_v39, %s1878_s8  ;;  %v2396_v46 = vsel %vm400_vm0, 0.0, %v428_v24  ;;  %1671 = vmatpush1.bf16.msra.mxu0 %v1670_v11  ;;  %v545_v51 = vrot.slane %v2130_v12, 2  ;;  %v539_v60 = vrot.slane %v2192_v50, 2  ;;  %v540_v22 = vrot.slane %v2189_v49, 2  ;;  %v665_v11 = vld [vmem:[%s3008_s3 + $0xa8] sm:$0xff] }
  0x43   : > { %1636 = vmatprep.subr.bf16.mxu1 %v1877_v1  ;;  %v2402_v33 = vsel %vm400_vm0, %v428_v24, %v429_v40  ;;  %v2405_v44 = vsel %vm400_vm0, %v429_v40, 0.0  ;;  %1672 = vmatprep.subr.bf16.mxu0 %v1877_v1  ;;  %v1041_v56 = vrot.slane %v2396_v46, 1  ;;  %v547_v6 = vrot.slane %v2136_v15, 2  ;;  %v664_v15 = vld [vmem:[%s3008_s3 + $0xa0] sm:$0xff]  ;;  %v1533_v24 = vld [vmem:[%s3008_s3 + $0x170] sm:$0xff]  ;;  %v667_v40 = vld [vmem:[%s3008_s3 + $0xb8] sm:$0xff] }
  0x44   : > { %v1042_v58 = vrot.slane %v2402_v33, 1  ;;  %v1044_v59 = vrot.slane %v2405_v44, 1  ;;  %v2421_v62 = vsel %vm538_vm4, %v544_v13, %v545_v51  ;;  %v1676_v4 = vpack.c.bf16 %v663_v30, %v662_v29 }
  0x45   : > { %607 = vrot.lane.b32.xlu0 %v535_v36, %s1878_s8  ;;  %1638 = vmatpush1.bf16.msra.mxu1 %v1637_v41  ;;  %v542_v10 = vrot.slane %v2195_v52, 2  ;;  %v541_v17 = vsel %vm538_vm4, %v539_v60, %v540_v22  ;;  %v2444_v20 = vsel %vm538_vm4, %v545_v51, %v547_v6  ;;  %v550_v31 = vrot.slane %v2148_v21, 2 }
  0x46   : > { %v1045_v3 = vsel %vm497_vm1, %v1042_v58, %v1044_v59  ;;  %1674 = vmatpush1.bf16.msra.mxu0 %v1673_v42  ;;  %1639 = vmatprep.subr.bf16.mxu1 %v1877_v1  ;;  %v552_v32 = vrot.slane %v2152_v26, 2  ;;  %v1043_v34 = vsel %vm497_vm1, %v1041_v56, %v1042_v58  ;;  %v1643_v35 = vpack.c.bf16 %v1532_v9, %v1531_v7  ;;  %v1534_v26 = vld [vmem:[%s3008_s3 + $0x178] sm:$0xff]  ;;  %v1567_v9 = vld [vmem:[%s3008_s3 + $0x180] sm:$0xff] }
  0x47   : > { %1053 = vrot.lane.b32.xlu1 %v1045_v3, %s1878_s8  ;;  %1675 = vmatprep.subr.bf16.mxu0 %v1877_v1  ;;  %v2450_v52 = vsel %vm538_vm4, %v540_v22, %v542_v10  ;;  %v555_v37 = vrot.slane %v2176_v43, 2  ;;  %v557_v39 = vrot.slane %v2180_v45, 2  ;;  %v1679_v23 = vpack.c.bf16 %v665_v11, %v664_v15  ;;  %v666_v45 = vld [vmem:[%s3008_s3 + $0xb0] sm:$0xff] }
  0x48   : > { %1535 = vmatprep.mubr.msk.f32.mxu1 %vm627_vm5, %v2421_v62  ;;  %1551 = vmatprep.mubr.msk.f32.mxu0 %vm627_vm5, %v541_v17  ;;  %v2468_v36 = vsel %vm538_vm4, %v550_v31, %v552_v32  ;;  %v560_v42 = vrot.slane %v2231_v18, 2  ;;  %v1646_v13 = vpack.c.bf16 %v1534_v26, %v1533_v24  ;;  %v565_v29 = vrot.slane %v2258_v48, 2  ;;  %v1570_v32 = vld [vmem:[%s3008_s3 + $0x198] sm:$0xff] }
  0x49   : > { %680 = vrot.lane.b32.xlu0 %v672_v55, %s1878_s8  ;;  %1641 = vmatpush1.bf16.msra.mxu1 %v1640_v47  ;;  %v2480_v41 = vsel %vm538_vm4, %v555_v37, %v557_v39  ;;  %v562_v47 = vrot.slane %v2234_v19, 2  ;;  %v567_v30 = vrot.slane %v2264_v54, 2  ;;  %v1682_v51 = vpack.c.bf16 %v667_v40, %v666_v45 }
  0x4a   : > { %1677 = vmatpush1.bf16.msra.mxu0 %v1676_v4  ;;  %1642 = vmatprep.subr.bf16.mxu1 %v1877_v1  ;;  %v570_v56 = vrot.slane %v2280_v63, 2  ;;  %v572_v19 = vrot.slane %v2292_v5, 2  ;;  %v575_v54 = vrot.slane %v2303_v25, 2  ;;  %v577_v5 = vrot.slane %v2309_v28, 2 }
  0x4b   : > { %1678 = vmatprep.subr.bf16.mxu0 %v1877_v1  ;;  %v2488_v55 = vsel %vm538_vm4, %v560_v42, %v562_v47  ;;  %v2499_v58 = vsel %vm538_vm4, %v565_v29, %v567_v30  ;;  %v676_v22 = vrot.slane %v2359_v0, 2  ;;  %v678_v6 = vrot.slane %v2362_v2, 2  ;;  %v1568_v2 = vld [vmem:[%s3008_s3 + $0x188] sm:$0xff] }
  0x4c   : > { %v2504_v59 = vsel %vm538_vm4, %v570_v56, %v572_v19  ;;  %v2513_v60 = vsel %vm538_vm4, %v575_v54, %v577_v5  ;;  %v1047_v4 = vrot.slane %v2402_v33, 2  ;;  %v1049_v28 = vrot.slane %v2405_v44, 2  ;;  %v1569_v44 = vld [vmem:[%s3008_s3 + $0x190] sm:$0xff] }
  0x4d   : > { %1051 = vrot.lane.b32.xlu0 %v1043_v34, %s1878_s8  ;;  %1644 = vmatpush1.bf16.msra.mxu1 %v1643_v35  ;;  %v2520_v3 = vsel %vm538_vm4, %v676_v22, %v678_v6  ;;  %v1685_v17 = vpack.c.bf16 %v1568_v2, %v1567_v9  ;;  %v549_v39 = vrot.slane %v2139_v16, 2  ;;  %v1688_v40 = vpack.c.bf16 %v1570_v32, %v1569_v44  ;;  %v1579_v32 = vld [vmem:[%s3008_s3 + $0x1e0] sm:$0xff]  ;;  %s2851_s8 = scalar_lea.vmem %s3009_s4, %s1502_s16 }
  0x4e   : > { %1680 = vmatpush1.bf16.msra.mxu0 %v1679_v23  ;;  %1645 = vmatprep.subr.bf16.mxu1 %v1877_v1  ;;  %v2527_v7 = vsel %vm538_vm4, %v1047_v4, %v1049_v28  ;;  %v554_v30 = vrot.slane %v2163_v38, 2  ;;  %v559_v2 = vrot.slane %v2222_v8, 2 }
  0x4f   : > { %1681 = vmatprep.subr.bf16.mxu0 %v1877_v1  ;;  %v2559_v47 = vsel %vm538_vm4, %v549_v39, %v550_v31 }
  0x50   : > { %v2596_v5 = vsel %vm538_vm4, %v554_v30, %v555_v37 }
  0x51   : > { %1647 = vmatpush1.bf16.msra.mxu1 %v1646_v13  ;;  %v1571_v13 = vld [vmem:[%s3008_s3 + $0x1a0] sm:$0xff] }
  0x52   : > { %1683 = vmatpush1.bf16.msra.mxu0 %v1682_v51  ;;  %1720 = vmatprep.subr.bf16.mxu1 %v1877_v1  ;;  %v1573_v51 = vld [vmem:[%s3008_s3 + $0x1b0] sm:$0xff] }
  0x53   : > { %1684 = vmatprep.subr.bf16.mxu0 %v1877_v1 }
  0x97   : > { %v588_v24 = vpop.permute.xlu1 %587 }
  0x9f   : > { %v1829_v10 = vpop.permute.xlu0 %1828 }
  0xa0   : > { %v1831_v15 = vunpack.i.h.bf16 %v1829_v10  ;;  %v1830_v11 = vunpack.i.l.bf16 %v1829_v10  ;;  %v1577_v10 = vld [vmem:[%s3008_s3 + $0x1d0] sm:$0xff] }
  0xa2   : > { %v630_v34 = vsel %vm627_vm5, %v2133_v14, %v1831_v15  ;;  %v628_v35 = vsel %vm627_vm5, %v2192_v50, %v1830_v11  ;;  %v1578_v15 = vld [vmem:[%s3008_s3 + $0x1d8] sm:$0xff] }
  0xa3   : > { %v1834_v23 = vpop.permute.xlu0 %1833  ;;  %810 = vmatmul.mubr.f32.vlgmr.msra.gmra.mrb[0].mxu1 %v630_v34  ;;  %959 = vmatmul.mubr.f32.vlgmr.msra.gmra.mrb[0].mxu0 %v628_v35  ;;  %v1700_v44 = vpack.c.bf16 %v1578_v15, %v1577_v10  ;;  %v564_v35 = vrot.slane %v2261_v53, 2 }
  0xa4   : > { %v1836_v26 = vunpack.i.h.bf16 %v1834_v23  ;;  %v1835_v45 = vunpack.i.l.bf16 %v1834_v23  ;;  %1686 = vmatpush1.bf16.msra.mxu0 %v1685_v17  ;;  %1732 = vmatpush1.bf16.msra.mxu1 %v1685_v17  ;;  %v2637_v17 = vsel %vm538_vm4, %v559_v2, %v560_v42  ;;  %v1581_v23 = vld [vmem:[%s3008_s3 + $0x1f0] sm:$0xff] }
  0xa5   : > { %1536 = vmatprep.mubr.msk.f32.mxu1 %vm627_vm5, %v2444_v20  ;;  %1552 = vmatprep.mubr.msk.f32.mxu0 %vm627_vm5, %v2450_v52  ;;  %v590_v52 = vpop.permute.xlu1 %589 }
  0xa6   : > { %v631_v14 = vsel %vm627_vm5, %v2130_v12, %v1836_v26  ;;  %v629_v50 = vsel %vm627_vm5, %v2189_v49, %v1835_v45  ;;  %1687 = vmatprep.subr.bf16.mxu0 %v1877_v1  ;;  %1721 = vmatprep.subr.bf16.mxu1 %v1877_v1  ;;  %v1572_v12 = vld [vmem:[%s3008_s3 + $0x1a8] sm:$0xff]  ;;  %v2569_v49 = vsel %vm627_vm5, %v2139_v16, %v588_v24  ;;  %v1574_v16 = vld [vmem:[%s3008_s3 + $0x1b8] sm:$0xff] }
  0xa7   : > { %815 = vmatmul.mubr.f32.gmra.mrb[2].mxu1 %v631_v14  ;;  %964 = vmatmul.mubr.f32.gmra.mrb[2].mxu0 %v629_v50  ;;  %v1691_v31 = vpack.c.bf16 %v1572_v12, %v1571_v13  ;;  %v592_v19 = vpop.permute.xlu0 %591  ;;  %v1694_v6 = vpack.c.bf16 %v1574_v16, %v1573_v51  ;;  %v1582_v24 = vld [vmem:[%s3008_s3 + $0x1f8] sm:$0xff]  ;;  %v2679_v45 = vsel %vm538_vm4, %v564_v35, %v565_v29  ;;  %v569_v13 = vrot.slane %v2272_v57, 2 }
  0xa8   : > { %1689 = vmatpush1.bf16.msra.mxu0 %v1688_v40  ;;  %1733 = vmatpush1.bf16.msra.mxu1 %v1688_v40  ;;  %v2613_v37 = vsel %vm627_vm5, %v2163_v38, %v592_v19  ;;  %v1706_v40 = vpack.c.bf16 %v1582_v24, %v1581_v23  ;;  %v1587_v19 = vld [vmem:[%s3008_s3 + $0x220] sm:$0xff] }
  0xa9   : > { %1537 = vmatprep.mubr.msk.f32.mxu1 %vm627_vm5, %v2559_v47  ;;  %1553 = vmatprep.mubr.msk.f32.mxu0 %vm627_vm5, %v2421_v62  ;;  %v2591_v62 = vsel %vm627_vm5, %v2148_v21, %v590_v52  ;;  %v1576_v21 = vld [vmem:[%s3008_s3 + $0x1c8] sm:$0xff]  ;;  %v594_v28 = vpop.permute.xlu1 %593  ;;  %v1585_v52 = vld [vmem:[%s3008_s3 + $0x210] sm:$0xff]  ;;  %v2721_v51 = vsel %vm538_vm4, %v569_v13, %v570_v56 }
  0xaa   : > { %1690 = vmatprep.subr.bf16.mxu0 %v1877_v1  ;;  %1722 = vmatprep.subr.bf16.mxu1 %v1877_v1  ;;  %v2632_v38 = vsel %vm627_vm5, %v2176_v43, %v594_v28  ;;  %v1580_v43 = vld [vmem:[%s3008_s3 + $0x1e8] sm:$0xff]  ;;  %v1589_v28 = vld [vmem:[%s3008_s3 + $0x230] sm:$0xff] }
  0xab   : > { %820 = vmatmul.mubr.f32.gmra.mrb[4].mxu1 %v2569_v49  ;;  %969 = vmatmul.mubr.f32.gmra.mrb[4].mxu0 %v630_v34  ;;  %v596_v11 = vpop.permute.xlu0 %595  ;;  %v1703_v39 = vpack.c.bf16 %v1580_v43, %v1579_v32 }
  0xac   : > { %1538 = vmatprep.mubr.msk.f32.mxu1 %vm627_vm5, %v2468_v36  ;;  %1554 = vmatprep.mubr.msk.f32.mxu0 %vm627_vm5, %v2444_v20  ;;  %v1575_v20 = vld [vmem:[%s3008_s3 + $0x1c0] sm:$0xff]  ;;  %v2655_v42 = vsel %vm627_vm5, %v2222_v8, %v596_v11 }
  0xad   : > { %1692 = vmatpush1.bf16.msra.mxu0 %v1691_v31  ;;  %1734 = vmatpush1.bf16.msra.mxu1 %v1691_v31  ;;  %v1697_v9 = vpack.c.bf16 %v1576_v21, %v1575_v20  ;;  %v598_v34 = vpop.permute.xlu1 %597  ;;  %v1586_v31 = vld [vmem:[%s3008_s3 + $0x218] sm:$0xff]  ;;  %v574_v20 = vrot.slane %v2306_v27, 2 }
  0xae   : > { %1693 = vmatprep.subr.bf16.mxu0 %v1877_v1  ;;  %1723 = vmatprep.subr.bf16.mxu1 %v1877_v1  ;;  %v2674_v8 = vsel %vm627_vm5, %v2231_v18, %v598_v34  ;;  %v1584_v18 = vld [vmem:[%s3008_s3 + $0x208] sm:$0xff]  ;;  %v1712_v16 = vpack.c.bf16 %v1586_v31, %v1585_v52 }
  0xaf   : > { %825 = vmatmul.mubr.f32.gmra.mrb[6].mxu1 %v2591_v62  ;;  %974 = vmatmul.mubr.f32.gmra.mrb[6].mxu0 %v631_v14  ;;  %v600_v26 = vpop.permute.xlu0 %599  ;;  %v1583_v14 = vld [vmem:[%s3008_s3 + $0x200] sm:$0xff]  ;;  %v576_v10 = vsel %vm538_vm4, %v574_v20, %v575_v54  ;;  %v675_v54 = vrot.slane %v2351_v61, 2 }
  0xb0   : > { %1539 = vmatprep.mubr.msk.f32.mxu1 %vm627_vm5, %v2596_v5  ;;  %1555 = vmatprep.mubr.msk.f32.mxu0 %vm627_vm5, %v2559_v47  ;;  %v2697_v29 = vsel %vm627_vm5, %v2261_v53, %v600_v26  ;;  %v1709_v12 = vpack.c.bf16 %v1584_v18, %v1583_v14 }
  0xb1   : > { %1695 = vmatpush1.bf16.msra.mxu0 %v1694_v6  ;;  %1735 = vmatpush1.bf16.msra.mxu1 %v1694_v6  ;;  %v602_v50 = vpop.permute.xlu1 %601 }
  0xb2   : > { %1696 = vmatprep.subr.bf16.mxu0 %v1877_v1  ;;  %1724 = vmatprep.subr.bf16.mxu1 %v1877_v1  ;;  %v2716_v53 = vsel %vm627_vm5, %v2258_v48, %v602_v50  ;;  %v1588_v48 = vld [vmem:[%s3008_s3 + $0x228] sm:$0xff] }
  0xb3   : > { %830 = vmatmul.mubr.f32.gmra.mrb[8].mxu1 %v2613_v37  ;;  %979 = vmatmul.mubr.f32.gmra.mrb[8].mxu0 %v2569_v49  ;;  %v604_v30 = vpop.permute.xlu0 %603  ;;  %v1715_v21 = vpack.c.bf16 %v1588_v48, %v1587_v19 }
  0xb4   : > { %1540 = vmatprep.mubr.msk.f32.mxu1 %vm627_vm5, %v2480_v41  ;;  %1556 = vmatprep.mubr.msk.f32.mxu0 %vm627_vm5, %v2468_v36  ;;  %v640_v56 = vsel %vm627_vm5, %v2272_v57, %v604_v30 }
  0xb5   : > { %1698 = vmatpush1.bf16.msra.mxu0 %v1697_v9  ;;  %1736 = vmatpush1.bf16.msra.mxu1 %v1697_v9  ;;  %v606_v6 = vpop.permute.xlu1 %605  ;;  %v1590_v9 = vld [vmem:[%s3008_s3 + $0x238] sm:$0xff] }
  0xb6   : > { %1699 = vmatprep.subr.bf16.mxu0 %v1877_v1  ;;  %1725 = vmatprep.subr.bf16.mxu1 %v1877_v1  ;;  %v641_v57 = vsel %vm627_vm5, %v2280_v63, %v606_v6  ;;  %v1718_v15 = vpack.c.bf16 %v1590_v9, %v1589_v28 }
  0xb7   : > { %835 = vmatmul.mubr.f32.gmra.mrb[10].mxu1 %v2632_v38  ;;  %984 = vmatmul.mubr.f32.gmra.mrb[10].mxu0 %v2591_v62  ;;  %v608_v2 = vpop.permute.xlu0 %607 }
  0xb8   : > { %1541 = vmatprep.mubr.msk.f32.mxu1 %vm627_vm5, %v2637_v17  ;;  %1557 = vmatprep.mubr.msk.f32.mxu0 %vm627_vm5, %v2596_v5  ;;  %v642_v63 = vsel %vm627_vm5, %v2306_v27, %v608_v2  ;;  %v677_v27 = vsel %vm538_vm4, %v675_v54, %v676_v22 }
  0xb9   : > { %1701 = vmatpush1.bf16.msra.mxu0 %v1700_v44  ;;  %1737 = vmatpush1.bf16.msra.mxu1 %v1700_v44  ;;  %v610_v11 = vpop.permute.xlu1 %609 }
  0xba   : > { %1702 = vmatprep.subr.bf16.mxu0 %v1877_v1  ;;  %1726 = vmatprep.subr.bf16.mxu1 %v1877_v1 }
  0xbb   : > { %840 = vmatmul.mubr.f32.gmra.mrb[12].mxu1 %v2655_v42  ;;  %989 = vmatmul.mubr.f32.gmra.mrb[12].mxu0 %v2613_v37  ;;  %v681_v44 = vpop.permute.xlu0 %680 }
  0xbc   : > { %1542 = vmatprep.mubr.msk.f32.mxu1 %vm627_vm5, %v2488_v55  ;;  %1558 = vmatprep.mubr.msk.f32.mxu0 %vm627_vm5, %v2480_v41  ;;  %v686_v32 = vsel %vm627_vm5, %v2351_v61, %v681_v44  ;;  %v1046_v61 = vrot.slane %v2396_v46, 2 }
  0xbd   : > { %1704 = vmatpush1.bf16.msra.mxu0 %v1703_v39  ;;  %1738 = vmatpush1.bf16.msra.mxu1 %v1703_v39  ;;  %v683_v43 = vpop.permute.xlu1 %682 }
  0xbe   : > { %1705 = vmatprep.subr.bf16.mxu0 %v1877_v1  ;;  %1727 = vmatprep.subr.bf16.mxu1 %v1877_v1 }
  0xbf   : > { %845 = vmatmul.mubr.f32.gmra.mrb[14].mxu1 %v2674_v8  ;;  %994 = vmatmul.mubr.f32.gmra.mrb[14].mxu0 %v2632_v38 }
  0xc0   : > { %1543 = vmatprep.mubr.msk.f32.mxu1 %vm627_vm5, %v2679_v45  ;;  %1559 = vmatprep.mubr.msk.f32.mxu0 %vm627_vm5, %v2637_v17 }
  0xc1   : > { %1707 = vmatpush1.bf16.msra.mxu0 %v1706_v40  ;;  %1739 = vmatpush1.bf16.msra.mxu1 %v1706_v40 }
  0xc2   : > { %1708 = vmatprep.subr.bf16.mxu0 %v1877_v1  ;;  %1728 = vmatprep.subr.bf16.mxu1 %v1877_v1 }
  0xc3   : > { %850 = vmatmul.mubr.f32.gmra.mrb[16].mxu1 %v2697_v29  ;;  %999 = vmatmul.mubr.f32.gmra.mrb[16].mxu0 %v2655_v42 }
  0xc4   : > { %1544 = vmatprep.mubr.msk.f32.mxu1 %vm627_vm5, %v2499_v58  ;;  %1560 = vmatprep.mubr.msk.f32.mxu0 %vm627_vm5, %v2488_v55 }
  0xc5   : > { %1710 = vmatpush1.bf16.msra.mxu0 %v1709_v12  ;;  %1740 = vmatpush1.bf16.msra.mxu1 %v1709_v12 }
  0xc6   : > { %1711 = vmatprep.subr.bf16.mxu0 %v1877_v1  ;;  %1729 = vmatprep.subr.bf16.mxu1 %v1877_v1 }
  0xc7   : > { %855 = vmatmul.mubr.f32.gmra.mrb[18].mxu1 %v2716_v53  ;;  %1004 = vmatmul.mubr.f32.gmra.mrb[18].mxu0 %v2674_v8 }
  0xc8   : > { %1545 = vmatprep.mubr.msk.f32.mxu1 %vm627_vm5, %v2721_v51  ;;  %1561 = vmatprep.mubr.msk.f32.mxu0 %vm627_vm5, %v2679_v45 }
  0xc9   : > { %1713 = vmatpush1.bf16.msra.mxu0 %v1712_v16  ;;  %1741 = vmatpush1.bf16.msra.mxu1 %v1712_v16 }
  0xca   : > { %1714 = vmatprep.subr.bf16.mxu0 %v1877_v1  ;;  %1730 = vmatprep.subr.bf16.mxu1 %v1877_v1 }
  0xcb   : > { %860 = vmatmul.mubr.f32.gmra.mrb[20].mxu1 %v640_v56  ;;  %1009 = vmatmul.mubr.f32.gmra.mrb[20].mxu0 %v2697_v29 }
  0xcc   : > { %1546 = vmatprep.mubr.msk.f32.mxu1 %vm627_vm5, %v2504_v59  ;;  %1562 = vmatprep.mubr.msk.f32.mxu0 %vm627_vm5, %v2499_v58 }
  0xcd   : > { %1716 = vmatpush1.bf16.msra.mxu0 %v1715_v21  ;;  %1742 = vmatpush1.bf16.msra.mxu1 %v1715_v21 }
  0xce   : > { %1717 = vmatprep.subr.bf16.mxu0 %v1877_v1  ;;  %1731 = vmatprep.subr.bf16.mxu1 %v1877_v1  ;;  %v643_v1 = vsel %vm627_vm5, %v2303_v25, %v610_v11  ;;  %v687_v25 = vsel %vm627_vm5, %v2359_v0, %v683_v43  ;;  %v1052_v0 = vpop.permute.xlu0 %1051 }
  0xcf   : > { %865 = vmatmul.mubr.f32.gmra.mrb[22].mxu1 %v641_v57  ;;  %1014 = vmatmul.mubr.f32.gmra.mrb[22].mxu0 %v2716_v53 }
  0xd0   : > { %1547 = vmatprep.mubr.msk.f32.mxu1 %vm627_vm5, %v576_v10  ;;  %1563 = vmatprep.mubr.msk.f32.mxu0 %vm627_vm5, %v2721_v51 }
  0xd1   : > { %1719 = vmatpush1.bf16.msra.mxu0 %v1718_v15  ;;  %1743 = vmatpush1.bf16.msra.mxu1 %v1718_v15 }
  0xd3   : > { %870 = vmatmul.mubr.f32.gmra.mrb[24].mxu1 %v642_v63  ;;  %1019 = vmatmul.mubr.f32.gmra.mrb[24].mxu0 %v640_v56 }
  0xd4   : > { %1548 = vmatprep.mubr.msk.f32.mxu1 %vm627_vm5, %v2513_v60  ;;  %1564 = vmatprep.mubr.msk.f32.mxu0 %vm627_vm5, %v2504_v59 }
  0xd7   : > { %875 = vmatmul.mubr.f32.gmra.mrb[26].mxu1 %v643_v1  ;;  %1024 = vmatmul.mubr.f32.gmra.mrb[26].mxu0 %v641_v57 }
  0xd8   : > { %1549 = vmatprep.mubr.msk.f32.mxu1 %vm627_vm5, %v677_v27  ;;  %1565 = vmatprep.mubr.msk.f32.mxu0 %vm627_vm5, %v576_v10 }
  0xdb   : > { %880 = vmatmul.mubr.f32.gmra.mrb[28].mxu1 %v686_v32  ;;  %1029 = vmatmul.mubr.f32.gmra.mrb[28].mxu0 %v642_v63 }
  0xdc   : > { %1550 = vmatprep.mubr.msk.f32.mxu1 %vm627_vm5, %v2520_v3  ;;  %1566 = vmatprep.mubr.msk.f32.mxu0 %vm627_vm5, %v2513_v60 }
  0xdf   : > { %885 = vmatmul.mubr.f32.gmra.mrb[30].mxu1 %v687_v25  ;;  %1034 = vmatmul.mubr.f32.gmra.mrb[30].mxu0 %v643_v1 }
  0xe0   : > { %1591 = vmatprep.mubr.msk.f32.mxu0 %vm627_vm5, %v2559_v47  ;;  %1599 = vmatprep.mubr.msk.f32.mxu1 %vm627_vm5, %v2721_v51 }
  0xe3   : > { %1153 = vmatmul.mubr.f32.vlgmr.msra.gmra.mrb[0].mxu0 %v2569_v49  ;;  %1193 = vmatmul.mubr.f32.vlgmr.msra.gmra.mrb[32].mxu1 %v640_v56 }
  0xe4   : > { %1592 = vmatprep.mubr.msk.f32.mxu0 %vm627_vm5, %v2468_v36  ;;  %1600 = vmatprep.mubr.msk.f32.mxu1 %vm627_vm5, %v2504_v59  ;;  %v1048_v36 = vsel %vm538_vm4, %v1046_v61, %v1047_v4 }
  0xe7   : > { %1158 = vmatmul.mubr.f32.gmra.mrb[2].mxu0 %v2591_v62  ;;  %1198 = vmatmul.mubr.f32.gmra.mrb[34].mxu1 %v641_v57 }
  0xe8   : > { %1593 = vmatprep.mubr.msk.f32.mxu0 %vm627_vm5, %v2596_v5  ;;  %1601 = vmatprep.mubr.msk.f32.mxu1 %vm627_vm5, %v576_v10 }
  0xeb   : > { %1163 = vmatmul.mubr.f32.gmra.mrb[4].mxu0 %v2613_v37  ;;  %1203 = vmatmul.mubr.f32.gmra.mrb[36].mxu1 %v642_v63 }
  0xec   : > { %1594 = vmatprep.mubr.msk.f32.mxu0 %vm627_vm5, %v2480_v41  ;;  %1602 = vmatprep.mubr.msk.f32.mxu1 %vm627_vm5, %v2513_v60  ;;  %v1057_v41 = vsel %vm627_vm5, %v2396_v46, %v1052_v0 }
  0xef   : > { %1168 = vmatmul.mubr.f32.gmra.mrb[6].mxu0 %v2632_v38  ;;  %1208 = vmatmul.mubr.f32.gmra.mrb[38].mxu1 %v643_v1 }
  0xf0   : > { %1595 = vmatprep.mubr.msk.f32.mxu0 %vm627_vm5, %v2637_v17  ;;  %1603 = vmatprep.mubr.msk.f32.mxu1 %vm627_vm5, %v677_v27 }
  0xf3   : > { %1173 = vmatmul.mubr.f32.gmra.mrb[8].mxu0 %v2655_v42  ;;  %1213 = vmatmul.mubr.f32.gmra.mrb[40].mxu1 %v686_v32 }
  0xf4   : > { %1596 = vmatprep.mubr.msk.f32.mxu0 %vm627_vm5, %v2488_v55  ;;  %1604 = vmatprep.mubr.msk.f32.mxu1 %vm627_vm5, %v2520_v3  ;;  %v1054_v55 = vpop.permute.xlu1 %1053 }
  0xf5   : > { %v1058_v59 = vsel %vm627_vm5, %v2402_v33, %v1054_v55 }
  0xf7   : > { %1178 = vmatmul.mubr.f32.gmra.mrb[10].mxu0 %v2674_v8  ;;  %1218 = vmatmul.mubr.f32.gmra.mrb[42].mxu1 %v687_v25 }
  0xf8   : > { %1597 = vmatprep.mubr.msk.f32.mxu0 %vm627_vm5, %v2679_v45  ;;  %1605 = vmatprep.mubr.msk.f32.mxu1 %vm627_vm5, %v1048_v36 }
  0xfb   : > { %1183 = vmatmul.mubr.f32.gmra.mrb[12].mxu0 %v2697_v29  ;;  %1223 = vmatmul.mubr.f32.gmra.mrb[44].mxu1 %v1057_v41 }
  0xfc   : > { %1598 = vmatprep.mubr.msk.f32.mxu0 %vm627_vm5, %v2499_v58  ;;  %1606 = vmatprep.mubr.msk.f32.mxu1 %vm627_vm5, %v2527_v7 }
  0xff   : > { %1188 = vmatmul.mubr.f32.gmra.mrb[14].mxu0 %v2716_v53  ;;  %1228 = vmatmul.mubr.f32.gmra.mrb[46].mxu1 %v1058_v59 }
 0x176   : > { %v811_v60 = vpop.f32.mrb[0].mxu1 }
 0x177   : > { %v813_v22 = vpop.f32.mrb[1].mxu1 }
 0x17a   : > { %v2831_v3 = vpop.f32.mrb[2].mxu1 }
 0x17b   : > { %v818_v46 = vpop.f32.mrb[3].mxu1 }
 0x17e   : > { %v2833_v4 = vpop.f32.mrb[4].mxu1 }
 0x17f   : > { %v823_v47 = vpop.f32.mrb[5].mxu1 }
 0x182   : > { %v2835_v49 = vpop.f32.mrb[6].mxu1 }
 0x183   : > { %v828_v58 = vpop.f32.mrb[7].mxu1 }
 0x186   : > { %v2837_v62 = vpop.f32.mrb[8].mxu1 }
 0x187   : > { %v833_v7 = vpop.f32.mrb[9].mxu1 }
 0x18a   : > { %v2839_v5 = vpop.f32.mrb[10].mxu1 }
 0x18b   : > { %v838_v33 = vpop.f32.mrb[11].mxu1 }
 0x18e   : > { %v2841_v37 = vpop.f32.mrb[12].mxu1 }
 0x18f   : > { %v843_v38 = vpop.f32.mrb[13].mxu1 }
 0x192   : > { %v2843_v17 = vpop.f32.mrb[14].mxu1 }
 0x193   : > { %v848_v42 = vpop.f32.mrb[15].mxu1 }
 0x196   : > { %v851_v34 = vpop.f32.mrb[16].mxu1  ;;  %v1000_v35 = vpop.f32.mrb[16].mxu0 }
 0x197   : > { %v1001_v39 = vadd.f32 %v1000_v35, %v851_v34  ;;  %v853_v23 = vpop.f32.mrb[17].mxu1  ;;  %v1002_v24 = vpop.f32.mrb[17].mxu0 }
 0x19a   : > { %v856_v8 = vpop.f32.mrb[18].mxu1  ;;  %v1005_v26 = vpop.f32.mrb[18].mxu0 }
 0x19b   : > { %v1006_v45 = vadd.f32 %v1005_v26, %v856_v8  ;;  %v858_v40 = vpop.f32.mrb[19].mxu1  ;;  %v1007_v14 = vpop.f32.mrb[19].mxu0 }
 0x19e   : > { %v861_v18 = vpop.f32.mrb[20].mxu1  ;;  %v1010_v29 = vpop.f32.mrb[20].mxu0 }
 0x19f   : > { %v1011_v50 = vadd.f32 %v1010_v29, %v861_v18  ;;  %v863_v13 = vpop.f32.mrb[21].mxu1  ;;  %v1012_v12 = vpop.f32.mrb[21].mxu0 }
 0x1a2   : > { %v866_v52 = vpop.f32.mrb[22].mxu1  ;;  %v1015_v31 = vpop.f32.mrb[22].mxu0 }
 0x1a3   : > { %v1016_v53 = vadd.f32 %v1015_v31, %v866_v52  ;;  %v868_v30 = vpop.f32.mrb[23].mxu1  ;;  %v1017_v51 = vpop.f32.mrb[23].mxu0 }
 0x1a6   : > { %v871_v16 = vpop.f32.mrb[24].mxu1  ;;  %v1020_v19 = vpop.f32.mrb[24].mxu0 }
 0x1a7   : > { %v1021_v48 = vadd.f32 %v1020_v19, %v871_v16  ;;  %v873_v56 = vpop.f32.mrb[25].mxu1  ;;  %v1022_v6 = vpop.f32.mrb[25].mxu0 }
 0x1aa   : > { %v876_v20 = vpop.f32.mrb[26].mxu1  ;;  %v1025_v21 = vpop.f32.mrb[26].mxu0 }
 0x1ab   : > { %v1026_v28 = vadd.f32 %v1025_v21, %v876_v20  ;;  %v878_v9 = vpop.f32.mrb[27].mxu1  ;;  %v1027_v57 = vpop.f32.mrb[27].mxu0 }
 0x1ae   : > { %v881_v2 = vpop.f32.mrb[28].mxu1  ;;  %v1030_v10 = vpop.f32.mrb[28].mxu0 }
 0x1af   : > { %v1031_v15 = vadd.f32 %v1030_v10, %v881_v2  ;;  %v883_v63 = vpop.f32.mrb[29].mxu1  ;;  %v1032_v11 = vpop.f32.mrb[29].mxu0 }
 0x1b2   : > { %v886_v54 = vpop.f32.mrb[30].mxu1  ;;  %v1035_v1 = vpop.f32.mrb[30].mxu0 }
 0x1b3   : > { %v2846_v44 = vadd.f32 %v1035_v1, %v886_v54  ;;  %v888_v27 = vpop.f32.mrb[31].mxu1  ;;  %v1037_v32 = vpop.f32.mrb[31].mxu0 }
 0x1b6   : > { %v1154_v43 = vpop.f32.mrb[0].mxu0  ;;  %v1194_v25 = vpop.f32.mrb[32].mxu1 }
 0x1b7   : > { %v2853_v61 = vadd.f32 %v1154_v43, %v811_v60  ;;  %v2855_v0 = vadd.f32 %v1194_v25, %v1001_v39  ;;  %v1156_v36 = vpop.f32.mrb[1].mxu0  ;;  %v1196_v41 = vpop.f32.mrb[33].mxu1 }
 0x1b9   : > { %1249 = vst.msk [vmem:[%s2851_s8] sm:$0xff] %vm627_vm5, %v2853_v61  ;;  %1257 = vst.msk [vmem:[%s2851_s8 + $0x40] sm:$0xff] %vm627_vm5, %v2855_v0 }
 0x1ba   : > { %v1159_v55 = vpop.f32.mrb[2].mxu0  ;;  %v1199_v59 = vpop.f32.mrb[34].mxu1 }
 0x1bb   : > { %v2864_v22 = vadd.f32 %v1159_v55, %v2831_v3  ;;  %v2866_v46 = vadd.f32 %v1199_v59, %v1006_v45  ;;  %v1161_v60 = vpop.f32.mrb[3].mxu0  ;;  %v1201_v47 = vpop.f32.mrb[35].mxu1 }
 0x1bd   : > { %1250 = vst.msk [vmem:[%s2851_s8 + $0x8] sm:$0xff] %vm627_vm5, %v2864_v22  ;;  %1258 = vst.msk [vmem:[%s2851_s8 + $0x48] sm:$0xff] %vm627_vm5, %v2866_v46 }
 0x1be   : > { %v1164_v58 = vpop.f32.mrb[4].mxu0  ;;  %v1204_v7 = vpop.f32.mrb[36].mxu1 }
 0x1bf   : > { %v1746_v33 = vadd.f32 %v1164_v58, %v2833_v4  ;;  %v2875_v38 = vadd.f32 %v1204_v7, %v1011_v50  ;;  %v1166_v3 = vpop.f32.mrb[5].mxu0  ;;  %v1206_v42 = vpop.f32.mrb[37].mxu1 }
 0x1c1   : > { %1251 = vst.msk [vmem:[%s2851_s8 + $0x10] sm:$0xff] %vm627_vm5, %v1746_v33  ;;  %1259 = vst.msk [vmem:[%s2851_s8 + $0x50] sm:$0xff] %vm627_vm5, %v2875_v38 }
 0x1c2   : > { %v1169_v34 = vpop.f32.mrb[6].mxu0  ;;  %v1209_v35 = vpop.f32.mrb[38].mxu1 }
 0x1c3   : > { %v1747_v39 = vadd.f32 %v1169_v34, %v2835_v49  ;;  %v2883_v23 = vadd.f32 %v1209_v35, %v1016_v53  ;;  %v1171_v24 = vpop.f32.mrb[7].mxu0  ;;  %v1211_v8 = vpop.f32.mrb[39].mxu1 }
 0x1c5   : > { %1252 = vst.msk [vmem:[%s2851_s8 + $0x18] sm:$0xff] %vm627_vm5, %v1747_v39  ;;  %1260 = vst.msk [vmem:[%s2851_s8 + $0x58] sm:$0xff] %vm627_vm5, %v2883_v23 }
 0x1c6   : > { %v1174_v4 = vpop.f32.mrb[8].mxu0  ;;  %v1214_v26 = vpop.f32.mrb[40].mxu1 }
 0x1c7   : > { %v1748_v45 = vadd.f32 %v1174_v4, %v2837_v62  ;;  %v2891_v40 = vadd.f32 %v1214_v26, %v1021_v48  ;;  %v1176_v14 = vpop.f32.mrb[9].mxu0  ;;  %v1216_v18 = vpop.f32.mrb[41].mxu1 }
 0x1c9   : > { %1253 = vst.msk [vmem:[%s2851_s8 + $0x20] sm:$0xff] %vm627_vm5, %v1748_v45  ;;  %1261 = vst.msk [vmem:[%s2851_s8 + $0x60] sm:$0xff] %vm627_vm5, %v2891_v40 }
 0x1ca   : > { %v1179_v49 = vpop.f32.mrb[10].mxu0  ;;  %v1219_v29 = vpop.f32.mrb[42].mxu1 }
 0x1cb   : > { %v1749_v50 = vadd.f32 %v1179_v49, %v2839_v5  ;;  %v2899_v13 = vadd.f32 %v1219_v29, %v1026_v28  ;;  %v1181_v12 = vpop.f32.mrb[11].mxu0  ;;  %v1221_v52 = vpop.f32.mrb[43].mxu1 }
 0x1cd   : > { %1254 = vst.msk [vmem:[%s2851_s8 + $0x28] sm:$0xff] %vm627_vm5, %v1749_v50  ;;  %1262 = vst.msk [vmem:[%s2851_s8 + $0x68] sm:$0xff] %vm627_vm5, %v2899_v13 }
 0x1ce   : > { %v1184_v62 = vpop.f32.mrb[12].mxu0  ;;  %v1224_v31 = vpop.f32.mrb[44].mxu1 }
 0x1cf   : > { %v1750_v53 = vadd.f32 %v1184_v62, %v2841_v37  ;;  %v2907_v30 = vadd.f32 %v1224_v31, %v1031_v15  ;;  %v1186_v51 = vpop.f32.mrb[13].mxu0  ;;  %v1226_v16 = vpop.f32.mrb[45].mxu1  ;;  %1267 = sbr.rel (%p1607_p11) target bundleno = 470 (0x1d6), region = 40  ;;  %v1879_v37 = vmov (!%p1607_p11), 0.0  }
 0x1d0   : > { %1269 = vst.msk [vmem:[%s2032_s13] sm:$0x3] (!%p1607_p11), %vm1268_vm6, %v1879_v37 }
 0x1d1   : > { %1255 = vst.msk [vmem:[%s2851_s8 + $0x30] sm:$0xff] %vm627_vm5, %v1750_v53  ;;  %1263 = vst.msk [vmem:[%s2851_s8 + $0x70] sm:$0xff] %vm627_vm5, %v2907_v30 }
 0x1d2   : > { %v1189_v5 = vpop.f32.mrb[14].mxu0  ;;  %v1229_v19 = vpop.f32.mrb[46].mxu1 }
 0x1d3   : > { %v1751_v48 = vadd.f32 %v1189_v5, %v2843_v17  ;;  %v2916_v56 = vadd.f32 %v1229_v19, %v2846_v44  ;;  %v1191_v6 = vpop.f32.mrb[15].mxu0  ;;  %v1231_v20 = vpop.f32.mrb[47].mxu1 }
 0x1d5   : > { %1256 = vst.msk [vmem:[%s2851_s8 + $0x38] sm:$0xff] %vm627_vm5, %v1751_v48  ;;  %1264 = vst.msk [vmem:[%s2851_s8 + $0x78] sm:$0xff] %vm627_vm5, %v2916_v56 }
 0x1d6 PF: > { %v1270_v17 = vsel %vm627_vm5, %v2853_v61, 0.0  ;;  %v1271_v21 = vsel %vm627_vm5, %v2864_v22, 0.0  ;;  %v1273_v28 = vsel %vm627_vm5, %v1746_v33, 0.0  ;;  %v1275_v57 = vsel %vm627_vm5, %v1747_v39, 0.0 }
 0x1d7   : > { %v1272_v9 = vadd.f32 %v1271_v21, %v1270_v17  ;;  %v1277_v10 = vsel %vm627_vm5, %v1748_v45, 0.0  ;;  %v1307_v63 = vmul.f32 %v2853_v61, %v2853_v61  ;;  %v1308_v11 = vmul.f32 %v2864_v22, %v2864_v22 }
 0x1d8   : > { %v1309_v54 = vmul.f32 %v1746_v33, %v1746_v33  ;;  %v1279_v1 = vsel %vm627_vm5, %v1749_v50, 0.0  ;;  %v1310_v27 = vmul.f32 %v1747_v39, %v1747_v39  ;;  %v1281_v32 = vsel %vm627_vm5, %v1750_v53, 0.0 }
 0x1d9   : > { %v1274_v2 = vadd.f32 %v1273_v28, %v1272_v9  ;;  %v1311_v43 = vmul.f32 %v1748_v45, %v1748_v45  ;;  %v1323_v36 = vsel %vm627_vm5, %v1307_v63, 0.0  ;;  %v1324_v41 = vsel %vm627_vm5, %v1308_v11, 0.0 }
 0x1da   : > { %v1326_v55 = vsel %vm627_vm5, %v1309_v54, 0.0  ;;  %v1283_v61 = vsel %vm627_vm5, %v1751_v48, 0.0  ;;  %v1325_v59 = vadd.f32 %v1324_v41, %v1323_v36  ;;  %v1312_v22 = vmul.f32 %v1749_v50, %v1749_v50 }
 0x1db   : > { %v1276_v15 = vadd.f32 %v1275_v57, %v1274_v2  ;;  %v1328_v47 = vsel %vm627_vm5, %v1310_v27, 0.0  ;;  %v1285_v58 = vsel %vm627_vm5, %v2855_v0, 0.0  ;;  %v1313_v3 = vmul.f32 %v1750_v53, %v1750_v53 }
 0x1dc   : > { %v1327_v7 = vadd.f32 %v1326_v55, %v1325_v59  ;;  %v1330_v42 = vsel %vm627_vm5, %v1311_v43, 0.0  ;;  %v1287_v34 = vsel %vm627_vm5, %v2866_v46, 0.0  ;;  %v1314_v24 = vmul.f32 %v1751_v48, %v1751_v48 }
 0x1dd   : > { %v1278_v44 = vadd.f32 %v1277_v10, %v1276_v15  ;;  %v1332_v8 = vsel %vm627_vm5, %v1312_v22, 0.0  ;;  %v1289_v4 = vsel %vm627_vm5, %v2875_v38, 0.0  ;;  %v1315_v14 = vmul.f32 %v2855_v0, %v2855_v0 }
 0x1de   : > { %v1329_v35 = vadd.f32 %v1328_v47, %v1327_v7  ;;  %v1334_v18 = vsel %vm627_vm5, %v1313_v3, 0.0  ;;  %v1291_v49 = vsel %vm627_vm5, %v2883_v23, 0.0  ;;  %v1316_v12 = vmul.f32 %v2866_v46, %v2866_v46  ;;  %v1360_v7 = vld [vmem:[%s2032_s13] sm:$0x3] }
 0x1df   : > { %v1280_v25 = vadd.f32 %v1279_v1, %v1278_v44  ;;  %v1336_v52 = vsel %vm627_vm5, %v1314_v24, 0.0  ;;  %v1293_v62 = vsel %vm627_vm5, %v2891_v40, 0.0  ;;  %v1317_v0 = vmul.f32 %v2875_v38, %v2875_v38 }
 0x1e0   : > { %v1331_v26 = vadd.f32 %v1330_v42, %v1329_v35  ;;  %v1338_v51 = vsel %vm627_vm5, %v1315_v14, 0.0  ;;  %v1295_v16 = vsel %vm627_vm5, %v2899_v13, 0.0  ;;  %v1318_v46 = vmul.f32 %v2883_v23, %v2883_v23 }
 0x1e1   : > { %v1282_v60 = vadd.f32 %v1281_v32, %v1280_v25  ;;  %v1340_v48 = vsel %vm627_vm5, %v1316_v12, 0.0  ;;  %v1297_v6 = vsel %vm627_vm5, %v2907_v30, 0.0  ;;  %v1319_v38 = vmul.f32 %v2891_v40, %v2891_v40 }
 0x1e2   : > { %v1333_v29 = vadd.f32 %v1332_v8, %v1331_v26  ;;  %v1342_v17 = vsel %vm627_vm5, %v1317_v0, 0.0  ;;  %v1299_v21 = vsel %vm627_vm5, %v2916_v56, 0.0  ;;  %v1320_v23 = vmul.f32 %v2899_v13, %v2899_v13 }
 0x1e3   : > { %v1284_v33 = vadd.f32 %v1283_v61, %v1282_v60  ;;  %v1344_v57 = vsel %vm627_vm5, %v1318_v46, 0.0  ;;  %v1321_v15 = vmul.f32 %v2907_v30, %v2907_v30  ;;  %v1346_v63 = vsel %vm627_vm5, %v1319_v38, 0.0 }
 0x1e4   : > { %v1335_v31 = vadd.f32 %v1334_v18, %v1333_v29  ;;  %v1322_v54 = vmul.f32 %v2916_v56, %v2916_v56  ;;  %v1348_v1 = vsel %vm627_vm5, %v1320_v23, 0.0  ;;  %vm1363_vm7 = vcmask 517120  }
 0x1e5   : > { %v1286_v39 = vadd.f32 %v1285_v58, %v1284_v33  ;;  %v1350_v13 = vsel %vm627_vm5, %v1321_v15, 0.0 }
 0x1e6   : > { %v1337_v5 = vadd.f32 %v1336_v52, %v1335_v31  ;;  %v1352_v43 = vsel %vm627_vm5, %v1322_v54, 0.0 }
 0x1e7   : > { %v1288_v45 = vadd.f32 %v1287_v34, %v1286_v39 }
 0x1e8   : > { %v1339_v20 = vadd.f32 %v1338_v51, %v1337_v5 }
 0x1e9   : > { %v1290_v50 = vadd.f32 %v1289_v4, %v1288_v45 }
 0x1ea   : > { %v1341_v28 = vadd.f32 %v1340_v48, %v1339_v20 }
 0x1eb   : > { %v1292_v53 = vadd.f32 %v1291_v49, %v1290_v50 }
 0x1ec   : > { %v1343_v2 = vadd.f32 %v1342_v17, %v1341_v28 }
 0x1ed   : > { %v1294_v19 = vadd.f32 %v1293_v62, %v1292_v53 }
 0x1ee   : > { %v1345_v40 = vadd.f32 %v1344_v57, %v1343_v2 }
 0x1ef   : > { %v1296_v37 = vadd.f32 %v1295_v16, %v1294_v19 }
 0x1f0   : > { %v1347_v44 = vadd.f32 %v1346_v63, %v1345_v40 }
 0x1f1   : > { %v1298_v9 = vadd.f32 %v1297_v6, %v1296_v37 }
 0x1f2   : > { %v1349_v32 = vadd.f32 %v1348_v1, %v1347_v44 }
 0x1f3   : > { %v1300_v10 = vadd.f32 %v1299_v21, %v1298_v9 }
 0x1f4   : > { %v1351_v30 = vadd.f32 %v1350_v13, %v1349_v32 }
 0x1f5   : > { %v1301_v11 = vrot.slane %v1300_v10, 4 }
 0x1f6   : > { %v1353_v36 = vadd.f32 %v1352_v43, %v1351_v30 }
 0x1f7   : > { %v1302_v27 = vadd.f32 %v1301_v11, %v1300_v10 }
 0x1f8   : > { %v1354_v55 = vrot.slane %v1353_v36, 4 }
 0x1f9   : > { %v1303_v25 = vrot.slane %v1302_v27, 2 }
 0x1fa   : > { %v1355_v61 = vadd.f32 %v1354_v55, %v1353_v36 }
 0x1fb   : > { %v1304_v41 = vadd.f32 %v1303_v25, %v1302_v27 }
 0x1fc   : > { %v1356_v60 = vrot.slane %v1355_v61, 2 }
 0x1fd   : > { %v1305_v59 = vrot.slane %v1304_v41, 1 }
 0x1fe   : > { %v1357_v56 = vadd.f32 %v1356_v60, %v1355_v61 }
 0x1ff   : > { %v1306_v22 = vadd.f32 %v1305_v59, %v1304_v41 }
 0x200   : > { %v1358_v47 = vrot.slane %v1357_v56, 1 }
 0x202   : > { %v1359_v58 = vadd.f32 %v1358_v47, %v1357_v56 }
 0x204   : > { %v1361_v33 = vsel %vm400_vm0, %v1306_v22, %v1359_v58 }
 0x205   : > { %v1362_v3 = vadd.f32 %v1361_v33, %v1360_v7 }
 0x207   : > { %1364 = vst.msk [vmem:[%s2032_s13] sm:$0x3] %vm1363_vm7, %v1362_v3 }
 0x208 PF: > { %s16_s22 = sadd.s32 1, %s1875_s22   ;;  %s3017_s18 = smov %s1867_s20 }
 0x209   : > { %p13_p12 = scmp.ge.s32.totalorder %s16_s22, 6   ;;  %s3018_s19 = smov %s1871_s21 }
 0x20a   : > { %s3019_s20 = smov %s3022_s23  ;;  %s3020_s21 = smov %s3026_s24 }
 0x20b   :  { %15 = sbr.rel (!%p13_p12) target bundleno = 3 (0x3), region = 87 }

// kernel: reverse.1
= control target key start
LH: loop header
LB: loop body
LE: loop exit
PB: predicated region body
PF: predicated region fallthrough
CT: control target
= control target key end

     0   :  { %v1007_v3 = vmov 0.0   ;;  %s2026_s0 = inlined_call_operand.vmem [shape: f32[3,3,128,128], index: 0, kind: input, shape index: {}]   ;;  %s2027_s1 = inlined_call_operand.vmem [shape: bf16[3,3,128,128], index: 1, kind: output, shape index: {}]  }
   0x1   :  { %v720_v0 = vld [vmem:[%s2026_s0 + $0x400] sm:$0xff]  ;;  %v736_v19 = vld [vmem:[%s2026_s0 + $0x408] sm:$0xff]  ;;  %v754_v37 = vld [vmem:[%s2026_s0 + $0x410] sm:$0xff] }
   0x2   :  { %v721_v1 = vld [vmem:[%s2026_s0 + $0x280] sm:$0xff]  ;;  %v4_v4 = vpack.c.bf16 %v1007_v3, %v720_v0  ;;  %v738_v20 = vld [vmem:[%s2026_s0 + $0x288] sm:$0xff]  ;;  %v48_v22 = vpack.c.bf16 %v1007_v3, %v736_v19  ;;  %v756_v38 = vld [vmem:[%s2026_s0 + $0x290] sm:$0xff]  ;;  %v93_v40 = vpack.c.bf16 %v1007_v3, %v754_v37 }
   0x3   :  { %v723_v2 = vld [vmem:[%s2026_s0 + $0x100] sm:$0xff]  ;;  %v9_v5 = vpack.c.bf16 %v1007_v3, %v721_v1  ;;  %v740_v21 = vld [vmem:[%s2026_s0 + $0x108] sm:$0xff]  ;;  %v53_v23 = vpack.c.bf16 %v1007_v3, %v738_v20  ;;  %v758_v39 = vld [vmem:[%s2026_s0 + $0x110] sm:$0xff]  ;;  %v98_v41 = vpack.c.bf16 %v1007_v3, %v756_v38 }
   0x4   :  { %v14_v6 = vpack.c.bf16 %v1007_v3, %v723_v2  ;;  %v725_v7 = vld [vmem:[%s2026_s0 + $0x380] sm:$0xff]  ;;  %5 = vst [vmem:[%s2027_s1] sm:$0xf] %v4_v4  ;;  %v58_v24 = vpack.c.bf16 %v1007_v3, %v740_v21  ;;  %v742_v25 = vld [vmem:[%s2026_s0 + $0x388] sm:$0xff]  ;;  %737 = vst [vmem:[%s2027_s1 + $0x4] sm:$0xf] %v48_v22  ;;  %v103_v42 = vpack.c.bf16 %v1007_v3, %v758_v39 }
   0x5   :  { %v727_v8 = vld [vmem:[%s2026_s0 + $0x200] sm:$0xff]  ;;  %v19_v10 = vpack.c.bf16 %v1007_v3, %v725_v7  ;;  %722 = vst [vmem:[%s2027_s1 + $0xc0] sm:$0xf] %v9_v5  ;;  %v744_v26 = vld [vmem:[%s2026_s0 + $0x208] sm:$0xff]  ;;  %v63_v28 = vpack.c.bf16 %v1007_v3, %v742_v25  ;;  %739 = vst [vmem:[%s2027_s1 + $0xc4] sm:$0xf] %v53_v23 }
   0x6   :  { %v729_v9 = vld [vmem:[%s2026_s0 + $0x80] sm:$0xff]  ;;  %v24_v11 = vpack.c.bf16 %v1007_v3, %v727_v8  ;;  %724 = vst [vmem:[%s2027_s1 + $0x180] sm:$0xf] %v14_v6  ;;  %v746_v27 = vld [vmem:[%s2026_s0 + $0x88] sm:$0xff]  ;;  %v68_v29 = vpack.c.bf16 %v1007_v3, %v744_v26  ;;  %741 = vst [vmem:[%s2027_s1 + $0x184] sm:$0xf] %v58_v24 }
   0x7   :  { %v29_v12 = vpack.c.bf16 %v1007_v3, %v729_v9  ;;  %v731_v13 = vld [vmem:[%s2026_s0 + $0x300] sm:$0xff]  ;;  %726 = vst [vmem:[%s2027_s1 + $0x40] sm:$0xf] %v19_v10  ;;  %v73_v30 = vpack.c.bf16 %v1007_v3, %v746_v27  ;;  %v748_v31 = vld [vmem:[%s2026_s0 + $0x308] sm:$0xff]  ;;  %743 = vst [vmem:[%s2027_s1 + $0x44] sm:$0xf] %v63_v28 }
   0x8   :  { %v733_v14 = vld [vmem:[%s2026_s0 + $0x180] sm:$0xff]  ;;  %v34_v16 = vpack.c.bf16 %v1007_v3, %v731_v13  ;;  %728 = vst [vmem:[%s2027_s1 + $0x100] sm:$0xf] %v24_v11  ;;  %v750_v32 = vld [vmem:[%s2026_s0 + $0x188] sm:$0xff]  ;;  %v78_v34 = vpack.c.bf16 %v1007_v3, %v748_v31  ;;  %745 = vst [vmem:[%s2027_s1 + $0x104] sm:$0xf] %v68_v29 }
   0x9   :  { %v41_v15 = vld [vmem:[%s2026_s0] sm:$0xff]  ;;  %v39_v17 = vpack.c.bf16 %v1007_v3, %v733_v14  ;;  %730 = vst [vmem:[%s2027_s1 + $0x1c0] sm:$0xf] %v29_v12  ;;  %v752_v33 = vld [vmem:[%s2026_s0 + $0x8] sm:$0xff]  ;;  %v83_v35 = vpack.c.bf16 %v1007_v3, %v750_v32  ;;  %747 = vst [vmem:[%s2027_s1 + $0x1c4] sm:$0xf] %v73_v30 }
   0xa   :  { %v43_v18 = vpack.c.bf16 %v1007_v3, %v41_v15  ;;  %732 = vst [vmem:[%s2027_s1 + $0x80] sm:$0xf] %v34_v16  ;;  %v88_v36 = vpack.c.bf16 %v1007_v3, %v752_v33  ;;  %v760_v43 = vld [vmem:[%s2026_s0 + $0x390] sm:$0xff]  ;;  %749 = vst [vmem:[%s2027_s1 + $0x84] sm:$0xf] %v78_v34  ;;  %v772_v55 = vld [vmem:[%s2026_s0 + $0x418] sm:$0xff] }
   0xb   :  { %734 = vst [vmem:[%s2027_s1 + $0x140] sm:$0xf] %v39_v17  ;;  %v762_v44 = vld [vmem:[%s2026_s0 + $0x210] sm:$0xff]  ;;  %751 = vst [vmem:[%s2027_s1 + $0x144] sm:$0xf] %v83_v35  ;;  %v108_v46 = vpack.c.bf16 %v1007_v3, %v760_v43  ;;  %v774_v56 = vld [vmem:[%s2026_s0 + $0x298] sm:$0xff]  ;;  %v138_v58 = vpack.c.bf16 %v1007_v3, %v772_v55 }
   0xc   :  { %735 = vst [vmem:[%s2027_s1 + $0x200] sm:$0xf] %v43_v18  ;;  %v764_v45 = vld [vmem:[%s2026_s0 + $0x90] sm:$0xff]  ;;  %753 = vst [vmem:[%s2027_s1 + $0x204] sm:$0xf] %v88_v36  ;;  %v113_v47 = vpack.c.bf16 %v1007_v3, %v762_v44  ;;  %v776_v57 = vld [vmem:[%s2026_s0 + $0x118] sm:$0xff]  ;;  %v143_v59 = vpack.c.bf16 %v1007_v3, %v774_v56 }
   0xd   :  { %v118_v48 = vpack.c.bf16 %v1007_v3, %v764_v45  ;;  %v766_v49 = vld [vmem:[%s2026_s0 + $0x310] sm:$0xff]  ;;  %755 = vst [vmem:[%s2027_s1 + $0x8] sm:$0xf] %v93_v40  ;;  %757 = vst [vmem:[%s2027_s1 + $0xc8] sm:$0xf] %v98_v41  ;;  %v148_v60 = vpack.c.bf16 %v1007_v3, %v776_v57  ;;  %v778_v61 = vld [vmem:[%s2026_s0 + $0x398] sm:$0xff] }
   0xe   :  { %v768_v50 = vld [vmem:[%s2026_s0 + $0x190] sm:$0xff]  ;;  %759 = vst [vmem:[%s2027_s1 + $0x188] sm:$0xf] %v103_v42  ;;  %v123_v52 = vpack.c.bf16 %v1007_v3, %v766_v49  ;;  %761 = vst [vmem:[%s2027_s1 + $0x48] sm:$0xf] %v108_v46  ;;  %v780_v62 = vld [vmem:[%s2026_s0 + $0x218] sm:$0xff]  ;;  %v153_v0 = vpack.c.bf16 %v1007_v3, %v778_v61 }
   0xf   :  { %v770_v51 = vld [vmem:[%s2026_s0 + $0x10] sm:$0xff]  ;;  %v128_v53 = vpack.c.bf16 %v1007_v3, %v768_v50  ;;  %763 = vst [vmem:[%s2027_s1 + $0x108] sm:$0xf] %v113_v47  ;;  %765 = vst [vmem:[%s2027_s1 + $0x1c8] sm:$0xf] %v118_v48  ;;  %v782_v63 = vld [vmem:[%s2026_s0 + $0x98] sm:$0xff]  ;;  %v158_v1 = vpack.c.bf16 %v1007_v3, %v780_v62 }
  0x10   :  { %v133_v54 = vpack.c.bf16 %v1007_v3, %v770_v51  ;;  %767 = vst [vmem:[%s2027_s1 + $0x88] sm:$0xf] %v123_v52  ;;  %v163_v2 = vpack.c.bf16 %v1007_v3, %v782_v63  ;;  %v784_v4 = vld [vmem:[%s2026_s0 + $0x318] sm:$0xff]  ;;  %773 = vst [vmem:[%s2027_s1 + $0xc] sm:$0xf] %v138_v58  ;;  %v790_v10 = vld [vmem:[%s2026_s0 + $0x420] sm:$0xff] }
  0x11   :  { %769 = vst [vmem:[%s2027_s1 + $0x148] sm:$0xf] %v128_v53  ;;  %v786_v5 = vld [vmem:[%s2026_s0 + $0x198] sm:$0xff]  ;;  %775 = vst [vmem:[%s2027_s1 + $0xcc] sm:$0xf] %v143_v59  ;;  %v168_v7 = vpack.c.bf16 %v1007_v3, %v784_v4  ;;  %v792_v11 = vld [vmem:[%s2026_s0 + $0x2a0] sm:$0xff]  ;;  %v183_v13 = vpack.c.bf16 %v1007_v3, %v790_v10 }
  0x12   :  { %771 = vst [vmem:[%s2027_s1 + $0x208] sm:$0xf] %v133_v54  ;;  %v788_v6 = vld [vmem:[%s2026_s0 + $0x18] sm:$0xff]  ;;  %777 = vst [vmem:[%s2027_s1 + $0x18c] sm:$0xf] %v148_v60  ;;  %v173_v8 = vpack.c.bf16 %v1007_v3, %v786_v5  ;;  %v794_v12 = vld [vmem:[%s2026_s0 + $0x120] sm:$0xff]  ;;  %v188_v14 = vpack.c.bf16 %v1007_v3, %v792_v11 }
  0x13   :  { %v178_v9 = vpack.c.bf16 %v1007_v3, %v788_v6  ;;  %779 = vst [vmem:[%s2027_s1 + $0x4c] sm:$0xf] %v153_v0  ;;  %781 = vst [vmem:[%s2027_s1 + $0x10c] sm:$0xf] %v158_v1  ;;  %v193_v15 = vpack.c.bf16 %v1007_v3, %v794_v12  ;;  %v796_v16 = vld [vmem:[%s2026_s0 + $0x3a0] sm:$0xff]  ;;  %v808_v28 = vld [vmem:[%s2026_s0 + $0x428] sm:$0xff] }
  0x14   :  { %783 = vst [vmem:[%s2027_s1 + $0x1cc] sm:$0xf] %v163_v2  ;;  %v798_v17 = vld [vmem:[%s2026_s0 + $0x220] sm:$0xff]  ;;  %785 = vst [vmem:[%s2027_s1 + $0x8c] sm:$0xf] %v168_v7  ;;  %v198_v19 = vpack.c.bf16 %v1007_v3, %v796_v16  ;;  %v810_v29 = vld [vmem:[%s2026_s0 + $0x2a8] sm:$0xff]  ;;  %v228_v31 = vpack.c.bf16 %v1007_v3, %v808_v28 }
  0x15   :  { %v800_v18 = vld [vmem:[%s2026_s0 + $0xa0] sm:$0xff]  ;;  %787 = vst [vmem:[%s2027_s1 + $0x14c] sm:$0xf] %v173_v8  ;;  %789 = vst [vmem:[%s2027_s1 + $0x20c] sm:$0xf] %v178_v9  ;;  %v203_v20 = vpack.c.bf16 %v1007_v3, %v798_v17  ;;  %v812_v30 = vld [vmem:[%s2026_s0 + $0x128] sm:$0xff]  ;;  %v233_v32 = vpack.c.bf16 %v1007_v3, %v810_v29 }
  0x16   :  { %v208_v21 = vpack.c.bf16 %v1007_v3, %v800_v18  ;;  %v802_v22 = vld [vmem:[%s2026_s0 + $0x320] sm:$0xff]  ;;  %791 = vst [vmem:[%s2027_s1 + $0x10] sm:$0xf] %v183_v13  ;;  %793 = vst [vmem:[%s2027_s1 + $0xd0] sm:$0xf] %v188_v14  ;;  %v238_v33 = vpack.c.bf16 %v1007_v3, %v812_v30  ;;  %v814_v34 = vld [vmem:[%s2026_s0 + $0x3a8] sm:$0xff] }
  0x17   :  { %v804_v23 = vld [vmem:[%s2026_s0 + $0x1a0] sm:$0xff]  ;;  %795 = vst [vmem:[%s2027_s1 + $0x190] sm:$0xf] %v193_v15  ;;  %v213_v25 = vpack.c.bf16 %v1007_v3, %v802_v22  ;;  %797 = vst [vmem:[%s2027_s1 + $0x50] sm:$0xf] %v198_v19  ;;  %v816_v35 = vld [vmem:[%s2026_s0 + $0x228] sm:$0xff]  ;;  %v243_v37 = vpack.c.bf16 %v1007_v3, %v814_v34 }
  0x18   :  { %v806_v24 = vld [vmem:[%s2026_s0 + $0x20] sm:$0xff]  ;;  %v218_v26 = vpack.c.bf16 %v1007_v3, %v804_v23  ;;  %799 = vst [vmem:[%s2027_s1 + $0x110] sm:$0xf] %v203_v20  ;;  %801 = vst [vmem:[%s2027_s1 + $0x1d0] sm:$0xf] %v208_v21  ;;  %v818_v36 = vld [vmem:[%s2026_s0 + $0xa8] sm:$0xff]  ;;  %v248_v38 = vpack.c.bf16 %v1007_v3, %v816_v35 }
  0x19   :  { %v223_v27 = vpack.c.bf16 %v1007_v3, %v806_v24  ;;  %803 = vst [vmem:[%s2027_s1 + $0x90] sm:$0xf] %v213_v25  ;;  %v253_v39 = vpack.c.bf16 %v1007_v3, %v818_v36  ;;  %v820_v40 = vld [vmem:[%s2026_s0 + $0x328] sm:$0xff]  ;;  %809 = vst [vmem:[%s2027_s1 + $0x14] sm:$0xf] %v228_v31  ;;  %v826_v46 = vld [vmem:[%s2026_s0 + $0x430] sm:$0xff] }
  0x1a   :  { %805 = vst [vmem:[%s2027_s1 + $0x150] sm:$0xf] %v218_v26  ;;  %v822_v41 = vld [vmem:[%s2026_s0 + $0x1a8] sm:$0xff]  ;;  %811 = vst [vmem:[%s2027_s1 + $0xd4] sm:$0xf] %v233_v32  ;;  %v258_v43 = vpack.c.bf16 %v1007_v3, %v820_v40  ;;  %v828_v47 = vld [vmem:[%s2026_s0 + $0x2b0] sm:$0xff]  ;;  %v273_v49 = vpack.c.bf16 %v1007_v3, %v826_v46 }
  0x1b   :  { %807 = vst [vmem:[%s2027_s1 + $0x210] sm:$0xf] %v223_v27  ;;  %v824_v42 = vld [vmem:[%s2026_s0 + $0x28] sm:$0xff]  ;;  %813 = vst [vmem:[%s2027_s1 + $0x194] sm:$0xf] %v238_v33  ;;  %v263_v44 = vpack.c.bf16 %v1007_v3, %v822_v41  ;;  %v830_v48 = vld [vmem:[%s2026_s0 + $0x130] sm:$0xff]  ;;  %v278_v50 = vpack.c.bf16 %v1007_v3, %v828_v47 }
  0x1c   :  { %v268_v45 = vpack.c.bf16 %v1007_v3, %v824_v42  ;;  %815 = vst [vmem:[%s2027_s1 + $0x54] sm:$0xf] %v243_v37  ;;  %817 = vst [vmem:[%s2027_s1 + $0x114] sm:$0xf] %v248_v38  ;;  %v283_v51 = vpack.c.bf16 %v1007_v3, %v830_v48  ;;  %v832_v52 = vld [vmem:[%s2026_s0 + $0x3b0] sm:$0xff]  ;;  %v844_v0 = vld [vmem:[%s2026_s0 + $0x438] sm:$0xff] }
  0x1d   :  { %819 = vst [vmem:[%s2027_s1 + $0x1d4] sm:$0xf] %v253_v39  ;;  %v834_v53 = vld [vmem:[%s2026_s0 + $0x230] sm:$0xff]  ;;  %821 = vst [vmem:[%s2027_s1 + $0x94] sm:$0xf] %v258_v43  ;;  %v288_v55 = vpack.c.bf16 %v1007_v3, %v832_v52  ;;  %v846_v1 = vld [vmem:[%s2026_s0 + $0x2b8] sm:$0xff]  ;;  %v318_v4 = vpack.c.bf16 %v1007_v3, %v844_v0 }
  0x1e   :  { %v836_v54 = vld [vmem:[%s2026_s0 + $0xb0] sm:$0xff]  ;;  %823 = vst [vmem:[%s2027_s1 + $0x154] sm:$0xf] %v263_v44  ;;  %825 = vst [vmem:[%s2027_s1 + $0x214] sm:$0xf] %v268_v45  ;;  %v293_v56 = vpack.c.bf16 %v1007_v3, %v834_v53  ;;  %v848_v2 = vld [vmem:[%s2026_s0 + $0x138] sm:$0xff]  ;;  %v323_v5 = vpack.c.bf16 %v1007_v3, %v846_v1 }
  0x1f   :  { %v298_v57 = vpack.c.bf16 %v1007_v3, %v836_v54  ;;  %v838_v58 = vld [vmem:[%s2026_s0 + $0x330] sm:$0xff]  ;;  %827 = vst [vmem:[%s2027_s1 + $0x18] sm:$0xf] %v273_v49  ;;  %829 = vst [vmem:[%s2027_s1 + $0xd8] sm:$0xf] %v278_v50  ;;  %v328_v6 = vpack.c.bf16 %v1007_v3, %v848_v2  ;;  %v850_v7 = vld [vmem:[%s2026_s0 + $0x3b8] sm:$0xff] }
  0x20   :  { %v840_v59 = vld [vmem:[%s2026_s0 + $0x1b0] sm:$0xff]  ;;  %831 = vst [vmem:[%s2027_s1 + $0x198] sm:$0xf] %v283_v51  ;;  %v303_v61 = vpack.c.bf16 %v1007_v3, %v838_v58  ;;  %833 = vst [vmem:[%s2027_s1 + $0x58] sm:$0xf] %v288_v55  ;;  %v852_v8 = vld [vmem:[%s2026_s0 + $0x238] sm:$0xff]  ;;  %v333_v10 = vpack.c.bf16 %v1007_v3, %v850_v7 }
  0x21   :  { %v842_v60 = vld [vmem:[%s2026_s0 + $0x30] sm:$0xff]  ;;  %v308_v62 = vpack.c.bf16 %v1007_v3, %v840_v59  ;;  %835 = vst [vmem:[%s2027_s1 + $0x118] sm:$0xf] %v293_v56  ;;  %837 = vst [vmem:[%s2027_s1 + $0x1d8] sm:$0xf] %v298_v57  ;;  %v854_v9 = vld [vmem:[%s2026_s0 + $0xb8] sm:$0xff]  ;;  %v338_v11 = vpack.c.bf16 %v1007_v3, %v852_v8 }
  0x22   :  { %v313_v63 = vpack.c.bf16 %v1007_v3, %v842_v60  ;;  %839 = vst [vmem:[%s2027_s1 + $0x98] sm:$0xf] %v303_v61  ;;  %v343_v12 = vpack.c.bf16 %v1007_v3, %v854_v9  ;;  %v856_v13 = vld [vmem:[%s2026_s0 + $0x338] sm:$0xff]  ;;  %845 = vst [vmem:[%s2027_s1 + $0x1c] sm:$0xf] %v318_v4  ;;  %v862_v19 = vld [vmem:[%s2026_s0 + $0x440] sm:$0xff] }
  0x23   :  { %841 = vst [vmem:[%s2027_s1 + $0x158] sm:$0xf] %v308_v62  ;;  %v858_v14 = vld [vmem:[%s2026_s0 + $0x1b8] sm:$0xff]  ;;  %847 = vst [vmem:[%s2027_s1 + $0xdc] sm:$0xf] %v323_v5  ;;  %v348_v16 = vpack.c.bf16 %v1007_v3, %v856_v13  ;;  %v864_v20 = vld [vmem:[%s2026_s0 + $0x2c0] sm:$0xff]  ;;  %v363_v22 = vpack.c.bf16 %v1007_v3, %v862_v19 }
  0x24   :  { %843 = vst [vmem:[%s2027_s1 + $0x218] sm:$0xf] %v313_v63  ;;  %v860_v15 = vld [vmem:[%s2026_s0 + $0x38] sm:$0xff]  ;;  %849 = vst [vmem:[%s2027_s1 + $0x19c] sm:$0xf] %v328_v6  ;;  %v353_v17 = vpack.c.bf16 %v1007_v3, %v858_v14  ;;  %v866_v21 = vld [vmem:[%s2026_s0 + $0x140] sm:$0xff]  ;;  %v368_v23 = vpack.c.bf16 %v1007_v3, %v864_v20 }
  0x25   :  { %v358_v18 = vpack.c.bf16 %v1007_v3, %v860_v15  ;;  %851 = vst [vmem:[%s2027_s1 + $0x5c] sm:$0xf] %v333_v10  ;;  %853 = vst [vmem:[%s2027_s1 + $0x11c] sm:$0xf] %v338_v11  ;;  %v373_v24 = vpack.c.bf16 %v1007_v3, %v866_v21  ;;  %v868_v25 = vld [vmem:[%s2026_s0 + $0x3c0] sm:$0xff]  ;;  %v880_v37 = vld [vmem:[%s2026_s0 + $0x448] sm:$0xff] }
  0x26   :  { %855 = vst [vmem:[%s2027_s1 + $0x1dc] sm:$0xf] %v343_v12  ;;  %v870_v26 = vld [vmem:[%s2026_s0 + $0x240] sm:$0xff]  ;;  %857 = vst [vmem:[%s2027_s1 + $0x9c] sm:$0xf] %v348_v16  ;;  %v378_v28 = vpack.c.bf16 %v1007_v3, %v868_v25  ;;  %v882_v38 = vld [vmem:[%s2026_s0 + $0x2c8] sm:$0xff]  ;;  %v408_v40 = vpack.c.bf16 %v1007_v3, %v880_v37 }
  0x27   :  { %v872_v27 = vld [vmem:[%s2026_s0 + $0xc0] sm:$0xff]  ;;  %859 = vst [vmem:[%s2027_s1 + $0x15c] sm:$0xf] %v353_v17  ;;  %861 = vst [vmem:[%s2027_s1 + $0x21c] sm:$0xf] %v358_v18  ;;  %v383_v29 = vpack.c.bf16 %v1007_v3, %v870_v26  ;;  %v884_v39 = vld [vmem:[%s2026_s0 + $0x148] sm:$0xff]  ;;  %v413_v41 = vpack.c.bf16 %v1007_v3, %v882_v38 }
  0x28   :  { %v388_v30 = vpack.c.bf16 %v1007_v3, %v872_v27  ;;  %v874_v31 = vld [vmem:[%s2026_s0 + $0x340] sm:$0xff]  ;;  %863 = vst [vmem:[%s2027_s1 + $0x20] sm:$0xf] %v363_v22  ;;  %865 = vst [vmem:[%s2027_s1 + $0xe0] sm:$0xf] %v368_v23  ;;  %v418_v42 = vpack.c.bf16 %v1007_v3, %v884_v39  ;;  %v886_v43 = vld [vmem:[%s2026_s0 + $0x3c8] sm:$0xff] }
  0x29   :  { %v876_v32 = vld [vmem:[%s2026_s0 + $0x1c0] sm:$0xff]  ;;  %867 = vst [vmem:[%s2027_s1 + $0x1a0] sm:$0xf] %v373_v24  ;;  %v393_v34 = vpack.c.bf16 %v1007_v3, %v874_v31  ;;  %869 = vst [vmem:[%s2027_s1 + $0x60] sm:$0xf] %v378_v28  ;;  %v888_v44 = vld [vmem:[%s2026_s0 + $0x248] sm:$0xff]  ;;  %v423_v46 = vpack.c.bf16 %v1007_v3, %v886_v43 }
  0x2a   :  { %v878_v33 = vld [vmem:[%s2026_s0 + $0x40] sm:$0xff]  ;;  %v398_v35 = vpack.c.bf16 %v1007_v3, %v876_v32  ;;  %871 = vst [vmem:[%s2027_s1 + $0x120] sm:$0xf] %v383_v29  ;;  %873 = vst [vmem:[%s2027_s1 + $0x1e0] sm:$0xf] %v388_v30  ;;  %v890_v45 = vld [vmem:[%s2026_s0 + $0xc8] sm:$0xff]  ;;  %v428_v47 = vpack.c.bf16 %v1007_v3, %v888_v44 }
  0x2b   :  { %v403_v36 = vpack.c.bf16 %v1007_v3, %v878_v33  ;;  %875 = vst [vmem:[%s2027_s1 + $0xa0] sm:$0xf] %v393_v34  ;;  %v433_v48 = vpack.c.bf16 %v1007_v3, %v890_v45  ;;  %v892_v49 = vld [vmem:[%s2026_s0 + $0x348] sm:$0xff]  ;;  %881 = vst [vmem:[%s2027_s1 + $0x24] sm:$0xf] %v408_v40  ;;  %v898_v55 = vld [vmem:[%s2026_s0 + $0x450] sm:$0xff] }
  0x2c   :  { %877 = vst [vmem:[%s2027_s1 + $0x160] sm:$0xf] %v398_v35  ;;  %v894_v50 = vld [vmem:[%s2026_s0 + $0x1c8] sm:$0xff]  ;;  %883 = vst [vmem:[%s2027_s1 + $0xe4] sm:$0xf] %v413_v41  ;;  %v438_v52 = vpack.c.bf16 %v1007_v3, %v892_v49  ;;  %v900_v56 = vld [vmem:[%s2026_s0 + $0x2d0] sm:$0xff]  ;;  %v453_v58 = vpack.c.bf16 %v1007_v3, %v898_v55 }
  0x2d   :  { %879 = vst [vmem:[%s2027_s1 + $0x220] sm:$0xf] %v403_v36  ;;  %v896_v51 = vld [vmem:[%s2026_s0 + $0x48] sm:$0xff]  ;;  %885 = vst [vmem:[%s2027_s1 + $0x1a4] sm:$0xf] %v418_v42  ;;  %v443_v53 = vpack.c.bf16 %v1007_v3, %v894_v50  ;;  %v902_v57 = vld [vmem:[%s2026_s0 + $0x150] sm:$0xff]  ;;  %v458_v59 = vpack.c.bf16 %v1007_v3, %v900_v56 }
  0x2e   :  { %v448_v54 = vpack.c.bf16 %v1007_v3, %v896_v51  ;;  %887 = vst [vmem:[%s2027_s1 + $0x64] sm:$0xf] %v423_v46  ;;  %889 = vst [vmem:[%s2027_s1 + $0x124] sm:$0xf] %v428_v47  ;;  %v463_v60 = vpack.c.bf16 %v1007_v3, %v902_v57  ;;  %v904_v61 = vld [vmem:[%s2026_s0 + $0x3d0] sm:$0xff]  ;;  %v916_v10 = vld [vmem:[%s2026_s0 + $0x458] sm:$0xff] }
  0x2f   :  { %891 = vst [vmem:[%s2027_s1 + $0x1e4] sm:$0xf] %v433_v48  ;;  %v906_v62 = vld [vmem:[%s2026_s0 + $0x250] sm:$0xff]  ;;  %893 = vst [vmem:[%s2027_s1 + $0xa4] sm:$0xf] %v438_v52  ;;  %v468_v0 = vpack.c.bf16 %v1007_v3, %v904_v61  ;;  %v918_v11 = vld [vmem:[%s2026_s0 + $0x2d8] sm:$0xff]  ;;  %v498_v13 = vpack.c.bf16 %v1007_v3, %v916_v10 }
  0x30   :  { %v908_v63 = vld [vmem:[%s2026_s0 + $0xd0] sm:$0xff]  ;;  %895 = vst [vmem:[%s2027_s1 + $0x164] sm:$0xf] %v443_v53  ;;  %897 = vst [vmem:[%s2027_s1 + $0x224] sm:$0xf] %v448_v54  ;;  %v473_v1 = vpack.c.bf16 %v1007_v3, %v906_v62  ;;  %v920_v12 = vld [vmem:[%s2026_s0 + $0x158] sm:$0xff]  ;;  %v503_v14 = vpack.c.bf16 %v1007_v3, %v918_v11 }
  0x31   :  { %v478_v2 = vpack.c.bf16 %v1007_v3, %v908_v63  ;;  %v910_v4 = vld [vmem:[%s2026_s0 + $0x350] sm:$0xff]  ;;  %899 = vst [vmem:[%s2027_s1 + $0x28] sm:$0xf] %v453_v58  ;;  %901 = vst [vmem:[%s2027_s1 + $0xe8] sm:$0xf] %v458_v59  ;;  %v508_v15 = vpack.c.bf16 %v1007_v3, %v920_v12  ;;  %v922_v16 = vld [vmem:[%s2026_s0 + $0x3d8] sm:$0xff] }
  0x32   :  { %v912_v5 = vld [vmem:[%s2026_s0 + $0x1d0] sm:$0xff]  ;;  %903 = vst [vmem:[%s2027_s1 + $0x1a8] sm:$0xf] %v463_v60  ;;  %v483_v7 = vpack.c.bf16 %v1007_v3, %v910_v4  ;;  %905 = vst [vmem:[%s2027_s1 + $0x68] sm:$0xf] %v468_v0  ;;  %v924_v17 = vld [vmem:[%s2026_s0 + $0x258] sm:$0xff]  ;;  %v513_v19 = vpack.c.bf16 %v1007_v3, %v922_v16 }
  0x33   :  { %v914_v6 = vld [vmem:[%s2026_s0 + $0x50] sm:$0xff]  ;;  %v488_v8 = vpack.c.bf16 %v1007_v3, %v912_v5  ;;  %907 = vst [vmem:[%s2027_s1 + $0x128] sm:$0xf] %v473_v1  ;;  %909 = vst [vmem:[%s2027_s1 + $0x1e8] sm:$0xf] %v478_v2  ;;  %v926_v18 = vld [vmem:[%s2026_s0 + $0xd8] sm:$0xff]  ;;  %v518_v20 = vpack.c.bf16 %v1007_v3, %v924_v17 }
  0x34   :  { %v493_v9 = vpack.c.bf16 %v1007_v3, %v914_v6  ;;  %911 = vst [vmem:[%s2027_s1 + $0xa8] sm:$0xf] %v483_v7  ;;  %v523_v21 = vpack.c.bf16 %v1007_v3, %v926_v18  ;;  %v928_v22 = vld [vmem:[%s2026_s0 + $0x358] sm:$0xff]  ;;  %917 = vst [vmem:[%s2027_s1 + $0x2c] sm:$0xf] %v498_v13  ;;  %v934_v28 = vld [vmem:[%s2026_s0 + $0x460] sm:$0xff] }
  0x35   :  { %913 = vst [vmem:[%s2027_s1 + $0x168] sm:$0xf] %v488_v8  ;;  %v930_v23 = vld [vmem:[%s2026_s0 + $0x1d8] sm:$0xff]  ;;  %919 = vst [vmem:[%s2027_s1 + $0xec] sm:$0xf] %v503_v14  ;;  %v528_v25 = vpack.c.bf16 %v1007_v3, %v928_v22  ;;  %v936_v29 = vld [vmem:[%s2026_s0 + $0x2e0] sm:$0xff]  ;;  %v543_v31 = vpack.c.bf16 %v1007_v3, %v934_v28 }
  0x36   :  { %915 = vst [vmem:[%s2027_s1 + $0x228] sm:$0xf] %v493_v9  ;;  %v932_v24 = vld [vmem:[%s2026_s0 + $0x58] sm:$0xff]  ;;  %921 = vst [vmem:[%s2027_s1 + $0x1ac] sm:$0xf] %v508_v15  ;;  %v533_v26 = vpack.c.bf16 %v1007_v3, %v930_v23  ;;  %v938_v30 = vld [vmem:[%s2026_s0 + $0x160] sm:$0xff]  ;;  %v548_v32 = vpack.c.bf16 %v1007_v3, %v936_v29 }
  0x37   :  { %v538_v27 = vpack.c.bf16 %v1007_v3, %v932_v24  ;;  %923 = vst [vmem:[%s2027_s1 + $0x6c] sm:$0xf] %v513_v19  ;;  %925 = vst [vmem:[%s2027_s1 + $0x12c] sm:$0xf] %v518_v20  ;;  %v553_v33 = vpack.c.bf16 %v1007_v3, %v938_v30  ;;  %v940_v34 = vld [vmem:[%s2026_s0 + $0x3e0] sm:$0xff]  ;;  %v952_v46 = vld [vmem:[%s2026_s0 + $0x468] sm:$0xff] }
  0x38   :  { %927 = vst [vmem:[%s2027_s1 + $0x1ec] sm:$0xf] %v523_v21  ;;  %v942_v35 = vld [vmem:[%s2026_s0 + $0x260] sm:$0xff]  ;;  %929 = vst [vmem:[%s2027_s1 + $0xac] sm:$0xf] %v528_v25  ;;  %v558_v37 = vpack.c.bf16 %v1007_v3, %v940_v34  ;;  %v954_v47 = vld [vmem:[%s2026_s0 + $0x2e8] sm:$0xff]  ;;  %v588_v49 = vpack.c.bf16 %v1007_v3, %v952_v46 }
  0x39   :  { %v944_v36 = vld [vmem:[%s2026_s0 + $0xe0] sm:$0xff]  ;;  %931 = vst [vmem:[%s2027_s1 + $0x16c] sm:$0xf] %v533_v26  ;;  %933 = vst [vmem:[%s2027_s1 + $0x22c] sm:$0xf] %v538_v27  ;;  %v563_v38 = vpack.c.bf16 %v1007_v3, %v942_v35  ;;  %v956_v48 = vld [vmem:[%s2026_s0 + $0x168] sm:$0xff]  ;;  %v593_v50 = vpack.c.bf16 %v1007_v3, %v954_v47 }
  0x3a   :  { %v568_v39 = vpack.c.bf16 %v1007_v3, %v944_v36  ;;  %v946_v40 = vld [vmem:[%s2026_s0 + $0x360] sm:$0xff]  ;;  %935 = vst [vmem:[%s2027_s1 + $0x30] sm:$0xf] %v543_v31  ;;  %937 = vst [vmem:[%s2027_s1 + $0xf0] sm:$0xf] %v548_v32  ;;  %v598_v51 = vpack.c.bf16 %v1007_v3, %v956_v48  ;;  %v958_v52 = vld [vmem:[%s2026_s0 + $0x3e8] sm:$0xff] }
  0x3b   :  { %v948_v41 = vld [vmem:[%s2026_s0 + $0x1e0] sm:$0xff]  ;;  %939 = vst [vmem:[%s2027_s1 + $0x1b0] sm:$0xf] %v553_v33  ;;  %v573_v43 = vpack.c.bf16 %v1007_v3, %v946_v40  ;;  %941 = vst [vmem:[%s2027_s1 + $0x70] sm:$0xf] %v558_v37  ;;  %v960_v53 = vld [vmem:[%s2026_s0 + $0x268] sm:$0xff]  ;;  %v603_v55 = vpack.c.bf16 %v1007_v3, %v958_v52 }
  0x3c   :  { %v950_v42 = vld [vmem:[%s2026_s0 + $0x60] sm:$0xff]  ;;  %v578_v44 = vpack.c.bf16 %v1007_v3, %v948_v41  ;;  %943 = vst [vmem:[%s2027_s1 + $0x130] sm:$0xf] %v563_v38  ;;  %945 = vst [vmem:[%s2027_s1 + $0x1f0] sm:$0xf] %v568_v39  ;;  %v962_v54 = vld [vmem:[%s2026_s0 + $0xe8] sm:$0xff]  ;;  %v608_v56 = vpack.c.bf16 %v1007_v3, %v960_v53 }
  0x3d   :  { %v583_v45 = vpack.c.bf16 %v1007_v3, %v950_v42  ;;  %947 = vst [vmem:[%s2027_s1 + $0xb0] sm:$0xf] %v573_v43  ;;  %v613_v57 = vpack.c.bf16 %v1007_v3, %v962_v54  ;;  %v964_v58 = vld [vmem:[%s2026_s0 + $0x368] sm:$0xff]  ;;  %953 = vst [vmem:[%s2027_s1 + $0x34] sm:$0xf] %v588_v49  ;;  %v970_v0 = vld [vmem:[%s2026_s0 + $0x470] sm:$0xff] }
  0x3e   :  { %949 = vst [vmem:[%s2027_s1 + $0x170] sm:$0xf] %v578_v44  ;;  %v966_v59 = vld [vmem:[%s2026_s0 + $0x1e8] sm:$0xff]  ;;  %955 = vst [vmem:[%s2027_s1 + $0xf4] sm:$0xf] %v593_v50  ;;  %v618_v61 = vpack.c.bf16 %v1007_v3, %v964_v58  ;;  %v972_v1 = vld [vmem:[%s2026_s0 + $0x2f0] sm:$0xff]  ;;  %v633_v4 = vpack.c.bf16 %v1007_v3, %v970_v0 }
  0x3f   :  { %951 = vst [vmem:[%s2027_s1 + $0x230] sm:$0xf] %v583_v45  ;;  %v968_v60 = vld [vmem:[%s2026_s0 + $0x68] sm:$0xff]  ;;  %957 = vst [vmem:[%s2027_s1 + $0x1b4] sm:$0xf] %v598_v51  ;;  %v623_v62 = vpack.c.bf16 %v1007_v3, %v966_v59  ;;  %v974_v2 = vld [vmem:[%s2026_s0 + $0x170] sm:$0xff]  ;;  %v638_v5 = vpack.c.bf16 %v1007_v3, %v972_v1 }
  0x40   :  { %v628_v63 = vpack.c.bf16 %v1007_v3, %v968_v60  ;;  %959 = vst [vmem:[%s2027_s1 + $0x74] sm:$0xf] %v603_v55  ;;  %961 = vst [vmem:[%s2027_s1 + $0x134] sm:$0xf] %v608_v56  ;;  %v643_v6 = vpack.c.bf16 %v1007_v3, %v974_v2  ;;  %v976_v7 = vld [vmem:[%s2026_s0 + $0x3f0] sm:$0xff]  ;;  %v988_v19 = vld [vmem:[%s2026_s0 + $0x478] sm:$0xff] }
  0x41   :  { %963 = vst [vmem:[%s2027_s1 + $0x1f4] sm:$0xf] %v613_v57  ;;  %v978_v8 = vld [vmem:[%s2026_s0 + $0x270] sm:$0xff]  ;;  %965 = vst [vmem:[%s2027_s1 + $0xb4] sm:$0xf] %v618_v61  ;;  %v648_v10 = vpack.c.bf16 %v1007_v3, %v976_v7  ;;  %v990_v20 = vld [vmem:[%s2026_s0 + $0x2f8] sm:$0xff]  ;;  %v678_v22 = vpack.c.bf16 %v1007_v3, %v988_v19 }
  0x42   :  { %v980_v9 = vld [vmem:[%s2026_s0 + $0xf0] sm:$0xff]  ;;  %967 = vst [vmem:[%s2027_s1 + $0x174] sm:$0xf] %v623_v62  ;;  %969 = vst [vmem:[%s2027_s1 + $0x234] sm:$0xf] %v628_v63  ;;  %v653_v11 = vpack.c.bf16 %v1007_v3, %v978_v8  ;;  %v992_v21 = vld [vmem:[%s2026_s0 + $0x178] sm:$0xff]  ;;  %v683_v23 = vpack.c.bf16 %v1007_v3, %v990_v20 }
  0x43   :  { %v658_v12 = vpack.c.bf16 %v1007_v3, %v980_v9  ;;  %v982_v13 = vld [vmem:[%s2026_s0 + $0x370] sm:$0xff]  ;;  %971 = vst [vmem:[%s2027_s1 + $0x38] sm:$0xf] %v633_v4  ;;  %973 = vst [vmem:[%s2027_s1 + $0xf8] sm:$0xf] %v638_v5  ;;  %v688_v24 = vpack.c.bf16 %v1007_v3, %v992_v21  ;;  %v994_v25 = vld [vmem:[%s2026_s0 + $0x3f8] sm:$0xff] }
  0x44   :  { %v984_v14 = vld [vmem:[%s2026_s0 + $0x1f0] sm:$0xff]  ;;  %975 = vst [vmem:[%s2027_s1 + $0x1b8] sm:$0xf] %v643_v6  ;;  %v663_v16 = vpack.c.bf16 %v1007_v3, %v982_v13  ;;  %977 = vst [vmem:[%s2027_s1 + $0x78] sm:$0xf] %v648_v10  ;;  %v996_v26 = vld [vmem:[%s2026_s0 + $0x278] sm:$0xff]  ;;  %v693_v28 = vpack.c.bf16 %v1007_v3, %v994_v25 }
  0x45   :  { %v986_v15 = vld [vmem:[%s2026_s0 + $0x70] sm:$0xff]  ;;  %v668_v17 = vpack.c.bf16 %v1007_v3, %v984_v14  ;;  %979 = vst [vmem:[%s2027_s1 + $0x138] sm:$0xf] %v653_v11  ;;  %981 = vst [vmem:[%s2027_s1 + $0x1f8] sm:$0xf] %v658_v12  ;;  %v998_v27 = vld [vmem:[%s2026_s0 + $0xf8] sm:$0xff]  ;;  %v698_v29 = vpack.c.bf16 %v1007_v3, %v996_v26 }
  0x46   :  { %v673_v18 = vpack.c.bf16 %v1007_v3, %v986_v15  ;;  %983 = vst [vmem:[%s2027_s1 + $0xb8] sm:$0xf] %v663_v16  ;;  %v703_v30 = vpack.c.bf16 %v1007_v3, %v998_v27  ;;  %v1000_v31 = vld [vmem:[%s2026_s0 + $0x378] sm:$0xff]  ;;  %989 = vst [vmem:[%s2027_s1 + $0x3c] sm:$0xf] %v678_v22 }
  0x47   :  { %985 = vst [vmem:[%s2027_s1 + $0x178] sm:$0xf] %v668_v17  ;;  %v1002_v32 = vld [vmem:[%s2026_s0 + $0x1f8] sm:$0xff]  ;;  %991 = vst [vmem:[%s2027_s1 + $0xfc] sm:$0xf] %v683_v23  ;;  %v708_v34 = vpack.c.bf16 %v1007_v3, %v1000_v31 }
  0x48   :  { %987 = vst [vmem:[%s2027_s1 + $0x238] sm:$0xf] %v673_v18  ;;  %v1004_v33 = vld [vmem:[%s2026_s0 + $0x78] sm:$0xff]  ;;  %993 = vst [vmem:[%s2027_s1 + $0x1bc] sm:$0xf] %v688_v24  ;;  %v713_v35 = vpack.c.bf16 %v1007_v3, %v1002_v32 }
  0x49   :  { %v718_v3 = vpack.c.bf16 %v1007_v3, %v1004_v33  ;;  %995 = vst [vmem:[%s2027_s1 + $0x7c] sm:$0xf] %v693_v28  ;;  %997 = vst [vmem:[%s2027_s1 + $0x13c] sm:$0xf] %v698_v29 }
  0x4a   :  { %999 = vst [vmem:[%s2027_s1 + $0x1fc] sm:$0xf] %v703_v30  ;;  %1001 = vst [vmem:[%s2027_s1 + $0xbc] sm:$0xf] %v708_v34 }
  0x4b   :  { %1003 = vst [vmem:[%s2027_s1 + $0x17c] sm:$0xf] %v713_v35  ;;  %1005 = vst [vmem:[%s2027_s1 + $0x23c] sm:$0xf] %v718_v3 }

// kernel: reverse.3
= control target key start
LH: loop header
LB: loop body
LE: loop exit
PB: predicated region body
PF: predicated region fallthrough
CT: control target
= control target key end

     0   :  { %s359_s0 = inlined_call_operand.vmem [shape: bf16[3,3,128,24], index: 0, kind: input, shape index: {}]   ;;  %s360_s1 = inlined_call_operand.vmem [shape: bf16[3,3,128,24], index: 1, kind: output, shape index: {}]  }
   0x1   :  { %v189_v0 = vld [vmem:[%s359_s0 + $0x60] sm:$0xff]   ;;  %v192_v2 = vld [vmem:[%s359_s0 + $0x18] sm:$0xff]   ;;  %v196_v4 = vld [vmem:[%s359_s0 + $0x30] sm:$0xff]  }
   0x2   :  { %v190_v1 = vld [vmem:[%s359_s0 + $0x3c] sm:$0xff]   ;;  %7 = vst [vmem:[%s360_s1] sm:$0xff] %v189_v0   ;;  %193 = vst [vmem:[%s360_s1 + $0x48] sm:$0xff] %v192_v2   ;;  %v194_v3 = vld [vmem:[%s359_s0 + $0x54] sm:$0xff]  }
   0x3   :  { %191 = vst [vmem:[%s360_s1 + $0x24] sm:$0xff] %v190_v1   ;;  %v198_v5 = vld [vmem:[%s359_s0 + $0xc] sm:$0xff]   ;;  %195 = vst [vmem:[%s360_s1 + $0xc] sm:$0xff] %v194_v3   ;;  %v202_v7 = vld [vmem:[%s359_s0 + $0x24] sm:$0xff]  }
   0x4   :  { %197 = vst [vmem:[%s360_s1 + $0x30] sm:$0xff] %v196_v4   ;;  %199 = vst [vmem:[%s360_s1 + $0x54] sm:$0xff] %v198_v5   ;;  %v200_v6 = vld [vmem:[%s359_s0 + $0x48] sm:$0xff]   ;;  %v57_v8 = vld [vmem:[%s359_s0] sm:$0xff]  }
   0x5   :  { %201 = vst [vmem:[%s360_s1 + $0x18] sm:$0xff] %v200_v6   ;;  %203 = vst [vmem:[%s360_s1 + $0x3c] sm:$0xff] %v202_v7   ;;  %v223_v9 = vld [vmem:[%s359_s0 + $0x68] sm:$0xf]  ;;  %v225_v10 = vld [vmem:[%s359_s0 + $0x44] sm:$0xf] }
   0x6   :  { %204 = vst [vmem:[%s360_s1 + $0x60] sm:$0xff] %v57_v8   ;;  %v227_v11 = vld [vmem:[%s359_s0 + $0x20] sm:$0xf]  ;;  %224 = vst [vmem:[%s360_s1 + $0x8] sm:$0xf] %v223_v9 }
   0x7   :  { %226 = vst [vmem:[%s360_s1 + $0x2c] sm:$0xf] %v225_v10  ;;  %228 = vst [vmem:[%s360_s1 + $0x50] sm:$0xf] %v227_v11  ;;  %v229_v12 = vld [vmem:[%s359_s0 + $0x5c] sm:$0xf] }
   0x8   :  { %v231_v13 = vld [vmem:[%s359_s0 + $0x38] sm:$0xf]  ;;  %v233_v14 = vld [vmem:[%s359_s0 + $0x14] sm:$0xf]  ;;  %230 = vst [vmem:[%s360_s1 + $0x14] sm:$0xf] %v229_v12 }
   0x9   :  { %232 = vst [vmem:[%s360_s1 + $0x38] sm:$0xf] %v231_v13  ;;  %234 = vst [vmem:[%s360_s1 + $0x5c] sm:$0xf] %v233_v14  ;;  %v235_v15 = vld [vmem:[%s359_s0 + $0x50] sm:$0xf] }
   0xa   :  { %v237_v16 = vld [vmem:[%s359_s0 + $0x2c] sm:$0xf]  ;;  %v239_v17 = vld [vmem:[%s359_s0 + $0x8] sm:$0xf]  ;;  %236 = vst [vmem:[%s360_s1 + $0x20] sm:$0xf] %v235_v15 }
   0xb   :  { %238 = vst [vmem:[%s360_s1 + $0x44] sm:$0xf] %v237_v16  ;;  %240 = vst [vmem:[%s360_s1 + $0x68] sm:$0xf] %v239_v17 }

</bundles_post_ra>
